<compile_context>
chip_gen: v7x
topology: tpu7x:2x2x1
jax: 0.10.0
libtpu: 0.0.40
codegen_flags: <defaults>
</compile_context>

<pallas_src>
import functools
import math

import jax
import jax.numpy as jnp
from jax import lax
from jax.experimental import pallas as pl
from jax.experimental.pallas import tpu as pltpu

LANE = 128        # canvas row stride in lanes (lane-dense layout)
PAD = 2           # spatial zero border (covers 5x5 pad=2 and 3x3 pad=1)
CIN_PAD = 8       # input channels padded to one sublane group


def _num_parallel_tc():
    """How many TensorCores a 'parallel' grid axis can actually feed."""
    try:
        kind = jax.devices()[0].device_kind.lower()
    except Exception:
        return 1
    if ("7" in kind) or ("v4" in kind) or ("v5p" in kind):
        return 2            # v7x (2 TC/chip) or megacore generations
    return 1                # v5e / v6e: single TensorCore per chip


def _make_deco_kernel(*, C, n_layers, NPIX, MARGIN, TOT, use_tanh):

    def im2col_conv(src_ref, cin, K, w, slab_ref):
        """One fused MXU dot per KxK conv.  Per row shift di we issue ONE
        128-aligned load; the +/-1, +/-2 lane shifts are produced with
        pltpu.roll on that already-loaded value (XLU slot, no extra vld, no
        unaligned lane shuffles).  Circular wrap lands only in masked lanes."""
        p = K // 2
        for di in range(-p, p + 1):
            a = MARGIN + di * LANE                      # pure 128-multiple
            rows = src_ref[0:cin, a:a + NPIX]           # one aligned load / di
            for dj in range(-p, p + 1):
                t = (di + p) * K + (dj + p)
                if dj == 0:
                    shifted = rows
                else:
                    shifted = pltpu.roll(rows, (-dj) % NPIX, axis=1)
                slab_ref[t * cin:(t + 1) * cin, :] = shifted
        return jnp.dot(w, slab_ref[0:K * K * cin, :],
                       preferred_element_type=jnp.float32)

    def kernel(x_ref, w1_ref, b1_ref, wb1_ref, bb1_ref, wb2_ref, bb2_ref,
               wout_ref, bout_ref, mask_ref, sw_ref,
               o_ref, act_a, act_b, slab):
        # Hoisted, loop-invariant broadcast of the interior mask.
        mask_c = jnp.broadcast_to(mask_ref[...], (C, NPIX))

        # Zero only the margins of the resident activation buffers; their
        # interiors are fully (re)written before every read.  (Never removed:
        # 0 * garbage could be NaN otherwise.)
        zmarg = jnp.zeros((C, MARGIN), jnp.float32)
        act_a[:, 0:MARGIN] = zmarg
        act_a[:, MARGIN + NPIX:TOT] = zmarg
        act_b[:, 0:MARGIN] = zmarg
        act_b[:, MARGIN + NPIX:TOT] = zmarg

        # conv1 (5x5, pad 2, eval-mode BN scale folded into weights) + ReLU.
        y = im2col_conv(x_ref, CIN_PAD, 5, w1_ref[...], slab)
        y = jnp.maximum(y + b1_ref[...], 0.0) * mask_c
        act_a[:, MARGIN:MARGIN + NPIX] = y

        # layer1: n_layers ResNet BasicBlocks (eval-mode BN folded).
        # TODO(synk): a per-row-shift accumulation variant that skips the slab
        # round-trip for the 3x3 convs may win further; kept the explicit
        # single-big-dot slab since it cannot be benchmarked here.
        for l in range(n_layers):
            t1 = im2col_conv(act_a, C, 3, wb1_ref[l], slab)
            t1 = jnp.maximum(t1 + bb1_ref[l], 0.0) * mask_c
            act_b[:, MARGIN:MARGIN + NPIX] = t1
            t2 = im2col_conv(act_b, C, 3, wb2_ref[l], slab) + bb2_ref[l]
            ynew = jnp.maximum(t2 + act_a[:, MARGIN:MARGIN + NPIX], 0.0) * mask_c
            act_a[:, MARGIN:MARGIN + NPIX] = ynew

        # conv_out: 1x1, C -> 3, with bias.
        out = jnp.dot(wout_ref[...], act_a[:, MARGIN:MARGIN + NPIX],
                      preferred_element_type=jnp.float32) + bout_ref[...]

        # weighted residual sum (+ tanh); scalars read from SMEM.
        dw = sw_ref[0]
        iw = sw_ref[1]
        res = dw * out + iw * x_ref[0:3, MARGIN:MARGIN + NPIX]
        if use_tanh:
            res = jnp.tanh(res)
        o_ref[...] = res

    return kernel


def deco_mini_forward(x_nchw, pk, *, C, n_layers, use_tanh):
    N, cin, H, W = x_nchw.shape
    assert cin == 3
    assert C % 8 == 0, "deco_kernels must be a multiple of the sublane group"
    BW = W + 2 * PAD                       # lane width of one packed image band
    assert BW <= LANE, "image width must fit a 128-lane row with border"
    BANDS = LANE // BW                     # images packed side-by-side per row
    HP = H + 2 * PAD

    # Grid: feed both TensorCores on multi-TC chips; one larger step otherwise.
    NG = 2 if (_num_parallel_tc() >= 2 and N % 2 == 0 and N >= 2) else 1
    NB = N // NG                           # images per grid step
    nstacks = -(-NB // BANDS)              # row-stacks of packed bands per step
    NBP = nstacks * BANDS                  # band slots per step (>= NB)

    NPIX = nstacks * HP * LANE             # lanes per grid step (multiple of 128)
    MARGIN = 2 * LANE                      # >= max |di|*LANE (rolls handle dj)
    TOT = NPIX + 2 * MARGIN

    kernel = _make_deco_kernel(C=C, n_layers=n_layers, NPIX=NPIX,
                               MARGIN=MARGIN, TOT=TOT, use_tanh=use_tanh)

    # --- lane-packed, margin-padded input canvas: (NG, CIN_PAD, TOT) ---------
    xc = jnp.pad(x_nchw.astype(jnp.float32),
                 ((0, 0), (0, CIN_PAD - 3), (PAD, PAD), (PAD, BW - W - PAD)))
    xc = xc.reshape(NG, NB, CIN_PAD, HP, BW)
    xc = jnp.pad(xc, ((0, 0), (0, NBP - NB), (0, 0), (0, 0), (0, 0)))
    xc = xc.reshape(NG, nstacks, BANDS, CIN_PAD, HP, BW)
    xc = xc.transpose(0, 3, 1, 4, 2, 5).reshape(NG, CIN_PAD, nstacks, HP,
                                                BANDS * BW)
    xc = jnp.pad(xc, ((0, 0), (0, 0), (0, 0), (0, 0), (0, LANE - BANDS * BW)))
    xc = xc.reshape(NG, CIN_PAD, NPIX)
    xc = jnp.pad(xc, ((0, 0), (0, 0), (MARGIN, MARGIN)))

    # Interior mask (1 inside real images; 0 in pad lanes/rows and empty slots).
    mask = jnp.zeros((NBP, HP, BW), jnp.float32)
    mask = mask.at[:NB, PAD:PAD + H, PAD:PAD + W].set(1.0)
    mask = mask.reshape(nstacks, BANDS, HP, BW).transpose(0, 2, 1, 3)
    mask = mask.reshape(nstacks, HP, BANDS * BW)
    mask = jnp.pad(mask, ((0, 0), (0, 0), (0, LANE - BANDS * BW)))
    mask = mask.reshape(1, NPIX)

    def full(arr):
        nd = arr.ndim
        return pl.BlockSpec(arr.shape, lambda g: (0,) * nd)

    slab_rows = max(25 * CIN_PAD, 9 * C)

    # VMEM budget (f32): slab + 2 resident acts + double-buffered in/out blocks.
    vmem_bytes = 4 * (slab_rows * NPIX + 2 * C * TOT
                      + 2 * CIN_PAD * TOT + 2 * 3 * NPIX)
    assert vmem_bytes < 24 * 1024 * 1024, (
        "VMEM budget exceeded; tile NPIX over an extra grid axis")

    out = pl.pallas_call(
        kernel,
        out_shape=jax.ShapeDtypeStruct((NG, 3, NPIX), jnp.float32),
        grid_spec=pltpu.PrefetchScalarGridSpec(
            num_scalar_prefetch=0,
            grid=(NG,),
            in_specs=[
                pl.BlockSpec((None, CIN_PAD, TOT), lambda g: (g, 0, 0)),
                full(pk['w1']), full(pk['b1']),
                full(pk['wb1']), full(pk['bb1']),
                full(pk['wb2']), full(pk['bb2']),
                full(pk['wout']), full(pk['bout']),
                full(mask),
                pl.BlockSpec(memory_space=pltpu.MemorySpace.SMEM),
            ],
            out_specs=pl.BlockSpec((None, 3, NPIX), lambda g: (g, 0, 0)),
            scratch_shapes=[
                pltpu.VMEM((C, TOT), jnp.float32),           # act_a (resident)
                pltpu.VMEM((C, TOT), jnp.float32),           # act_b (resident)
                pltpu.VMEM((slab_rows, NPIX), jnp.float32),  # im2col slab
            ],
        ),
        compiler_params=pltpu.CompilerParams(dimension_semantics=("parallel",)),
    )(xc, pk['w1'], pk['b1'], pk['wb1'], pk['bb1'], pk['wb2'], pk['bb2'],
      pk['wout'], pk['bout'], mask, pk['sw'])

    # --- unpack the lane-packed canvas back to NCHW ---------------------------
    out = out.reshape(NG, 3, nstacks, HP, LANE)[..., :BANDS * BW]
    out = out.reshape(NG, 3, nstacks, HP, BANDS, BW).transpose(0, 2, 4, 1, 3, 5)
    out = out.reshape(NG, NBP, 3, HP, BW)[:, :NB].reshape(N, 3, HP, BW)
    return out[:, :, PAD:PAD + H, PAD:PAD + W]


def init_torch_params(key, C, L):
    """Deterministic init mirroring DECO_mini.__init__ / init_weights (OIHW)."""
    k1, k2, k3, k4, k5 = jax.random.split(key, 5)
    w1 = jax.random.normal(k1, (C, 3, 5, 5), jnp.float32) * math.sqrt(2.0 / (5 * 5 * C))
    wb1 = jax.random.normal(k2, (L, C, C, 3, 3), jnp.float32) * math.sqrt(2.0 / (3 * 3 * C))
    wb2 = jax.random.normal(k3, (L, C, C, 3, 3), jnp.float32) * math.sqrt(2.0 / (3 * 3 * C))
    wout = jax.random.normal(k4, (3, C, 1, 1), jnp.float32) * math.sqrt(2.0 / (1 * 1 * 3))
    bound = 1.0 / math.sqrt(C)
    bout = jax.random.uniform(k5, (3,), jnp.float32, -bound, bound)
    return dict(w1=w1, wb1=wb1, wb2=wb2, wout=wout, bout=bout)


def to_kernel_params(pt, C, L, deco_w, image_w):
    """Fuse conv weights into im2col form (Cout, K*K*cin_pad) with the
    eval-mode BatchNorm scale folded in; biases stay as (C,1) vectors."""
    eps = 1e-5
    bn_scale = jnp.full((C,), 1.0 / math.sqrt(1.0 + eps), jnp.float32)  # gamma=1, rv=1
    bn_bias = jnp.zeros((C, 1), jnp.float32)                            # beta=0, rm=0

    def fuse(w_oihw, cin_pad, scale):
        o, i, k, _ = w_oihw.shape
        w = w_oihw * scale[:, None, None, None]
        w = jnp.pad(w, ((0, 0), (0, cin_pad - i), (0, 0), (0, 0)))
        return jnp.transpose(w, (0, 2, 3, 1)).reshape(o, k * k * cin_pad)

    return dict(
        w1=fuse(pt['w1'], CIN_PAD, bn_scale),                       # (C, 25*8)
        b1=bn_bias,
        wb1=jnp.stack([fuse(pt['wb1'][l], C, bn_scale) for l in range(L)]),
        bb1=jnp.broadcast_to(bn_bias, (L, C, 1)),
        wb2=jnp.stack([fuse(pt['wb2'][l], C, bn_scale) for l in range(L)]),
        bb2=jnp.broadcast_to(bn_bias, (L, C, 1)),
        wout=pt['wout'].reshape(3, C),
        bout=pt['bout'].reshape(3, 1),
        sw=jnp.array([deco_w, image_w], jnp.float32),
    )


def reference_forward(x, pt, *, n_layers, use_tanh, deco_w, image_w):
    """Pure-JAX (XLA conv) reference of the PyTorch forward, NCHW."""
    eps = 1e-5

    def conv(a, w, pad):
        return lax.conv_general_dilated(
            a, w, (1, 1), [(pad, pad), (pad, pad)],
            dimension_numbers=('NCHW', 'OIHW', 'NCHW'))

    def bn(y):
        return y * (1.0 / jnp.sqrt(1.0 + eps))   # gamma=1, beta=0, rm=0, rv=1

    y = jax.nn.relu(bn(conv(x, pt['w1'], 2)))
    for l in range(n_layers):
        identity = y
        t = jax.nn.relu(bn(conv(y, pt['wb1'][l], 1)))
        t = bn(conv(t, pt['wb2'][l], 1))
        y = jax.nn.relu(t + identity)
    out = conv(y, pt['wout'], 0) + pt['bout'][None, :, None, None]
    res = deco_w * out + image_w * x
    return jnp.tanh(res) if use_tanh else res


if __name__ == "__main__":
    N, H, W = 2, 16, 16
    C = 8            # deco_args.deco_kernels
    L = 2            # deco_args.n_layers
    use_tanh = True
    deco_w, image_w = 0.1, 1.0

    key = jax.random.PRNGKey(0)
    kx, kp = jax.random.split(key)
    x = jax.random.normal(kx, (N, 3, H, W), jnp.float32)

    pt = init_torch_params(kp, C, L)
    pk = to_kernel_params(pt, C, L, deco_w, image_w)

    fwd = jax.jit(functools.partial(deco_mini_forward,
                                    C=C, n_layers=L, use_tanh=use_tanh))
    out = jax.block_until_ready(fwd(x, pk))
    assert out.shape == (N, 3, H, W)

    ref = reference_forward(x, pt, n_layers=L, use_tanh=use_tanh,
                            deco_w=deco_w, image_w=image_w)
    err = float(jnp.max(jnp.abs(out - ref)))
    assert err < 2e-4, f"kernel/reference mismatch: max abs err = {err}"
    print("KERNEL_OK")
</pallas_src>

<mosaic_0001>
module attributes {stable_mosaic.version = 11 : i64} {
  func.func @kernel(%arg0: i32, %arg1: memref<1x8x3072xf32, #tpu.memory_space<vmem>>, %arg2: memref<8x200xf32, #tpu.memory_space<vmem>>, %arg3: memref<8x1xf32, #tpu.memory_space<vmem>>, %arg4: memref<2x8x72xf32, #tpu.memory_space<vmem>>, %arg5: memref<2x8x1xf32, #tpu.memory_space<vmem>>, %arg6: memref<2x8x72xf32, #tpu.memory_space<vmem>>, %arg7: memref<2x8x1xf32, #tpu.memory_space<vmem>>, %arg8: memref<3x8xf32, #tpu.memory_space<vmem>>, %arg9: memref<3x1xf32, #tpu.memory_space<vmem>>, %arg10: memref<1x2560xf32, #tpu.memory_space<vmem>>, %arg11: memref<2xf32, #tpu.memory_space<smem>>, %arg12: memref<1x3x2560xf32, #tpu.memory_space<vmem>>, %arg13: memref<8x3072xf32, #tpu.memory_space<vmem>>, %arg14: memref<8x3072xf32, #tpu.memory_space<vmem>>, %arg15: memref<200x2560xf32, #tpu.memory_space<vmem>>) attributes {dimension_semantics = [#tpu.dimension_semantics<parallel>], iteration_bounds = array<i64: 1>, scalar_prefetch = 0 : i64, scratch_operands = 3 : i64, tpu.core_type = #tpu.core_type<tc>, window_params = [{transform_indices = @transform_0, window_bounds = array<i64: 1, 8, 3072>}, {pipeline_mode = #tpu.pipeline_mode<synchronous>, transform_indices = @transform_1, window_bounds = array<i64: 8, 200>}, {pipeline_mode = #tpu.pipeline_mode<synchronous>, transform_indices = @transform_2, window_bounds = array<i64: 8, 1>}, {pipeline_mode = #tpu.pipeline_mode<synchronous>, transform_indices = @transform_3, window_bounds = array<i64: 2, 8, 72>}, {pipeline_mode = #tpu.pipeline_mode<synchronous>, transform_indices = @transform_4, window_bounds = array<i64: 2, 8, 1>}, {pipeline_mode = #tpu.pipeline_mode<synchronous>, transform_indices = @transform_5, window_bounds = array<i64: 2, 8, 72>}, {pipeline_mode = #tpu.pipeline_mode<synchronous>, transform_indices = @transform_6, window_bounds = array<i64: 2, 8, 1>}, {pipeline_mode = #tpu.pipeline_mode<synchronous>, transform_indices = @transform_7, window_bounds = array<i64: 3, 8>}, {pipeline_mode = #tpu.pipeline_mode<synchronous>, transform_indices = @transform_8, window_bounds = array<i64: 3, 1>}, {pipeline_mode = #tpu.pipeline_mode<synchronous>, transform_indices = @transform_9, window_bounds = array<i64: 1, 2560>}, {transform_indices = @transform_10, window_bounds = array<i64: 2>}, {transform_indices = @transform_11, window_bounds = array<i64: 1, 3, 2560>}]} {
    %c0 = arith.constant 0 : index
    %c0_0 = arith.constant 0 : index
    %0 = vector.load %arg10[%c0, %c0_0] : memref<1x2560xf32, #tpu.memory_space<vmem>>, vector<1x2560xf32>
    %1 = vector.shape_cast %0 : vector<1x2560xf32> to vector<1x2560xf32>
    %2 = vector.broadcast %1 : vector<1x2560xf32> to vector<8x2560xf32>
    %cst = arith.constant 0.000000e+00 : f32
    %3 = vector.broadcast %cst : f32 to vector<8x256xf32>
    %c0_1 = arith.constant 0 : index
    %c0_2 = arith.constant 0 : index
    %4 = vector.load %arg13[%c0_1, %c0_2] : memref<8x3072xf32, #tpu.memory_space<vmem>>, vector<8x256xf32>
    tpu.vector_store %arg13[%c0_1, %c0_2], %3 {strides = array<i32>} : memref<8x3072xf32, #tpu.memory_space<vmem>>, vector<8x256xf32>,
    %c0_3 = arith.constant 0 : index
    %c2816 = arith.constant 2816 : index
    %5 = vector.load %arg13[%c0_3, %c2816] : memref<8x3072xf32, #tpu.memory_space<vmem>>, vector<8x256xf32>
    tpu.vector_store %arg13[%c0_3, %c2816], %3 {strides = array<i32>} : memref<8x3072xf32, #tpu.memory_space<vmem>>, vector<8x256xf32>,
    %c0_4 = arith.constant 0 : index
    %c0_5 = arith.constant 0 : index
    %6 = vector.load %arg14[%c0_4, %c0_5] : memref<8x3072xf32, #tpu.memory_space<vmem>>, vector<8x256xf32>
    tpu.vector_store %arg14[%c0_4, %c0_5], %3 {strides = array<i32>} : memref<8x3072xf32, #tpu.memory_space<vmem>>, vector<8x256xf32>,
    %c0_6 = arith.constant 0 : index
    %c2816_7 = arith.constant 2816 : index
    %7 = vector.load %arg14[%c0_6, %c2816_7] : memref<8x3072xf32, #tpu.memory_space<vmem>>, vector<8x256xf32>
    tpu.vector_store %arg14[%c0_6, %c2816_7], %3 {strides = array<i32>} : memref<8x3072xf32, #tpu.memory_space<vmem>>, vector<8x256xf32>,
    %c0_8 = arith.constant 0 : index
    %c0_9 = arith.constant 0 : index
    %8 = vector.load %arg2[%c0_8, %c0_9] : memref<8x200xf32, #tpu.memory_space<vmem>>, vector<8x200xf32>
    %c0_10 = arith.constant 0 : index
    %c0_11 = arith.constant 0 : index
    %c0_12 = arith.constant 0 : index
    %9 = vector.load %arg1[%c0_10, %c0_11, %c0_12] : memref<1x8x3072xf32, #tpu.memory_space<vmem>>, vector<1x8x2560xf32>
    %10 = vector.shape_cast %9 : vector<1x8x2560xf32> to vector<8x2560xf32>
    %c2_i32 = arith.constant 2 : i32
    %11 = tpu.dynamic_rotate %10 by %c2_i32 dim 1 : vector<8x2560xf32>, i32 -> vector<8x2560xf32>
    %c0_13 = arith.constant 0 : index
    %c0_14 = arith.constant 0 : index
    %12 = vector.load %arg15[%c0_13, %c0_14] : memref<200x2560xf32, #tpu.memory_space<vmem>>, vector<8x2560xf32>
    tpu.vector_store %arg15[%c0_13, %c0_14], %11 {strides = array<i32>} : memref<200x2560xf32, #tpu.memory_space<vmem>>, vector<8x2560xf32>,
    %c1_i32 = arith.constant 1 : i32
    %13 = tpu.dynamic_rotate %10 by %c1_i32 dim 1 : vector<8x2560xf32>, i32 -> vector<8x2560xf32>
    %c8 = arith.constant 8 : index
    %c0_15 = arith.constant 0 : index
    %14 = vector.load %arg15[%c8, %c0_15] : memref<200x2560xf32, #tpu.memory_space<vmem>>, vector<8x2560xf32>
    tpu.vector_store %arg15[%c8, %c0_15], %13 {strides = array<i32>} : memref<200x2560xf32, #tpu.memory_space<vmem>>, vector<8x2560xf32>,
    %c16 = arith.constant 16 : index
    %c0_16 = arith.constant 0 : index
    %15 = vector.load %arg15[%c16, %c0_16] : memref<200x2560xf32, #tpu.memory_space<vmem>>, vector<8x2560xf32>
    tpu.vector_store %arg15[%c16, %c0_16], %10 {strides = array<i32>} : memref<200x2560xf32, #tpu.memory_space<vmem>>, vector<8x2560xf32>,
    %c2559_i32 = arith.constant 2559 : i32
    %16 = tpu.dynamic_rotate %10 by %c2559_i32 dim 1 : vector<8x2560xf32>, i32 -> vector<8x2560xf32>
    %c24 = arith.constant 24 : index
    %c0_17 = arith.constant 0 : index
    %17 = vector.load %arg15[%c24, %c0_17] : memref<200x2560xf32, #tpu.memory_space<vmem>>, vector<8x2560xf32>
    tpu.vector_store %arg15[%c24, %c0_17], %16 {strides = array<i32>} : memref<200x2560xf32, #tpu.memory_space<vmem>>, vector<8x2560xf32>,
    %c2558_i32 = arith.constant 2558 : i32
    %18 = tpu.dynamic_rotate %10 by %c2558_i32 dim 1 : vector<8x2560xf32>, i32 -> vector<8x2560xf32>
    %c32 = arith.constant 32 : index
    %c0_18 = arith.constant 0 : index
    %19 = vector.load %arg15[%c32, %c0_18] : memref<200x2560xf32, #tpu.memory_space<vmem>>, vector<8x2560xf32>
    tpu.vector_store %arg15[%c32, %c0_18], %18 {strides = array<i32>} : memref<200x2560xf32, #tpu.memory_space<vmem>>, vector<8x2560xf32>,
    %c0_19 = arith.constant 0 : index
    %c0_20 = arith.constant 0 : index
    %c128 = arith.constant 128 : index
    %20 = vector.load %arg1[%c0_19, %c0_20, %c128] : memref<1x8x3072xf32, #tpu.memory_space<vmem>>, vector<1x8x2560xf32>
    %21 = vector.shape_cast %20 : vector<1x8x2560xf32> to vector<8x2560xf32>
    %c2_i32_21 = arith.constant 2 : i32
    %22 = tpu.dynamic_rotate %21 by %c2_i32_21 dim 1 : vector<8x2560xf32>, i32 -> vector<8x2560xf32>
    %c40 = arith.constant 40 : index
    %c0_22 = arith.constant 0 : index
    %23 = vector.load %arg15[%c40, %c0_22] : memref<200x2560xf32, #tpu.memory_space<vmem>>, vector<8x2560xf32>
    tpu.vector_store %arg15[%c40, %c0_22], %22 {strides = array<i32>} : memref<200x2560xf32, #tpu.memory_space<vmem>>, vector<8x2560xf32>,
    %c1_i32_23 = arith.constant 1 : i32
    %24 = tpu.dynamic_rotate %21 by %c1_i32_23 dim 1 : vector<8x2560xf32>, i32 -> vector<8x2560xf32>
    %c48 = arith.constant 48 : index
    %c0_24 = arith.constant 0 : index
    %25 = vector.load %arg15[%c48, %c0_24] : memref<200x2560xf32, #tpu.memory_space<vmem>>, vector<8x2560xf32>
    tpu.vector_store %arg15[%c48, %c0_24], %24 {strides = array<i32>} : memref<200x2560xf32, #tpu.memory_space<vmem>>, vector<8x2560xf32>,
    %c56 = arith.constant 56 : index
    %c0_25 = arith.constant 0 : index
    %26 = vector.load %arg15[%c56, %c0_25] : memref<200x2560xf32, #tpu.memory_space<vmem>>, vector<8x2560xf32>
    tpu.vector_store %arg15[%c56, %c0_25], %21 {strides = array<i32>} : memref<200x2560xf32, #tpu.memory_space<vmem>>, vector<8x2560xf32>,
    %c2559_i32_26 = arith.constant 2559 : i32
    %27 = tpu.dynamic_rotate %21 by %c2559_i32_26 dim 1 : vector<8x2560xf32>, i32 -> vector<8x2560xf32>
    %c64 = arith.constant 64 : index
    %c0_27 = arith.constant 0 : index
    %28 = vector.load %arg15[%c64, %c0_27] : memref<200x2560xf32, #tpu.memory_space<vmem>>, vector<8x2560xf32>
    tpu.vector_store %arg15[%c64, %c0_27], %27 {strides = array<i32>} : memref<200x2560xf32, #tpu.memory_space<vmem>>, vector<8x2560xf32>,
    %c2558_i32_28 = arith.constant 2558 : i32
    %29 = tpu.dynamic_rotate %21 by %c2558_i32_28 dim 1 : vector<8x2560xf32>, i32 -> vector<8x2560xf32>
    %c72 = arith.constant 72 : index
    %c0_29 = arith.constant 0 : index
    %30 = vector.load %arg15[%c72, %c0_29] : memref<200x2560xf32, #tpu.memory_space<vmem>>, vector<8x2560xf32>
    tpu.vector_store %arg15[%c72, %c0_29], %29 {strides = array<i32>} : memref<200x2560xf32, #tpu.memory_space<vmem>>, vector<8x2560xf32>,
    %c0_30 = arith.constant 0 : index
    %c0_31 = arith.constant 0 : index
    %c256 = arith.constant 256 : index
    %31 = vector.load %arg1[%c0_30, %c0_31, %c256] : memref<1x8x3072xf32, #tpu.memory_space<vmem>>, vector<1x8x2560xf32>
    %32 = vector.shape_cast %31 : vector<1x8x2560xf32> to vector<8x2560xf32>
    %c2_i32_32 = arith.constant 2 : i32
    %33 = tpu.dynamic_rotate %32 by %c2_i32_32 dim 1 : vector<8x2560xf32>, i32 -> vector<8x2560xf32>
    %c80 = arith.constant 80 : index
    %c0_33 = arith.constant 0 : index
    %34 = vector.load %arg15[%c80, %c0_33] : memref<200x2560xf32, #tpu.memory_space<vmem>>, vector<8x2560xf32>
    tpu.vector_store %arg15[%c80, %c0_33], %33 {strides = array<i32>} : memref<200x2560xf32, #tpu.memory_space<vmem>>, vector<8x2560xf32>,
    %c1_i32_34 = arith.constant 1 : i32
    %35 = tpu.dynamic_rotate %32 by %c1_i32_34 dim 1 : vector<8x2560xf32>, i32 -> vector<8x2560xf32>
    %c88 = arith.constant 88 : index
    %c0_35 = arith.constant 0 : index
    %36 = vector.load %arg15[%c88, %c0_35] : memref<200x2560xf32, #tpu.memory_space<vmem>>, vector<8x2560xf32>
    tpu.vector_store %arg15[%c88, %c0_35], %35 {strides = array<i32>} : memref<200x2560xf32, #tpu.memory_space<vmem>>, vector<8x2560xf32>,
    %c96 = arith.constant 96 : index
    %c0_36 = arith.constant 0 : index
    %37 = vector.load %arg15[%c96, %c0_36] : memref<200x2560xf32, #tpu.memory_space<vmem>>, vector<8x2560xf32>
    tpu.vector_store %arg15[%c96, %c0_36], %32 {strides = array<i32>} : memref<200x2560xf32, #tpu.memory_space<vmem>>, vector<8x2560xf32>,
    %c2559_i32_37 = arith.constant 2559 : i32
    %38 = tpu.dynamic_rotate %32 by %c2559_i32_37 dim 1 : vector<8x2560xf32>, i32 -> vector<8x2560xf32>
    %c104 = arith.constant 104 : index
    %c0_38 = arith.constant 0 : index
    %39 = vector.load %arg15[%c104, %c0_38] : memref<200x2560xf32, #tpu.memory_space<vmem>>, vector<8x2560xf32>
    tpu.vector_store %arg15[%c104, %c0_38], %38 {strides = array<i32>} : memref<200x2560xf32, #tpu.memory_space<vmem>>, vector<8x2560xf32>,
    %c2558_i32_39 = arith.constant 2558 : i32
    %40 = tpu.dynamic_rotate %32 by %c2558_i32_39 dim 1 : vector<8x2560xf32>, i32 -> vector<8x2560xf32>
    %c112 = arith.constant 112 : index
    %c0_40 = arith.constant 0 : index
    %41 = vector.load %arg15[%c112, %c0_40] : memref<200x2560xf32, #tpu.memory_space<vmem>>, vector<8x2560xf32>
    tpu.vector_store %arg15[%c112, %c0_40], %40 {strides = array<i32>} : memref<200x2560xf32, #tpu.memory_space<vmem>>, vector<8x2560xf32>,
    %c0_41 = arith.constant 0 : index
    %c0_42 = arith.constant 0 : index
    %c384 = arith.constant 384 : index
    %42 = vector.load %arg1[%c0_41, %c0_42, %c384] : memref<1x8x3072xf32, #tpu.memory_space<vmem>>, vector<1x8x2560xf32>
    %43 = vector.shape_cast %42 : vector<1x8x2560xf32> to vector<8x2560xf32>
    %c2_i32_43 = arith.constant 2 : i32
    %44 = tpu.dynamic_rotate %43 by %c2_i32_43 dim 1 : vector<8x2560xf32>, i32 -> vector<8x2560xf32>
    %c120 = arith.constant 120 : index
    %c0_44 = arith.constant 0 : index
    %45 = vector.load %arg15[%c120, %c0_44] : memref<200x2560xf32, #tpu.memory_space<vmem>>, vector<8x2560xf32>
    tpu.vector_store %arg15[%c120, %c0_44], %44 {strides = array<i32>} : memref<200x2560xf32, #tpu.memory_space<vmem>>, vector<8x2560xf32>,
    %c1_i32_45 = arith.constant 1 : i32
    %46 = tpu.dynamic_rotate %43 by %c1_i32_45 dim 1 : vector<8x2560xf32>, i32 -> vector<8x2560xf32>
    %c128_46 = arith.constant 128 : index
    %c0_47 = arith.constant 0 : index
    %47 = vector.load %arg15[%c128_46, %c0_47] : memref<200x2560xf32, #tpu.memory_space<vmem>>, vector<8x2560xf32>
    tpu.vector_store %arg15[%c128_46, %c0_47], %46 {strides = array<i32>} : memref<200x2560xf32, #tpu.memory_space<vmem>>, vector<8x2560xf32>,
    %c136 = arith.constant 136 : index
    %c0_48 = arith.constant 0 : index
    %48 = vector.load %arg15[%c136, %c0_48] : memref<200x2560xf32, #tpu.memory_space<vmem>>, vector<8x2560xf32>
    tpu.vector_store %arg15[%c136, %c0_48], %43 {strides = array<i32>} : memref<200x2560xf32, #tpu.memory_space<vmem>>, vector<8x2560xf32>,
    %c2559_i32_49 = arith.constant 2559 : i32
    %49 = tpu.dynamic_rotate %43 by %c2559_i32_49 dim 1 : vector<8x2560xf32>, i32 -> vector<8x2560xf32>
    %c144 = arith.constant 144 : index
    %c0_50 = arith.constant 0 : index
    %50 = vector.load %arg15[%c144, %c0_50] : memref<200x2560xf32, #tpu.memory_space<vmem>>, vector<8x2560xf32>
    tpu.vector_store %arg15[%c144, %c0_50], %49 {strides = array<i32>} : memref<200x2560xf32, #tpu.memory_space<vmem>>, vector<8x2560xf32>,
    %c2558_i32_51 = arith.constant 2558 : i32
    %51 = tpu.dynamic_rotate %43 by %c2558_i32_51 dim 1 : vector<8x2560xf32>, i32 -> vector<8x2560xf32>
    %c152 = arith.constant 152 : index
    %c0_52 = arith.constant 0 : index
    %52 = vector.load %arg15[%c152, %c0_52] : memref<200x2560xf32, #tpu.memory_space<vmem>>, vector<8x2560xf32>
    tpu.vector_store %arg15[%c152, %c0_52], %51 {strides = array<i32>} : memref<200x2560xf32, #tpu.memory_space<vmem>>, vector<8x2560xf32>,
    %c0_53 = arith.constant 0 : index
    %c0_54 = arith.constant 0 : index
    %c512 = arith.constant 512 : index
    %53 = vector.load %arg1[%c0_53, %c0_54, %c512] : memref<1x8x3072xf32, #tpu.memory_space<vmem>>, vector<1x8x2560xf32>
    %54 = vector.shape_cast %53 : vector<1x8x2560xf32> to vector<8x2560xf32>
    %c2_i32_55 = arith.constant 2 : i32
    %55 = tpu.dynamic_rotate %54 by %c2_i32_55 dim 1 : vector<8x2560xf32>, i32 -> vector<8x2560xf32>
    %c160 = arith.constant 160 : index
    %c0_56 = arith.constant 0 : index
    %56 = vector.load %arg15[%c160, %c0_56] : memref<200x2560xf32, #tpu.memory_space<vmem>>, vector<8x2560xf32>
    tpu.vector_store %arg15[%c160, %c0_56], %55 {strides = array<i32>} : memref<200x2560xf32, #tpu.memory_space<vmem>>, vector<8x2560xf32>,
    %c1_i32_57 = arith.constant 1 : i32
    %57 = tpu.dynamic_rotate %54 by %c1_i32_57 dim 1 : vector<8x2560xf32>, i32 -> vector<8x2560xf32>
    %c168 = arith.constant 168 : index
    %c0_58 = arith.constant 0 : index
    %58 = vector.load %arg15[%c168, %c0_58] : memref<200x2560xf32, #tpu.memory_space<vmem>>, vector<8x2560xf32>
    tpu.vector_store %arg15[%c168, %c0_58], %57 {strides = array<i32>} : memref<200x2560xf32, #tpu.memory_space<vmem>>, vector<8x2560xf32>,
    %c176 = arith.constant 176 : index
    %c0_59 = arith.constant 0 : index
    %59 = vector.load %arg15[%c176, %c0_59] : memref<200x2560xf32, #tpu.memory_space<vmem>>, vector<8x2560xf32>
    tpu.vector_store %arg15[%c176, %c0_59], %54 {strides = array<i32>} : memref<200x2560xf32, #tpu.memory_space<vmem>>, vector<8x2560xf32>,
    %c2559_i32_60 = arith.constant 2559 : i32
    %60 = tpu.dynamic_rotate %54 by %c2559_i32_60 dim 1 : vector<8x2560xf32>, i32 -> vector<8x2560xf32>
    %c184 = arith.constant 184 : index
    %c0_61 = arith.constant 0 : index
    %61 = vector.load %arg15[%c184, %c0_61] : memref<200x2560xf32, #tpu.memory_space<vmem>>, vector<8x2560xf32>
    tpu.vector_store %arg15[%c184, %c0_61], %60 {strides = array<i32>} : memref<200x2560xf32, #tpu.memory_space<vmem>>, vector<8x2560xf32>,
    %c2558_i32_62 = arith.constant 2558 : i32
    %62 = tpu.dynamic_rotate %54 by %c2558_i32_62 dim 1 : vector<8x2560xf32>, i32 -> vector<8x2560xf32>
    %c192 = arith.constant 192 : index
    %c0_63 = arith.constant 0 : index
    %63 = vector.load %arg15[%c192, %c0_63] : memref<200x2560xf32, #tpu.memory_space<vmem>>, vector<8x2560xf32>
    tpu.vector_store %arg15[%c192, %c0_63], %62 {strides = array<i32>} : memref<200x2560xf32, #tpu.memory_space<vmem>>, vector<8x2560xf32>,
    %c0_64 = arith.constant 0 : index
    %c0_65 = arith.constant 0 : index
    %64 = vector.load %arg15[%c0_64, %c0_65] : memref<200x2560xf32, #tpu.memory_space<vmem>>, vector<200x2560xf32>
    %cst_66 = arith.constant dense<0.000000e+00> : vector<8x2560xf32>
    %65 = tpu.matmul %8, %64, %cst_66 {dimension_numbers = #tpu.dot_dimension_numbers<[1], [0], [0], [1], [0, 0, 1, 1], [], []>} : vector<8x200xf32>, vector<200x2560xf32>, vector<8x2560xf32> -> vector<8x2560xf32>
    %c0_67 = arith.constant 0 : index
    %c0_68 = arith.constant 0 : index
    %66 = vector.load %arg3[%c0_67, %c0_68] : memref<8x1xf32, #tpu.memory_space<vmem>>, vector<8x1xf32>
    %67 = vector.broadcast %66 : vector<8x1xf32> to vector<8x2560xf32>
    %68 = arith.addf %65, %67 : vector<8x2560xf32>
    %cst_69 = arith.constant 0.000000e+00 : f32
    %69 = vector.broadcast %cst_69 : f32 to vector<8x2560xf32>
    %70 = arith.maximumf %68, %69 : vector<8x2560xf32>
    %71 = arith.mulf %70, %2 : vector<8x2560xf32>
    %c0_70 = arith.constant 0 : index
    %c256_71 = arith.constant 256 : index
    %72 = vector.load %arg13[%c0_70, %c256_71] : memref<8x3072xf32, #tpu.memory_space<vmem>>, vector<8x2560xf32>
    tpu.vector_store %arg13[%c0_70, %c256_71], %71 {strides = array<i32>} : memref<8x3072xf32, #tpu.memory_space<vmem>>, vector<8x2560xf32>,
    %c0_72 = arith.constant 0 : index
    %c0_73 = arith.constant 0 : index
    %c0_74 = arith.constant 0 : index
    %73 = vector.load %arg4[%c0_72, %c0_73, %c0_74] : memref<2x8x72xf32, #tpu.memory_space<vmem>>, vector<1x8x72xf32>
    %74 = vector.shape_cast %73 : vector<1x8x72xf32> to vector<8x72xf32>
    %c0_75 = arith.constant 0 : index
    %c128_76 = arith.constant 128 : index
    %75 = vector.load %arg13[%c0_75, %c128_76] : memref<8x3072xf32, #tpu.memory_space<vmem>>, vector<8x2560xf32>
    %c1_i32_77 = arith.constant 1 : i32
    %76 = tpu.dynamic_rotate %75 by %c1_i32_77 dim 1 : vector<8x2560xf32>, i32 -> vector<8x2560xf32>
    %c0_78 = arith.constant 0 : index
    %c0_79 = arith.constant 0 : index
    %77 = vector.load %arg15[%c0_78, %c0_79] : memref<200x2560xf32, #tpu.memory_space<vmem>>, vector<8x2560xf32>
    tpu.vector_store %arg15[%c0_78, %c0_79], %76 {strides = array<i32>} : memref<200x2560xf32, #tpu.memory_space<vmem>>, vector<8x2560xf32>,
    %c8_80 = arith.constant 8 : index
    %c0_81 = arith.constant 0 : index
    %78 = vector.load %arg15[%c8_80, %c0_81] : memref<200x2560xf32, #tpu.memory_space<vmem>>, vector<8x2560xf32>
    tpu.vector_store %arg15[%c8_80, %c0_81], %75 {strides = array<i32>} : memref<200x2560xf32, #tpu.memory_space<vmem>>, vector<8x2560xf32>,
    %c2559_i32_82 = arith.constant 2559 : i32
    %79 = tpu.dynamic_rotate %75 by %c2559_i32_82 dim 1 : vector<8x2560xf32>, i32 -> vector<8x2560xf32>
    %c16_83 = arith.constant 16 : index
    %c0_84 = arith.constant 0 : index
    %80 = vector.load %arg15[%c16_83, %c0_84] : memref<200x2560xf32, #tpu.memory_space<vmem>>, vector<8x2560xf32>
    tpu.vector_store %arg15[%c16_83, %c0_84], %79 {strides = array<i32>} : memref<200x2560xf32, #tpu.memory_space<vmem>>, vector<8x2560xf32>,
    %c0_85 = arith.constant 0 : index
    %c256_86 = arith.constant 256 : index
    %81 = vector.load %arg13[%c0_85, %c256_86] : memref<8x3072xf32, #tpu.memory_space<vmem>>, vector<8x2560xf32>
    %c1_i32_87 = arith.constant 1 : i32
    %82 = tpu.dynamic_rotate %81 by %c1_i32_87 dim 1 : vector<8x2560xf32>, i32 -> vector<8x2560xf32>
    %c24_88 = arith.constant 24 : index
    %c0_89 = arith.constant 0 : index
    %83 = vector.load %arg15[%c24_88, %c0_89] : memref<200x2560xf32, #tpu.memory_space<vmem>>, vector<8x2560xf32>
    tpu.vector_store %arg15[%c24_88, %c0_89], %82 {strides = array<i32>} : memref<200x2560xf32, #tpu.memory_space<vmem>>, vector<8x2560xf32>,
    %c32_90 = arith.constant 32 : index
    %c0_91 = arith.constant 0 : index
    %84 = vector.load %arg15[%c32_90, %c0_91] : memref<200x2560xf32, #tpu.memory_space<vmem>>, vector<8x2560xf32>
    tpu.vector_store %arg15[%c32_90, %c0_91], %81 {strides = array<i32>} : memref<200x2560xf32, #tpu.memory_space<vmem>>, vector<8x2560xf32>,
    %c2559_i32_92 = arith.constant 2559 : i32
    %85 = tpu.dynamic_rotate %81 by %c2559_i32_92 dim 1 : vector<8x2560xf32>, i32 -> vector<8x2560xf32>
    %c40_93 = arith.constant 40 : index
    %c0_94 = arith.constant 0 : index
    %86 = vector.load %arg15[%c40_93, %c0_94] : memref<200x2560xf32, #tpu.memory_space<vmem>>, vector<8x2560xf32>
    tpu.vector_store %arg15[%c40_93, %c0_94], %85 {strides = array<i32>} : memref<200x2560xf32, #tpu.memory_space<vmem>>, vector<8x2560xf32>,
    %c0_95 = arith.constant 0 : index
    %c384_96 = arith.constant 384 : index
    %87 = vector.load %arg13[%c0_95, %c384_96] : memref<8x3072xf32, #tpu.memory_space<vmem>>, vector<8x2560xf32>
    %c1_i32_97 = arith.constant 1 : i32
    %88 = tpu.dynamic_rotate %87 by %c1_i32_97 dim 1 : vector<8x2560xf32>, i32 -> vector<8x2560xf32>
    %c48_98 = arith.constant 48 : index
    %c0_99 = arith.constant 0 : index
    %89 = vector.load %arg15[%c48_98, %c0_99] : memref<200x2560xf32, #tpu.memory_space<vmem>>, vector<8x2560xf32>
    tpu.vector_store %arg15[%c48_98, %c0_99], %88 {strides = array<i32>} : memref<200x2560xf32, #tpu.memory_space<vmem>>, vector<8x2560xf32>,
    %c56_100 = arith.constant 56 : index
    %c0_101 = arith.constant 0 : index
    %90 = vector.load %arg15[%c56_100, %c0_101] : memref<200x2560xf32, #tpu.memory_space<vmem>>, vector<8x2560xf32>
    tpu.vector_store %arg15[%c56_100, %c0_101], %87 {strides = array<i32>} : memref<200x2560xf32, #tpu.memory_space<vmem>>, vector<8x2560xf32>,
    %c2559_i32_102 = arith.constant 2559 : i32
    %91 = tpu.dynamic_rotate %87 by %c2559_i32_102 dim 1 : vector<8x2560xf32>, i32 -> vector<8x2560xf32>
    %c64_103 = arith.constant 64 : index
    %c0_104 = arith.constant 0 : index
    %92 = vector.load %arg15[%c64_103, %c0_104] : memref<200x2560xf32, #tpu.memory_space<vmem>>, vector<8x2560xf32>
    tpu.vector_store %arg15[%c64_103, %c0_104], %91 {strides = array<i32>} : memref<200x2560xf32, #tpu.memory_space<vmem>>, vector<8x2560xf32>,
    %c0_105 = arith.constant 0 : index
    %c0_106 = arith.constant 0 : index
    %93 = vector.load %arg15[%c0_105, %c0_106] : memref<200x2560xf32, #tpu.memory_space<vmem>>, vector<72x2560xf32>
    %cst_107 = arith.constant dense<0.000000e+00> : vector<8x2560xf32>
    %94 = tpu.matmul %74, %93, %cst_107 {dimension_numbers = #tpu.dot_dimension_numbers<[1], [0], [0], [1], [0, 0, 1, 1], [], []>} : vector<8x72xf32>, vector<72x2560xf32>, vector<8x2560xf32> -> vector<8x2560xf32>
    %c0_108 = arith.constant 0 : index
    %c0_109 = arith.constant 0 : index
    %c0_110 = arith.constant 0 : index
    %95 = vector.load %arg5[%c0_108, %c0_109, %c0_110] : memref<2x8x1xf32, #tpu.memory_space<vmem>>, vector<1x8x1xf32>
    %96 = vector.shape_cast %95 : vector<1x8x1xf32> to vector<8x1xf32>
    %97 = vector.broadcast %96 : vector<8x1xf32> to vector<8x2560xf32>
    %98 = arith.addf %94, %97 : vector<8x2560xf32>
    %cst_111 = arith.constant 0.000000e+00 : f32
    %99 = vector.broadcast %cst_111 : f32 to vector<8x2560xf32>
    %100 = arith.maximumf %98, %99 : vector<8x2560xf32>
    %101 = arith.mulf %100, %2 : vector<8x2560xf32>
    %c0_112 = arith.constant 0 : index
    %c256_113 = arith.constant 256 : index
    %102 = vector.load %arg14[%c0_112, %c256_113] : memref<8x3072xf32, #tpu.memory_space<vmem>>, vector<8x2560xf32>
    tpu.vector_store %arg14[%c0_112, %c256_113], %101 {strides = array<i32>} : memref<8x3072xf32, #tpu.memory_space<vmem>>, vector<8x2560xf32>,
    %c0_114 = arith.constant 0 : index
    %c0_115 = arith.constant 0 : index
    %c0_116 = arith.constant 0 : index
    %103 = vector.load %arg6[%c0_114, %c0_115, %c0_116] : memref<2x8x72xf32, #tpu.memory_space<vmem>>, vector<1x8x72xf32>
    %104 = vector.shape_cast %103 : vector<1x8x72xf32> to vector<8x72xf32>
    %c0_117 = arith.constant 0 : index
    %c128_118 = arith.constant 128 : index
    %105 = vector.load %arg14[%c0_117, %c128_118] : memref<8x3072xf32, #tpu.memory_space<vmem>>, vector<8x2560xf32>
    %c1_i32_119 = arith.constant 1 : i32
    %106 = tpu.dynamic_rotate %105 by %c1_i32_119 dim 1 : vector<8x2560xf32>, i32 -> vector<8x2560xf32>
    %c0_120 = arith.constant 0 : index
    %c0_121 = arith.constant 0 : index
    %107 = vector.load %arg15[%c0_120, %c0_121] : memref<200x2560xf32, #tpu.memory_space<vmem>>, vector<8x2560xf32>
    tpu.vector_store %arg15[%c0_120, %c0_121], %106 {strides = array<i32>} : memref<200x2560xf32, #tpu.memory_space<vmem>>, vector<8x2560xf32>,
    %c8_122 = arith.constant 8 : index
    %c0_123 = arith.constant 0 : index
    %108 = vector.load %arg15[%c8_122, %c0_123] : memref<200x2560xf32, #tpu.memory_space<vmem>>, vector<8x2560xf32>
    tpu.vector_store %arg15[%c8_122, %c0_123], %105 {strides = array<i32>} : memref<200x2560xf32, #tpu.memory_space<vmem>>, vector<8x2560xf32>,
    %c2559_i32_124 = arith.constant 2559 : i32
    %109 = tpu.dynamic_rotate %105 by %c2559_i32_124 dim 1 : vector<8x2560xf32>, i32 -> vector<8x2560xf32>
    %c16_125 = arith.constant 16 : index
    %c0_126 = arith.constant 0 : index
    %110 = vector.load %arg15[%c16_125, %c0_126] : memref<200x2560xf32, #tpu.memory_space<vmem>>, vector<8x2560xf32>
    tpu.vector_store %arg15[%c16_125, %c0_126], %109 {strides = array<i32>} : memref<200x2560xf32, #tpu.memory_space<vmem>>, vector<8x2560xf32>,
    %c0_127 = arith.constant 0 : index
    %c256_128 = arith.constant 256 : index
    %111 = vector.load %arg14[%c0_127, %c256_128] : memref<8x3072xf32, #tpu.memory_space<vmem>>, vector<8x2560xf32>
    %c1_i32_129 = arith.constant 1 : i32
    %112 = tpu.dynamic_rotate %111 by %c1_i32_129 dim 1 : vector<8x2560xf32>, i32 -> vector<8x2560xf32>
    %c24_130 = arith.constant 24 : index
    %c0_131 = arith.constant 0 : index
    %113 = vector.load %arg15[%c24_130, %c0_131] : memref<200x2560xf32, #tpu.memory_space<vmem>>, vector<8x2560xf32>
    tpu.vector_store %arg15[%c24_130, %c0_131], %112 {strides = array<i32>} : memref<200x2560xf32, #tpu.memory_space<vmem>>, vector<8x2560xf32>,
    %c32_132 = arith.constant 32 : index
    %c0_133 = arith.constant 0 : index
    %114 = vector.load %arg15[%c32_132, %c0_133] : memref<200x2560xf32, #tpu.memory_space<vmem>>, vector<8x2560xf32>
    tpu.vector_store %arg15[%c32_132, %c0_133], %111 {strides = array<i32>} : memref<200x2560xf32, #tpu.memory_space<vmem>>, vector<8x2560xf32>,
    %c2559_i32_134 = arith.constant 2559 : i32
    %115 = tpu.dynamic_rotate %111 by %c2559_i32_134 dim 1 : vector<8x2560xf32>, i32 -> vector<8x2560xf32>
    %c40_135 = arith.constant 40 : index
    %c0_136 = arith.constant 0 : index
    %116 = vector.load %arg15[%c40_135, %c0_136] : memref<200x2560xf32, #tpu.memory_space<vmem>>, vector<8x2560xf32>
    tpu.vector_store %arg15[%c40_135, %c0_136], %115 {strides = array<i32>} : memref<200x2560xf32, #tpu.memory_space<vmem>>, vector<8x2560xf32>,
    %c0_137 = arith.constant 0 : index
    %c384_138 = arith.constant 384 : index
    %117 = vector.load %arg14[%c0_137, %c384_138] : memref<8x3072xf32, #tpu.memory_space<vmem>>, vector<8x2560xf32>
    %c1_i32_139 = arith.constant 1 : i32
    %118 = tpu.dynamic_rotate %117 by %c1_i32_139 dim 1 : vector<8x2560xf32>, i32 -> vector<8x2560xf32>
    %c48_140 = arith.constant 48 : index
    %c0_141 = arith.constant 0 : index
    %119 = vector.load %arg15[%c48_140, %c0_141] : memref<200x2560xf32, #tpu.memory_space<vmem>>, vector<8x2560xf32>
    tpu.vector_store %arg15[%c48_140, %c0_141], %118 {strides = array<i32>} : memref<200x2560xf32, #tpu.memory_space<vmem>>, vector<8x2560xf32>,
    %c56_142 = arith.constant 56 : index
    %c0_143 = arith.constant 0 : index
    %120 = vector.load %arg15[%c56_142, %c0_143] : memref<200x2560xf32, #tpu.memory_space<vmem>>, vector<8x2560xf32>
    tpu.vector_store %arg15[%c56_142, %c0_143], %117 {strides = array<i32>} : memref<200x2560xf32, #tpu.memory_space<vmem>>, vector<8x2560xf32>,
    %c2559_i32_144 = arith.constant 2559 : i32
    %121 = tpu.dynamic_rotate %117 by %c2559_i32_144 dim 1 : vector<8x2560xf32>, i32 -> vector<8x2560xf32>
    %c64_145 = arith.constant 64 : index
    %c0_146 = arith.constant 0 : index
    %122 = vector.load %arg15[%c64_145, %c0_146] : memref<200x2560xf32, #tpu.memory_space<vmem>>, vector<8x2560xf32>
    tpu.vector_store %arg15[%c64_145, %c0_146], %121 {strides = array<i32>} : memref<200x2560xf32, #tpu.memory_space<vmem>>, vector<8x2560xf32>,
    %c0_147 = arith.constant 0 : index
    %c0_148 = arith.constant 0 : index
    %123 = vector.load %arg15[%c0_147, %c0_148] : memref<200x2560xf32, #tpu.memory_space<vmem>>, vector<72x2560xf32>
    %cst_149 = arith.constant dense<0.000000e+00> : vector<8x2560xf32>
    %124 = tpu.matmul %104, %123, %cst_149 {dimension_numbers = #tpu.dot_dimension_numbers<[1], [0], [0], [1], [0, 0, 1, 1], [], []>} : vector<8x72xf32>, vector<72x2560xf32>, vector<8x2560xf32> -> vector<8x2560xf32>
    %c0_150 = arith.constant 0 : index
    %c0_151 = arith.constant 0 : index
    %c0_152 = arith.constant 0 : index
    %125 = vector.load %arg7[%c0_150, %c0_151, %c0_152] : memref<2x8x1xf32, #tpu.memory_space<vmem>>, vector<1x8x1xf32>
    %126 = vector.shape_cast %125 : vector<1x8x1xf32> to vector<8x1xf32>
    %127 = vector.broadcast %126 : vector<8x1xf32> to vector<8x2560xf32>
    %128 = arith.addf %124, %127 : vector<8x2560xf32>
    %c0_153 = arith.constant 0 : index
    %c256_154 = arith.constant 256 : index
    %129 = vector.load %arg13[%c0_153, %c256_154] : memref<8x3072xf32, #tpu.memory_space<vmem>>, vector<8x2560xf32>
    %130 = arith.addf %128, %129 : vector<8x2560xf32>
    %cst_155 = arith.constant 0.000000e+00 : f32
    %131 = vector.broadcast %cst_155 : f32 to vector<8x2560xf32>
    %132 = arith.maximumf %130, %131 : vector<8x2560xf32>
    %133 = arith.mulf %132, %2 : vector<8x2560xf32>
    %c0_156 = arith.constant 0 : index
    %c256_157 = arith.constant 256 : index
    %134 = vector.load %arg13[%c0_156, %c256_157] : memref<8x3072xf32, #tpu.memory_space<vmem>>, vector<8x2560xf32>
    tpu.vector_store %arg13[%c0_156, %c256_157], %133 {strides = array<i32>} : memref<8x3072xf32, #tpu.memory_space<vmem>>, vector<8x2560xf32>,
    %c1 = arith.constant 1 : index
    %c0_158 = arith.constant 0 : index
    %c0_159 = arith.constant 0 : index
    %135 = vector.load %arg4[%c1, %c0_158, %c0_159] : memref<2x8x72xf32, #tpu.memory_space<vmem>>, vector<1x8x72xf32>
    %136 = vector.shape_cast %135 : vector<1x8x72xf32> to vector<8x72xf32>
    %c0_160 = arith.constant 0 : index
    %c128_161 = arith.constant 128 : index
    %137 = vector.load %arg13[%c0_160, %c128_161] : memref<8x3072xf32, #tpu.memory_space<vmem>>, vector<8x2560xf32>
    %c1_i32_162 = arith.constant 1 : i32
    %138 = tpu.dynamic_rotate %137 by %c1_i32_162 dim 1 : vector<8x2560xf32>, i32 -> vector<8x2560xf32>
    %c0_163 = arith.constant 0 : index
    %c0_164 = arith.constant 0 : index
    %139 = vector.load %arg15[%c0_163, %c0_164] : memref<200x2560xf32, #tpu.memory_space<vmem>>, vector<8x2560xf32>
    tpu.vector_store %arg15[%c0_163, %c0_164], %138 {strides = array<i32>} : memref<200x2560xf32, #tpu.memory_space<vmem>>, vector<8x2560xf32>,
    %c8_165 = arith.constant 8 : index
    %c0_166 = arith.constant 0 : index
    %140 = vector.load %arg15[%c8_165, %c0_166] : memref<200x2560xf32, #tpu.memory_space<vmem>>, vector<8x2560xf32>
    tpu.vector_store %arg15[%c8_165, %c0_166], %137 {strides = array<i32>} : memref<200x2560xf32, #tpu.memory_space<vmem>>, vector<8x2560xf32>,
    %c2559_i32_167 = arith.constant 2559 : i32
    %141 = tpu.dynamic_rotate %137 by %c2559_i32_167 dim 1 : vector<8x2560xf32>, i32 -> vector<8x2560xf32>
    %c16_168 = arith.constant 16 : index
    %c0_169 = arith.constant 0 : index
    %142 = vector.load %arg15[%c16_168, %c0_169] : memref<200x2560xf32, #tpu.memory_space<vmem>>, vector<8x2560xf32>
    tpu.vector_store %arg15[%c16_168, %c0_169], %141 {strides = array<i32>} : memref<200x2560xf32, #tpu.memory_space<vmem>>, vector<8x2560xf32>,
    %c0_170 = arith.constant 0 : index
    %c256_171 = arith.constant 256 : index
    %143 = vector.load %arg13[%c0_170, %c256_171] : memref<8x3072xf32, #tpu.memory_space<vmem>>, vector<8x2560xf32>
    %c1_i32_172 = arith.constant 1 : i32
    %144 = tpu.dynamic_rotate %143 by %c1_i32_172 dim 1 : vector<8x2560xf32>, i32 -> vector<8x2560xf32>
    %c24_173 = arith.constant 24 : index
    %c0_174 = arith.constant 0 : index
    %145 = vector.load %arg15[%c24_173, %c0_174] : memref<200x2560xf32, #tpu.memory_space<vmem>>, vector<8x2560xf32>
    tpu.vector_store %arg15[%c24_173, %c0_174], %144 {strides = array<i32>} : memref<200x2560xf32, #tpu.memory_space<vmem>>, vector<8x2560xf32>,
    %c32_175 = arith.constant 32 : index
    %c0_176 = arith.constant 0 : index
    %146 = vector.load %arg15[%c32_175, %c0_176] : memref<200x2560xf32, #tpu.memory_space<vmem>>, vector<8x2560xf32>
    tpu.vector_store %arg15[%c32_175, %c0_176], %143 {strides = array<i32>} : memref<200x2560xf32, #tpu.memory_space<vmem>>, vector<8x2560xf32>,
    %c2559_i32_177 = arith.constant 2559 : i32
    %147 = tpu.dynamic_rotate %143 by %c2559_i32_177 dim 1 : vector<8x2560xf32>, i32 -> vector<8x2560xf32>
    %c40_178 = arith.constant 40 : index
    %c0_179 = arith.constant 0 : index
    %148 = vector.load %arg15[%c40_178, %c0_179] : memref<200x2560xf32, #tpu.memory_space<vmem>>, vector<8x2560xf32>
    tpu.vector_store %arg15[%c40_178, %c0_179], %147 {strides = array<i32>} : memref<200x2560xf32, #tpu.memory_space<vmem>>, vector<8x2560xf32>,
    %c0_180 = arith.constant 0 : index
    %c384_181 = arith.constant 384 : index
    %149 = vector.load %arg13[%c0_180, %c384_181] : memref<8x3072xf32, #tpu.memory_space<vmem>>, vector<8x2560xf32>
    %c1_i32_182 = arith.constant 1 : i32
    %150 = tpu.dynamic_rotate %149 by %c1_i32_182 dim 1 : vector<8x2560xf32>, i32 -> vector<8x2560xf32>
    %c48_183 = arith.constant 48 : index
    %c0_184 = arith.constant 0 : index
    %151 = vector.load %arg15[%c48_183, %c0_184] : memref<200x2560xf32, #tpu.memory_space<vmem>>, vector<8x2560xf32>
    tpu.vector_store %arg15[%c48_183, %c0_184], %150 {strides = array<i32>} : memref<200x2560xf32, #tpu.memory_space<vmem>>, vector<8x2560xf32>,
    %c56_185 = arith.constant 56 : index
    %c0_186 = arith.constant 0 : index
    %152 = vector.load %arg15[%c56_185, %c0_186] : memref<200x2560xf32, #tpu.memory_space<vmem>>, vector<8x2560xf32>
    tpu.vector_store %arg15[%c56_185, %c0_186], %149 {strides = array<i32>} : memref<200x2560xf32, #tpu.memory_space<vmem>>, vector<8x2560xf32>,
    %c2559_i32_187 = arith.constant 2559 : i32
    %153 = tpu.dynamic_rotate %149 by %c2559_i32_187 dim 1 : vector<8x2560xf32>, i32 -> vector<8x2560xf32>
    %c64_188 = arith.constant 64 : index
    %c0_189 = arith.constant 0 : index
    %154 = vector.load %arg15[%c64_188, %c0_189] : memref<200x2560xf32, #tpu.memory_space<vmem>>, vector<8x2560xf32>
    tpu.vector_store %arg15[%c64_188, %c0_189], %153 {strides = array<i32>} : memref<200x2560xf32, #tpu.memory_space<vmem>>, vector<8x2560xf32>,
    %c0_190 = arith.constant 0 : index
    %c0_191 = arith.constant 0 : index
    %155 = vector.load %arg15[%c0_190, %c0_191] : memref<200x2560xf32, #tpu.memory_space<vmem>>, vector<72x2560xf32>
    %cst_192 = arith.constant dense<0.000000e+00> : vector<8x2560xf32>
    %156 = tpu.matmul %136, %155, %cst_192 {dimension_numbers = #tpu.dot_dimension_numbers<[1], [0], [0], [1], [0, 0, 1, 1], [], []>} : vector<8x72xf32>, vector<72x2560xf32>, vector<8x2560xf32> -> vector<8x2560xf32>
    %c1_193 = arith.constant 1 : index
    %c0_194 = arith.constant 0 : index
    %c0_195 = arith.constant 0 : index
    %157 = vector.load %arg5[%c1_193, %c0_194, %c0_195] : memref<2x8x1xf32, #tpu.memory_space<vmem>>, vector<1x8x1xf32>
    %158 = vector.shape_cast %157 : vector<1x8x1xf32> to vector<8x1xf32>
    %159 = vector.broadcast %158 : vector<8x1xf32> to vector<8x2560xf32>
    %160 = arith.addf %156, %159 : vector<8x2560xf32>
    %cst_196 = arith.constant 0.000000e+00 : f32
    %161 = vector.broadcast %cst_196 : f32 to vector<8x2560xf32>
    %162 = arith.maximumf %160, %161 : vector<8x2560xf32>
    %163 = arith.mulf %162, %2 : vector<8x2560xf32>
    %c0_197 = arith.constant 0 : index
    %c256_198 = arith.constant 256 : index
    %164 = vector.load %arg14[%c0_197, %c256_198] : memref<8x3072xf32, #tpu.memory_space<vmem>>, vector<8x2560xf32>
    tpu.vector_store %arg14[%c0_197, %c256_198], %163 {strides = array<i32>} : memref<8x3072xf32, #tpu.memory_space<vmem>>, vector<8x2560xf32>,
    %c1_199 = arith.constant 1 : index
    %c0_200 = arith.constant 0 : index
    %c0_201 = arith.constant 0 : index
    %165 = vector.load %arg6[%c1_199, %c0_200, %c0_201] : memref<2x8x72xf32, #tpu.memory_space<vmem>>, vector<1x8x72xf32>
    %166 = vector.shape_cast %165 : vector<1x8x72xf32> to vector<8x72xf32>
    %c0_202 = arith.constant 0 : index
    %c128_203 = arith.constant 128 : index
    %167 = vector.load %arg14[%c0_202, %c128_203] : memref<8x3072xf32, #tpu.memory_space<vmem>>, vector<8x2560xf32>
    %c1_i32_204 = arith.constant 1 : i32
    %168 = tpu.dynamic_rotate %167 by %c1_i32_204 dim 1 : vector<8x2560xf32>, i32 -> vector<8x2560xf32>
    %c0_205 = arith.constant 0 : index
    %c0_206 = arith.constant 0 : index
    %169 = vector.load %arg15[%c0_205, %c0_206] : memref<200x2560xf32, #tpu.memory_space<vmem>>, vector<8x2560xf32>
    tpu.vector_store %arg15[%c0_205, %c0_206], %168 {strides = array<i32>} : memref<200x2560xf32, #tpu.memory_space<vmem>>, vector<8x2560xf32>,
    %c8_207 = arith.constant 8 : index
    %c0_208 = arith.constant 0 : index
    %170 = vector.load %arg15[%c8_207, %c0_208] : memref<200x2560xf32, #tpu.memory_space<vmem>>, vector<8x2560xf32>
    tpu.vector_store %arg15[%c8_207, %c0_208], %167 {strides = array<i32>} : memref<200x2560xf32, #tpu.memory_space<vmem>>, vector<8x2560xf32>,
    %c2559_i32_209 = arith.constant 2559 : i32
    %171 = tpu.dynamic_rotate %167 by %c2559_i32_209 dim 1 : vector<8x2560xf32>, i32 -> vector<8x2560xf32>
    %c16_210 = arith.constant 16 : index
    %c0_211 = arith.constant 0 : index
    %172 = vector.load %arg15[%c16_210, %c0_211] : memref<200x2560xf32, #tpu.memory_space<vmem>>, vector<8x2560xf32>
    tpu.vector_store %arg15[%c16_210, %c0_211], %171 {strides = array<i32>} : memref<200x2560xf32, #tpu.memory_space<vmem>>, vector<8x2560xf32>,
    %c0_212 = arith.constant 0 : index
    %c256_213 = arith.constant 256 : index
    %173 = vector.load %arg14[%c0_212, %c256_213] : memref<8x3072xf32, #tpu.memory_space<vmem>>, vector<8x2560xf32>
    %c1_i32_214 = arith.constant 1 : i32
    %174 = tpu.dynamic_rotate %173 by %c1_i32_214 dim 1 : vector<8x2560xf32>, i32 -> vector<8x2560xf32>
    %c24_215 = arith.constant 24 : index
    %c0_216 = arith.constant 0 : index
    %175 = vector.load %arg15[%c24_215, %c0_216] : memref<200x2560xf32, #tpu.memory_space<vmem>>, vector<8x2560xf32>
    tpu.vector_store %arg15[%c24_215, %c0_216], %174 {strides = array<i32>} : memref<200x2560xf32, #tpu.memory_space<vmem>>, vector<8x2560xf32>,
    %c32_217 = arith.constant 32 : index
    %c0_218 = arith.constant 0 : index
    %176 = vector.load %arg15[%c32_217, %c0_218] : memref<200x2560xf32, #tpu.memory_space<vmem>>, vector<8x2560xf32>
    tpu.vector_store %arg15[%c32_217, %c0_218], %173 {strides = array<i32>} : memref<200x2560xf32, #tpu.memory_space<vmem>>, vector<8x2560xf32>,
    %c2559_i32_219 = arith.constant 2559 : i32
    %177 = tpu.dynamic_rotate %173 by %c2559_i32_219 dim 1 : vector<8x2560xf32>, i32 -> vector<8x2560xf32>
    %c40_220 = arith.constant 40 : index
    %c0_221 = arith.constant 0 : index
    %178 = vector.load %arg15[%c40_220, %c0_221] : memref<200x2560xf32, #tpu.memory_space<vmem>>, vector<8x2560xf32>
    tpu.vector_store %arg15[%c40_220, %c0_221], %177 {strides = array<i32>} : memref<200x2560xf32, #tpu.memory_space<vmem>>, vector<8x2560xf32>,
    %c0_222 = arith.constant 0 : index
    %c384_223 = arith.constant 384 : index
    %179 = vector.load %arg14[%c0_222, %c384_223] : memref<8x3072xf32, #tpu.memory_space<vmem>>, vector<8x2560xf32>
    %c1_i32_224 = arith.constant 1 : i32
    %180 = tpu.dynamic_rotate %179 by %c1_i32_224 dim 1 : vector<8x2560xf32>, i32 -> vector<8x2560xf32>
    %c48_225 = arith.constant 48 : index
    %c0_226 = arith.constant 0 : index
    %181 = vector.load %arg15[%c48_225, %c0_226] : memref<200x2560xf32, #tpu.memory_space<vmem>>, vector<8x2560xf32>
    tpu.vector_store %arg15[%c48_225, %c0_226], %180 {strides = array<i32>} : memref<200x2560xf32, #tpu.memory_space<vmem>>, vector<8x2560xf32>,
    %c56_227 = arith.constant 56 : index
    %c0_228 = arith.constant 0 : index
    %182 = vector.load %arg15[%c56_227, %c0_228] : memref<200x2560xf32, #tpu.memory_space<vmem>>, vector<8x2560xf32>
    tpu.vector_store %arg15[%c56_227, %c0_228], %179 {strides = array<i32>} : memref<200x2560xf32, #tpu.memory_space<vmem>>, vector<8x2560xf32>,
    %c2559_i32_229 = arith.constant 2559 : i32
    %183 = tpu.dynamic_rotate %179 by %c2559_i32_229 dim 1 : vector<8x2560xf32>, i32 -> vector<8x2560xf32>
    %c64_230 = arith.constant 64 : index
    %c0_231 = arith.constant 0 : index
    %184 = vector.load %arg15[%c64_230, %c0_231] : memref<200x2560xf32, #tpu.memory_space<vmem>>, vector<8x2560xf32>
    tpu.vector_store %arg15[%c64_230, %c0_231], %183 {strides = array<i32>} : memref<200x2560xf32, #tpu.memory_space<vmem>>, vector<8x2560xf32>,
    %c0_232 = arith.constant 0 : index
    %c0_233 = arith.constant 0 : index
    %185 = vector.load %arg15[%c0_232, %c0_233] : memref<200x2560xf32, #tpu.memory_space<vmem>>, vector<72x2560xf32>
    %cst_234 = arith.constant dense<0.000000e+00> : vector<8x2560xf32>
    %186 = tpu.matmul %166, %185, %cst_234 {dimension_numbers = #tpu.dot_dimension_numbers<[1], [0], [0], [1], [0, 0, 1, 1], [], []>} : vector<8x72xf32>, vector<72x2560xf32>, vector<8x2560xf32> -> vector<8x2560xf32>
    %c1_235 = arith.constant 1 : index
    %c0_236 = arith.constant 0 : index
    %c0_237 = arith.constant 0 : index
    %187 = vector.load %arg7[%c1_235, %c0_236, %c0_237] : memref<2x8x1xf32, #tpu.memory_space<vmem>>, vector<1x8x1xf32>
    %188 = vector.shape_cast %187 : vector<1x8x1xf32> to vector<8x1xf32>
    %189 = vector.broadcast %188 : vector<8x1xf32> to vector<8x2560xf32>
    %190 = arith.addf %186, %189 : vector<8x2560xf32>
    %c0_238 = arith.constant 0 : index
    %c256_239 = arith.constant 256 : index
    %191 = vector.load %arg13[%c0_238, %c256_239] : memref<8x3072xf32, #tpu.memory_space<vmem>>, vector<8x2560xf32>
    %192 = arith.addf %190, %191 : vector<8x2560xf32>
    %cst_240 = arith.constant 0.000000e+00 : f32
    %193 = vector.broadcast %cst_240 : f32 to vector<8x2560xf32>
    %194 = arith.maximumf %192, %193 : vector<8x2560xf32>
    %195 = arith.mulf %194, %2 : vector<8x2560xf32>
    %c0_241 = arith.constant 0 : index
    %c256_242 = arith.constant 256 : index
    %196 = vector.load %arg13[%c0_241, %c256_242] : memref<8x3072xf32, #tpu.memory_space<vmem>>, vector<8x2560xf32>
    tpu.vector_store %arg13[%c0_241, %c256_242], %195 {strides = array<i32>} : memref<8x3072xf32, #tpu.memory_space<vmem>>, vector<8x2560xf32>,
    %c0_243 = arith.constant 0 : index
    %c0_244 = arith.constant 0 : index
    %197 = vector.load %arg8[%c0_243, %c0_244] : memref<3x8xf32, #tpu.memory_space<vmem>>, vector<3x8xf32>
    %c0_245 = arith.constant 0 : index
    %c256_246 = arith.constant 256 : index
    %198 = vector.load %arg13[%c0_245, %c256_246] : memref<8x3072xf32, #tpu.memory_space<vmem>>, vector<8x2560xf32>
    %cst_247 = arith.constant dense<0.000000e+00> : vector<3x2560xf32>
    %199 = tpu.matmul %197, %198, %cst_247 {dimension_numbers = #tpu.dot_dimension_numbers<[1], [0], [0], [1], [0, 0, 1, 1], [], []>} : vector<3x8xf32>, vector<8x2560xf32>, vector<3x2560xf32> -> vector<3x2560xf32>
    %c0_248 = arith.constant 0 : index
    %c0_249 = arith.constant 0 : index
    %200 = vector.load %arg9[%c0_248, %c0_249] : memref<3x1xf32, #tpu.memory_space<vmem>>, vector<3x1xf32>
    %201 = vector.broadcast %200 : vector<3x1xf32> to vector<3x2560xf32>
    %202 = arith.addf %199, %201 : vector<3x2560xf32>
    %c0_250 = arith.constant 0 : index
    %203 = memref.load %arg11[%c0_250] : memref<2xf32, #tpu.memory_space<smem>>
    %c1_251 = arith.constant 1 : index
    %204 = memref.load %arg11[%c1_251] : memref<2xf32, #tpu.memory_space<smem>>
    %205 = vector.broadcast %203 : f32 to vector<3x2560xf32>
    %206 = arith.mulf %205, %202 : vector<3x2560xf32>
    %c0_252 = arith.constant 0 : index
    %c0_253 = arith.constant 0 : index
    %c256_254 = arith.constant 256 : index
    %207 = vector.load %arg1[%c0_252, %c0_253, %c256_254] : memref<1x8x3072xf32, #tpu.memory_space<vmem>>, vector<1x3x2560xf32>
    %208 = vector.shape_cast %207 : vector<1x3x2560xf32> to vector<3x2560xf32>
    %209 = vector.broadcast %204 : f32 to vector<3x2560xf32>
    %210 = arith.mulf %209, %208 : vector<3x2560xf32>
    %211 = arith.addf %206, %210 : vector<3x2560xf32>
    %212 = math.tanh %211 : vector<3x2560xf32>
    %c0_255 = arith.constant 0 : index
    %c0_256 = arith.constant 0 : index
    %c0_257 = arith.constant 0 : index
    %213 = vector.load %arg12[%c0_255, %c0_256, %c0_257] : memref<1x3x2560xf32, #tpu.memory_space<vmem>>, vector<1x3x2560xf32>
    %214 = vector.shape_cast %213 : vector<1x3x2560xf32> to vector<3x2560xf32>
    %215 = vector.shape_cast %212 : vector<3x2560xf32> to vector<1x3x2560xf32>
    tpu.vector_store %arg12[%c0_255, %c0_256, %c0_257], %215 {strides = array<i32>} : memref<1x3x2560xf32, #tpu.memory_space<vmem>>, vector<1x3x2560xf32>,
    return
  }
  func.func @transform_0(%arg0: i32) -> (i32, i32, i32) {
    %c0_i32 = arith.constant 0 : i32
    %c0_i32_0 = arith.constant 0 : i32
    %c0_i32_1 = arith.constant 0 : i32
    return %arg0, %c0_i32, %c0_i32_0 : i32, i32, i32
  }
  func.func @transform_1(%arg0: i32) -> (i32, i32) {
    %c0_i32 = arith.constant 0 : i32
    %c0_i32_0 = arith.constant 0 : i32
    %c0_i32_1 = arith.constant 0 : i32
    return %c0_i32, %c0_i32_0 : i32, i32
  }
  func.func @transform_2(%arg0: i32) -> (i32, i32) {
    %c0_i32 = arith.constant 0 : i32
    %c0_i32_0 = arith.constant 0 : i32
    %c0_i32_1 = arith.constant 0 : i32
    return %c0_i32, %c0_i32_0 : i32, i32
  }
  func.func @transform_3(%arg0: i32) -> (i32, i32, i32) {
    %c0_i32 = arith.constant 0 : i32
    %c0_i32_0 = arith.constant 0 : i32
    %c0_i32_1 = arith.constant 0 : i32
    %c0_i32_2 = arith.constant 0 : i32
    return %c0_i32, %c0_i32_0, %c0_i32_1 : i32, i32, i32
  }
  func.func @transform_4(%arg0: i32) -> (i32, i32, i32) {
    %c0_i32 = arith.constant 0 : i32
    %c0_i32_0 = arith.constant 0 : i32
    %c0_i32_1 = arith.constant 0 : i32
    %c0_i32_2 = arith.constant 0 : i32
    return %c0_i32, %c0_i32_0, %c0_i32_1 : i32, i32, i32
  }
  func.func @transform_5(%arg0: i32) -> (i32, i32, i32) {
    %c0_i32 = arith.constant 0 : i32
    %c0_i32_0 = arith.constant 0 : i32
    %c0_i32_1 = arith.constant 0 : i32
    %c0_i32_2 = arith.constant 0 : i32
    return %c0_i32, %c0_i32_0, %c0_i32_1 : i32, i32, i32
  }
  func.func @transform_6(%arg0: i32) -> (i32, i32, i32) {
    %c0_i32 = arith.constant 0 : i32
    %c0_i32_0 = arith.constant 0 : i32
    %c0_i32_1 = arith.constant 0 : i32
    %c0_i32_2 = arith.constant 0 : i32
    return %c0_i32, %c0_i32_0, %c0_i32_1 : i32, i32, i32
  }
  func.func @transform_7(%arg0: i32) -> (i32, i32) {
    %c0_i32 = arith.constant 0 : i32
    %c0_i32_0 = arith.constant 0 : i32
    %c0_i32_1 = arith.constant 0 : i32
    return %c0_i32, %c0_i32_0 : i32, i32
  }
  func.func @transform_8(%arg0: i32) -> (i32, i32) {
    %c0_i32 = arith.constant 0 : i32
    %c0_i32_0 = arith.constant 0 : i32
    %c0_i32_1 = arith.constant 0 : i32
    return %c0_i32, %c0_i32_0 : i32, i32
  }
  func.func @transform_9(%arg0: i32) -> (i32, i32) {
    %c0_i32 = arith.constant 0 : i32
    %c0_i32_0 = arith.constant 0 : i32
    %c0_i32_1 = arith.constant 0 : i32
    return %c0_i32, %c0_i32_0 : i32, i32
  }
  func.func @transform_10(%arg0: i32) -> i32 {
    %c0_i32 = arith.constant 0 : i32
    %c0_i32_0 = arith.constant 0 : i32
    return %c0_i32 : i32
  }
  func.func @transform_11(%arg0: i32) -> (i32, i32, i32) {
    %c0_i32 = arith.constant 0 : i32
    %c0_i32_0 = arith.constant 0 : i32
    %c0_i32_1 = arith.constant 0 : i32
    return %arg0, %c0_i32, %c0_i32_0 : i32, i32, i32
  }
}

</mosaic_0001>

<bundles_post_ra>
// kernel: deco_mini_forward.1
= control target key start
LH: loop header
LB: loop body
LE: loop exit
PB: predicated region body
PF: predicated region fallthrough
CT: control target
= control target key end

     0   :  { %16 = vsyncpa [#allocation6], 0  ;;  %s20258_s0 = inlined_call_operand.vmem [shape: f32[1,8,3072], index: 0, kind: input, shape index: {}]   ;;  %s20259_s1 = inlined_call_operand.vmem [shape: f32[8,200], index: 1, kind: input, shape index: {}]   ;;  %s20260_s2 = inlined_call_operand.vmem [shape: f32[8,1], index: 2, kind: input, shape index: {}]   ;;  %s20261_s3 = inlined_call_operand.vmem [shape: f32[2,8,72], index: 3, kind: input, shape index: {}]   ;;  %s20262_s4 = inlined_call_operand.vmem [shape: f32[2,8,1], index: 4, kind: input, shape index: {}]   ;;  %s20263_s5 = inlined_call_operand.vmem [shape: f32[2,8,72], index: 5, kind: input, shape index: {}]   ;;  %s20264_s6 = inlined_call_operand.vmem [shape: f32[2,8,1], index: 6, kind: input, shape index: {}]   ;;  %s20265_s7 = inlined_call_operand.vmem [shape: f32[3,8], index: 7, kind: input, shape index: {}]   ;;  %s20266_s8 = inlined_call_operand.vmem [shape: f32[3,1], index: 8, kind: input, shape index: {}]   ;;  %s20267_s9 = inlined_call_operand.vmem [shape: f32[1,2560], index: 9, kind: input, shape index: {}]   ;;  %s20268_s10 = inlined_call_operand.vmem [shape: f32[2], index: 10, kind: input, shape index: {}]   ;;  %s20269_s11 = inlined_call_operand.vmem [shape: f32[1,3,2560], index: 11, kind: output, shape index: {}]  }
   0x1   :  { %s43_s19 = sshll.u32 %s20268_s10, 4  ;;  %s44_s19 = int_to_ptr.vmem [resolvable:$true] %s43_s19 }
   0x2   :  { %s13590_s20 = scalar_lea.vmem %s44_s19, 16  ;;  %p13595_p1 = scmp.lt.s32.totalorder %s44_s19, %s44_s19 }
   0x3   :  { %p13591_p0 = scmp.ne.s32.totalorder %s44_s19, %s13590_s20  ;;  %p13596_p2 = scmp.lt.s32.totalorder %s13590_s20, %s13590_s20 }
   0x5   :  { %p13597_p3 = por %p13596_p2, %p13595_p1 }
   0x7   :  { %p13598_p4 = pnand %p13597_p3, %p13591_p0 }
   0x9   :  { %13601 = shalt.err (!%p13598_p4)
}
   0xa   :  { %s13604_s21 = smov [#allocation5]  }
   0xb   :  { %46 = dma.vmem_to_smem %s44_s19, 16, %s13604_s21, [#allocation6]  }
   0xc   :  { %13602 = dma.done.wait [#allocation6], 16  }
   0xd   :  { %13603 = vsyncadd [#allocation6], 4294967280 }
   0xe   :  { %50 = sfence }
   0xf   :  { %v13677_v0 = vld [vmem:[%s20258_s0] sm:$0xff]  ;;  %v13682_v1 = vld [vmem:[%s20258_s0 + $0x8] sm:$0xff]  ;;  %v13687_v2 = vld [vmem:[%s20258_s0 + $0x10] sm:$0xff]  ;;  %s13605_s29 = smov 1   ;;  %s13606_s30 = smov 2   ;;  %vm2479_vm0 = vcmask 588800   ;;  %v20270_v33 = vlaneseq }
  0x10   :  { %v11679_v3 = vpack.i.bf16 %v13682_v1, %v13677_v0  ;;  %v13694_v4 = vld [vmem:[%s20258_s0 + $0x18] sm:$0xff]  ;;  %v13709_v8 = vld [vmem:[%s20258_s0 + $0x20] sm:$0xff]  ;;  %v11699_v10 = vpack.i.bf16 %v13687_v2, %v13682_v1  ;;  %s13607_s16 = smov 127   ;;  %v11709_v11 = vpack.i.bf16 %v13687_v2, %v13677_v0  ;;  %s13608_s17 = smov 126   ;;  %v13734_v14 = vld [vmem:[%s20258_s0 + $0x28] sm:$0xff]  ;;  %vm9604_vm5 = vcmask 64512  }
  0x11   :  { %v11684_v5 = vpack.i.bf16 %v13694_v4, %v13687_v2  ;;  %v186_v6 = vld [vmem:[%s20258_s0 + $0x98] sm:$0xff]  ;;  %v11704_v9 = vpack.i.bf16 %v13709_v8, %v13694_v4  ;;  %v552_v12 = vld [vmem:[%s20258_s0 + $0xa0] sm:$0xff]  ;;  %v11754_v15 = vpack.i.bf16 %v13682_v1, %v13734_v14  ;;  %v11774_v16 = vpack.i.bf16 %v13734_v14, %v13709_v8  ;;  %v912_v17 = vld [vmem:[%s20258_s0 + $0xa8] sm:$0xff] }
  0x12   :  { %11680 = vrot.lane.b32.xlu1 %v11679_v3, %s13605_s29  ;;  %11670 = vrot.lane.b32.xlu0 %v11679_v3, %s13606_s30  ;;  %v11694_v7 = vpack.i.bf16 %v13682_v1, %v186_v6  ;;  %v11729_v13 = vpack.i.bf16 %v552_v12, %v13709_v8  ;;  %v11794_v18 = vpack.i.bf16 %v13694_v4, %v912_v17  ;;  %v13757_v19 = vld [vmem:[%s20258_s0 + $0x30] sm:$0xff]  ;;  %v13784_v24 = vld [vmem:[%s20258_s0 + $0x38] sm:$0xff]  ;;  %v13850_v34 = vand.u32 127, %v20270_v33 }
  0x13   :  { %v13763_v20 = vpack.i.bf16 %v13757_v19, %v13734_v14  ;;  %v11809_v21 = vpack.i.bf16 %v13709_v8, %v13687_v2  ;;  %v1272_v22 = vld [vmem:[%s20258_s0 + $0xb0] sm:$0xff]  ;;  %v11854_v25 = vpack.i.bf16 %v13694_v4, %v13784_v24  ;;  %v13798_v26 = vpack.i.bf16 %v13784_v24, %v13757_v19  ;;  %v1632_v27 = vld [vmem:[%s20258_s0 + $0xb8] sm:$0xff]  ;;  %v13813_v29 = vld [vmem:[%s20258_s0 + $0x40] sm:$0xff] }
  0x14   :  { %v11829_v23 = vpack.i.bf16 %v1272_v22, %v13757_v19  ;;  %v11894_v28 = vpack.i.bf16 %v13709_v8, %v1632_v27  ;;  %v13819_v30 = vpack.i.bf16 %v13813_v29, %v13784_v24  ;;  %v11919_v31 = vpack.i.bf16 %v13734_v14, %v13784_v24  ;;  %v13836_v32 = vld [vmem:[%s20259_s1 + $0x8] sm:$0xff] }
  0x15   :  { %10477 = vmatprep.mubr.msk.f32.mxu0 %vm2479_vm0, %v13836_v32  ;;  %10478 = vmatprep.mubr.msk.f32.mxu1 %vm2479_vm0, %v13836_v32  ;;  %v11939_v35 = vpack.i.bf16 %v13757_v19, %v13813_v29  ;;  %vm229_vm1 = vcmp.lt.s32.totalorder %v13850_v34, 2  ;;  %vm310_vm2 = vcmp.lt.s32.totalorder %v13850_v34, 1  ;;  %v13911_v63 = vld [vmem:[%s20258_s0 + $0x48] sm:$0xff]  ;;  %vm411_vm3 = vcmp.lt.s32.totalorder %v13850_v34, 127 }
  0x16   :  { %11685 = vrot.lane.b32.xlu1 %v11684_v5, %s13605_s29  ;;  %11675 = vrot.lane.b32.xlu0 %v11684_v5, %s13606_s30  ;;  %v11979_v12 = vpack.i.bf16 %v13784_v24, %v13911_v63  ;;  %vm492_vm4 = vcmp.lt.s32.totalorder %v13850_v34, 126 }
  0x1a   :  { %11695 = vrot.lane.b32.xlu1 %v11694_v7, %s13605_s29  ;;  %11690 = vrot.lane.b32.xlu0 %v11694_v7, %s13606_s30 }
  0x1e   :  { %11705 = vrot.lane.b32.xlu1 %v11704_v9, %s13607_s16  ;;  %11700 = vrot.lane.b32.xlu0 %v11699_v10, %s13607_s16 }
  0x22   :  { %11715 = vrot.lane.b32.xlu1 %v11699_v10, %s13608_s17  ;;  %11710 = vrot.lane.b32.xlu0 %v11709_v11, %s13607_s16 }
  0x26   :  { %11725 = vrot.lane.b32.xlu1 %v11684_v5, %s13606_s30  ;;  %11720 = vrot.lane.b32.xlu0 %v11704_v9, %s13608_s17 }
  0x2a   :  { %11735 = vrot.lane.b32.xlu1 %v11709_v11, %s13608_s17  ;;  %11730 = vrot.lane.b32.xlu0 %v11729_v13, %s13606_s30 }
  0x2e   :  { %11745 = vrot.lane.b32.xlu1 %v11729_v13, %s13605_s29  ;;  %11740 = vrot.lane.b32.xlu0 %v11684_v5, %s13605_s29 }
  0x32   :  { %11755 = vrot.lane.b32.xlu1 %v11754_v15, %s13607_s16  ;;  %11750 = vrot.lane.b32.xlu0 %v11704_v9, %s13607_s16 }
  0x36   :  { %11765 = vrot.lane.b32.xlu1 %v11754_v15, %s13608_s17  ;;  %11760 = vrot.lane.b32.xlu0 %v11704_v9, %s13608_s17 }
  0x3a   :  { %11775 = vrot.lane.b32.xlu1 %v11774_v16, %s13606_s30  ;;  %11770 = vrot.lane.b32.xlu0 %v11684_v5, %s13606_s30 }
  0x3e   :  { %11785 = vrot.lane.b32.xlu1 %v11774_v16, %s13605_s29  ;;  %11780 = vrot.lane.b32.xlu0 %v11684_v5, %s13605_s29 }
  0x42   :  { %11795 = vrot.lane.b32.xlu1 %v11794_v18, %s13605_s29  ;;  %11790 = vrot.lane.b32.xlu0 %v11794_v18, %s13606_s30 }
  0x46   :  { %11805 = vrot.lane.b32.xlu1 %v13763_v20, %s13607_s16  ;;  %11800 = vrot.lane.b32.xlu0 %v11704_v9, %s13607_s16 }
  0x4a   :  { %11815 = vrot.lane.b32.xlu1 %v11704_v9, %s13608_s17  ;;  %11810 = vrot.lane.b32.xlu0 %v11809_v21, %s13607_s16 }
  0x4e   :  { %11825 = vrot.lane.b32.xlu1 %v11774_v16, %s13606_s30  ;;  %11820 = vrot.lane.b32.xlu0 %v13763_v20, %s13608_s17 }
  0x52   :  { %11835 = vrot.lane.b32.xlu1 %v11809_v21, %s13608_s17  ;;  %11830 = vrot.lane.b32.xlu0 %v11829_v23, %s13606_s30 }
  0x56   :  { %11845 = vrot.lane.b32.xlu1 %v11829_v23, %s13605_s29  ;;  %11840 = vrot.lane.b32.xlu0 %v11774_v16, %s13605_s29 }
  0x5a   :  { %11855 = vrot.lane.b32.xlu1 %v11854_v25, %s13607_s16  ;;  %11850 = vrot.lane.b32.xlu0 %v13763_v20, %s13607_s16 }
  0x5e   :  { %11865 = vrot.lane.b32.xlu1 %v11854_v25, %s13608_s17  ;;  %11860 = vrot.lane.b32.xlu0 %v13763_v20, %s13608_s17  ;;  %v13942_v25 = vpack.i.bf16 %v13911_v63, %v13813_v29 }
  0x62   :  { %11875 = vrot.lane.b32.xlu1 %v13798_v26, %s13606_s30  ;;  %11870 = vrot.lane.b32.xlu0 %v11774_v16, %s13606_s30 }
  0x66   :  { %11885 = vrot.lane.b32.xlu1 %v13798_v26, %s13605_s29  ;;  %11880 = vrot.lane.b32.xlu0 %v11774_v16, %s13605_s29 }
  0x6a   :  { %11895 = vrot.lane.b32.xlu1 %v11894_v28, %s13605_s29  ;;  %11890 = vrot.lane.b32.xlu0 %v11894_v28, %s13606_s30 }
  0x6e   :  { %11905 = vrot.lane.b32.xlu1 %v13819_v30, %s13607_s16  ;;  %11900 = vrot.lane.b32.xlu0 %v13763_v20, %s13607_s16 }
  0x72   :  { %11915 = vrot.lane.b32.xlu1 %v13763_v20, %s13606_s30  ;;  %11910 = vrot.lane.b32.xlu0 %v11774_v16, %s13607_s16 }
  0x76   :  { %11925 = vrot.lane.b32.xlu1 %v13763_v20, %s13605_s29  ;;  %11920 = vrot.lane.b32.xlu0 %v11919_v31, %s13606_s30 }
  0x7a   :  { %1895 = vrot.lane.b32.xlu1 %v13734_v14, %s13608_s17  ;;  %11930 = vrot.lane.b32.xlu0 %v11919_v31, %s13605_s29 }
  0x7e   :  { %1899 = vrot.lane.b32.xlu1 %v13784_v24, %s13608_s17  ;;  %1897 = vrot.lane.b32.xlu0 %v13757_v19, %s13608_s17 }
  0x82   :  { %1893 = vrot.lane.b32.xlu1 %v13709_v8, %s13608_s17  ;;  %1901 = vrot.lane.b32.xlu0 %v13813_v29, %s13608_s17 }
  0x84   :  { %v11681_v36 = vpop.permute.xlu1 %11680  ;;  %v11671_v37 = vpop.permute.xlu0 %11670 }
  0x85   :  { %v11683_v38 = vunpack.i.h.bf16 %v11681_v36  ;;  %v11682_v39 = vunpack.i.l.bf16 %v11681_v36  ;;  %v11673_v40 = vunpack.i.h.bf16 %v11671_v37  ;;  %v11672_v41 = vunpack.i.l.bf16 %v11671_v37 }
  0x86   :  { %11940 = vrot.lane.b32.xlu1 %v11939_v35, %s13607_s16  ;;  %11935 = vrot.lane.b32.xlu0 %v13798_v26, %s13607_s16 }
  0x87   :  { %v248_v42 = vsel %vm229_vm1, %v11672_v41, %v11673_v40  ;;  %v329_v43 = vsel %vm310_vm2, %v11682_v39, %v11683_v38 }
  0x88   :  { %v13867_v44 = vpop.permute.xlu1 %11685  ;;  %v13869_v45 = vpop.permute.xlu0 %11675  ;;  %v10542_v46 = vpack.c.bf16 %v329_v43, %v248_v42 }
  0x89   :  { %v11688_v47 = vunpack.i.h.bf16 %v13867_v44  ;;  %v11687_v48 = vunpack.i.l.bf16 %v13867_v44  ;;  %v11678_v49 = vunpack.i.h.bf16 %v13869_v45  ;;  %v11677_v50 = vunpack.i.l.bf16 %v13869_v45 }
  0x8a   :  { %11950 = vrot.lane.b32.xlu1 %v13819_v30, %s13608_s17  ;;  %11945 = vrot.lane.b32.xlu0 %v13763_v20, %s13608_s17 }
  0x8b   :  { %10543 = vmatprep.subr.bf16.mxu0 %v10542_v46  ;;  %v246_v51 = vsel %vm229_vm1, %v11677_v50, %v11678_v49  ;;  %v327_v52 = vsel %vm310_vm2, %v11687_v48, %v11688_v47  ;;  %v247_v53 = vsel %vm229_vm1, %v11673_v40, %v11677_v50  ;;  %v328_v54 = vsel %vm310_vm2, %v11683_v38, %v11687_v48 }
  0x8c   :  { %v13891_v55 = vpop.permute.xlu1 %11695  ;;  %v13893_v56 = vpop.permute.xlu0 %11690  ;;  %v10590_v57 = vpack.c.bf16 %v327_v52, %v246_v51  ;;  %v10592_v58 = vpack.c.bf16 %v328_v54, %v247_v53 }
  0x8d   :  { %v20280_v59 = vunpack.i.l.bf16 %v13891_v55  ;;  %v20281_v60 = vunpack.i.l.bf16 %v13893_v56  ;;  %v11693_v38 = vunpack.i.h.bf16 %v13893_v56 }
  0x8e   :  { %11960 = vrot.lane.b32.xlu1 %v11939_v35, %s13606_s30  ;;  %11955 = vrot.lane.b32.xlu0 %v13798_v26, %s13606_s30 }
  0x8f   :  { %10591 = vmatprep.subr.bf16.mxu1 %v10590_v57  ;;  %v249_v61 = vsel %vm229_vm1, %v20281_v60, %v11672_v41  ;;  %v330_v62 = vsel %vm310_vm2, %v20280_v59, %v11682_v39 }
  0x90   :  { %10593 = vmatpush1.bf16.msra.mxu1 %v10592_v58  ;;  %v13914_v3 = vpop.permute.xlu1 %11705  ;;  %v11701_v5 = vpop.permute.xlu0 %11700  ;;  %v10544_v6 = vpack.c.bf16 %v330_v62, %v249_v61 }
  0x91   :  { %v11708_v7 = vunpack.i.h.bf16 %v13914_v3  ;;  %v11707_v9 = vunpack.i.l.bf16 %v13914_v3  ;;  %v11703_v10 = vunpack.i.h.bf16 %v11701_v5  ;;  %v11702_v11 = vunpack.i.l.bf16 %v11701_v5  ;;  %v13996_v5 = vld [vmem:[%s20258_s0 + $0x50] sm:$0xff] }
  0x92   :  { %11970 = vrot.lane.b32.xlu1 %v11939_v35, %s13605_s29  ;;  %11965 = vrot.lane.b32.xlu0 %v13798_v26, %s13605_s29 }
  0x93   :  { %10545 = vmatpush1.bf16.msra.mxu0 %v10544_v6  ;;  %v429_v13 = vsel %vm411_vm3, %v11702_v11, %v11703_v10  ;;  %v427_v15 = vsel %vm411_vm3, %v11707_v9, %v11708_v7  ;;  %v428_v16 = vsel %vm411_vm3, %v11703_v10, %v11707_v9  ;;  %v11698_v6 = vunpack.i.h.bf16 %v13891_v55 }
  0x94   :  { %v11716_v17 = vpop.permute.xlu1 %11715  ;;  %v13931_v18 = vpop.permute.xlu0 %11710  ;;  %v10546_v20 = vpack.c.bf16 %v429_v13, %v13682_v1  ;;  %v10594_v21 = vpack.c.bf16 %v427_v15, %v13694_v4  ;;  %v10596_v22 = vpack.c.bf16 %v428_v16, %v13687_v2 }
  0x95   :  { %v20279_v23 = vunpack.i.l.bf16 %v13931_v18  ;;  %v11718_v27 = vunpack.i.h.bf16 %v11716_v17  ;;  %v11717_v28 = vunpack.i.l.bf16 %v11716_v17 }
  0x96   :  { %11980 = vrot.lane.b32.xlu1 %v11979_v12, %s13607_s16  ;;  %11975 = vrot.lane.b32.xlu0 %v13819_v30, %s13607_s16 }
  0x97   :  { %10547 = vmatprep.subr.bf16.mxu0 %v10546_v20  ;;  %10595 = vmatprep.subr.bf16.mxu1 %v10594_v21  ;;  %v430_v31 = vsel %vm411_vm3, %v20279_v23, %v11702_v11 }
  0x98   :  { %10597 = vmatpush1.bf16.msra.mxu1 %v10596_v22  ;;  %v11726_v35 = vpop.permute.xlu1 %11725  ;;  %v13948_v36 = vpop.permute.xlu0 %11720  ;;  %v10548_v37 = vpack.c.bf16 %v430_v31, %v13677_v0  ;;  %v510_v0 = vsel %vm492_vm4, %v11717_v28, %v11718_v27  ;;  %v14008_v22 = vpack.i.bf16 %v13813_v29, %v13996_v5 }
  0x99   :  { %v11727_v39 = vunpack.i.l.bf16 %v11726_v35  ;;  %v11723_v40 = vunpack.i.h.bf16 %v13948_v36  ;;  %v11722_v41 = vunpack.i.l.bf16 %v13948_v36  ;;  %v11728_v42 = vunpack.i.h.bf16 %v11726_v35 }
  0x9a   :  { %11990 = vrot.lane.b32.xlu1 %v13942_v25, %s13608_s17  ;;  %11985 = vrot.lane.b32.xlu0 %v13798_v26, %s13608_s17 }
  0x9b   :  { %10549 = vmatpush1.bf16.msra.mxu0 %v10548_v37  ;;  %v611_v43 = vsel %vm229_vm1, %v11693_v38, %v11727_v39  ;;  %v508_v26 = vsel %vm492_vm4, %v11722_v41, %v11723_v40  ;;  %v509_v54 = vsel %vm492_vm4, %v11718_v27, %v11722_v41  ;;  %v610_v62 = vsel %vm229_vm1, %v11727_v39, %v11728_v42 }
  0x9c   :  { %v13963_v46 = vpop.permute.xlu1 %11735  ;;  %v13965_v48 = vpop.permute.xlu0 %11730  ;;  %v10550_v50 = vpack.c.bf16 %v611_v43, %v510_v0  ;;  %v10600_v21 = vpack.c.bf16 %v610_v62, %v509_v54  ;;  %v14030_v43 = vpack.i.bf16 %v13996_v5, %v13911_v63 }
  0x9d   :  { %v20278_v51 = vunpack.i.l.bf16 %v13963_v46  ;;  %v20277_v52 = vunpack.i.h.bf16 %v13965_v48  ;;  %v20305_v53 = vunpack.i.l.bf16 %v13965_v48 }
  0x9e   :  { %12000 = vrot.lane.b32.xlu1 %v11979_v12, %s13606_s30  ;;  %11995 = vrot.lane.b32.xlu0 %v13819_v30, %s13606_s30 }
  0x9f   :  { %10551 = vmatprep.subr.bf16.mxu0 %v10550_v50  ;;  %v511_v57 = vsel %vm492_vm4, %v20278_v51, %v11717_v28  ;;  %v612_v58 = vsel %vm229_vm1, %v20277_v52, %v11693_v38  ;;  %v609_v61 = vsel %vm229_vm1, %v11728_v42, %v20305_v53  ;;  %v11713_v42 = vunpack.i.h.bf16 %v13931_v18 }
  0xa0   :  { %v13999_v9 = vpop.permute.xlu1 %11745  ;;  %v11741_v10 = vpop.permute.xlu0 %11740  ;;  %v10552_v11 = vpack.c.bf16 %v612_v58, %v511_v57  ;;  %v10598_v13 = vpack.c.bf16 %v609_v61, %v508_v26  ;;  %v11738_v57 = vunpack.i.h.bf16 %v13963_v46 }
  0xa1   :  { %v20276_v15 = vunpack.i.h.bf16 %v13999_v9  ;;  %v20304_v16 = vunpack.i.l.bf16 %v13999_v9  ;;  %v11743_v17 = vunpack.i.h.bf16 %v11741_v10  ;;  %v11742_v20 = vunpack.i.l.bf16 %v11741_v10 }
  0xa2   :  { %12010 = vrot.lane.b32.xlu1 %v11979_v12, %s13605_s29  ;;  %12005 = vrot.lane.b32.xlu0 %v13819_v30, %s13605_s29 }
  0xa3   :  { %10553 = vmatpush1.bf16.msra.mxu0 %v10552_v11  ;;  %10599 = vmatprep.subr.bf16.mxu1 %v10598_v13  ;;  %v691_v27 = vsel %vm310_vm2, %v11698_v6, %v11742_v20  ;;  %v689_v28 = vsel %vm310_vm2, %v11743_v17, %v20304_v16  ;;  %v692_v12 = vsel %vm310_vm2, %v20276_v15, %v11698_v6 }
  0xa4   :  { %10601 = vmatpush1.bf16.msra.mxu1 %v10600_v21  ;;  %v14020_v31 = vpop.permute.xlu1 %11755  ;;  %v11751_v35 = vpop.permute.xlu0 %11750  ;;  %v10554_v37 = vpack.c.bf16 %v13687_v2, %v691_v27  ;;  %v10602_v38 = vpack.c.bf16 %v13709_v8, %v689_v28  ;;  %v10556_v39 = vpack.c.bf16 %v13682_v1, %v692_v12  ;;  %v690_v41 = vsel %vm310_vm2, %v11742_v20, %v11743_v17 }
  0xa5   :  { %v11752_v0 = vunpack.i.l.bf16 %v11751_v35  ;;  %v20271_v50 = vunpack.i.h.bf16 %v14020_v31  ;;  %v20297_v26 = vunpack.i.l.bf16 %v14020_v31  ;;  %v11753_v54 = vunpack.i.h.bf16 %v11751_v35 }
  0xa6   :  { %12020 = vrot.lane.b32.xlu1 %v14008_v22, %s13607_s16  ;;  %12015 = vrot.lane.b32.xlu0 %v13942_v25, %s13607_s16  ;;  %v10604_v1 = vpack.c.bf16 %v13694_v4, %v690_v41 }
  0xa7   :  { %10555 = vmatprep.subr.bf16.mxu0 %v10554_v37  ;;  %10603 = vmatprep.subr.bf16.mxu1 %v10602_v38  ;;  %v790_v62 = vsel %vm411_vm3, %v11713_v42, %v11752_v0  ;;  %v788_v17 = vsel %vm411_vm3, %v11753_v54, %v20297_v26  ;;  %v791_v20 = vsel %vm411_vm3, %v20271_v50, %v11713_v42 }
  0xa8   :  { %10557 = vmatpush1.bf16.msra.mxu0 %v10556_v39  ;;  %10605 = vmatpush1.bf16.msra.mxu1 %v10604_v1  ;;  %v14040_v58 = vpop.permute.xlu1 %11765  ;;  %v11761_v61 = vpop.permute.xlu0 %11760  ;;  %v789_v21 = vsel %vm411_vm3, %v11752_v0, %v11753_v54 }
  0xa9   :  { %v20272_v6 = vunpack.i.h.bf16 %v14040_v58  ;;  %v20293_v10 = vunpack.i.l.bf16 %v14040_v58  ;;  %v11763_v11 = vunpack.i.h.bf16 %v11761_v61  ;;  %v11762_v13 = vunpack.i.l.bf16 %v11761_v61  ;;  %v14083_v61 = vld [vmem:[%s20258_s0 + $0x58] sm:$0xff] }
  0xaa   :  { %12030 = vrot.lane.b32.xlu1 %v14030_v43, %s13608_s17  ;;  %12025 = vrot.lane.b32.xlu0 %v13819_v30, %s13608_s17 }
  0xab   :  { %v870_v27 = vsel %vm492_vm4, %v11738_v57, %v11762_v13  ;;  %v868_v30 = vsel %vm492_vm4, %v11763_v11, %v20293_v10  ;;  %v871_v28 = vsel %vm492_vm4, %v20272_v6, %v11738_v57  ;;  %v869_v12 = vsel %vm492_vm4, %v11762_v13, %v11763_v11 }
  0xac   :  { %v14072_v35 = vpop.permute.xlu1 %11775  ;;  %v11771_v37 = vpop.permute.xlu0 %11770  ;;  %v10558_v38 = vpack.c.bf16 %v870_v27, %v790_v62  ;;  %v10606_v39 = vpack.c.bf16 %v868_v30, %v788_v17  ;;  %v10560_v41 = vpack.c.bf16 %v871_v28, %v791_v20  ;;  %v10608_v42 = vpack.c.bf16 %v869_v12, %v789_v21 }
  0xad   :  { %v20291_v0 = vunpack.i.h.bf16 %v14072_v35  ;;  %v11773_v54 = vunpack.i.h.bf16 %v11771_v37  ;;  %v11772_v1 = vunpack.i.l.bf16 %v11771_v37  ;;  %v11777_v57 = vunpack.i.l.bf16 %v14072_v35 }
  0xae   :  { %12040 = vrot.lane.b32.xlu1 %v14008_v22, %s13606_s30  ;;  %12035 = vrot.lane.b32.xlu0 %v13942_v25, %s13606_s30  ;;  %v14095_v27 = vpack.i.bf16 %v13911_v63, %v14083_v61 }
  0xaf   :  { %10559 = vmatprep.subr.bf16.mxu0 %v10558_v38  ;;  %10607 = vmatprep.subr.bf16.mxu1 %v10606_v39  ;;  %v971_v30 = vsel %vm229_vm1, %v11772_v1, %v11773_v54  ;;  %v969_v28 = vsel %vm229_vm1, %v11777_v57, %v20291_v0  ;;  %v970_v37 = vsel %vm229_vm1, %v11773_v54, %v11777_v57 }
  0xb0   :  { %10561 = vmatpush1.bf16.msra.mxu0 %v10560_v41  ;;  %10609 = vmatpush1.bf16.msra.mxu1 %v10608_v42  ;;  %v14085_v62 = vpop.permute.xlu1 %11785  ;;  %v11781_v11 = vpop.permute.xlu0 %11780  ;;  %v14125_v54 = vpack.i.bf16 %v14083_v61, %v13996_v5 }
  0xb1   :  { %v20292_v13 = vunpack.i.h.bf16 %v14085_v62  ;;  %v11787_v17 = vunpack.i.l.bf16 %v14085_v62  ;;  %v11783_v20 = vunpack.i.h.bf16 %v11781_v11  ;;  %v11782_v21 = vunpack.i.l.bf16 %v11781_v11 }
  0xb2   :  { %12050 = vrot.lane.b32.xlu1 %v14008_v22, %s13605_s29  ;;  %12045 = vrot.lane.b32.xlu0 %v13942_v25, %s13605_s29 }
  0xb3   :  { %v1051_v12 = vsel %vm310_vm2, %v11782_v21, %v11783_v20  ;;  %v1049_v22 = vsel %vm310_vm2, %v11787_v17, %v20292_v13  ;;  %v1050_v38 = vsel %vm310_vm2, %v11783_v20, %v11787_v17 }
  0xb4   :  { %v14113_v39 = vpop.permute.xlu1 %11795  ;;  %v14115_v41 = vpop.permute.xlu0 %11790  ;;  %v10562_v42 = vpack.c.bf16 %v1051_v12, %v971_v30  ;;  %v10610_v11 = vpack.c.bf16 %v1049_v22, %v969_v28  ;;  %v10612_v33 = vpack.c.bf16 %v1050_v38, %v970_v37 }
  0xb5   :  { %20600 = vst [vmem:[#allocation8_spill] sm:$0xff] %v14113_v39  ;;  %20601 = vst [vmem:[#allocation9_spill] sm:$0xff] %v14115_v41  ;;  %v20274_v50 = vunpack.i.l.bf16 %v14113_v39  ;;  %v20273_v6 = vunpack.i.l.bf16 %v14115_v41 }
  0xb6   :  { %12060 = vrot.lane.b32.xlu1 %v14095_v27, %s13607_s16  ;;  %12055 = vrot.lane.b32.xlu0 %v14030_v43, %s13607_s16 }
  0xb7   :  { %10563 = vmatprep.subr.bf16.mxu0 %v10562_v42  ;;  %10611 = vmatprep.subr.bf16.mxu1 %v10610_v11  ;;  %v972_v57 = vsel %vm229_vm1, %v20273_v6, %v11772_v1  ;;  %v1052_v17 = vsel %vm310_vm2, %v20274_v50, %v11782_v21  ;;  %v12079_v1 = vpack.i.bf16 %v13813_v29, %v14083_v61 }
  0xb8   :  { %10613 = vmatpush1.bf16.msra.mxu1 %v10612_v33  ;;  %v14135_v20 = vpop.permute.xlu1 %11805  ;;  %v11801_v30 = vpop.permute.xlu0 %11800  ;;  %v10564_v28 = vpack.c.bf16 %v1052_v17, %v972_v57 }
  0xb9   :  { %v20290_v12 = vunpack.i.h.bf16 %v14135_v20  ;;  %v11807_v22 = vunpack.i.l.bf16 %v14135_v20  ;;  %v11803_v37 = vunpack.i.h.bf16 %v11801_v30  ;;  %v11802_v38 = vunpack.i.l.bf16 %v11801_v30 }
  0xba   :  { %12070 = vrot.lane.b32.xlu1 %v14125_v54, %s13608_s17  ;;  %12065 = vrot.lane.b32.xlu0 %v13942_v25, %s13608_s17 }
  0xbb   :  { %10565 = vmatpush1.bf16.msra.mxu0 %v10564_v28  ;;  %v1150_v33 = vsel %vm411_vm3, %v11802_v38, %v11803_v37  ;;  %v1148_v21 = vsel %vm411_vm3, %v11807_v22, %v20290_v12  ;;  %v1149_v42 = vsel %vm411_vm3, %v11803_v37, %v11807_v22  ;;  %v14169_v37 = vld [vmem:[%s20258_s0 + $0x60] sm:$0xff] }
  0xbc   :  { %v11816_v11 = vpop.permute.xlu1 %11815  ;;  %v14153_v57 = vpop.permute.xlu0 %11810  ;;  %v10566_v25 = vpack.c.bf16 %v1150_v33, %v13694_v4  ;;  %v10614_v17 = vpack.c.bf16 %v1148_v21, %v13734_v14  ;;  %v10616_v29 = vpack.c.bf16 %v1149_v42, %v13709_v8 }
  0xbd   :  { %20602 = vst [vmem:[#allocation10_spill] sm:$0xff] %v14153_v57  ;;  %v20275_v30 = vunpack.i.l.bf16 %v14153_v57  ;;  %v11818_v28 = vunpack.i.h.bf16 %v11816_v11  ;;  %v11817_v6 = vunpack.i.l.bf16 %v11816_v11  ;;  %v11793_v11 = vunpack.i.h.bf16 %v14115_v41 }
  0xbe   :  { %12080 = vrot.lane.b32.xlu1 %v12079_v1, %s13606_s30  ;;  %12075 = vrot.lane.b32.xlu0 %v14030_v43, %s13606_s30 }
  0xbf   :  { %10567 = vmatprep.subr.bf16.mxu0 %v10566_v25  ;;  %10615 = vmatprep.subr.bf16.mxu1 %v10614_v17  ;;  %v1151_v22 = vsel %vm411_vm3, %v20275_v30, %v11802_v38  ;;  %v12099_v38 = vpack.i.bf16 %v13911_v63, %v14169_v37 }
  0xc0   :  { %10617 = vmatpush1.bf16.msra.mxu1 %v10616_v29  ;;  %v11826_v33 = vpop.permute.xlu1 %11825  ;;  %v14171_v21 = vpop.permute.xlu0 %11820  ;;  %v10568_v42 = vpack.c.bf16 %v1151_v22, %v13687_v2  ;;  %v1230_v2 = vsel %vm492_vm4, %v11817_v6, %v11818_v28 }
  0xc1   :  { %v11827_v25 = vunpack.i.l.bf16 %v11826_v33  ;;  %v20283_v17 = vunpack.i.h.bf16 %v14171_v21  ;;  %v11822_v50 = vunpack.i.l.bf16 %v14171_v21  ;;  %v11828_v29 = vunpack.i.h.bf16 %v11826_v33 }
  0xc2   :  { %12090 = vrot.lane.b32.xlu1 %v12079_v1, %s13605_s29  ;;  %12085 = vrot.lane.b32.xlu0 %v14030_v43, %s13605_s29 }
  0xc3   :  { %10569 = vmatpush1.bf16.msra.mxu0 %v10568_v42  ;;  %v1331_v22 = vsel %vm229_vm1, %v11793_v11, %v11827_v25  ;;  %v1228_v33 = vsel %vm492_vm4, %v11822_v50, %v20283_v17  ;;  %v1229_v42 = vsel %vm492_vm4, %v11818_v28, %v11822_v50  ;;  %v1330_v59 = vsel %vm229_vm1, %v11827_v25, %v11828_v29 }
  0xc4   :  { %v14186_v30 = vpop.permute.xlu1 %11835  ;;  %v14188_v15 = vpop.permute.xlu0 %11830  ;;  %v10570_v52 = vpack.c.bf16 %v1331_v22, %v1230_v2  ;;  %v10620_v25 = vpack.c.bf16 %v1330_v59, %v1229_v42 }
  0xc5   :  { %20603 = vst [vmem:[#allocation11_spill] sm:$0xff] %v14186_v30  ;;  %v20282_v1 = vunpack.i.l.bf16 %v14186_v30  ;;  %v20284_v51 = vunpack.i.h.bf16 %v14188_v15  ;;  %v20286_v23 = vunpack.i.l.bf16 %v14188_v15 }
  0xc6   :  { %12100 = vrot.lane.b32.xlu1 %v12099_v38, %s13607_s16  ;;  %12095 = vrot.lane.b32.xlu0 %v14125_v54, %s13607_s16 }
  0xc7   :  { %10571 = vmatprep.subr.bf16.mxu0 %v10570_v52  ;;  %v1231_v2 = vsel %vm492_vm4, %v20282_v1, %v11817_v6  ;;  %v1332_v38 = vsel %vm229_vm1, %v20284_v51, %v11793_v11  ;;  %v1329_v22 = vsel %vm229_vm1, %v11828_v29, %v20286_v23  ;;  %v11798_v52 = vunpack.i.h.bf16 %v14113_v39 }
  0xc8   :  { %v14217_v50 = vpop.permute.xlu1 %11845  ;;  %v11841_v28 = vpop.permute.xlu0 %11840  ;;  %v10572_v60 = vpack.c.bf16 %v1332_v38, %v1231_v2  ;;  %v10618_v6 = vpack.c.bf16 %v1329_v22, %v1228_v33 }
  0xc9   :  { %20604 = vst [vmem:[#allocation12_spill] sm:$0xff] %v14217_v50  ;;  %v20287_v1 = vunpack.i.h.bf16 %v14217_v50  ;;  %v20285_v17 = vunpack.i.l.bf16 %v14217_v50  ;;  %v11843_v11 = vunpack.i.h.bf16 %v11841_v28  ;;  %v11842_v51 = vunpack.i.l.bf16 %v11841_v28 }
  0xca   :  { %12110 = vrot.lane.b32.xlu1 %v14095_v27, %s13606_s30  ;;  %12105 = vrot.lane.b32.xlu0 %v14030_v43, %s13606_s30 }
  0xcb   :  { %10573 = vmatpush1.bf16.msra.mxu0 %v10572_v60  ;;  %10619 = vmatprep.subr.bf16.mxu1 %v10618_v6  ;;  %v1411_v29 = vsel %vm310_vm2, %v11798_v52, %v11842_v51  ;;  %v1409_v33 = vsel %vm310_vm2, %v11843_v11, %v20285_v17  ;;  %v1412_v2 = vsel %vm310_vm2, %v20287_v1, %v11798_v52  ;;  %v11813_v6 = vunpack.i.h.bf16 %v14153_v57 }
  0xcc   :  { %10621 = vmatpush1.bf16.msra.mxu1 %v10620_v25  ;;  %v14235_v38 = vpop.permute.xlu1 %11855  ;;  %v11851_v22 = vpop.permute.xlu0 %11850  ;;  %v10574_v59 = vpack.c.bf16 %v13709_v8, %v1411_v29  ;;  %v10622_v60 = vpack.c.bf16 %v13757_v19, %v1409_v33  ;;  %v10576_v42 = vpack.c.bf16 %v13694_v4, %v1412_v2  ;;  %v1410_v28 = vsel %vm310_vm2, %v11842_v51, %v11843_v11 }
  0xcd   :  { %20605 = vst [vmem:[#allocation13_spill] sm:$0xff] %v14235_v38  ;;  %v11852_v17 = vunpack.i.l.bf16 %v11851_v22  ;;  %v20288_v23 = vunpack.i.h.bf16 %v14235_v38  ;;  %v20289_v52 = vunpack.i.l.bf16 %v14235_v38  ;;  %v11853_v25 = vunpack.i.h.bf16 %v11851_v22 }
  0xce   :  { %12120 = vrot.lane.b32.xlu1 %v14095_v27, %s13605_s29  ;;  %12115 = vrot.lane.b32.xlu0 %v14030_v43, %s13605_s29  ;;  %v10624_v29 = vpack.c.bf16 %v13734_v14, %v1410_v28  ;;  %v11838_v4 = vunpack.i.h.bf16 %v14186_v30 }
  0xcf   :  { %10575 = vmatprep.subr.bf16.mxu0 %v10574_v59  ;;  %10623 = vmatprep.subr.bf16.mxu1 %v10622_v60  ;;  %v1510_v33 = vsel %vm411_vm3, %v11813_v6, %v11852_v17  ;;  %v1508_v59 = vsel %vm411_vm3, %v11853_v25, %v20289_v52  ;;  %v1511_v60 = vsel %vm411_vm3, %v20288_v23, %v11813_v6 }
  0xd0   :  { %10577 = vmatpush1.bf16.msra.mxu0 %v10576_v42  ;;  %10625 = vmatpush1.bf16.msra.mxu1 %v10624_v29  ;;  %v14251_v51 = vpop.permute.xlu1 %11865  ;;  %v11861_v11 = vpop.permute.xlu0 %11860  ;;  %v1509_v42 = vsel %vm411_vm3, %v11852_v17, %v11853_v25 }
  0xd1   :  { %20606 = vst [vmem:[#allocation14_spill] sm:$0xff] %v14251_v51  ;;  %v20294_v2 = vunpack.i.h.bf16 %v14251_v51  ;;  %v20296_v27 = vunpack.i.l.bf16 %v14251_v51  ;;  %v11863_v22 = vunpack.i.h.bf16 %v11861_v11  ;;  %v11862_v1 = vunpack.i.l.bf16 %v11861_v11 }
  0xd2   :  { %1905 = vrot.lane.b32.xlu1 %v13996_v5, %s13608_s17  ;;  %1903 = vrot.lane.b32.xlu0 %v13911_v63, %s13608_s17 }
  0xd3   :  { %v1590_v28 = vsel %vm492_vm4, %v11838_v4, %v11862_v1  ;;  %v1588_v63 = vsel %vm492_vm4, %v11863_v22, %v20296_v27  ;;  %v1591_v29 = vsel %vm492_vm4, %v20294_v2, %v11838_v4  ;;  %v1589_v11 = vsel %vm492_vm4, %v11862_v1, %v11863_v22 }
  0xd4   :  { %v14283_v6 = vpop.permute.xlu1 %11875  ;;  %v11871_v23 = vpop.permute.xlu0 %11870  ;;  %v10578_v17 = vpack.c.bf16 %v1590_v28, %v1510_v33  ;;  %v10626_v25 = vpack.c.bf16 %v1588_v63, %v1508_v59  ;;  %v10580_v52 = vpack.c.bf16 %v1591_v29, %v1511_v60  ;;  %v10628_v12 = vpack.c.bf16 %v1589_v11, %v1509_v42 }
  0xd5   :  { %v20295_v0 = vunpack.i.h.bf16 %v14283_v6  ;;  %v11873_v13 = vunpack.i.h.bf16 %v11871_v23  ;;  %v11872_v10 = vunpack.i.l.bf16 %v11871_v23  ;;  %v12129_v1 = vpack.i.bf16 %v13996_v5, %v14169_v37 }
  0xd6   :  { %1909 = vrot.lane.b32.xlu1 %v14169_v37, %s13608_s17  ;;  %1907 = vrot.lane.b32.xlu0 %v14083_v61, %s13608_s17  ;;  %v11877_v4 = vunpack.i.l.bf16 %v14283_v6  ;;  %v14302_v5 = vpack.i.bf16 %v14169_v37, %v14083_v61 }
  0xd7   :  { %10579 = vmatprep.subr.bf16.mxu0 %v10578_v17  ;;  %10627 = vmatprep.subr.bf16.mxu1 %v10626_v25 }
  0xd8   :  { %10581 = vmatpush1.bf16.msra.mxu0 %v10580_v52  ;;  %10629 = vmatpush1.bf16.msra.mxu1 %v10628_v12  ;;  %v14293_v33 = vpop.permute.xlu1 %11885  ;;  %v11881_v22 = vpop.permute.xlu0 %11880  ;;  %v1691_v12 = vsel %vm229_vm1, %v11872_v10, %v11873_v13  ;;  %v1689_v52 = vsel %vm229_vm1, %v11877_v4, %v20295_v0  ;;  %v1690_v29 = vsel %vm229_vm1, %v11873_v13, %v11877_v4 }
  0xd9   :  { %v20302_v23 = vunpack.i.h.bf16 %v14293_v33  ;;  %v11887_v59 = vunpack.i.l.bf16 %v14293_v33  ;;  %v11883_v60 = vunpack.i.h.bf16 %v11881_v22  ;;  %v11882_v42 = vunpack.i.l.bf16 %v11881_v22 }
  0xda   :  { %12130 = vrot.lane.b32.xlu1 %v12129_v1, %s13607_s16  ;;  %12125 = vrot.lane.b32.xlu0 %v14125_v54, %s13607_s16 }
  0xdb   :  { %v1771_v28 = vsel %vm310_vm2, %v11882_v42, %v11883_v60  ;;  %v1769_v63 = vsel %vm310_vm2, %v11887_v59, %v20302_v23  ;;  %v1770_v11 = vsel %vm310_vm2, %v11883_v60, %v11887_v59 }
  0xdc   :  { %v14320_v17 = vpop.permute.xlu1 %11895  ;;  %v14322_v25 = vpop.permute.xlu0 %11890  ;;  %v10582_v22 = vpack.c.bf16 %v1771_v28, %v1691_v12  ;;  %v10630_v2 = vpack.c.bf16 %v1769_v63, %v1689_v52  ;;  %v10632_v0 = vpack.c.bf16 %v1770_v11, %v1690_v29  ;;  %v14356_v63 = vld [vmem:[%s20258_s0 + $0x68] sm:$0xff] }
  0xdd   :  { %20607 = vst [vmem:[#allocation15_spill] sm:$0xff] %v14320_v17  ;;  %20608 = vst [vmem:[#allocation16_spill] sm:$0xff] %v14322_v25  ;;  %v20300_v27 = vunpack.i.l.bf16 %v14320_v17  ;;  %v20299_v26 = vunpack.i.l.bf16 %v14322_v25 }
  0xde   :  { %12140 = vrot.lane.b32.xlu1 %v14302_v5, %s13608_s17  ;;  %12135 = vrot.lane.b32.xlu0 %v14030_v43, %s13608_s17 }
  0xdf   :  { %10583 = vmatprep.subr.bf16.mxu0 %v10582_v22  ;;  %10631 = vmatprep.subr.bf16.mxu1 %v10630_v2  ;;  %v1692_v13 = vsel %vm229_vm1, %v20299_v26, %v11872_v10  ;;  %v1772_v60 = vsel %vm310_vm2, %v20300_v27, %v11882_v42 }
  0xe0   :  { %10633 = vmatpush1.bf16.msra.mxu1 %v10632_v0  ;;  %v14334_v4 = vpop.permute.xlu1 %11905  ;;  %v11901_v59 = vpop.permute.xlu0 %11900  ;;  %v10584_v10 = vpack.c.bf16 %v1772_v60, %v1692_v13 }
  0xe1   :  { %v20301_v12 = vunpack.i.h.bf16 %v14334_v4  ;;  %v11907_v43 = vunpack.i.l.bf16 %v14334_v4  ;;  %v11903_v52 = vunpack.i.h.bf16 %v11901_v59  ;;  %v11902_v2 = vunpack.i.l.bf16 %v11901_v59 }
  0xe2   :  { %12150 = vrot.lane.b32.xlu1 %v12129_v1, %s13606_s30  ;;  %12145 = vrot.lane.b32.xlu0 %v14125_v54, %s13606_s30 }
  0xe3   :  { %v1870_v0 = vsel %vm411_vm3, %v11902_v2, %v11903_v52  ;;  %v1868_v42 = vsel %vm411_vm3, %v11907_v43, %v20301_v12  ;;  %v1869_v28 = vsel %vm411_vm3, %v11903_v52, %v11907_v43  ;;  %10585 = vmatpush1.bf16.msra.mxu0 %v10584_v10  ;;  %v12169_v43 = vpack.i.bf16 %v14083_v61, %v14356_v63 }
  0xe4   :  { %v11916_v29 = vpop.permute.xlu1 %11915  ;;  %v14358_v11 = vpop.permute.xlu0 %11910  ;;  %v10586_v22 = vpack.c.bf16 %v1870_v0, %v13734_v14  ;;  %v10634_v13 = vpack.c.bf16 %v1868_v42, %v13784_v24  ;;  %v10636_v59 = vpack.c.bf16 %v1869_v28, %v13757_v19  ;;  %v14381_v61 = vpack.i.bf16 %v14356_v63, %v14169_v37 }
  0xe5   :  { %20609 = vst [vmem:[#allocation17_spill] sm:$0xff] %v14358_v11  ;;  %v20298_v60 = vunpack.i.l.bf16 %v14358_v11  ;;  %v11918_v27 = vunpack.i.h.bf16 %v11916_v29 }
  0xe6   :  { %12160 = vrot.lane.b32.xlu1 %v12129_v1, %s13605_s29  ;;  %12155 = vrot.lane.b32.xlu0 %v14125_v54, %s13605_s29 }
  0xe7   :  { %10587 = vmatprep.subr.bf16.mxu0 %v10586_v22  ;;  %10635 = vmatprep.subr.bf16.mxu1 %v10634_v13  ;;  %v1871_v14 = vsel %vm411_vm3, %v20298_v60, %v11902_v2  ;;  %v11898_v2 = vunpack.i.h.bf16 %v14320_v17  ;;  %v11893_v13 = vunpack.i.h.bf16 %v14322_v25 }
  0xe8   :  { %10637 = vmatpush1.bf16.msra.mxu1 %v10636_v59  ;;  %v11926_v52 = vpop.permute.xlu1 %11925  ;;  %v14373_v19 = vpop.permute.xlu0 %11920  ;;  %v10588_v10 = vpack.c.bf16 %v1871_v14, %v13709_v8  ;;  %v11917_v59 = vunpack.i.l.bf16 %v11916_v29 }
  0xe9   :  { %v11927_v8 = vunpack.i.l.bf16 %v11926_v52  ;;  %v20306_v60 = vunpack.i.l.bf16 %v14373_v19  ;;  %v326_v26 = vsel %vm310_vm2, %v11688_v47, %v11898_v2  ;;  %v245_v44 = vsel %vm229_vm1, %v11678_v49, %v11893_v13  ;;  %v14438_v49 = vld [vmem:[%s20259_s1] sm:$0xff] }
  0xea   :  { %12170 = vrot.lane.b32.xlu1 %v12169_v43, %s13607_s16  ;;  %12165 = vrot.lane.b32.xlu0 %v14302_v5, %s13607_s16  ;;  %v10640_v53 = vpack.c.bf16 %v326_v26, %v245_v44  ;;  %v14493_v44 = vld [vmem:[%s20258_s0 + $0x30] sm:$0xff] }
  0xeb   :  { %10589 = vmatpush1.bf16.msra.mxu0 %v10588_v10  ;;  %v11928_v10 = vunpack.i.h.bf16 %v11926_v52 }
  0xec   :  { %v1896_v1 = vpop.permute.xlu1 %1895  ;;  %v14383_v0 = vpop.permute.xlu0 %11930 }
  0xed   :  { %v20303_v42 = vunpack.i.l.bf16 %v14383_v0  ;;  %v324_v16 = vsel %vm310_vm2, %v11927_v8, %v11928_v10 }
  0xee   :  { %12180 = vrot.lane.b32.xlu1 %v14381_v61, %s13608_s17  ;;  %12175 = vrot.lane.b32.xlu0 %v14125_v54, %s13608_s17  ;;  %v325_v54 = vsel %vm310_vm2, %v11898_v2, %v11927_v8  ;;  %v244_v2 = vsel %vm229_vm1, %v11893_v13, %v11917_v59 }
  0xef   :  { %v323_v23 = vsel %vm310_vm2, %v11928_v10, %v20303_v42  ;;  %v11913_v42 = vunpack.i.h.bf16 %v14358_v11  ;;  %v10638_v45 = vpack.c.bf16 %v325_v54, %v244_v2  ;;  %v243_v10 = vsel %vm229_vm1, %v11917_v59, %v11918_v27 }
  0xf0   :  { %v1900_v28 = vpop.permute.xlu1 %1899  ;;  %v1898_v22 = vpop.permute.xlu0 %1897 }
  0xf1   :  { %v1950_v14 = vsel %vm492_vm4, %v1896_v1, %v1898_v22  ;;  %v1949_v8 = vsel %vm492_vm4, %v1898_v22, %v1900_v28 }
  0xf2   :  { %12190 = vrot.lane.b32.xlu1 %v12169_v43, %s13606_s30  ;;  %12185 = vrot.lane.b32.xlu0 %v14302_v5, %s13606_s30 }
  0xf3   :  { %2531 = vmatprep.subr.mxu0 %v1950_v14  ;;  %v14415_v14 = vld [vmem:[%s20258_s0 + $0x70] sm:$0xff] }
  0xf4   :  { %v14404_v12 = vpop.permute.xlu1 %1893  ;;  %v14406_v52 = vpop.permute.xlu0 %1901  ;;  %v14448_v13 = vpack.i.bf16 %v14169_v37, %v14415_v14  ;;  %v14467_v26 = vpack.i.bf16 %v14415_v14, %v14356_v63 }
  0xf5   :  { %20610 = vst [vmem:[#allocation18_spill] sm:$0xff] %v14404_v12  ;;  %v1951_v47 = vsel %vm492_vm4, %v14404_v12, %v1896_v1  ;;  %v1948_v29 = vsel %vm492_vm4, %v1900_v28, %v14406_v52  ;;  %v242_v1 = vsel %vm229_vm1, %v11918_v27, %v20306_v60  ;;  %v426_v28 = vsel %vm411_vm3, %v11708_v7, %v11913_v42 }
  0xf6   :  { %12200 = vrot.lane.b32.xlu1 %v12169_v43, %s13605_s29  ;;  %12195 = vrot.lane.b32.xlu0 %v14302_v5, %s13605_s29  ;;  %v10686_v43 = vpack.c.bf16 %v323_v23, %v242_v1  ;;  %v10688_v23 = vpack.c.bf16 %v324_v16, %v243_v10  ;;  %v14478_v16 = vld [vmem:[%s20258_s0 + $0x28] sm:$0xff] }
  0xf7   :  { %2532 = vmatpush1.msra.mxu0 %v1951_v47  ;;  %2602 = vmatprep.subr.mxu1 %v1948_v29 }
  0xf8   :  { %2603 = vmatpush1.msra.mxu1 %v1949_v8  ;;  %10639 = vmatprep.subr.bf16.mxu0 %v10638_v45  ;;  %v14452_v54 = vpop.permute.xlu1 %11940  ;;  %v11936_v2 = vpop.permute.xlu0 %11935 }
  0xf9   :  { %v20309_v47 = vunpack.i.l.bf16 %v14452_v54  ;;  %v11938_v29 = vunpack.i.h.bf16 %v11936_v2  ;;  %v11937_v60 = vunpack.i.l.bf16 %v11936_v2  ;;  %2548 = vmatmul.mubr.f32.vlgmr.msra.gmra.mrb[0].mxu0 %v14438_v49  ;;  %10687 = vmatprep.subr.bf16.mxu1 %v10686_v43 }
  0xfa   :  { %10641 = vmatpush1.bf16.msra.mxu0 %v10640_v53  ;;  %2619 = vmatmul.mubr.f32.vlgmr.msra.gmra.mrb[0].mxu1 %v14438_v49 }
  0xfb   :  { %v424_v27 = vsel %vm411_vm3, %v11937_v60, %v11938_v29  ;;  %10689 = vmatpush1.bf16.msra.mxu1 %v10688_v23  ;;  %12210 = vrot.lane.b32.xlu1 %v14448_v13, %s13607_s16  ;;  %v425_v3 = vsel %vm411_vm3, %v11913_v42, %v11937_v60  ;;  %v423_v59 = vsel %vm411_vm3, %v11938_v29, %v20309_v47  ;;  %v13562_v60 = vld [vmem:[%s20258_s0 + $0x20] sm:$0xff]  ;;  %v11923_v29 = vunpack.i.h.bf16 %v14373_v19 }
  0xfc   :  { %12205 = vrot.lane.b32.xlu0 %v14381_v61, %s13607_s16  ;;  %v14473_v7 = vpop.permute.xlu1 %11950  ;;  %v11946_v53 = vpop.permute.xlu0 %11945  ;;  %v10642_v22 = vpack.c.bf16 %v425_v3, %v14478_v16  ;;  %10479 = vmatprep.mubr.msk.f32.mxu0 %vm2479_vm0, %v13836_v32  ;;  %v10644_v42 = vpack.c.bf16 %v426_v28, %v13562_v60  ;;  %v10692_v45 = vpack.c.bf16 %v424_v27, %v14493_v44  ;;  %v11933_v3 = vunpack.i.h.bf16 %v14383_v0 }
  0xfd   :  { %10480 = vmatprep.mubr.msk.f32.mxu1 %vm2479_vm0, %v13836_v32  ;;  %v11952_v1 = vunpack.i.l.bf16 %v14473_v7  ;;  %v11948_v8 = vunpack.i.h.bf16 %v11946_v53  ;;  %v11947_v43 = vunpack.i.l.bf16 %v11946_v53  ;;  %v10690_v10 = vpack.c.bf16 %v423_v59, %v13784_v24 }
  0xfe   :  { %10643 = vmatprep.subr.bf16.mxu0 %v10642_v22  ;;  %v20308_v2 = vunpack.i.h.bf16 %v14473_v7 }
  0xff   :  { %12220 = vrot.lane.b32.xlu1 %v14467_v26, %s13608_s17  ;;  %10645 = vmatpush1.bf16.msra.mxu0 %v10644_v42  ;;  %v505_v53 = vsel %vm492_vm4, %v11948_v8, %v11952_v1  ;;  %v507_v22 = vsel %vm492_vm4, %v11723_v40, %v11947_v43  ;;  %v20611_v42 = vunpack.i.l.bf16 %v13965_v48 }
 0x100   :  { %12215 = vrot.lane.b32.xlu0 %v14302_v5, %s13608_s17  ;;  %10691 = vmatprep.subr.bf16.mxu1 %v10690_v10  ;;  %v14506_v32 = vpop.permute.xlu1 %11960  ;;  %v11956_v23 = vpop.permute.xlu0 %11955  ;;  %v506_v5 = vsel %vm492_vm4, %v11947_v43, %v11948_v8  ;;  %v504_v36 = vsel %vm492_vm4, %v11952_v1, %v20308_v2  ;;  %v14543_v1 = vld [vmem:[%s20258_s0 + $0x78] sm:$0xff] }
 0x101   :  { %10693 = vmatpush1.bf16.msra.mxu1 %v10692_v45  ;;  %v20307_v28 = vunpack.i.l.bf16 %v14506_v32  ;;  %v11958_v27 = vunpack.i.h.bf16 %v11956_v23  ;;  %v11957_v24 = vunpack.i.l.bf16 %v11956_v23  ;;  %v608_v45 = vsel %vm229_vm1, %v20611_v42, %v11923_v29 }
 0x102   :  { %v10648_v47 = vpack.c.bf16 %v608_v45, %v507_v22 }
 0x103   :  { %v606_v59 = vsel %vm229_vm1, %v11957_v24, %v11958_v27  ;;  %12230 = vrot.lane.b32.xlu1 %v14448_v13, %s13606_s30  ;;  %v607_v60 = vsel %vm229_vm1, %v11923_v29, %v11957_v24  ;;  %v605_v40 = vsel %vm229_vm1, %v11958_v27, %v20307_v28  ;;  %v20612_v29 = vunpack.i.l.bf16 %v13999_v9 }
 0x104   :  { %12225 = vrot.lane.b32.xlu0 %v14381_v61, %s13606_s30  ;;  %v14538_v8 = vpop.permute.xlu1 %11970  ;;  %v11966_v43 = vpop.permute.xlu0 %11965  ;;  %v10646_v10 = vpack.c.bf16 %v607_v60, %v506_v5  ;;  %v10694_v23 = vpack.c.bf16 %v605_v40, %v504_v36  ;;  %v10696_v24 = vpack.c.bf16 %v606_v59, %v505_v53  ;;  %v14556_v5 = vpack.i.bf16 %v14356_v63, %v14543_v1 }
 0x105   :  { %v20310_v27 = vunpack.i.l.bf16 %v14538_v8  ;;  %v11968_v28 = vunpack.i.h.bf16 %v11966_v43  ;;  %v11967_v2 = vunpack.i.l.bf16 %v11966_v43  ;;  %v688_v42 = vsel %vm310_vm2, %v20612_v29, %v11933_v3 }
 0x106   :  { %10647 = vmatprep.subr.bf16.mxu0 %v10646_v10  ;;  %10695 = vmatprep.subr.bf16.mxu1 %v10694_v23  ;;  %v10652_v40 = vpack.c.bf16 %v14478_v16, %v688_v42  ;;  %v14588_v16 = vpack.i.bf16 %v14543_v1, %v14415_v14  ;;  %v12269_v42 = vpack.i.bf16 %v14169_v37, %v14543_v1  ;;  %v11973_v17 = vunpack.i.h.bf16 %v14538_v8 }
 0x107   :  { %v686_v53 = vsel %vm310_vm2, %v11967_v2, %v11968_v28  ;;  %12240 = vrot.lane.b32.xlu1 %v14448_v13, %s13605_s29  ;;  %10649 = vmatpush1.bf16.msra.mxu0 %v10648_v47  ;;  %v687_v22 = vsel %vm310_vm2, %v11933_v3, %v11967_v2  ;;  %v685_v13 = vsel %vm310_vm2, %v11968_v28, %v20310_v27  ;;  %v11943_v47 = vunpack.i.h.bf16 %v14452_v54  ;;  %v14574_v2 = vld [vmem:[%s20258_s0 + $0x38] sm:$0xff]  ;;  %v14581_v28 = vld [vmem:[%s20258_s0 + $0x40] sm:$0xff] }
 0x108   :  { %12235 = vrot.lane.b32.xlu0 %v14381_v61, %s13605_s29  ;;  %10697 = vmatpush1.bf16.msra.mxu1 %v10696_v24  ;;  %v14562_v59 = vpop.permute.xlu1 %11980  ;;  %v11976_v60 = vpop.permute.xlu0 %11975  ;;  %v10650_v36 = vpack.c.bf16 %v14493_v44, %v687_v22  ;;  %v10700_v3 = vpack.c.bf16 %v14574_v2, %v686_v53  ;;  %v10698_v23 = vpack.c.bf16 %v14581_v28, %v685_v13  ;;  %v20613_v13 = vunpack.i.l.bf16 %v14020_v31 }
 0x109   :  { %v20311_v45 = vunpack.i.l.bf16 %v14562_v59  ;;  %v11978_v43 = vunpack.i.h.bf16 %v11976_v60  ;;  %v11977_v10 = vunpack.i.l.bf16 %v11976_v60 }
 0x10a   :  { %10651 = vmatprep.subr.bf16.mxu0 %v10650_v36  ;;  %10699 = vmatprep.subr.bf16.mxu1 %v10698_v23 }
 0x10b   :  { %12250 = vrot.lane.b32.xlu1 %v14556_v5, %s13607_s16  ;;  %10653 = vmatpush1.bf16.msra.mxu0 %v10652_v40  ;;  %v787_v40 = vsel %vm411_vm3, %v20613_v13, %v11943_v47  ;;  %v785_v23 = vsel %vm411_vm3, %v11977_v10, %v11978_v43  ;;  %v786_v27 = vsel %vm411_vm3, %v11943_v47, %v11977_v10 }
 0x10c   :  { %12245 = vrot.lane.b32.xlu0 %v14467_v26, %s13607_s16  ;;  %v14592_v24 = vpop.permute.xlu1 %11990  ;;  %v11986_v29 = vpop.permute.xlu0 %11985  ;;  %10701 = vmatpush1.bf16.msra.mxu1 %v10700_v3  ;;  %v784_v37 = vsel %vm411_vm3, %v11978_v43, %v20311_v45 }
 0x10d   :  { %v11992_v22 = vunpack.i.l.bf16 %v14592_v24  ;;  %v11988_v60 = vunpack.i.h.bf16 %v11986_v29  ;;  %v11987_v36 = vunpack.i.l.bf16 %v11986_v29  ;;  %v20614_v29 = vunpack.i.l.bf16 %v14040_v58 }
 0x10e   :  { %v20615_v47 = vunpack.i.h.bf16 %v14592_v24 }
 0x10f   :  { %v865_v3 = vsel %vm492_vm4, %v11988_v60, %v11992_v22  ;;  %v867_v53 = vsel %vm492_vm4, %v20614_v29, %v11987_v36  ;;  %12260 = vrot.lane.b32.xlu1 %v14588_v16, %s13608_s17  ;;  %v866_v13 = vsel %vm492_vm4, %v11987_v36, %v11988_v60 }
 0x110   :  { %v864_v10 = vsel %vm492_vm4, %v11992_v22, %v20615_v47  ;;  %12255 = vrot.lane.b32.xlu0 %v14381_v61, %s13608_s17  ;;  %v14626_v43 = vpop.permute.xlu1 %12000  ;;  %v11996_v45 = vpop.permute.xlu0 %11995  ;;  %v10654_v12 = vpack.c.bf16 %v866_v13, %v786_v27  ;;  %v10656_v29 = vpack.c.bf16 %v867_v53, %v787_v40  ;;  %v10704_v25 = vpack.c.bf16 %v865_v3, %v785_v23  ;;  %v14632_v22 = vld [vmem:[%s20258_s0 + $0x80] sm:$0xff] }
 0x111   :  { %v10702_v11 = vpack.c.bf16 %v864_v10, %v784_v37  ;;  %v11998_v30 = vunpack.i.h.bf16 %v11996_v45  ;;  %v11997_v57 = vunpack.i.l.bf16 %v11996_v45  ;;  %v20318_v61 = vunpack.i.l.bf16 %v14626_v43 }
 0x112   :  { %10655 = vmatprep.subr.bf16.mxu0 %v10654_v12  ;;  %v11963_v27 = vunpack.i.h.bf16 %v14506_v32  ;;  %v12289_v36 = vpack.i.bf16 %v14356_v63, %v14632_v22  ;;  %v20616_v40 = vunpack.i.h.bf16 %v14085_v62  ;;  %v11983_v37 = vunpack.i.h.bf16 %v14562_v59 }
 0x113   :  { %10703 = vmatprep.subr.bf16.mxu1 %v10702_v11  ;;  %12270 = vrot.lane.b32.xlu1 %v12269_v42, %s13606_s30  ;;  %v965_v62 = vsel %vm229_vm1, %v11998_v30, %v20318_v61 }
 0x114   :  { %10657 = vmatpush1.bf16.msra.mxu0 %v10656_v29  ;;  %12265 = vrot.lane.b32.xlu0 %v14467_v26, %s13606_s30  ;;  %v14639_v53 = vpop.permute.xlu1 %12010  ;;  %v12006_v12 = vpop.permute.xlu0 %12005  ;;  %v1048_v23 = vsel %vm310_vm2, %v20616_v40, %v11973_v17  ;;  %v967_v3 = vsel %vm229_vm1, %v11963_v27, %v11997_v57 }
 0x115   :  { %10705 = vmatpush1.bf16.msra.mxu1 %v10704_v25  ;;  %v20326_v11 = vunpack.i.l.bf16 %v14639_v53  ;;  %v12008_v45 = vunpack.i.h.bf16 %v12006_v12  ;;  %v12007_v60 = vunpack.i.l.bf16 %v12006_v12  ;;  %v966_v25 = vsel %vm229_vm1, %v11997_v57, %v11998_v30 }
 0x116   :  { %v20617_v57 = vunpack.i.h.bf16 %v14072_v35 }
 0x117   :  { %v1046_v13 = vsel %vm310_vm2, %v12007_v60, %v12008_v45  ;;  %12280 = vrot.lane.b32.xlu1 %v12269_v42, %s13605_s29  ;;  %v1047_v47 = vsel %vm310_vm2, %v11973_v17, %v12007_v60  ;;  %v1045_v10 = vsel %vm310_vm2, %v12008_v45, %v20326_v11  ;;  %v20618_v45 = vunpack.i.h.bf16 %v14135_v20 }
 0x118   :  { %v968_v29 = vsel %vm229_vm1, %v20617_v57, %v11963_v27  ;;  %12275 = vrot.lane.b32.xlu0 %v14467_v26, %s13605_s29  ;;  %v14672_v42 = vpop.permute.xlu1 %12020  ;;  %v12016_v17 = vpop.permute.xlu0 %12015  ;;  %v10658_v12 = vpack.c.bf16 %v1047_v47, %v967_v3  ;;  %v10706_v60 = vpack.c.bf16 %v1045_v10, %v965_v62  ;;  %v10708_v40 = vpack.c.bf16 %v1046_v13, %v966_v25  ;;  %v14699_v62 = vld [vmem:[%s20258_s0 + $0x48] sm:$0xff] }
 0x119   :  { %v20325_v30 = vunpack.i.l.bf16 %v14672_v42  ;;  %v12018_v61 = vunpack.i.h.bf16 %v12016_v17  ;;  %v12017_v41 = vunpack.i.l.bf16 %v12016_v17  ;;  %v10660_v39 = vpack.c.bf16 %v1048_v23, %v968_v29 }
 0x11a   :  { %v1147_v35 = vsel %vm411_vm3, %v20618_v45, %v11983_v37  ;;  %10659 = vmatprep.subr.bf16.mxu0 %v10658_v12  ;;  %10707 = vmatprep.subr.bf16.mxu1 %v10706_v60 }
 0x11b   :  { %v1145_v27 = vsel %vm411_vm3, %v12017_v41, %v12018_v61  ;;  %12290 = vrot.lane.b32.xlu1 %v12289_v36, %s13607_s16  ;;  %10661 = vmatpush1.bf16.msra.mxu0 %v10660_v39  ;;  %v1146_v25 = vsel %vm411_vm3, %v11983_v37, %v12017_v41  ;;  %v1144_v13 = vsel %vm411_vm3, %v12018_v61, %v20325_v30 }
 0x11c   :  { %12285 = vrot.lane.b32.xlu0 %v14588_v16, %s13607_s16  ;;  %10709 = vmatpush1.bf16.msra.mxu1 %v10708_v40  ;;  %v14686_v23 = vpop.permute.xlu1 %12030  ;;  %v12026_v20 = vpop.permute.xlu0 %12025  ;;  %v10662_v3 = vpack.c.bf16 %v1146_v25, %v14574_v2  ;;  %v10664_v36 = vpack.c.bf16 %v1147_v35, %v14493_v44  ;;  %v10712_v39 = vpack.c.bf16 %v1145_v27, %v14581_v28  ;;  %v12003_v44 = vunpack.i.h.bf16 %v14626_v43 }
 0x11d   :  { %v12032_v41 = vunpack.i.l.bf16 %v14686_v23  ;;  %v12028_v37 = vunpack.i.h.bf16 %v12026_v20  ;;  %v12027_v47 = vunpack.i.l.bf16 %v12026_v20  ;;  %v10710_v10 = vpack.c.bf16 %v1144_v13, %v14699_v62 }
 0x11e   :  { %10663 = vmatprep.subr.bf16.mxu0 %v10662_v3  ;;  %v20321_v57 = vunpack.i.h.bf16 %v14686_v23  ;;  %v12013_v40 = vunpack.i.h.bf16 %v14639_v53  ;;  %v20619_v35 = vunpack.i.h.bf16 %v14171_v21 }
 0x11f   :  { %12300 = vrot.lane.b32.xlu1 %v14556_v5, %s13606_s30  ;;  %10665 = vmatpush1.bf16.msra.mxu0 %v10664_v36  ;;  %v1225_v45 = vsel %vm492_vm4, %v12028_v37, %v12032_v41  ;;  %v1226_v25 = vsel %vm492_vm4, %v12027_v47, %v12028_v37  ;;  %v20620_v36 = vunpack.i.l.bf16 %v14188_v15 }
 0x120   :  { %12295 = vrot.lane.b32.xlu0 %v14467_v26, %s13606_s30  ;;  %10711 = vmatprep.subr.bf16.mxu1 %v10710_v10  ;;  %v14708_v61 = vpop.permute.xlu1 %12040  ;;  %v12036_v29 = vpop.permute.xlu0 %12035  ;;  %v1227_v27 = vsel %vm492_vm4, %v20619_v35, %v12027_v47  ;;  %v1224_v21 = vsel %vm492_vm4, %v12032_v41, %v20321_v57 }
 0x121   :  { %10713 = vmatpush1.bf16.msra.mxu1 %v10712_v39  ;;  %v20322_v17 = vunpack.i.l.bf16 %v14708_v61  ;;  %v12038_v12 = vunpack.i.h.bf16 %v12036_v29  ;;  %v12037_v60 = vunpack.i.l.bf16 %v12036_v29  ;;  %v1328_v39 = vsel %vm229_vm1, %v20620_v36, %v12003_v44 }
 0x122   :  { %v10668_v57 = vpack.c.bf16 %v1328_v39, %v1227_v27  ;;  %v14769_v39 = vld [vmem:[%s20258_s0 + $0x50] sm:$0xff] }
 0x123   :  { %v1326_v20 = vsel %vm229_vm1, %v12037_v60, %v12038_v12  ;;  %12310 = vrot.lane.b32.xlu1 %v14556_v5, %s13605_s29  ;;  %v1327_v3 = vsel %vm229_vm1, %v12003_v44, %v12037_v60  ;;  %v1325_v13 = vsel %vm229_vm1, %v12038_v12, %v20322_v17  ;;  %v20621_v12 = vunpack.i.l.bf16 %v14217_v50 }
 0x124   :  { %12305 = vrot.lane.b32.xlu0 %v14467_v26, %s13605_s29  ;;  %v14740_v5 = vpop.permute.xlu1 %12050  ;;  %v12046_v37 = vpop.permute.xlu0 %12045  ;;  %v10666_v47 = vpack.c.bf16 %v1327_v3, %v1226_v25  ;;  %v10714_v10 = vpack.c.bf16 %v1325_v13, %v1224_v21  ;;  %v10716_v29 = vpack.c.bf16 %v1326_v20, %v1225_v45  ;;  %v12023_v21 = vunpack.i.h.bf16 %v14672_v42 }
 0x125   :  { %v20324_v41 = vunpack.i.l.bf16 %v14740_v5  ;;  %v12048_v60 = vunpack.i.h.bf16 %v12046_v37  ;;  %v12047_v35 = vunpack.i.l.bf16 %v12046_v37  ;;  %v1408_v17 = vsel %vm310_vm2, %v20621_v12, %v12013_v40 }
 0x126   :  { %10667 = vmatprep.subr.bf16.mxu0 %v10666_v47  ;;  %10715 = vmatprep.subr.bf16.mxu1 %v10714_v10  ;;  %v14784_v10 = vpack.i.bf16 %v14632_v22, %v14543_v1 }
 0x127   :  { %v1406_v44 = vsel %vm310_vm2, %v12047_v35, %v12048_v60  ;;  %1913 = vrot.lane.b32.xlu1 %v14415_v14, %s13608_s17  ;;  %10669 = vmatpush1.bf16.msra.mxu0 %v10668_v57  ;;  %v1407_v45 = vsel %vm310_vm2, %v12013_v40, %v12047_v35  ;;  %v1405_v3 = vsel %vm310_vm2, %v12048_v60, %v20324_v41  ;;  %v12053_v41 = vunpack.i.h.bf16 %v14740_v5 }
 0x128   :  { %1911 = vrot.lane.b32.xlu0 %v14356_v63, %s13608_s17  ;;  %10717 = vmatpush1.bf16.msra.mxu1 %v10716_v29  ;;  %v14755_v27 = vpop.permute.xlu1 %12060  ;;  %v12056_v25 = vpop.permute.xlu0 %12055  ;;  %v10670_v20 = vpack.c.bf16 %v14581_v28, %v1407_v45  ;;  %v10672_v57 = vpack.c.bf16 %v14574_v2, %v1408_v17  ;;  %v10720_v40 = vpack.c.bf16 %v14699_v62, %v1406_v44 }
 0x129   :  { %v20323_v13 = vunpack.i.l.bf16 %v14755_v27  ;;  %v12058_v63 = vunpack.i.h.bf16 %v12056_v25  ;;  %v12057_v36 = vunpack.i.l.bf16 %v12056_v25  ;;  %v10718_v37 = vpack.c.bf16 %v14769_v39, %v1405_v3 }
 0x12a   :  { %10671 = vmatprep.subr.bf16.mxu0 %v10670_v20  ;;  %v14776_v2 = vpack.i.bf16 %v14415_v14, %v14632_v22  ;;  %v20622_v14 = vunpack.i.l.bf16 %v14235_v38 }
 0x12b   :  { %1917 = vrot.lane.b32.xlu1 %v14632_v22, %s13608_s17  ;;  %10673 = vmatpush1.bf16.msra.mxu0 %v10672_v57  ;;  %v1505_v45 = vsel %vm411_vm3, %v12057_v36, %v12058_v63  ;;  %v1506_v25 = vsel %vm411_vm3, %v12023_v21, %v12057_v36  ;;  %v1504_v20 = vsel %vm411_vm3, %v12058_v63, %v20323_v13  ;;  %v20623_v57 = vunpack.i.l.bf16 %v14251_v51 }
 0x12c   :  { %1915 = vrot.lane.b32.xlu0 %v14543_v1, %s13608_s17  ;;  %10719 = vmatprep.subr.bf16.mxu1 %v10718_v37  ;;  %v14780_v17 = vpop.permute.xlu1 %12070  ;;  %v12066_v47 = vpop.permute.xlu0 %12065  ;;  %v1507_v44 = vsel %vm411_vm3, %v20622_v14, %v12023_v21 }
 0x12d   :  { %10721 = vmatpush1.bf16.msra.mxu1 %v10720_v40  ;;  %v20333_v29 = vunpack.i.h.bf16 %v14780_v17  ;;  %v12072_v60 = vunpack.i.l.bf16 %v14780_v17  ;;  %v12068_v35 = vunpack.i.h.bf16 %v12066_v47  ;;  %v12067_v12 = vunpack.i.l.bf16 %v12066_v47 }
 0x12f   :  { %v1585_v3 = vsel %vm492_vm4, %v12068_v35, %v12072_v60  ;;  %v1587_v40 = vsel %vm492_vm4, %v20623_v57, %v12067_v12  ;;  %12320 = vrot.lane.b32.xlu1 %v14776_v2, %s13607_s16  ;;  %v1586_v37 = vsel %vm492_vm4, %v12067_v12, %v12068_v35  ;;  %v1584_v21 = vsel %vm492_vm4, %v12072_v60, %v20333_v29 }
 0x130   :  { %12315 = vrot.lane.b32.xlu0 %v14588_v16, %s13607_s16  ;;  %v14816_v63 = vpop.permute.xlu1 %12080  ;;  %v12076_v36 = vpop.permute.xlu0 %12075  ;;  %v10674_v47 = vpack.c.bf16 %v1586_v37, %v1506_v25  ;;  %v10722_v14 = vpack.c.bf16 %v1584_v21, %v1504_v20  ;;  %v10676_v57 = vpack.c.bf16 %v1587_v40, %v1507_v44  ;;  %v10724_v13 = vpack.c.bf16 %v1585_v3, %v1505_v45 }
 0x131   :  { %v12078_v30 = vunpack.i.h.bf16 %v12076_v36  ;;  %v12077_v11 = vunpack.i.l.bf16 %v12076_v36  ;;  %v20328_v35 = vunpack.i.l.bf16 %v14816_v63  ;;  %v12043_v60 = vunpack.i.h.bf16 %v14708_v61 }
 0x132   :  { %10675 = vmatprep.subr.bf16.mxu0 %v10674_v47  ;;  %10723 = vmatprep.subr.bf16.mxu1 %v10722_v14  ;;  %v20624_v3 = vunpack.i.h.bf16 %v14293_v33  ;;  %v12063_v37 = vunpack.i.h.bf16 %v14755_v27 }
 0x133   :  { %12330 = vrot.lane.b32.xlu1 %v14784_v10, %s13608_s17  ;;  %10677 = vmatpush1.bf16.msra.mxu0 %v10676_v57  ;;  %v1686_v21 = vsel %vm229_vm1, %v12077_v11, %v12078_v30  ;;  %v1685_v36 = vsel %vm229_vm1, %v12078_v30, %v20328_v35  ;;  %v14862_v30 = vld [vmem:[%s20258_s0 + $0x88] sm:$0xff] }
 0x134   :  { %12325 = vrot.lane.b32.xlu0 %v14467_v26, %s13608_s17  ;;  %10725 = vmatpush1.bf16.msra.mxu1 %v10724_v13  ;;  %v14825_v12 = vpop.permute.xlu1 %12090  ;;  %v12086_v44 = vpop.permute.xlu0 %12085  ;;  %v1768_v40 = vsel %vm310_vm2, %v20624_v3, %v12053_v41  ;;  %v1687_v26 = vsel %vm229_vm1, %v12043_v60, %v12077_v11  ;;  %v20625_v11 = vunpack.i.h.bf16 %v14283_v6 }
 0x135   :  { %v20327_v45 = vunpack.i.l.bf16 %v14825_v12  ;;  %v12088_v25 = vunpack.i.h.bf16 %v12086_v44  ;;  %v12087_v20 = vunpack.i.l.bf16 %v12086_v44 }
 0x136   :  { %v1688_v14 = vsel %vm229_vm1, %v20625_v11, %v12043_v60  ;;  %v20626_v60 = vunpack.i.h.bf16 %v14334_v4 }
 0x137   :  { %v1766_v13 = vsel %vm310_vm2, %v12087_v20, %v12088_v25  ;;  %12340 = vrot.lane.b32.xlu1 %v14776_v2, %s13606_s30  ;;  %v1767_v33 = vsel %vm310_vm2, %v12053_v41, %v12087_v20  ;;  %v1765_v47 = vsel %vm310_vm2, %v12088_v25, %v20327_v45  ;;  %v10680_v35 = vpack.c.bf16 %v1768_v40, %v1688_v14 }
 0x138   :  { %12335 = vrot.lane.b32.xlu0 %v14588_v16, %s13606_s30  ;;  %v14857_v57 = vpop.permute.xlu1 %12100  ;;  %v12096_v41 = vpop.permute.xlu0 %12095  ;;  %v10678_v44 = vpack.c.bf16 %v1767_v33, %v1687_v26  ;;  %v10726_v20 = vpack.c.bf16 %v1765_v47, %v1685_v36  ;;  %v10728_v3 = vpack.c.bf16 %v1766_v13, %v1686_v21  ;;  %v1867_v11 = vsel %vm411_vm3, %v20626_v60, %v12063_v37 }
 0x139   :  { %v20332_v25 = vunpack.i.l.bf16 %v14857_v57  ;;  %v12098_v6 = vunpack.i.h.bf16 %v12096_v41  ;;  %v12097_v45 = vunpack.i.l.bf16 %v12096_v41  ;;  %v14875_v26 = vpack.i.bf16 %v14543_v1, %v14862_v30 }
 0x13a   :  { %10679 = vmatprep.subr.bf16.mxu0 %v10678_v44  ;;  %10727 = vmatprep.subr.bf16.mxu1 %v10726_v20  ;;  %v10684_v1 = vpack.c.bf16 %v1867_v11, %v14581_v28  ;;  %v13609_v36 = vmov 0   ;;  %v14900_v47 = vpack.i.bf16 %v14862_v30, %v14632_v22  ;;  %v12093_v14 = vunpack.i.h.bf16 %v14825_v12 }
 0x13b   :  { %v1865_v21 = vsel %vm411_vm3, %v12097_v45, %v12098_v6  ;;  %12350 = vrot.lane.b32.xlu1 %v14776_v2, %s13605_s29  ;;  %10681 = vmatpush1.bf16.msra.mxu0 %v10680_v35  ;;  %v1866_v40 = vsel %vm411_vm3, %v12063_v37, %v12097_v45  ;;  %v1864_v2 = vsel %vm411_vm3, %v12098_v6, %v20332_v25  ;;  %v14893_v45 = vld [vmem:[%s20258_s0 + $0x58] sm:$0xff]  ;;  %v12083_v6 = vunpack.i.h.bf16 %v14816_v63 }
 0x13c   :  { %12345 = vrot.lane.b32.xlu0 %v14588_v16, %s13605_s29  ;;  %10729 = vmatpush1.bf16.msra.mxu1 %v10728_v3  ;;  %v14881_v4 = vpop.permute.xlu1 %12110  ;;  %v12106_v13 = vpop.permute.xlu0 %12105  ;;  %v10682_v33 = vpack.c.bf16 %v1866_v40, %v14699_v62  ;;  %v10732_v35 = vpack.c.bf16 %v1865_v21, %v14769_v39  ;;  %v10730_v37 = vpack.c.bf16 %v1864_v2, %v14893_v45  ;;  %v20627_v40 = vunpack.i.l.bf16 %v14383_v0 }
 0x13d   :  { %12609 = vset.pattern.permute.xlu0 %v13609_v36  ;;  %13275 = vset.pattern.permute.xlu1 %v13609_v36  ;;  %v12107_v20 = vunpack.i.l.bf16 %v12106_v13  ;;  %v20330_v2 = vunpack.i.l.bf16 %v14881_v4  ;;  %v12108_v36 = vunpack.i.h.bf16 %v12106_v13 }
 0x13e   :  { %10683 = vmatprep.subr.bf16.mxu0 %v10682_v33  ;;  %10731 = vmatprep.subr.bf16.mxu1 %v10730_v37  ;;  %v322_v33 = vsel %vm310_vm2, %v20627_v40, %v12093_v14  ;;  %v20628_v40 = vunpack.i.l.bf16 %v14373_v19 }
 0x13f   :  { %12360 = vrot.lane.b32.xlu1 %v14875_v26, %s13607_s16  ;;  %10685 = vmatpush1.bf16.msra.mxu0 %v10684_v1  ;;  %v240_v0 = vsel %vm229_vm1, %v12083_v6, %v12107_v20 }
 0x140   :  { %12355 = vrot.lane.b32.xlu0 %v14784_v10, %s13607_s16  ;;  %v14905_v41 = vpop.permute.xlu1 %12120  ;;  %v12116_v44 = vpop.permute.xlu0 %12115  ;;  %10733 = vmatpush1.bf16.msra.mxu1 %v10732_v35 }
 0x141   :  { %v12117_v3 = vunpack.i.l.bf16 %v12116_v44  ;;  %v20331_v60 = vunpack.i.l.bf16 %v14905_v41  ;;  %v12118_v11 = vunpack.i.h.bf16 %v12116_v44 }
 0x143   :  { %12370 = vrot.lane.b32.xlu1 %v14900_v47, %s13608_s17  ;;  %v321_v21 = vsel %vm310_vm2, %v12093_v14, %v12117_v3  ;;  %v319_v13 = vsel %vm310_vm2, %v12118_v11, %v20331_v60 }
 0x144   :  { %12365 = vrot.lane.b32.xlu0 %v14588_v16, %s13608_s17  ;;  %v1906_v1 = vpop.permute.xlu1 %1905  ;;  %v1904_v35 = vpop.permute.xlu0 %1903  ;;  %v10734_v14 = vpack.c.bf16 %v321_v21, %v240_v0  ;;  %v241_v16 = vsel %vm229_vm1, %v20628_v40, %v12083_v6  ;;  %v14944_v6 = vld [vmem:[%s20258_s0 + $0x90] sm:$0xff]  ;;  %v12103_v0 = vunpack.i.h.bf16 %v14857_v57 }
 0x145   :  { %v1946_v37 = vsel %vm492_vm4, %v1904_v35, %v1906_v1  ;;  %v1947_v44 = vsel %vm492_vm4, %v14406_v52, %v1904_v35  ;;  %v10736_v19 = vpack.c.bf16 %v322_v33, %v241_v16  ;;  %v320_v35 = vsel %vm310_vm2, %v12117_v3, %v12118_v11 }
 0x146   :  { %2673 = vmatprep.subr.mxu0 %v1946_v37  ;;  %v238_v33 = vsel %vm229_vm1, %v12108_v36, %v20330_v2  ;;  %v239_v3 = vsel %vm229_vm1, %v12107_v20, %v12108_v36  ;;  %v14965_v11 = vpack.i.bf16 %v14632_v22, %v14944_v6  ;;  %v20629_v36 = vunpack.i.l.bf16 %v14452_v54 }
 0x147   :  { %12380 = vrot.lane.b32.xlu1 %v14875_v26, %s13606_s30  ;;  %2674 = vmatpush1.msra.mxu0 %v1947_v44  ;;  %v10784_v16 = vpack.c.bf16 %v320_v35, %v239_v3  ;;  %v14992_v35 = vpack.i.bf16 %v14944_v6, %v14862_v30 }
 0x148   :  { %12375 = vrot.lane.b32.xlu0 %v14784_v10, %s13606_s30  ;;  %v14939_v52 = vpop.permute.xlu1 %1909  ;;  %v1908_v21 = vpop.permute.xlu0 %1907  ;;  %10735 = vmatprep.subr.bf16.mxu0 %v10734_v14  ;;  %v10782_v14 = vpack.c.bf16 %v319_v13, %v238_v33 }
 0x149   :  { %2690 = vmatmul.mubr.f32.vlgmr.msra.gmra.mrb[2].mxu0 %v14438_v49  ;;  %v1944_v37 = vsel %vm492_vm4, %v1908_v21, %v14939_v52  ;;  %v1945_v44 = vsel %vm492_vm4, %v1906_v1, %v1908_v21 }
 0x14a   :  { %10737 = vmatpush1.bf16.msra.mxu0 %v10736_v19  ;;  %2744 = vmatprep.subr.mxu1 %v1944_v37  ;;  %v422_v19 = vsel %vm411_vm3, %v20629_v36, %v12103_v0 }
 0x14b   :  { %12390 = vrot.lane.b32.xlu1 %v14875_v26, %s13605_s29  ;;  %2745 = vmatpush1.msra.mxu1 %v1945_v44  ;;  %v14976_v26 = vld [vmem:[%s20259_s1 + $0x8] sm:$0xff] }
 0x14c   :  { %12385 = vrot.lane.b32.xlu0 %v14784_v10, %s13605_s29  ;;  %v14969_v1 = vpop.permute.xlu1 %12130  ;;  %v12126_v40 = vpop.permute.xlu0 %12125  ;;  %10783 = vmatprep.subr.bf16.mxu1 %v10782_v14 }
 0x14d   :  { %v20329_v13 = vunpack.i.l.bf16 %v14969_v1  ;;  %v12128_v21 = vunpack.i.h.bf16 %v12126_v40  ;;  %v12127_v20 = vunpack.i.l.bf16 %v12126_v40  ;;  %2761 = vmatmul.mubr.f32.vlgmr.msra.gmra.mrb[2].mxu1 %v14438_v49  ;;  %10481 = vmatprep.mubr.msk.f32.mxu0 %vm2479_vm0, %v14976_v26 }
 0x14e   :  { %10785 = vmatpush1.bf16.msra.mxu1 %v10784_v16  ;;  %10482 = vmatprep.mubr.msk.f32.mxu1 %vm2479_vm0, %v14976_v26  ;;  %v10740_v16 = vpack.c.bf16 %v422_v19, %v14581_v28 }
 0x14f   :  { %v420_v49 = vsel %vm411_vm3, %v12127_v20, %v12128_v21  ;;  %12400 = vrot.lane.b32.xlu1 %v14965_v11, %s13607_s16  ;;  %v421_v54 = vsel %vm411_vm3, %v12103_v0, %v12127_v20  ;;  %v419_v37 = vsel %vm411_vm3, %v12128_v21, %v20329_v13 }
 0x150   :  { %12395 = vrot.lane.b32.xlu0 %v14900_v47, %s13607_s16  ;;  %v15002_v44 = vpop.permute.xlu1 %12140  ;;  %v12136_v33 = vpop.permute.xlu0 %12135  ;;  %v10738_v14 = vpack.c.bf16 %v421_v54, %v14699_v62  ;;  %v10786_v3 = vpack.c.bf16 %v419_v37, %v14893_v45  ;;  %v10788_v40 = vpack.c.bf16 %v420_v49, %v14769_v39  ;;  %v12113_v54 = vunpack.i.h.bf16 %v14881_v4 }
 0x151   :  { %v12142_v0 = vunpack.i.l.bf16 %v15002_v44  ;;  %v12138_v20 = vunpack.i.h.bf16 %v12136_v33  ;;  %v12137_v36 = vunpack.i.l.bf16 %v12136_v33  ;;  %v20334_v21 = vunpack.i.h.bf16 %v15002_v44 }
 0x152   :  { %10739 = vmatprep.subr.bf16.mxu0 %v10738_v14  ;;  %10787 = vmatprep.subr.bf16.mxu1 %v10786_v3  ;;  %v12123_v14 = vunpack.i.h.bf16 %v14905_v41 }
 0x153   :  { %12410 = vrot.lane.b32.xlu1 %v14992_v35, %s13608_s17  ;;  %10741 = vmatpush1.bf16.msra.mxu0 %v10740_v16  ;;  %v501_v3 = vsel %vm492_vm4, %v12138_v20, %v12142_v0  ;;  %v20630_v16 = vunpack.i.h.bf16 %v14473_v7  ;;  %v500_v7 = vsel %vm492_vm4, %v12142_v0, %v20334_v21  ;;  %v15052_v0 = vld [vmem:[%s20258_s0 + $0x98] sm:$0xff] }
 0x154   :  { %12405 = vrot.lane.b32.xlu0 %v14784_v10, %s13608_s17  ;;  %10789 = vmatpush1.bf16.msra.mxu1 %v10788_v40  ;;  %v15015_v49 = vpop.permute.xlu1 %12150  ;;  %v12146_v28 = vpop.permute.xlu0 %12145  ;;  %v502_v10 = vsel %vm492_vm4, %v12137_v36, %v12138_v20  ;;  %v20631_v20 = vunpack.i.l.bf16 %v14506_v32 }
 0x155   :  { %v20335_v19 = vunpack.i.l.bf16 %v15015_v49  ;;  %v12148_v37 = vunpack.i.h.bf16 %v12146_v28  ;;  %v12147_v33 = vunpack.i.l.bf16 %v12146_v28  ;;  %v503_v13 = vsel %vm492_vm4, %v20630_v16, %v12137_v36 }
 0x156   :  { %v604_v36 = vsel %vm229_vm1, %v20631_v20, %v12113_v54 }
 0x157   :  { %v602_v40 = vsel %vm229_vm1, %v12147_v33, %v12148_v37  ;;  %12420 = vrot.lane.b32.xlu1 %v14965_v11, %s13606_s30  ;;  %v603_v28 = vsel %vm229_vm1, %v12113_v54, %v12147_v33  ;;  %v601_v16 = vsel %vm229_vm1, %v12148_v37, %v20335_v19  ;;  %v10744_v19 = vpack.c.bf16 %v604_v36, %v503_v13 }
 0x158   :  { %12415 = vrot.lane.b32.xlu0 %v14900_v47, %s13606_s30  ;;  %v15047_v2 = vpop.permute.xlu1 %12160  ;;  %v12156_v33 = vpop.permute.xlu0 %12155  ;;  %v10742_v60 = vpack.c.bf16 %v603_v28, %v502_v10  ;;  %v10790_v25 = vpack.c.bf16 %v601_v16, %v500_v7  ;;  %v10792_v29 = vpack.c.bf16 %v602_v40, %v501_v3  ;;  %v20632_v54 = vunpack.i.l.bf16 %v14538_v8  ;;  %v15083_v7 = vld [vmem:[%s20258_s0 + $0x60] sm:$0xff] }
 0x159   :  { %v20337_v37 = vunpack.i.l.bf16 %v15047_v2  ;;  %v12158_v32 = vunpack.i.h.bf16 %v12156_v33  ;;  %v12157_v21 = vunpack.i.l.bf16 %v12156_v33  ;;  %v12439_v10 = vpack.i.bf16 %v14862_v30, %v15052_v0 }
 0x15a   :  { %v684_v20 = vsel %vm310_vm2, %v20632_v54, %v12123_v14  ;;  %10743 = vmatprep.subr.bf16.mxu0 %v10742_v60  ;;  %10791 = vmatprep.subr.bf16.mxu1 %v10790_v25 }
 0x15b   :  { %v682_v3 = vsel %vm310_vm2, %v12157_v21, %v12158_v32  ;;  %12430 = vrot.lane.b32.xlu1 %v14965_v11, %s13605_s29  ;;  %10745 = vmatpush1.bf16.msra.mxu0 %v10744_v19  ;;  %v683_v13 = vsel %vm310_vm2, %v12123_v14, %v12157_v21  ;;  %v681_v11 = vsel %vm310_vm2, %v12158_v32, %v20337_v37  ;;  %v12133_v19 = vunpack.i.h.bf16 %v14969_v1 }
 0x15c   :  { %12425 = vrot.lane.b32.xlu0 %v14900_v47, %s13605_s29  ;;  %10793 = vmatpush1.bf16.msra.mxu1 %v10792_v29  ;;  %v15069_v8 = vpop.permute.xlu1 %12170  ;;  %v12166_v25 = vpop.permute.xlu0 %12165  ;;  %v10746_v60 = vpack.c.bf16 %v14769_v39, %v683_v13  ;;  %v10748_v40 = vpack.c.bf16 %v14699_v62, %v684_v20  ;;  %v10796_v21 = vpack.c.bf16 %v14893_v45, %v682_v3  ;;  %v20633_v13 = vunpack.i.l.bf16 %v14562_v59 }
 0x15d   :  { %v20336_v14 = vunpack.i.l.bf16 %v15069_v8  ;;  %v12168_v28 = vunpack.i.h.bf16 %v12166_v25  ;;  %v12167_v29 = vunpack.i.l.bf16 %v12166_v25  ;;  %v10794_v16 = vpack.c.bf16 %v15083_v7, %v681_v11 }
 0x15e   :  { %10747 = vmatprep.subr.bf16.mxu0 %v10746_v60  ;;  %v15089_v62 = vpack.i.bf16 %v15052_v0, %v14944_v6  ;;  %v12459_v32 = vpack.i.bf16 %v14632_v22, %v15052_v0  ;;  %v783_v25 = vsel %vm411_vm3, %v20633_v13, %v12133_v19  ;;  %v12163_v37 = vunpack.i.h.bf16 %v15047_v2 }
 0x15f   :  { %12440 = vrot.lane.b32.xlu1 %v12439_v10, %s13607_s16  ;;  %10749 = vmatpush1.bf16.msra.mxu0 %v10748_v40  ;;  %v781_v60 = vsel %vm411_vm3, %v12167_v29, %v12168_v28  ;;  %v782_v11 = vsel %vm411_vm3, %v12133_v19, %v12167_v29  ;;  %v780_v22 = vsel %vm411_vm3, %v12168_v28, %v20336_v14  ;;  %v12153_v14 = vunpack.i.h.bf16 %v15015_v49 }
 0x160   :  { %12435 = vrot.lane.b32.xlu0 %v14992_v35, %s13607_s16  ;;  %10795 = vmatprep.subr.bf16.mxu1 %v10794_v16  ;;  %v15093_v36 = vpop.permute.xlu1 %12180  ;;  %v12176_v33 = vpop.permute.xlu0 %12175 }
 0x161   :  { %10797 = vmatpush1.bf16.msra.mxu1 %v10796_v21  ;;  %v20338_v54 = vunpack.i.h.bf16 %v15093_v36  ;;  %v12182_v20 = vunpack.i.l.bf16 %v15093_v36  ;;  %v12178_v3 = vunpack.i.h.bf16 %v12176_v33  ;;  %v12177_v10 = vunpack.i.l.bf16 %v12176_v33 }
 0x162   :  { %v20634_v21 = vunpack.i.h.bf16 %v14592_v24 }
 0x163   :  { %v861_v40 = vsel %vm492_vm4, %v12178_v3, %v12182_v20  ;;  %12450 = vrot.lane.b32.xlu1 %v15089_v62, %s13608_s17  ;;  %v862_v16 = vsel %vm492_vm4, %v12177_v10, %v12178_v3  ;;  %v860_v19 = vsel %vm492_vm4, %v12182_v20, %v20338_v54  ;;  %v15134_v20 = vld [vmem:[%s20258_s0 + $0xa0] sm:$0xff] }
 0x164   :  { %v863_v59 = vsel %vm492_vm4, %v20634_v21, %v12177_v10  ;;  %12445 = vrot.lane.b32.xlu0 %v14900_v47, %s13608_s17  ;;  %v15127_v28 = vpop.permute.xlu1 %12190  ;;  %v12186_v24 = vpop.permute.xlu0 %12185  ;;  %v10750_v29 = vpack.c.bf16 %v862_v16, %v782_v11  ;;  %v10798_v33 = vpack.c.bf16 %v860_v19, %v780_v22  ;;  %v10800_v21 = vpack.c.bf16 %v861_v40, %v781_v60 }
 0x165   :  { %v10752_v13 = vpack.c.bf16 %v863_v59, %v783_v25  ;;  %v12188_v3 = vunpack.i.h.bf16 %v12186_v24  ;;  %v12187_v10 = vunpack.i.l.bf16 %v12186_v24  ;;  %v20339_v47 = vunpack.i.l.bf16 %v15127_v28 }
 0x166   :  { %10751 = vmatprep.subr.bf16.mxu0 %v10750_v29  ;;  %10799 = vmatprep.subr.bf16.mxu1 %v10798_v33  ;;  %v12479_v59 = vpack.i.bf16 %v14862_v30, %v15134_v20  ;;  %v20635_v16 = vunpack.i.l.bf16 %v14626_v43  ;;  %v20636_v24 = vunpack.i.l.bf16 %v14639_v53 }
 0x167   :  { %12460 = vrot.lane.b32.xlu1 %v12459_v32, %s13606_s30  ;;  %10753 = vmatpush1.bf16.msra.mxu0 %v10752_v13  ;;  %v962_v33 = vsel %vm229_vm1, %v12187_v10, %v12188_v3  ;;  %v963_v13 = vsel %vm229_vm1, %v12153_v14, %v12187_v10  ;;  %v961_v53 = vsel %vm229_vm1, %v12188_v3, %v20339_v47 }
 0x168   :  { %12455 = vrot.lane.b32.xlu0 %v14992_v35, %s13606_s30  ;;  %10801 = vmatpush1.bf16.msra.mxu1 %v10800_v21  ;;  %v15140_v25 = vpop.permute.xlu1 %12200  ;;  %v12196_v60 = vpop.permute.xlu0 %12195  ;;  %v964_v19 = vsel %vm229_vm1, %v20635_v16, %v12153_v14  ;;  %v1044_v29 = vsel %vm310_vm2, %v20636_v24, %v12163_v37  ;;  %v12173_v14 = vunpack.i.h.bf16 %v15069_v8 }
 0x169   :  { %v20342_v11 = vunpack.i.l.bf16 %v15140_v25  ;;  %v12198_v22 = vunpack.i.h.bf16 %v12196_v60  ;;  %v12197_v40 = vunpack.i.l.bf16 %v12196_v60 }
 0x16b   :  { %v1042_v21 = vsel %vm310_vm2, %v12197_v40, %v12198_v22  ;;  %12470 = vrot.lane.b32.xlu1 %v12459_v32, %s13605_s29  ;;  %v1043_v43 = vsel %vm310_vm2, %v12163_v37, %v12197_v40  ;;  %v1041_v60 = vsel %vm310_vm2, %v12198_v22, %v20342_v11  ;;  %v10756_v37 = vpack.c.bf16 %v1044_v29, %v964_v19 }
 0x16c   :  { %12465 = vrot.lane.b32.xlu0 %v14992_v35, %s13605_s29  ;;  %v10754_v10 = vpack.c.bf16 %v1043_v43, %v963_v13  ;;  %v10802_v32 = vpack.c.bf16 %v1041_v60, %v961_v53  ;;  %v10804_v16 = vpack.c.bf16 %v1042_v21, %v962_v33  ;;  %v20637_v22 = vunpack.i.l.bf16 %v14672_v42  ;;  %v15197_v21 = vld [vmem:[%s20258_s0 + $0x68] sm:$0xff] }
 0x16d   :  { %v15173_v24 = vpop.permute.xlu1 %12210  ;;  %v12193_v60 = vunpack.i.h.bf16 %v15127_v28 }
 0x16e   :  { %v20341_v40 = vunpack.i.l.bf16 %v15173_v24  ;;  %v12206_v54 = vpop.permute.xlu0 %12205  ;;  %10755 = vmatprep.subr.bf16.mxu0 %v10754_v10  ;;  %10803 = vmatprep.subr.bf16.mxu1 %v10802_v32  ;;  %v1143_v13 = vsel %vm411_vm3, %v20637_v22, %v12173_v14 }
 0x16f   :  { %v12208_v3 = vunpack.i.h.bf16 %v12206_v54  ;;  %v12207_v47 = vunpack.i.l.bf16 %v12206_v54  ;;  %12480 = vrot.lane.b32.xlu1 %v12479_v59, %s13607_s16  ;;  %10757 = vmatpush1.bf16.msra.mxu0 %v10756_v37 }
 0x170   :  { %12475 = vrot.lane.b32.xlu0 %v15089_v62, %s13607_s16  ;;  %10805 = vmatpush1.bf16.msra.mxu1 %v10804_v16 }
 0x171   :  { %v1141_v19 = vsel %vm411_vm3, %v12207_v47, %v12208_v3  ;;  %v15185_v29 = vpop.permute.xlu1 %12220  ;;  %v1142_v54 = vsel %vm411_vm3, %v12173_v14, %v12207_v47  ;;  %v1140_v42 = vsel %vm411_vm3, %v12208_v3, %v20341_v40  ;;  %v10760_v47 = vpack.c.bf16 %v1143_v13, %v14769_v39 }
 0x172   :  { %v12216_v59 = vpop.permute.xlu0 %12215  ;;  %v10758_v33 = vpack.c.bf16 %v1142_v54, %v14893_v45  ;;  %v10806_v43 = vpack.c.bf16 %v1140_v42, %v15197_v21  ;;  %v10808_v53 = vpack.c.bf16 %v1141_v19, %v15083_v7  ;;  %v20340_v14 = vunpack.i.h.bf16 %v15185_v29 }
 0x173   :  { %12490 = vrot.lane.b32.xlu1 %v14992_v35, %s13605_s29  ;;  %v12217_v10 = vunpack.i.l.bf16 %v12216_v59  ;;  %v12218_v32 = vunpack.i.h.bf16 %v12216_v59  ;;  %v12222_v37 = vunpack.i.l.bf16 %v15185_v29  ;;  %v20638_v19 = vunpack.i.l.bf16 %v14708_v61 }
 0x174   :  { %12485 = vrot.lane.b32.xlu0 %v14992_v35, %s13606_s30  ;;  %10759 = vmatprep.subr.bf16.mxu0 %v10758_v33  ;;  %v12203_v42 = vunpack.i.h.bf16 %v15140_v25  ;;  %v20639_v59 = vunpack.i.h.bf16 %v14686_v23 }
 0x175   :  { %10807 = vmatprep.subr.bf16.mxu1 %v10806_v43  ;;  %10761 = vmatpush1.bf16.msra.mxu0 %v10760_v47  ;;  %v15208_v16 = vpop.permute.xlu1 %12230  ;;  %v1324_v54 = vsel %vm229_vm1, %v20638_v19, %v12193_v60  ;;  %v1220_v43 = vsel %vm492_vm4, %v12222_v37, %v20340_v14 }
 0x176   :  { %10809 = vmatpush1.bf16.msra.mxu1 %v10808_v53  ;;  %v20347_v39 = vunpack.i.l.bf16 %v15208_v16  ;;  %v12226_v3 = vpop.permute.xlu0 %12225  ;;  %v1223_v33 = vsel %vm492_vm4, %v20639_v59, %v12217_v10  ;;  %v1222_v53 = vsel %vm492_vm4, %v12217_v10, %v12218_v32 }
 0x177   :  { %v12228_v22 = vunpack.i.h.bf16 %v12226_v3  ;;  %v12227_v13 = vunpack.i.l.bf16 %v12226_v3  ;;  %1921 = vrot.lane.b32.xlu1 %v14944_v6, %s13608_s17  ;;  %v1221_v3 = vsel %vm492_vm4, %v12218_v32, %v12222_v37  ;;  %v10764_v10 = vpack.c.bf16 %v1324_v54, %v1223_v33  ;;  %v15255_v32 = vld [vmem:[%s20258_s0 + $0x98] sm:$0xff] }
 0x178   :  { %1919 = vrot.lane.b32.xlu0 %v14862_v30, %s13608_s17  ;;  %v12494_v37 = vpack.i.bf16 %v15255_v32, %v14944_v6 }
 0x179   :  { %v1322_v61 = vsel %vm229_vm1, %v12227_v13, %v12228_v22  ;;  %v15231_v47 = vpop.permute.xlu1 %12240  ;;  %v1323_v23 = vsel %vm229_vm1, %v12193_v60, %v12227_v13  ;;  %v1321_v30 = vsel %vm229_vm1, %v12228_v22, %v20347_v39  ;;  %v20640_v13 = vunpack.i.l.bf16 %v14740_v5 }
 0x17a   :  { %v20346_v19 = vunpack.i.l.bf16 %v15231_v47  ;;  %v12236_v59 = vpop.permute.xlu0 %12235  ;;  %v10762_v14 = vpack.c.bf16 %v1323_v23, %v1222_v53  ;;  %v10810_v40 = vpack.c.bf16 %v1321_v30, %v1220_v43  ;;  %v10812_v60 = vpack.c.bf16 %v1322_v61, %v1221_v3  ;;  %v15273_v53 = vld [vmem:[%s20258_s0 + $0x70] sm:$0xff] }
 0x17b   :  { %v12238_v11 = vunpack.i.h.bf16 %v12236_v59  ;;  %v12237_v51 = vunpack.i.l.bf16 %v12236_v59  ;;  %1925 = vrot.lane.b32.xlu1 %v15134_v20, %s13608_s17  ;;  %v1404_v22 = vsel %vm310_vm2, %v20640_v13, %v12203_v42  ;;  %v12213_v23 = vunpack.i.h.bf16 %v15173_v24 }
 0x17c   :  { %1923 = vrot.lane.b32.xlu0 %v15052_v0, %s13608_s17  ;;  %10763 = vmatprep.subr.bf16.mxu0 %v10762_v14 }
 0x17d   :  { %v1402_v54 = vsel %vm310_vm2, %v12237_v51, %v12238_v11  ;;  %10811 = vmatprep.subr.bf16.mxu1 %v10810_v40  ;;  %10765 = vmatpush1.bf16.msra.mxu0 %v10764_v10  ;;  %v15261_v5 = vpop.permute.xlu1 %12250  ;;  %v1403_v33 = vsel %vm310_vm2, %v12203_v42, %v12237_v51  ;;  %v1401_v14 = vsel %vm310_vm2, %v12238_v11, %v20346_v19 }
 0x17e   :  { %10813 = vmatpush1.bf16.msra.mxu1 %v10812_v60  ;;  %v12246_v43 = vpop.permute.xlu0 %12245  ;;  %v10766_v61 = vpack.c.bf16 %v15083_v7, %v1403_v33  ;;  %v10814_v40 = vpack.c.bf16 %v15273_v53, %v1401_v14  ;;  %v10768_v51 = vpack.c.bf16 %v14893_v45, %v1404_v22  ;;  %v10816_v42 = vpack.c.bf16 %v15197_v21, %v1402_v54 }
 0x17f   :  { %12500 = vrot.lane.b32.xlu1 %v14992_v35, %s13608_s17  ;;  %v12504_v11 = vpack.i.bf16 %v14944_v6, %v15255_v32  ;;  %v20344_v30 = vunpack.i.l.bf16 %v15261_v5  ;;  %v12248_v3 = vunpack.i.h.bf16 %v12246_v43  ;;  %v12247_v59 = vunpack.i.l.bf16 %v12246_v43 }
 0x180   :  { %12495 = vrot.lane.b32.xlu0 %v12494_v37, %s13607_s16  ;;  %10767 = vmatprep.subr.bf16.mxu0 %v10766_v61  ;;  %v12514_v33 = vpack.i.bf16 %v14944_v6, %v15052_v0  ;;  %v20641_v37 = vunpack.i.l.bf16 %v14755_v27 }
 0x181   :  { %10815 = vmatprep.subr.bf16.mxu1 %v10814_v40  ;;  %10769 = vmatpush1.bf16.msra.mxu0 %v10768_v51  ;;  %v15285_v10 = vpop.permute.xlu1 %12260  ;;  %v1502_v43 = vsel %vm411_vm3, %v12213_v23, %v12247_v59  ;;  %v1500_v61 = vsel %vm411_vm3, %v12248_v3, %v20344_v30  ;;  %v20642_v40 = vunpack.i.h.bf16 %v14780_v17 }
 0x182   :  { %10817 = vmatpush1.bf16.msra.mxu1 %v10816_v42  ;;  %v20345_v45 = vunpack.i.h.bf16 %v15285_v10  ;;  %v12262_v60 = vunpack.i.l.bf16 %v15285_v10  ;;  %v12256_v13 = vpop.permute.xlu0 %12255  ;;  %v1503_v14 = vsel %vm411_vm3, %v20641_v37, %v12213_v23 }
 0x183   :  { %v12258_v22 = vunpack.i.h.bf16 %v12256_v13  ;;  %v12257_v54 = vunpack.i.l.bf16 %v12256_v13  ;;  %12510 = vrot.lane.b32.xlu1 %v14992_v35, %s13606_s30  ;;  %v1501_v13 = vsel %vm411_vm3, %v12247_v59, %v12248_v3 }
 0x184   :  { %12505 = vrot.lane.b32.xlu0 %v12504_v11, %s13608_s17  ;;  %v1580_v6 = vsel %vm492_vm4, %v12262_v60, %v20345_v45 }
 0x185   :  { %v1581_v27 = vsel %vm492_vm4, %v12258_v22, %v12262_v60  ;;  %v1583_v51 = vsel %vm492_vm4, %v20642_v40, %v12257_v54  ;;  %v15314_v42 = vpop.permute.xlu1 %12270  ;;  %v1582_v11 = vsel %vm492_vm4, %v12257_v54, %v12258_v22  ;;  %v10818_v23 = vpack.c.bf16 %v1580_v6, %v1500_v61 }
 0x186   :  { %v12266_v37 = vpop.permute.xlu0 %12265  ;;  %v10770_v30 = vpack.c.bf16 %v1582_v11, %v1502_v43  ;;  %v10772_v45 = vpack.c.bf16 %v1583_v51, %v1503_v14  ;;  %v10820_v17 = vpack.c.bf16 %v1581_v27, %v1501_v13  ;;  %v12233_v60 = vunpack.i.h.bf16 %v15208_v16  ;;  %v15332_v14 = vld [vmem:[%s20258_s0 + $0xa0] sm:$0xff] }
 0x187   :  { %12520 = vrot.lane.b32.xlu1 %v14992_v35, %s13605_s29  ;;  %10819 = vmatprep.subr.bf16.mxu1 %v10818_v23  ;;  %v12243_v40 = vunpack.i.h.bf16 %v15231_v47  ;;  %v12267_v19 = vunpack.i.l.bf16 %v12266_v37  ;;  %v20349_v22 = vunpack.i.l.bf16 %v15314_v42  ;;  %v12268_v54 = vunpack.i.h.bf16 %v12266_v37 }
 0x188   :  { %12515 = vrot.lane.b32.xlu0 %v12514_v33, %s13606_s30  ;;  %10771 = vmatprep.subr.bf16.mxu0 %v10770_v30  ;;  %v12539_v43 = vpack.i.bf16 %v15332_v14, %v15052_v0  ;;  %v15342_v6 = vpack.i.bf16 %v15134_v20, %v15052_v0  ;;  %v20643_v27 = vunpack.i.l.bf16 %v14816_v63  ;;  %v20644_v11 = vunpack.i.l.bf16 %v14825_v12 }
 0x189   :  { %10773 = vmatpush1.bf16.msra.mxu0 %v10772_v45  ;;  %10821 = vmatpush1.bf16.msra.mxu1 %v10820_v17  ;;  %v15326_v3 = vpop.permute.xlu1 %12280  ;;  %v12534_v45 = vpack.i.bf16 %v15052_v0, %v15332_v14  ;;  %v12253_v13 = vunpack.i.h.bf16 %v15261_v5  ;;  %v1681_v12 = vsel %vm229_vm1, %v12268_v54, %v20349_v22  ;;  %v1682_v17 = vsel %vm229_vm1, %v12267_v19, %v12268_v54 }
 0x18a   :  { %v20356_v59 = vunpack.i.l.bf16 %v15326_v3  ;;  %v12276_v35 = vpop.permute.xlu0 %12275  ;;  %v1684_v51 = vsel %vm229_vm1, %v20643_v27, %v12233_v60  ;;  %v1764_v23 = vsel %vm310_vm2, %v20644_v11, %v12243_v40  ;;  %v20645_v22 = vunpack.i.l.bf16 %v14857_v57 }
 0x18b   :  { %v12278_v61 = vunpack.i.h.bf16 %v12276_v35  ;;  %v12277_v30 = vunpack.i.l.bf16 %v12276_v35  ;;  %12530 = vrot.lane.b32.xlu1 %v15089_v62, %s13607_s16  ;;  %v1683_v62 = vsel %vm229_vm1, %v12233_v60, %v12267_v19 }
 0x18c   :  { %12525 = vrot.lane.b32.xlu0 %v12514_v33, %s13605_s29  ;;  %v1863_v50 = vsel %vm411_vm3, %v20645_v22, %v12253_v13 }
 0x18d   :  { %v1762_v0 = vsel %vm310_vm2, %v12277_v30, %v12278_v61  ;;  %v15358_v37 = vpop.permute.xlu1 %12290  ;;  %v1763_v63 = vsel %vm310_vm2, %v12243_v40, %v12277_v30  ;;  %v1761_v33 = vsel %vm310_vm2, %v12278_v61, %v20356_v59  ;;  %v10776_v30 = vpack.c.bf16 %v1764_v23, %v1684_v51 }
 0x18e   :  { %v20351_v60 = vunpack.i.l.bf16 %v15358_v37  ;;  %v12286_v35 = vpop.permute.xlu0 %12285  ;;  %v10774_v27 = vpack.c.bf16 %v1763_v63, %v1683_v62  ;;  %v10822_v11 = vpack.c.bf16 %v1761_v33, %v1681_v12  ;;  %v10824_v38 = vpack.c.bf16 %v1762_v0, %v1682_v17 }
 0x18f   :  { %v12288_v39 = vunpack.i.h.bf16 %v12286_v35  ;;  %v12287_v40 = vunpack.i.l.bf16 %v12286_v35  ;;  %12540 = vrot.lane.b32.xlu1 %v12539_v43, %s13608_s17  ;;  %v10780_v23 = vpack.c.bf16 %v1863_v50, %v15083_v7  ;;  %v12283_v50 = vunpack.i.h.bf16 %v15326_v3 }
 0x190   :  { %12535 = vrot.lane.b32.xlu0 %v12534_v45, %s13607_s16  ;;  %10775 = vmatprep.subr.bf16.mxu0 %v10774_v27  ;;  %v15393_v45 = vld [vmem:[%s20258_s0 + $0x78] sm:$0xff]  ;;  %v12273_v33 = vunpack.i.h.bf16 %v15314_v42 }
 0x191   :  { %v1861_v19 = vsel %vm411_vm3, %v12287_v40, %v12288_v39  ;;  %10823 = vmatprep.subr.bf16.mxu1 %v10822_v11  ;;  %10777 = vmatpush1.bf16.msra.mxu0 %v10776_v30  ;;  %v15381_v54 = vpop.permute.xlu1 %12300  ;;  %v1862_v43 = vsel %vm411_vm3, %v12253_v13, %v12287_v40  ;;  %v1860_v57 = vsel %vm411_vm3, %v12288_v39, %v20351_v60  ;;  %v15424_v30 = vld [vmem:[%s20258_s0 + $0xa8] sm:$0xff] }
 0x192   :  { %10825 = vmatpush1.bf16.msra.mxu1 %v10824_v38  ;;  %v12296_v22 = vpop.permute.xlu0 %12295  ;;  %v10778_v61 = vpack.c.bf16 %v1862_v43, %v15197_v21  ;;  %v10826_v51 = vpack.c.bf16 %v1860_v57, %v15393_v45  ;;  %v10828_v13 = vpack.c.bf16 %v1861_v19, %v15273_v53  ;;  %v15405_v38 = vld [vmem:[%s20258_s0 + $0xa8] sm:$0xff]  ;;  %v20646_v19 = vunpack.i.l.bf16 %v14905_v41 }
 0x193   :  { %12550 = vrot.lane.b32.xlu1 %v15342_v6, %s13605_s29  ;;  %v12554_v39 = vpack.i.bf16 %v15405_v38, %v15134_v20  ;;  %v12297_v63 = vunpack.i.l.bf16 %v12296_v22  ;;  %v12564_v17 = vpack.i.bf16 %v15134_v20, %v15405_v38  ;;  %v20354_v57 = vunpack.i.l.bf16 %v15381_v54 }
 0x194   :  { %12545 = vrot.lane.b32.xlu0 %v15342_v6, %s13606_s30  ;;  %10779 = vmatprep.subr.bf16.mxu0 %v10778_v61  ;;  %v318_v43 = vsel %vm310_vm2, %v20646_v19, %v12283_v50 }
 0x195   :  { %10827 = vmatprep.subr.bf16.mxu1 %v10826_v51  ;;  %10781 = vmatpush1.bf16.msra.mxu0 %v10780_v23  ;;  %v15409_v62 = vpop.permute.xlu1 %12310  ;;  %v12298_v51 = vunpack.i.h.bf16 %v12296_v22  ;;  %v236_v41 = vsel %vm229_vm1, %v12273_v33, %v12297_v63 }
 0x196   :  { %10829 = vmatpush1.bf16.msra.mxu1 %v10828_v13  ;;  %v12306_v0 = vpop.permute.xlu0 %12305  ;;  %v20355_v35 = vunpack.i.l.bf16 %v15409_v62 }
 0x197   :  { %v12307_v12 = vunpack.i.l.bf16 %v12306_v0  ;;  %12560 = vrot.lane.b32.xlu1 %v15342_v6, %s13608_s17  ;;  %v12308_v27 = vunpack.i.h.bf16 %v12306_v0  ;;  %v12574_v0 = vpack.i.bf16 %v15134_v20, %v15424_v30 }
 0x198   :  { %12555 = vrot.lane.b32.xlu0 %v12554_v39, %s13607_s16  ;;  %v20647_v39 = vunpack.i.l.bf16 %v14881_v4 }
 0x199   :  { %v1914_v11 = vpop.permute.xlu1 %1913  ;;  %v317_v40 = vsel %vm310_vm2, %v12283_v50, %v12307_v12  ;;  %v316_v4 = vsel %vm310_vm2, %v12307_v12, %v12308_v27 }
 0x19a   :  { %v1912_v61 = vpop.permute.xlu0 %1911  ;;  %v237_v50 = vsel %vm229_vm1, %v20647_v39, %v12273_v33  ;;  %v10830_v22 = vpack.c.bf16 %v317_v40, %v236_v41  ;;  %v12584_v40 = vpack.i.bf16 %v15424_v30, %v15134_v20  ;;  %v235_v20 = vsel %vm229_vm1, %v12297_v63, %v12298_v51  ;;  %v15488_v63 = vld [vmem:[%s20258_s0 + $0xb0] sm:$0xff] }
 0x19b   :  { %12570 = vrot.lane.b32.xlu1 %v15342_v6, %s13606_s30  ;;  %v1942_v23 = vsel %vm492_vm4, %v1912_v61, %v1914_v11  ;;  %v1943_v13 = vsel %vm492_vm4, %v14939_v52, %v1912_v61  ;;  %v10832_v60 = vpack.c.bf16 %v318_v43, %v237_v50  ;;  %v315_v52 = vsel %vm310_vm2, %v12308_v27, %v20355_v35 }
 0x19c   :  { %12565 = vrot.lane.b32.xlu0 %v12564_v17, %s13608_s17  ;;  %2815 = vmatprep.subr.mxu0 %v1942_v23  ;;  %v15458_v17 = vld [vmem:[%s20259_s1] sm:$0xff]  ;;  %v234_v43 = vsel %vm229_vm1, %v12298_v51, %v20354_v57  ;;  %v12293_v61 = vunpack.i.h.bf16 %v15358_v37  ;;  %v10880_v23 = vpack.c.bf16 %v316_v4, %v235_v20  ;;  %20648 = vst [vmem:[#allocation19_spill] sm:$0xff] %v15488_v63  ;;  %v20649_v50 = vunpack.i.l.bf16 %v14969_v1 }
 0x19d   :  { %2816 = vmatpush1.msra.mxu0 %v1943_v13  ;;  %v15447_v19 = vpop.permute.xlu1 %1917  ;;  %v12589_v51 = vpack.i.bf16 %v15488_v63, %v15424_v30  ;;  %v12303_v20 = vunpack.i.h.bf16 %v15381_v54 }
 0x19e   :  { %v1916_v33 = vpop.permute.xlu0 %1915  ;;  %2832 = vmatmul.mubr.f32.vlgmr.msra.gmra.mrb[4].mxu0 %v15458_v17  ;;  %10831 = vmatprep.subr.bf16.mxu0 %v10830_v22  ;;  %v418_v22 = vsel %vm411_vm3, %v20649_v50, %v12293_v61 }
 0x19f   :  { %10833 = vmatpush1.bf16.msra.mxu0 %v10832_v60  ;;  %12580 = vrot.lane.b32.xlu1 %v15342_v6, %s13605_s29  ;;  %v1940_v12 = vsel %vm492_vm4, %v1916_v33, %v15447_v19  ;;  %v1941_v27 = vsel %vm492_vm4, %v1914_v11, %v1916_v33  ;;  %v10878_v6 = vpack.c.bf16 %v315_v52, %v234_v43  ;;  %v15513_v33 = vld [vmem:[%s20258_s0 + $0xb0] sm:$0xff] }
 0x1a0   :  { %12575 = vrot.lane.b32.xlu0 %v12574_v0, %s13606_s30  ;;  %2886 = vmatprep.subr.mxu1 %v1940_v12  ;;  %v10836_v43 = vpack.c.bf16 %v418_v22, %v15083_v7 }
 0x1a1   :  { %2887 = vmatpush1.msra.mxu1 %v1941_v27  ;;  %v15478_v60 = vpop.permute.xlu1 %12320  ;;  %10483 = vmatprep.mubr.msk.f32.mxu0 %vm2479_vm0, %v14976_v26 }
 0x1a2   :  { %v20353_v11 = vunpack.i.l.bf16 %v15478_v60  ;;  %v12316_v13 = vpop.permute.xlu0 %12315  ;;  %2903 = vmatmul.mubr.f32.vlgmr.msra.gmra.mrb[4].mxu1 %v15458_v17  ;;  %10879 = vmatprep.subr.bf16.mxu1 %v10878_v6 }
 0x1a3   :  { %v12318_v41 = vunpack.i.h.bf16 %v12316_v13  ;;  %v12317_v39 = vunpack.i.l.bf16 %v12316_v13  ;;  %10881 = vmatpush1.bf16.msra.mxu1 %v10880_v23  ;;  %12585 = vrot.lane.b32.xlu1 %v12584_v40, %s13607_s16  ;;  %v12594_v13 = vpack.i.bf16 %v15513_v33, %v15424_v30 }
 0x1a4   :  { %1389 = vrot.lane.b32.xlu0 %v15424_v30, %s13605_s29  ;;  %10484 = vmatprep.mubr.msk.f32.mxu1 %vm2479_vm0, %v14976_v26 }
 0x1a5   :  { %v416_v0 = vsel %vm411_vm3, %v12317_v39, %v12318_v41  ;;  %v15502_v52 = vpop.permute.xlu1 %12330  ;;  %v417_v4 = vsel %vm411_vm3, %v12293_v61, %v12317_v39  ;;  %v415_v1 = vsel %vm411_vm3, %v12318_v41, %v20353_v11 }
 0x1a6   :  { %v12326_v12 = vpop.permute.xlu0 %12325  ;;  %v10834_v26 = vpack.c.bf16 %v417_v4, %v15197_v21  ;;  %v10882_v27 = vpack.c.bf16 %v415_v1, %v15393_v45  ;;  %v10884_v61 = vpack.c.bf16 %v416_v0, %v15273_v53  ;;  %v20352_v6 = vunpack.i.h.bf16 %v15502_v52 }
 0x1a7   :  { %12590 = vrot.lane.b32.xlu1 %v12589_v51, %s13608_s17  ;;  %v12327_v23 = vunpack.i.l.bf16 %v12326_v12  ;;  %v12328_v41 = vunpack.i.h.bf16 %v12326_v12  ;;  %v12332_v7 = vunpack.i.l.bf16 %v15502_v52  ;;  %v20650_v4 = vunpack.i.l.bf16 %v15015_v49 }
 0x1a8   :  { %1491 = vrot.lane.b32.xlu0 %v15488_v63, %s13607_s16  ;;  %10835 = vmatprep.subr.bf16.mxu0 %v10834_v26  ;;  %v12313_v12 = vunpack.i.h.bf16 %v15409_v62  ;;  %v20651_v26 = vunpack.i.h.bf16 %v15002_v44 }
 0x1a9   :  { %10883 = vmatprep.subr.bf16.mxu1 %v10882_v27  ;;  %10837 = vmatpush1.bf16.msra.mxu0 %v10836_v43  ;;  %v15526_v39 = vpop.permute.xlu1 %12340  ;;  %v600_v1 = vsel %vm229_vm1, %v20650_v4, %v12303_v20  ;;  %v496_v43 = vsel %vm492_vm4, %v12332_v7, %v20352_v6  ;;  %v497_v4 = vsel %vm492_vm4, %v12328_v41, %v12332_v7 }
 0x1aa   :  { %10885 = vmatpush1.bf16.msra.mxu1 %v10884_v61  ;;  %v20365_v51 = vunpack.i.l.bf16 %v15526_v39  ;;  %v12336_v50 = vpop.permute.xlu0 %12335  ;;  %v499_v27 = vsel %vm492_vm4, %v20651_v26, %v12327_v23  ;;  %v498_v61 = vsel %vm492_vm4, %v12327_v23, %v12328_v41 }
 0x1ab   :  { %v12338_v22 = vunpack.i.h.bf16 %v12336_v50  ;;  %v12337_v0 = vunpack.i.l.bf16 %v12336_v50  ;;  %12600 = vrot.lane.b32.xlu1 %v12584_v40, %s13605_s29  ;;  %v10840_v23 = vpack.c.bf16 %v600_v1, %v499_v27 }
 0x1ac   :  { %12595 = vrot.lane.b32.xlu0 %v12594_v13, %s13606_s30 }
 0x1ad   :  { %v598_v49 = vsel %vm229_vm1, %v12337_v0, %v12338_v22  ;;  %v15547_v40 = vpop.permute.xlu1 %12350  ;;  %v599_v44 = vsel %vm229_vm1, %v12303_v20, %v12337_v0  ;;  %v597_v50 = vsel %vm229_vm1, %v12338_v22, %v20365_v51  ;;  %v20652_v20 = vunpack.i.l.bf16 %v15047_v2 }
 0x1ae   :  { %v20364_v26 = vunpack.i.l.bf16 %v15547_v40  ;;  %v12346_v6 = vpop.permute.xlu0 %12345  ;;  %v10838_v11 = vpack.c.bf16 %v599_v44, %v498_v61  ;;  %v10886_v57 = vpack.c.bf16 %v597_v50, %v496_v43  ;;  %v10888_v63 = vpack.c.bf16 %v598_v49, %v497_v4  ;;  %v15593_v43 = vld [vmem:[%s20258_s0 + $0xb8] sm:$0xff] }
 0x1af   :  { %v12348_v35 = vunpack.i.h.bf16 %v12346_v6  ;;  %v12347_v59 = vunpack.i.l.bf16 %v12346_v6  ;;  %12605 = vrot.lane.b32.xlu1 %v12594_v13, %s13607_s16  ;;  %v680_v0 = vsel %vm310_vm2, %v20652_v20, %v12313_v12  ;;  %v20653_v4 = vunpack.i.l.bf16 %v15069_v8 }
 0x1b0   :  { %1749 = vrot.lane.b32.xlu0 %v15513_v33, %s13605_s29  ;;  %10839 = vmatprep.subr.bf16.mxu0 %v10838_v11  ;;  %v15581_v11 = vld [vmem:[%s20258_s0 + $0x80] sm:$0xff] }
 0x1b1   :  { %v678_v41 = vsel %vm310_vm2, %v12347_v59, %v12348_v35  ;;  %10887 = vmatprep.subr.bf16.mxu1 %v10886_v57  ;;  %10841 = vmatpush1.bf16.msra.mxu0 %v10840_v23  ;;  %v15569_v7 = vpop.permute.xlu1 %12360  ;;  %v679_v6 = vsel %vm310_vm2, %v12313_v12, %v12347_v59  ;;  %v677_v2 = vsel %vm310_vm2, %v12348_v35, %v20364_v26  ;;  %v12323_v35 = vunpack.i.h.bf16 %v15478_v60 }
 0x1b2   :  { %10889 = vmatpush1.bf16.msra.mxu1 %v10888_v63  ;;  %v12356_v13 = vpop.permute.xlu0 %12355  ;;  %v10842_v22 = vpack.c.bf16 %v15273_v53, %v679_v6  ;;  %v10890_v57 = vpack.c.bf16 %v15581_v11, %v677_v2  ;;  %v10844_v59 = vpack.c.bf16 %v15197_v21, %v680_v0  ;;  %v10892_v1 = vpack.c.bf16 %v15393_v45, %v678_v41 }
 0x1b3   :  { %1927 = vrot.lane.b32.xlu1 %v15424_v30, %s13608_s17  ;;  %v20359_v63 = vunpack.i.l.bf16 %v15569_v7  ;;  %v12358_v12 = vunpack.i.h.bf16 %v12356_v13  ;;  %v12357_v27 = vunpack.i.l.bf16 %v12356_v13  ;;  %v779_v23 = vsel %vm411_vm3, %v20653_v4, %v12323_v35  ;;  %v2473_v13 = vld [vmem:[%s20260_s2] sm:$0xff] }
 0x1b4   :  { %1851 = vrot.lane.b32.xlu0 %v15593_v43, %s13607_s16  ;;  %10843 = vmatprep.subr.bf16.mxu0 %v10842_v22  ;;  %v20654_v6 = vunpack.i.h.bf16 %v15093_v36  ;;  %v12353_v4 = vunpack.i.h.bf16 %v15547_v40 }
 0x1b5   :  { %10891 = vmatprep.subr.bf16.mxu1 %v10890_v57  ;;  %10845 = vmatpush1.bf16.msra.mxu0 %v10844_v59  ;;  %v15597_v21 = vpop.permute.xlu1 %12370  ;;  %v778_v20 = vsel %vm411_vm3, %v12323_v35, %v12357_v27  ;;  %v776_v0 = vsel %vm411_vm3, %v12358_v12, %v20359_v63  ;;  %v777_v59 = vsel %vm411_vm3, %v12357_v27, %v12358_v12 }
 0x1b6   :  { %10893 = vmatpush1.bf16.msra.mxu1 %v10892_v1  ;;  %v20358_v30 = vunpack.i.h.bf16 %v15597_v21  ;;  %v12372_v49 = vunpack.i.l.bf16 %v15597_v21  ;;  %v12366_v61 = vpop.permute.xlu0 %12365 }
 0x1b7   :  { %v12368_v44 = vunpack.i.h.bf16 %v12366_v61  ;;  %v12367_v50 = vunpack.i.l.bf16 %v12366_v61  ;;  %1931 = vrot.lane.b32.xlu1 %v15593_v43, %s13608_s17  ;;  %v12343_v61 = vunpack.i.h.bf16 %v15526_v39 }
 0x1b8   :  { %1929 = vrot.lane.b32.xlu0 %v15513_v33, %s13608_s17  ;;  %v856_v41 = vsel %vm492_vm4, %v12372_v49, %v20358_v30 }
 0x1b9   :  { %v857_v8 = vsel %vm492_vm4, %v12368_v44, %v12372_v49  ;;  %v859_v33 = vsel %vm492_vm4, %v20654_v6, %v12367_v50  ;;  %v15625_v2 = vpop.permute.xlu1 %12380  ;;  %v858_v22 = vsel %vm492_vm4, %v12367_v50, %v12368_v44  ;;  %v10894_v57 = vpack.c.bf16 %v856_v41, %v776_v0 }
 0x1ba   :  { %v12376_v1 = vpop.permute.xlu0 %12375  ;;  %v10846_v35 = vpack.c.bf16 %v858_v22, %v778_v20  ;;  %v10848_v49 = vpack.c.bf16 %v859_v33, %v779_v23  ;;  %v10896_v36 = vpack.c.bf16 %v857_v8, %v777_v59  ;;  %v20360_v30 = vunpack.i.l.bf16 %v15625_v2 }
 0x1bb   :  { %10895 = vmatprep.subr.bf16.mxu1 %v10894_v57  ;;  %v12377_v6 = vunpack.i.l.bf16 %v12376_v1  ;;  %v12378_v63 = vunpack.i.h.bf16 %v12376_v1  ;;  %v20655_v20 = vunpack.i.l.bf16 %v15127_v28  ;;  %v20656_v41 = vunpack.i.l.bf16 %v15140_v25 }
 0x1bc   :  { %2476 = vperm.xlu0 %12609, %v2473_v13   ;;  %10847 = vmatprep.subr.bf16.mxu0 %v10846_v35  ;;  %v12363_v33 = vunpack.i.h.bf16 %v15569_v7 }
 0x1bd   :  { %10849 = vmatpush1.bf16.msra.mxu0 %v10848_v49  ;;  %10897 = vmatpush1.bf16.msra.mxu1 %v10896_v36  ;;  %v15637_v44 = vpop.permute.xlu1 %12390  ;;  %v960_v0 = vsel %vm229_vm1, %v20655_v20, %v12343_v61  ;;  %v1040_v8 = vsel %vm310_vm2, %v20656_v41, %v12353_v4  ;;  %v959_v13 = vsel %vm229_vm1, %v12343_v61, %v12377_v6  ;;  %v20657_v41 = vunpack.i.l.bf16 %v15173_v24 }
 0x1be   :  { %v20363_v12 = vunpack.i.l.bf16 %v15637_v44  ;;  %v12386_v27 = vpop.permute.xlu0 %12385  ;;  %v957_v25 = vsel %vm229_vm1, %v12378_v63, %v20360_v30  ;;  %v958_v1 = vsel %vm229_vm1, %v12377_v6, %v12378_v63 }
 0x1bf   :  { %v12388_v50 = vunpack.i.h.bf16 %v12386_v27  ;;  %v12387_v23 = vunpack.i.l.bf16 %v12386_v27  ;;  %v1139_v30 = vsel %vm411_vm3, %v20657_v41, %v12363_v33  ;;  %v12393_v41 = vunpack.i.h.bf16 %v15637_v44 }
 0x1c1   :  { %v1038_v22 = vsel %vm310_vm2, %v12387_v23, %v12388_v50  ;;  %v15653_v57 = vpop.permute.xlu1 %12400  ;;  %v1039_v28 = vsel %vm310_vm2, %v12353_v4, %v12387_v23  ;;  %v1037_v59 = vsel %vm310_vm2, %v12388_v50, %v20363_v12  ;;  %v10852_v23 = vpack.c.bf16 %v1040_v8, %v960_v0 }
 0x1c2   :  { %v20362_v35 = vunpack.i.l.bf16 %v15653_v57  ;;  %v12396_v49 = vpop.permute.xlu0 %12395  ;;  %v10850_v36 = vpack.c.bf16 %v1039_v28, %v959_v13  ;;  %v10898_v61 = vpack.c.bf16 %v1037_v59, %v957_v25  ;;  %v10900_v20 = vpack.c.bf16 %v1038_v22, %v958_v1  ;;  %v15686_v13 = vld [vmem:[%s20258_s0 + $0x88] sm:$0xff] }
 0x1c3   :  { %v12398_v27 = vunpack.i.h.bf16 %v12396_v49  ;;  %v12397_v4 = vunpack.i.l.bf16 %v12396_v49  ;;  %v10856_v28 = vpack.c.bf16 %v1139_v30, %v15273_v53 }
 0x1c4   :  { %10851 = vmatprep.subr.bf16.mxu0 %v10850_v36  ;;  %10899 = vmatprep.subr.bf16.mxu1 %v10898_v61 }
 0x1c5   :  { %v1137_v50 = vsel %vm411_vm3, %v12397_v4, %v12398_v27  ;;  %10853 = vmatpush1.bf16.msra.mxu0 %v10852_v23  ;;  %10901 = vmatpush1.bf16.msra.mxu1 %v10900_v20  ;;  %v15674_v63 = vpop.permute.xlu1 %12410  ;;  %v1138_v6 = vsel %vm411_vm3, %v12363_v33, %v12397_v4  ;;  %v1136_v24 = vsel %vm411_vm3, %v12398_v27, %v20362_v35  ;;  %v12383_v33 = vunpack.i.h.bf16 %v15625_v2 }
 0x1c6   :  { %v12406_v0 = vpop.permute.xlu0 %12405  ;;  %v10854_v8 = vpack.c.bf16 %v1138_v6, %v15393_v45  ;;  %v10902_v22 = vpack.c.bf16 %v1136_v24, %v15686_v13  ;;  %v10904_v25 = vpack.c.bf16 %v1137_v50, %v15581_v11  ;;  %v20361_v59 = vunpack.i.h.bf16 %v15674_v63 }
 0x1c7   :  { %v12407_v1 = vunpack.i.l.bf16 %v12406_v0  ;;  %v12408_v49 = vunpack.i.h.bf16 %v12406_v0  ;;  %v12412_v61 = vunpack.i.l.bf16 %v15674_v63  ;;  %v20658_v23 = vunpack.i.l.bf16 %v15208_v16 }
 0x1c8   :  { %10855 = vmatprep.subr.bf16.mxu0 %v10854_v8  ;;  %10903 = vmatprep.subr.bf16.mxu1 %v10902_v22  ;;  %v20659_v50 = vunpack.i.h.bf16 %v15185_v29 }
 0x1c9   :  { %10857 = vmatpush1.bf16.msra.mxu0 %v10856_v28  ;;  %10905 = vmatpush1.bf16.msra.mxu1 %v10904_v25  ;;  %v15693_v36 = vpop.permute.xlu1 %12420  ;;  %v1320_v20 = vsel %vm229_vm1, %v20658_v23, %v12383_v33  ;;  %v1216_v24 = vsel %vm492_vm4, %v12412_v61, %v20361_v59  ;;  %v1218_v22 = vsel %vm492_vm4, %v12407_v1, %v12408_v49 }
 0x1ca   :  { %v20366_v27 = vunpack.i.l.bf16 %v15693_v36  ;;  %v12416_v4 = vpop.permute.xlu0 %12415  ;;  %v1219_v6 = vsel %vm492_vm4, %v20659_v50, %v12407_v1 }
 0x1cb   :  { %v12418_v53 = vunpack.i.h.bf16 %v12416_v4  ;;  %v12417_v30 = vunpack.i.l.bf16 %v12416_v4  ;;  %v1217_v4 = vsel %vm492_vm4, %v12408_v49, %v12412_v61 }
 0x1cc   :  { %v15710_v0 = vpop.f32.mrb[0].mxu0 }
 0x1cd   :  { %20660 = vst [vmem:[#allocation20_spill] sm:$0xff] %v15710_v0  ;;  %v1318_v16 = vsel %vm229_vm1, %v12417_v30, %v12418_v53  ;;  %v15714_v8 = vpop.permute.xlu1 %12430  ;;  %v1319_v29 = vsel %vm229_vm1, %v12383_v33, %v12417_v30  ;;  %v1317_v28 = vsel %vm229_vm1, %v12418_v53, %v20366_v27  ;;  %v15724_v25 = vpop.f32.mrb[1].mxu0  ;;  %v10860_v33 = vpack.c.bf16 %v1320_v20, %v1219_v6 }
 0x1ce   :  { %20661 = vst [vmem:[#allocation21_spill] sm:$0xff] %v15724_v25  ;;  %v20369_v23 = vunpack.i.l.bf16 %v15714_v8  ;;  %v12426_v50 = vpop.permute.xlu0 %12425  ;;  %v10858_v59 = vpack.c.bf16 %v1319_v29, %v1218_v22  ;;  %v10906_v35 = vpack.c.bf16 %v1317_v28, %v1216_v24  ;;  %v15729_v12 = vpop.f32.mrb[0].mxu1  ;;  %v10908_v30 = vpack.c.bf16 %v1318_v16, %v1217_v4 }
 0x1cf   :  { %v12428_v1 = vunpack.i.h.bf16 %v12426_v50  ;;  %v12427_v26 = vunpack.i.l.bf16 %v12426_v50  ;;  %v15731_v51 = vpop.f32.mrb[1].mxu1  ;;  %v20662_v53 = vunpack.i.l.bf16 %v15231_v47  ;;  %v20667_v25 = vunpack.i.l.bf16 %v15358_v37 }
 0x1d0   :  { %10859 = vmatprep.subr.bf16.mxu0 %v10858_v59  ;;  %10907 = vmatprep.subr.bf16.mxu1 %v10906_v35  ;;  %v15751_v35 = vld [vmem:[%s20258_s0 + $0x90] sm:$0xff] }
 0x1d1   :  { %v1400_v27 = vsel %vm310_vm2, %v20662_v53, %v12393_v41  ;;  %v1398_v49 = vsel %vm310_vm2, %v12427_v26, %v12428_v1  ;;  %10861 = vmatpush1.bf16.msra.mxu0 %v10860_v33  ;;  %10909 = vmatpush1.bf16.msra.mxu1 %v10908_v30  ;;  %v15739_v61 = vpop.permute.xlu1 %12440  ;;  %v1399_v20 = vsel %vm310_vm2, %v12393_v41, %v12427_v26  ;;  %v12403_v26 = vunpack.i.h.bf16 %v15653_v57 }
 0x1d2   :  { %v1397_v47 = vsel %vm310_vm2, %v12428_v1, %v20369_v23  ;;  %v12436_v6 = vpop.permute.xlu0 %12435  ;;  %v10862_v24 = vpack.c.bf16 %v15581_v11, %v1399_v20  ;;  %v10864_v16 = vpack.c.bf16 %v15393_v45, %v1400_v27  ;;  %v10912_v22 = vpack.c.bf16 %v15686_v13, %v1398_v49 }
 0x1d3   :  { %v10910_v59 = vpack.c.bf16 %v15751_v35, %v1397_v47  ;;  %v20368_v41 = vunpack.i.l.bf16 %v15739_v61  ;;  %v12438_v29 = vunpack.i.h.bf16 %v12436_v6  ;;  %v12437_v28 = vunpack.i.l.bf16 %v12436_v6 }
 0x1d4   :  { %10863 = vmatprep.subr.bf16.mxu0 %v10862_v24  ;;  %v20663_v30 = vunpack.i.l.bf16 %v15261_v5  ;;  %v20664_v5 = vunpack.i.h.bf16 %v15285_v10  ;;  %v12433_v10 = vunpack.i.h.bf16 %v15714_v8 }
 0x1d5   :  { %10911 = vmatprep.subr.bf16.mxu1 %v10910_v59  ;;  %10865 = vmatpush1.bf16.msra.mxu0 %v10864_v16  ;;  %v15758_v4 = vpop.permute.xlu1 %12450  ;;  %v1498_v49 = vsel %vm411_vm3, %v12403_v26, %v12437_v28  ;;  %v1496_v20 = vsel %vm411_vm3, %v12438_v29, %v20368_v41 }
 0x1d6   :  { %10913 = vmatpush1.bf16.msra.mxu1 %v10912_v22  ;;  %v20367_v50 = vunpack.i.h.bf16 %v15758_v4  ;;  %v12452_v1 = vunpack.i.l.bf16 %v15758_v4  ;;  %v12446_v33 = vpop.permute.xlu0 %12445  ;;  %v1499_v53 = vsel %vm411_vm3, %v20663_v30, %v12403_v26  ;;  %v1497_v26 = vsel %vm411_vm3, %v12437_v28, %v12438_v29 }
 0x1d7   :  { %v12448_v45 = vunpack.i.h.bf16 %v12446_v33  ;;  %v12447_v27 = vunpack.i.l.bf16 %v12446_v33 }
 0x1d8   :  { %v1576_v47 = vsel %vm492_vm4, %v12452_v1, %v20367_v50 }
 0x1d9   :  { %v1577_v6 = vsel %vm492_vm4, %v12448_v45, %v12452_v1  ;;  %v1579_v24 = vsel %vm492_vm4, %v20664_v5, %v12447_v27  ;;  %v15782_v59 = vpop.permute.xlu1 %12460  ;;  %v1578_v16 = vsel %vm492_vm4, %v12447_v27, %v12448_v45  ;;  %v10914_v22 = vpack.c.bf16 %v1576_v47, %v1496_v20 }
 0x1da   :  { %v12456_v33 = vpop.permute.xlu0 %12455  ;;  %v10866_v30 = vpack.c.bf16 %v1578_v16, %v1498_v49  ;;  %v10868_v50 = vpack.c.bf16 %v1579_v24, %v1499_v53  ;;  %v10916_v41 = vpack.c.bf16 %v1577_v6, %v1497_v26  ;;  %v12423_v1 = vunpack.i.h.bf16 %v15693_v36 }
 0x1db   :  { %10915 = vmatprep.subr.bf16.mxu1 %v10914_v22  ;;  %v12457_v23 = vunpack.i.l.bf16 %v12456_v33  ;;  %v20370_v5 = vunpack.i.l.bf16 %v15782_v59  ;;  %v12458_v0 = vunpack.i.h.bf16 %v12456_v33  ;;  %v20665_v49 = vunpack.i.l.bf16 %v15314_v42 }
 0x1dc   :  { %10867 = vmatprep.subr.bf16.mxu0 %v10866_v30  ;;  %10917 = vmatpush1.bf16.msra.mxu1 %v10916_v41  ;;  %v20666_v47 = vunpack.i.l.bf16 %v15326_v3 }
 0x1dd   :  { %10869 = vmatpush1.bf16.msra.mxu0 %v10868_v50  ;;  %v15791_v45 = vpop.permute.xlu1 %12470  ;;  %v1680_v20 = vsel %vm229_vm1, %v20665_v49, %v12423_v1  ;;  %v12443_v50 = vunpack.i.h.bf16 %v15739_v61  ;;  %v1679_v41 = vsel %vm229_vm1, %v12423_v1, %v12457_v23  ;;  %v1677_v3 = vsel %vm229_vm1, %v12458_v0, %v20370_v5 }
 0x1de   :  { %v12472_v29 = vunpack.i.l.bf16 %v15791_v45  ;;  %v12466_v28 = vpop.permute.xlu0 %12465  ;;  %v1760_v6 = vsel %vm310_vm2, %v20666_v47, %v12433_v10  ;;  %v1678_v26 = vsel %vm229_vm1, %v12457_v23, %v12458_v0  ;;  %v12473_v37 = vunpack.i.h.bf16 %v15791_v45 }
 0x1df   :  { %v12468_v27 = vunpack.i.h.bf16 %v12466_v28  ;;  %v12467_v53 = vunpack.i.l.bf16 %v12466_v28  ;;  %v1859_v5 = vsel %vm411_vm3, %v20667_v25, %v12443_v50 }
 0x1e1   :  { %v1758_v24 = vsel %vm310_vm2, %v12467_v53, %v12468_v27  ;;  %v15807_v16 = vpop.permute.xlu1 %12480  ;;  %v1759_v42 = vsel %vm310_vm2, %v12433_v10, %v12467_v53  ;;  %v1757_v22 = vsel %vm310_vm2, %v12468_v27, %v12472_v29  ;;  %v10872_v53 = vpack.c.bf16 %v1760_v6, %v1680_v20 }
 0x1e2   :  { %v12482_v33 = vunpack.i.l.bf16 %v15807_v16  ;;  %v12476_v30 = vpop.permute.xlu0 %12475  ;;  %v10870_v1 = vpack.c.bf16 %v1759_v42, %v1679_v41  ;;  %v10918_v28 = vpack.c.bf16 %v1757_v22, %v1677_v3  ;;  %v10920_v47 = vpack.c.bf16 %v1758_v24, %v1678_v26  ;;  %v15839_v24 = vld [vmem:[%s20258_s0 + $0x98] sm:$0xff] }
 0x1e3   :  { %v12478_v49 = vunpack.i.h.bf16 %v12476_v30  ;;  %v12477_v10 = vunpack.i.l.bf16 %v12476_v30  ;;  %v10876_v22 = vpack.c.bf16 %v1859_v5, %v15581_v11 }
 0x1e4   :  { %10871 = vmatprep.subr.bf16.mxu0 %v10870_v1  ;;  %10919 = vmatprep.subr.bf16.mxu1 %v10918_v28 }
 0x1e5   :  { %v1857_v27 = vsel %vm411_vm3, %v12477_v10, %v12478_v49  ;;  %10873 = vmatpush1.bf16.msra.mxu0 %v10872_v53  ;;  %10921 = vmatpush1.bf16.msra.mxu1 %v10920_v47  ;;  %v12491_v0 = vpop.permute.xlu1 %12490  ;;  %v1858_v23 = vsel %vm411_vm3, %v12443_v50, %v12477_v10  ;;  %v1856_v20 = vsel %vm411_vm3, %v12478_v49, %v12482_v33  ;;  %v12463_v50 = vunpack.i.h.bf16 %v15782_v59 }
 0x1e6   :  { %v12492_v6 = vunpack.i.l.bf16 %v12491_v0  ;;  %v12486_v25 = vpop.permute.xlu0 %12485  ;;  %v10874_v41 = vpack.c.bf16 %v1858_v23, %v15686_v13  ;;  %v10922_v42 = vpack.c.bf16 %v1856_v20, %v15839_v24  ;;  %v10924_v26 = vpack.c.bf16 %v1857_v27, %v15751_v35 }
 0x1e7   :  { %v12487_v3 = vunpack.i.l.bf16 %v12486_v25  ;;  %v12493_v30 = vunpack.i.h.bf16 %v12491_v0  ;;  %v12488_v1 = vunpack.i.h.bf16 %v12486_v25  ;;  %v20668_v53 = vunpack.i.l.bf16 %v15409_v62 }
 0x1e8   :  { %10875 = vmatprep.subr.bf16.mxu0 %v10874_v41  ;;  %10923 = vmatprep.subr.bf16.mxu1 %v10922_v42  ;;  %v313_v10 = vsel %vm310_vm2, %v12473_v37, %v12492_v6  ;;  %v20669_v23 = vunpack.i.l.bf16 %v15381_v54 }
 0x1e9   :  { %10877 = vmatpush1.bf16.msra.mxu0 %v10876_v22  ;;  %10925 = vmatpush1.bf16.msra.mxu1 %v10924_v26  ;;  %v1922_v28 = vpop.permute.xlu1 %1921  ;;  %v232_v49 = vsel %vm229_vm1, %v12463_v50, %v12487_v3  ;;  %v314_v5 = vsel %vm310_vm2, %v20668_v53, %v12473_v37  ;;  %v20670_v37 = vunpack.i.l.bf16 %v13893_v56  ;;  %v20671_v22 = vunpack.i.l.bf16 %v13891_v55 }
 0x1ea   :  { %v1920_v47 = vpop.permute.xlu0 %1919  ;;  %v233_v20 = vsel %vm229_vm1, %v20669_v23, %v12463_v50  ;;  %v10926_v25 = vpack.c.bf16 %v313_v10, %v232_v49  ;;  %v312_v54 = vsel %vm310_vm2, %v12492_v6, %v12493_v30  ;;  %v231_v50 = vsel %vm229_vm1, %v12487_v3, %v12488_v1  ;;  %v13584_v49 = vld [vmem:[%s20259_s1 + $0x8] sm:$0xff] }
 0x1eb   :  { %v1938_v27 = vsel %vm492_vm4, %v1920_v47, %v1922_v28  ;;  %v1939_v0 = vsel %vm492_vm4, %v15447_v19, %v1920_v47  ;;  %v10928_v41 = vpack.c.bf16 %v314_v5, %v233_v20  ;;  %v230_v42 = vsel %vm229_vm1, %v12488_v1, %v20670_v37 }
 0x1ec   :  { %2957 = vmatprep.subr.mxu0 %v1938_v27  ;;  %v311_v19 = vsel %vm310_vm2, %v12493_v30, %v20671_v22  ;;  %v12483_v6 = vunpack.i.h.bf16 %v15807_v16  ;;  %v10976_v1 = vpack.c.bf16 %v312_v54, %v231_v50  ;;  %v20713_v16 = vld [vmem:[#allocation17_spill] sm:$0xff] }
 0x1ed   :  { %2958 = vmatpush1.msra.mxu0 %v1939_v0  ;;  %v15862_v62 = vpop.permute.xlu1 %1925  ;;  %v10974_v3 = vpack.c.bf16 %v311_v19, %v230_v42 }
 0x1ee   :  { %v1924_v26 = vpop.permute.xlu0 %1923  ;;  %2974 = vmatmul.mubr.f32.vlgmr.msra.gmra.mrb[6].mxu0 %v15458_v17  ;;  %10927 = vmatprep.subr.bf16.mxu0 %v10926_v25  ;;  %v20673_v25 = vunpack.i.l.bf16 %v13931_v18 }
 0x1ef   :  { %10929 = vmatpush1.bf16.msra.mxu0 %v10928_v41  ;;  %v1936_v56 = vsel %vm492_vm4, %v1924_v26, %v15862_v62  ;;  %v1937_v55 = vsel %vm492_vm4, %v1922_v28, %v1924_v26  ;;  %10485 = vmatprep.mubr.msk.f32.mxu0 %vm2479_vm0, %v13584_v49  ;;  %v20672_v28 = vunpack.i.l.bf16 %v15478_v60  ;;  %v20674_v26 = vunpack.i.l.bf16 %v15526_v39 }
 0x1f0   :  { %3028 = vmatprep.subr.mxu1 %v1936_v56 }
 0x1f1   :  { %3029 = vmatpush1.msra.mxu1 %v1937_v55  ;;  %v12501_v30 = vpop.permute.xlu1 %12500  ;;  %v414_v47 = vsel %vm411_vm3, %v20672_v28, %v12483_v6 }
 0x1f2   :  { %v12496_v10 = vpop.permute.xlu0 %12495  ;;  %3045 = vmatmul.mubr.f32.vlgmr.msra.gmra.mrb[6].mxu1 %v15458_v17  ;;  %10975 = vmatprep.subr.bf16.mxu1 %v10974_v3  ;;  %v12503_v27 = vunpack.i.h.bf16 %v12501_v30  ;;  %v12502_v0 = vunpack.i.l.bf16 %v12501_v30  ;;  %v10932_v54 = vpack.c.bf16 %v414_v47, %v15581_v11 }
 0x1f3   :  { %v12498_v53 = vunpack.i.h.bf16 %v12496_v10  ;;  %v12497_v5 = vunpack.i.l.bf16 %v12496_v10  ;;  %10977 = vmatpush1.bf16.msra.mxu1 %v10976_v1  ;;  %10486 = vmatprep.mubr.msk.f32.mxu1 %vm2479_vm0, %v13584_v49  ;;  %v20675_v49 = vunpack.i.h.bf16 %v15502_v52 }
 0x1f4   :  { %v494_v56 = vsel %vm492_vm4, %v12502_v0, %v12503_v27 }
 0x1f5   :  { %v412_v23 = vsel %vm411_vm3, %v12497_v5, %v12498_v53  ;;  %v12511_v20 = vpop.permute.xlu1 %12510  ;;  %v413_v17 = vsel %vm411_vm3, %v12483_v6, %v12497_v5  ;;  %v431_v41 = vsel %vm411_vm3, %v12498_v53, %v20673_v25  ;;  %v20676_v5 = vunpack.i.l.bf16 %v15547_v40 }
 0x1f6   :  { %v12513_v37 = vunpack.i.h.bf16 %v12511_v20  ;;  %v12512_v42 = vunpack.i.l.bf16 %v12511_v20  ;;  %v15901_v60 = vpop.permute.xlu0 %12505  ;;  %v10930_v22 = vpack.c.bf16 %v413_v17, %v15686_v13  ;;  %v10978_v19 = vpack.c.bf16 %v431_v41, %v15255_v32 }
 0x1f7   :  { %v10980_v50 = vpack.c.bf16 %v412_v23, %v15751_v35  ;;  %v495_v32 = vsel %vm492_vm4, %v20675_v49, %v12502_v0  ;;  %v12507_v11 = vunpack.i.l.bf16 %v15901_v60  ;;  %v20677_v17 = vunpack.i.l.bf16 %v13963_v46 }
 0x1f8   :  { %v596_v18 = vsel %vm229_vm1, %v20674_v26, %v12512_v42  ;;  %10931 = vmatprep.subr.bf16.mxu0 %v10930_v22  ;;  %10979 = vmatprep.subr.bf16.mxu1 %v10978_v19  ;;  %v595_v55 = vsel %vm229_vm1, %v12512_v42, %v12513_v37  ;;  %v20678_v25 = vunpack.i.h.bf16 %v13965_v48  ;;  %v20679_v48 = vunpack.i.l.bf16 %v15625_v2 }
 0x1f9   :  { %10933 = vmatpush1.bf16.msra.mxu0 %v10932_v54  ;;  %10981 = vmatpush1.bf16.msra.mxu1 %v10980_v50  ;;  %v12521_v39 = vpop.permute.xlu1 %12520  ;;  %v10934_v6 = vpack.c.bf16 %v595_v55, %v494_v56  ;;  %v10936_v10 = vpack.c.bf16 %v596_v18, %v495_v32  ;;  %v512_v40 = vsel %vm492_vm4, %v12507_v11, %v20677_v17  ;;  %v12508_v50 = vunpack.i.h.bf16 %v15901_v60 }
 0x1fa   :  { %v12523_v3 = vunpack.i.h.bf16 %v12521_v39  ;;  %v12522_v30 = vunpack.i.l.bf16 %v12521_v39  ;;  %v15920_v1 = vpop.permute.xlu0 %12515  ;;  %v493_v42 = vsel %vm492_vm4, %v12503_v27, %v12507_v11  ;;  %v20680_v27 = vunpack.i.l.bf16 %v15569_v7 }
 0x1fb   :  { %v12517_v53 = vunpack.i.l.bf16 %v15920_v1  ;;  %10935 = vmatprep.subr.bf16.mxu0 %v10934_v6  ;;  %v12518_v28 = vunpack.i.h.bf16 %v15920_v1  ;;  %v20681_v60 = vunpack.i.l.bf16 %v15637_v44  ;;  %v20682_v11 = vunpack.i.h.bf16 %v13999_v9 }
 0x1fc   :  { %v676_v52 = vsel %vm310_vm2, %v20676_v5, %v12522_v30  ;;  %v675_v47 = vsel %vm310_vm2, %v12522_v30, %v12523_v3  ;;  %v20683_v44 = vunpack.i.h.bf16 %v15597_v21 }
 0x1fd   :  { %v594_v0 = vsel %vm229_vm1, %v12513_v37, %v12517_v53  ;;  %10937 = vmatpush1.bf16.msra.mxu0 %v10936_v10  ;;  %v12531_v23 = vpop.permute.xlu1 %12530  ;;  %v10938_v20 = vpack.c.bf16 %v15751_v35, %v675_v47  ;;  %v593_v41 = vsel %vm229_vm1, %v12517_v53, %v20678_v25  ;;  %v10940_v54 = vpack.c.bf16 %v15686_v13, %v676_v52 }
 0x1fe   :  { %v12532_v22 = vunpack.i.l.bf16 %v12531_v23  ;;  %v12526_v19 = vpop.permute.xlu0 %12525  ;;  %v10982_v37 = vpack.c.bf16 %v593_v41, %v512_v40  ;;  %v10984_v18 = vpack.c.bf16 %v594_v0, %v493_v42  ;;  %v956_v56 = vsel %vm229_vm1, %v20679_v48, %v12518_v28  ;;  %v20686_v48 = vld [vmem:[#allocation8_spill] sm:$0xff] }
 0x1ff   :  { %v12528_v26 = vunpack.i.h.bf16 %v12526_v19  ;;  %v12527_v46 = vunpack.i.l.bf16 %v12526_v19  ;;  %10939 = vmatprep.subr.bf16.mxu0 %v10938_v20  ;;  %v12533_v55 = vunpack.i.h.bf16 %v12531_v23  ;;  %v855_v53 = vsel %vm492_vm4, %v20683_v44, %v12508_v50 }
 0x200   :  { %v775_v49 = vsel %vm411_vm3, %v20680_v27, %v12532_v22  ;;  %10983 = vmatprep.subr.bf16.mxu1 %v10982_v37  ;;  %v20685_v40 = vunpack.i.h.bf16 %v14020_v31 }
 0x201   :  { %v674_v13 = vsel %vm310_vm2, %v12523_v3, %v12527_v46  ;;  %v1036_v32 = vsel %vm310_vm2, %v20681_v60, %v12528_v26  ;;  %10941 = vmatpush1.bf16.msra.mxu0 %v10940_v54  ;;  %10985 = vmatpush1.bf16.msra.mxu1 %v10984_v18  ;;  %v12541_v2 = vpop.permute.xlu1 %12540  ;;  %v673_v7 = vsel %vm310_vm2, %v12527_v46, %v20682_v11  ;;  %v20688_v60 = vld [vmem:[#allocation9_spill] sm:$0xff] }
 0x202   :  { %v12543_v39 = vunpack.i.h.bf16 %v12541_v2  ;;  %v12542_v6 = vunpack.i.l.bf16 %v12541_v2  ;;  %v12536_v30 = vpop.permute.xlu0 %12535  ;;  %v10986_v10 = vpack.c.bf16 %v15332_v14, %v673_v7  ;;  %v10988_v3 = vpack.c.bf16 %v15839_v24, %v674_v13 }
 0x203   :  { %v12537_v5 = vunpack.i.l.bf16 %v12536_v30  ;;  %v10948_v52 = vpack.c.bf16 %v1036_v32, %v956_v56  ;;  %v774_v47 = vsel %vm411_vm3, %v12532_v22, %v12533_v55  ;;  %v20684_v14 = vunpack.i.h.bf16 %v14040_v58 }
 0x204   :  { %v853_v9 = vsel %vm492_vm4, %v12542_v6, %v12543_v39  ;;  %10987 = vmatprep.subr.bf16.mxu1 %v10986_v10  ;;  %v854_v0 = vsel %vm492_vm4, %v12508_v50, %v12542_v6  ;;  %v10944_v41 = vpack.c.bf16 %v855_v53, %v775_v49  ;;  %v12538_v46 = vunpack.i.h.bf16 %v12536_v30 }
 0x205   :  { %v872_v21 = vsel %vm492_vm4, %v12543_v39, %v20684_v14  ;;  %v773_v23 = vsel %vm411_vm3, %v12533_v55, %v12537_v5  ;;  %10989 = vmatpush1.bf16.msra.mxu1 %v10988_v3  ;;  %v12551_v20 = vpop.permute.xlu1 %12550  ;;  %v10942_v17 = vpack.c.bf16 %v854_v0, %v774_v47  ;;  %v792_v25 = vsel %vm411_vm3, %v12537_v5, %v20685_v40 }
 0x206   :  { %v12553_v42 = vunpack.i.h.bf16 %v12551_v20  ;;  %v12552_v22 = vunpack.i.l.bf16 %v12551_v20  ;;  %v12546_v19 = vpop.permute.xlu0 %12545  ;;  %v10990_v37 = vpack.c.bf16 %v872_v21, %v792_v25  ;;  %v10992_v58 = vpack.c.bf16 %v853_v9, %v773_v23  ;;  %v20691_v9 = vld [vmem:[#allocation10_spill] sm:$0xff] }
 0x207   :  { %v12548_v54 = vunpack.i.h.bf16 %v12546_v19  ;;  %v12547_v50 = vunpack.i.l.bf16 %v12546_v19  ;;  %10943 = vmatprep.subr.bf16.mxu0 %v10942_v17  ;;  %v20687_v56 = vunpack.i.l.bf16 %v20686_v48  ;;  %v20689_v32 = vunpack.i.l.bf16 %v20688_v60  ;;  %v16025_v17 = vld [vmem:[%s20258_s0 + $0xa0] sm:$0xff] }
 0x208   :  { %v1034_v18 = vsel %vm310_vm2, %v12552_v22, %v12553_v42  ;;  %10991 = vmatprep.subr.bf16.mxu1 %v10990_v37  ;;  %10945 = vmatpush1.bf16.msra.mxu0 %v10944_v41  ;;  %v1035_v31 = vsel %vm310_vm2, %v12528_v26, %v12552_v22  ;;  %v20690_v10 = vunpack.i.l.bf16 %v15653_v57  ;;  %v20692_v47 = vunpack.i.l.bf16 %v20691_v9 }
 0x209   :  { %v1033_v55 = vsel %vm310_vm2, %v12553_v42, %v20687_v56  ;;  %v954_v27 = vsel %vm229_vm1, %v12547_v50, %v12548_v54  ;;  %10993 = vmatpush1.bf16.msra.mxu1 %v10992_v58  ;;  %v12561_v49 = vpop.permute.xlu1 %12560  ;;  %v955_v13 = vsel %vm229_vm1, %v12518_v28, %v12547_v50  ;;  %v953_v26 = vsel %vm229_vm1, %v12548_v54, %v20689_v32 }
 0x20a   :  { %v12556_v2 = vpop.permute.xlu0 %12555  ;;  %v10946_v11 = vpack.c.bf16 %v1035_v31, %v955_v13  ;;  %v10994_v7 = vpack.c.bf16 %v1033_v55, %v953_v26  ;;  %v10996_v30 = vpack.c.bf16 %v1034_v18, %v954_v27  ;;  %v1135_v3 = vsel %vm411_vm3, %v20690_v10, %v12538_v46 }
 0x20b   :  { %v12558_v39 = vunpack.i.h.bf16 %v12556_v2  ;;  %v12557_v6 = vunpack.i.l.bf16 %v12556_v2  ;;  %v12563_v1 = vunpack.i.h.bf16 %v12561_v49  ;;  %v12562_v28 = vunpack.i.l.bf16 %v12561_v49  ;;  %v20696_v49 = vld [vmem:[#allocation11_spill] sm:$0xff] }
 0x20c   :  { %10947 = vmatprep.subr.bf16.mxu0 %v10946_v11  ;;  %10995 = vmatprep.subr.bf16.mxu1 %v10994_v7  ;;  %v20693_v25 = vunpack.i.l.bf16 %v15693_v36  ;;  %v20695_v31 = vunpack.i.l.bf16 %v15714_v8  ;;  %v20697_v13 = vunpack.i.l.bf16 %v20696_v49  ;;  %v20698_v8 = vunpack.i.h.bf16 %v14188_v15 }
 0x20d   :  { %v1133_v44 = vsel %vm411_vm3, %v12557_v6, %v12558_v39  ;;  %10949 = vmatpush1.bf16.msra.mxu0 %v10948_v52  ;;  %10997 = vmatpush1.bf16.msra.mxu1 %v10996_v30  ;;  %v12571_v53 = vpop.permute.xlu1 %12570  ;;  %v1134_v5 = vsel %vm411_vm3, %v12538_v46, %v12557_v6  ;;  %v1152_v57 = vsel %vm411_vm3, %v12558_v39, %v20692_v47  ;;  %v20699_v30 = vld [vmem:[#allocation12_spill] sm:$0xff] }
 0x20e   :  { %v12573_v0 = vunpack.i.h.bf16 %v12571_v53  ;;  %v12572_v14 = vunpack.i.l.bf16 %v12571_v53  ;;  %v16017_v21 = vpop.permute.xlu0 %12565  ;;  %v10950_v23 = vpack.c.bf16 %v1134_v5, %v15839_v24  ;;  %v10998_v20 = vpack.c.bf16 %v1152_v57, %v15405_v38 }
 0x20f   :  { %v10952_v52 = vpack.c.bf16 %v1135_v3, %v15751_v35  ;;  %v11000_v40 = vpack.c.bf16 %v1133_v44, %v16025_v17  ;;  %v1214_v42 = vsel %vm492_vm4, %v12562_v28, %v12563_v1  ;;  %v20694_v35 = vunpack.i.h.bf16 %v15674_v63  ;;  %v20701_v44 = vld [vmem:[#allocation19_spill] sm:$0xff] }
 0x210   :  { %v1316_v41 = vsel %vm229_vm1, %v20693_v25, %v12572_v14  ;;  %10951 = vmatprep.subr.bf16.mxu0 %v10950_v23  ;;  %10999 = vmatprep.subr.bf16.mxu1 %v10998_v20  ;;  %v1315_v38 = vsel %vm229_vm1, %v12572_v14, %v12573_v0  ;;  %v12567_v19 = vunpack.i.l.bf16 %v16017_v21  ;;  %v20700_v10 = vunpack.i.h.bf16 %v20699_v30  ;;  %v13586_v23 = vld [vmem:[%s20258_s0 + $0xa8] sm:$0xff] }
 0x211   :  { %v1215_v22 = vsel %vm492_vm4, %v20694_v35, %v12562_v28  ;;  %10953 = vmatpush1.bf16.msra.mxu0 %v10952_v52  ;;  %11001 = vmatpush1.bf16.msra.mxu1 %v11000_v40  ;;  %v12581_v36 = vpop.permute.xlu1 %12580  ;;  %v10954_v37 = vpack.c.bf16 %v1315_v38, %v1214_v42  ;;  %v20703_v40 = vld [vmem:[#allocation13_spill] sm:$0xff]  ;;  %v20705_v38 = vld [vmem:[#allocation14_spill] sm:$0xff] }
 0x212   :  { %v12583_v58 = vunpack.i.h.bf16 %v12581_v36  ;;  %v12582_v54 = vunpack.i.l.bf16 %v12581_v36  ;;  %v16041_v50 = vpop.permute.xlu0 %12575  ;;  %v10956_v46 = vpack.c.bf16 %v1316_v41, %v1215_v22  ;;  %v1232_v60 = vsel %vm492_vm4, %v12567_v19, %v20697_v13 }
 0x213   :  { %v12577_v18 = vunpack.i.l.bf16 %v16041_v50  ;;  %10955 = vmatprep.subr.bf16.mxu0 %v10954_v37  ;;  %v1213_v26 = vsel %vm492_vm4, %v12563_v1, %v12567_v19  ;;  %v12568_v1 = vunpack.i.h.bf16 %v16017_v21  ;;  %v12578_v5 = vunpack.i.h.bf16 %v16041_v50 }
 0x214   :  { %v1396_v63 = vsel %vm310_vm2, %v20695_v31, %v12582_v54  ;;  %v1395_v48 = vsel %vm310_vm2, %v12582_v54, %v12583_v58  ;;  %v20704_v25 = vunpack.i.h.bf16 %v20703_v40  ;;  %v20706_v35 = vunpack.i.h.bf16 %v20705_v38  ;;  %v13588_v38 = vld [vmem:[%s20259_s1] sm:$0xff] }
 0x215   :  { %v1314_v56 = vsel %vm229_vm1, %v12573_v0, %v12577_v18  ;;  %10957 = vmatpush1.bf16.msra.mxu0 %v10956_v46  ;;  %v12586_v55 = vpop.permute.xlu1 %12585  ;;  %v10958_v27 = vpack.c.bf16 %v16025_v17, %v1395_v48  ;;  %v1313_v32 = vsel %vm229_vm1, %v12577_v18, %v20698_v8  ;;  %v10960_v7 = vpack.c.bf16 %v15839_v24, %v1396_v63 }
 0x216   :  { %v1390_v2 = vpop.permute.xlu0 %1389  ;;  %v11002_v11 = vpack.c.bf16 %v1313_v32, %v1232_v60  ;;  %v12588_v39 = vunpack.i.h.bf16 %v12586_v55  ;;  %v12587_v6 = vunpack.i.l.bf16 %v12586_v55  ;;  %v11004_v28 = vpack.c.bf16 %v1314_v56, %v1213_v26 }
 0x217   :  { %v1393_v3 = vsel %vm310_vm2, %v1390_v2, %v20700_v10  ;;  %10959 = vmatprep.subr.bf16.mxu0 %v10958_v27  ;;  %v1394_v15 = vsel %vm310_vm2, %v12583_v58, %v1390_v2  ;;  %v20702_v0 = vunpack.i.l.bf16 %v15739_v61  ;;  %v20707_v36 = vunpack.i.h.bf16 %v15758_v4 }
 0x218   :  { %11003 = vmatprep.subr.bf16.mxu1 %v11002_v11  ;;  %v11006_v53 = vpack.c.bf16 %v20701_v44, %v1393_v3  ;;  %v11008_v20 = vpack.c.bf16 %v13586_v23, %v1394_v15  ;;  %v1494_v52 = vsel %vm411_vm3, %v12587_v6, %v12588_v39  ;;  %v20708_v4 = vunpack.i.l.bf16 %v15782_v59 }
 0x219   :  { %10961 = vmatpush1.bf16.msra.mxu0 %v10960_v7  ;;  %11005 = vmatpush1.bf16.msra.mxu1 %v11004_v28  ;;  %v12591_v24 = vpop.permute.xlu1 %12590  ;;  %v1495_v14 = vsel %vm411_vm3, %v20702_v0, %v12587_v6  ;;  %v1575_v37 = vsel %vm492_vm4, %v20707_v36, %v12568_v1  ;;  %v20709_v6 = vld [vmem:[#allocation15_spill] sm:$0xff]  ;;  %v20711_v28 = vld [vmem:[#allocation16_spill] sm:$0xff] }
 0x21a   :  { %v12593_v9 = vunpack.i.h.bf16 %v12591_v24  ;;  %v12592_v47 = vunpack.i.l.bf16 %v12591_v24  ;;  %v1492_v57 = vpop.permute.xlu0 %1491  ;;  %11007 = vmatprep.subr.bf16.mxu1 %v11006_v53  ;;  %v10964_v56 = vpack.c.bf16 %v1575_v37, %v1495_v14  ;;  %v1676_v49 = vsel %vm229_vm1, %v20708_v4, %v12578_v5 }
 0x21b   :  { %v1493_v21 = vsel %vm411_vm3, %v12588_v39, %v1492_v57  ;;  %v1512_v41 = vsel %vm411_vm3, %v1492_v57, %v20704_v25  ;;  %v20710_v30 = vunpack.i.l.bf16 %v20709_v6  ;;  %v20712_v15 = vunpack.i.l.bf16 %v20711_v28  ;;  %v20715_v25 = vld [vmem:[#allocation18_spill] sm:$0xff] }
 0x21c   :  { %v1573_v61 = vsel %vm492_vm4, %v12592_v47, %v12593_v9  ;;  %v1574_v42 = vsel %vm492_vm4, %v12568_v1, %v12592_v47  ;;  %v1592_v22 = vsel %vm492_vm4, %v12593_v9, %v20706_v35  ;;  %v16096_v19 = vpop.f32.mrb[2].mxu0  ;;  %v20375_v35 = vmov 0.0  }
 0x21d   :  { %v11012_v58 = vpack.c.bf16 %v1573_v61, %v1493_v21  ;;  %11009 = vmatpush1.bf16.msra.mxu1 %v11008_v20  ;;  %v12601_v54 = vpop.permute.xlu1 %12600  ;;  %v10962_v50 = vpack.c.bf16 %v1574_v42, %v1494_v52  ;;  %v11010_v46 = vpack.c.bf16 %v1592_v22, %v1512_v41  ;;  %v16102_v18 = vpop.f32.mrb[3].mxu0  ;;  %v20714_v20 = vunpack.i.l.bf16 %v20713_v16  ;;  %v13587_v21 = vld [vmem:[%s20258_s0 + $0xb0] sm:$0xff] }
 0x21e   :  { %v12603_v31 = vunpack.i.h.bf16 %v12601_v54  ;;  %v12602_v63 = vunpack.i.l.bf16 %v12601_v54  ;;  %v12596_v48 = vpop.permute.xlu0 %12595  ;;  %v20716_v22 = vlaneseq }
 0x21f   :  { %v12598_v55 = vunpack.i.h.bf16 %v12596_v48  ;;  %v12597_v27 = vunpack.i.l.bf16 %v12596_v48  ;;  %10963 = vmatprep.subr.bf16.mxu0 %v10962_v50  ;;  %11011 = vmatprep.subr.bf16.mxu1 %v11010_v46 }
 0x220   :  { %v1756_v13 = vsel %vm310_vm2, %v12472_v29, %v12602_v63  ;;  %10965 = vmatpush1.bf16.msra.mxu0 %v10964_v56  ;;  %v1755_v60 = vsel %vm310_vm2, %v12602_v63, %v12603_v31  ;;  %v16114_v8 = vpop.f32.mrb[2].mxu1  ;;  %v16165_v36 = vshrl.u32 %v20716_v22, 7 }
 0x221   :  { %11013 = vmatpush1.bf16.msra.mxu1 %v11012_v58  ;;  %v12606_v32 = vpop.permute.xlu1 %12605  ;;  %v1675_v26 = vsel %vm229_vm1, %v12578_v5, %v12597_v27  ;;  %v10968_v59 = vpack.c.bf16 %v1756_v13, %v1676_v49  ;;  %v16118_v2 = vpop.f32.mrb[3].mxu1  ;;  %v1674_v29 = vsel %vm229_vm1, %v12597_v27, %v12598_v55  ;;  %v1673_v44 = vsel %vm229_vm1, %v12598_v55, %v20712_v15  ;;  %v51_v58 = vld [vmem:[%s20267_s9] sm:$0xff]  ;;  %v20720_v27 = vld [vmem:[#allocation21_spill] sm:$0xff] }
 0x222   :  { %v12608_v11 = vunpack.i.h.bf16 %v12606_v32  ;;  %v12607_v7 = vunpack.i.l.bf16 %v12606_v32  ;;  %v1750_v45 = vpop.permute.xlu0 %1749  ;;  %v10966_v39 = vpack.c.bf16 %v1755_v60, %v1675_v26  ;;  %v16171_v37 = vsub.s32 3, %v16165_v36  ;;  %v20721_v49 = vld [vmem:[#allocation20_spill] sm:$0xff] }
 0x223   :  { %v1753_v10 = vsel %vm310_vm2, %v1750_v45, %v20710_v30  ;;  %v1754_v3 = vsel %vm310_vm2, %v12603_v31, %v1750_v45  ;;  %v16177_v54 = vsub.s32 1, %v16165_v36  ;;  %v16182_v46 = vsub.s32 0, %v16165_v36 }
 0x224   :  { %v1855_v53 = vsel %vm411_vm3, %v12482_v33, %v12607_v7  ;;  %v11016_v1 = vpack.c.bf16 %v1754_v3, %v1674_v29  ;;  %10967 = vmatprep.subr.bf16.mxu0 %v10966_v39  ;;  %v11014_v24 = vpack.c.bf16 %v1753_v10, %v1673_v44  ;;  %v1854_v5 = vsel %vm411_vm3, %v12607_v7, %v12608_v11 }
 0x225   :  { %10969 = vmatpush1.bf16.msra.mxu0 %v10968_v59  ;;  %v1928_v9 = vpop.permute.xlu1 %1927  ;;  %v10970_v47 = vpack.c.bf16 %v1854_v5, %v13586_v23  ;;  %v10972_v57 = vpack.c.bf16 %v1855_v53, %v16025_v17  ;;  %v16188_v63 = vrot.slane %v51_v58, %v16171_v37  ;;  %v16195_v55 = vrot.slane %v51_v58, %v16177_v54 }
 0x226   :  { %v1852_v0 = vpop.permute.xlu0 %1851  ;;  %11015 = vmatprep.subr.bf16.mxu1 %v11014_v24  ;;  %v1935_v42 = vsel %vm492_vm4, %v15862_v62, %v1928_v9  ;;  %v16168_v62 = vsub.s32 2, %v16165_v36  ;;  %v75_v32 = vsub.s32 4, %v16165_v36  ;;  %v83_v39 = vsub.s32 6, %v16165_v36 }
 0x227   :  { %v1853_v14 = vsel %vm411_vm3, %v12608_v11, %v1852_v0  ;;  %v1872_v33 = vsel %vm411_vm3, %v1852_v0, %v20714_v20  ;;  %11017 = vmatpush1.bf16.msra.mxu1 %v11016_v1  ;;  %10971 = vmatprep.subr.bf16.mxu0 %v10970_v47  ;;  %20718 = vst [vmem:[#allocation9_spill] sm:$0xff] %v16188_v63  ;;  %20719 = vst [vmem:[#allocation10_spill] sm:$0xff] %v16195_v55  ;;  %v79_v1 = vsub.s32 5, %v16165_v36 }
 0x228   :  { %v11020_v52 = vpack.c.bf16 %v1853_v14, %v13587_v21  ;;  %v11018_v23 = vpack.c.bf16 %v1872_v33, %v15593_v43  ;;  %v16185_v31 = vrot.slane %v51_v58, %v16168_v62  ;;  %v16205_v11 = vrot.slane %v51_v58, %v16182_v46 }
 0x229   :  { %10973 = vmatpush1.bf16.msra.mxu0 %v10972_v57  ;;  %v1932_v17 = vpop.permute.xlu1 %1931  ;;  %v87_v47 = vsub.s32 7, %v16165_v36 }
 0x22a   :  { %v1930_v40 = vpop.permute.xlu0 %1929  ;;  %11019 = vmatprep.subr.bf16.mxu1 %v11018_v23  ;;  %v1952_v41 = vsel %vm492_vm4, %v1932_v17, %v20715_v25  ;;  %20717 = vst [vmem:[#allocation8_spill] sm:$0xff] %v16185_v31  ;;  %20722 = vst [vmem:[#allocation11_spill] sm:$0xff] %v16205_v11 }
 0x22b   :  { %11021 = vmatpush1.bf16.msra.mxu1 %v11020_v52  ;;  %v1934_v61 = vsel %vm492_vm4, %v1928_v9, %v1930_v40  ;;  %v1933_v43 = vsel %vm492_vm4, %v1930_v40, %v1932_v17 }
 0x22c   :  { %3099 = vmatprep.subr.mxu0 %v1934_v61  ;;  %3170 = vmatprep.subr.mxu1 %v1952_v41 }
 0x22d   :  { %3100 = vmatpush1.msra.mxu0 %v1935_v42  ;;  %v16311_v42 = vld [vmem:[%s20267_s9 + $0x8] sm:$0xff] }
 0x22e   :  { %3116 = vmatmul.mubr.f32.vlgmr.msra.gmra.mrb[8].mxu0 %v13588_v38 }
 0x22f   :  { %3171 = vmatpush1.msra.mxu1 %v1933_v43  ;;  %4107 = vmatprep.mubr.f32.mxu0 %v20375_v35 }
 0x230   :  { %3187 = vmatmul.mubr.f32.vlgmr.msra.gmra.mrb[8].mxu1 %v13588_v38  ;;  %v16315_v38 = vrot.slane %v16311_v42, %v16182_v46 }
 0x231   :  { %4178 = vmatprep.mubr.f32.mxu1 %v20375_v35 }
 0x232   :  { %20735 = vst [vmem:[#allocation24_spill] sm:$0xff] %v16315_v38 }
 0x23b   :  { %v16179_v50 = vpop.permute.xlu0 %2476 }
 0x23c   :  { %v2623_v48 = vadd.f32 %v15731_v51, %v16179_v50  ;;  %v2621_v56 = vadd.f32 %v15729_v12, %v16179_v50  ;;  %v2552_v4 = vadd.f32 %v20720_v27, %v16179_v50  ;;  %v2550_v13 = vadd.f32 %v20721_v49, %v16179_v50 }
 0x23d   :  { %v2692_v26 = vadd.f32 %v16096_v19, %v16179_v50  ;;  %v2763_v29 = vadd.f32 %v16114_v8, %v16179_v50  ;;  %v16221_v19 = vrot.slane %v51_v58, %v75_v32  ;;  %v16233_v8 = vrot.slane %v51_v58, %v83_v39 }
 0x23e   :  { %v3196_v60 = vmax.f32 %v2623_v48, 0.0  ;;  %v3195_v59 = vmax.f32 %v2621_v56, 0.0  ;;  %v3194_v51 = vmax.f32 %v2552_v4, 0.0  ;;  %v3193_v12 = vmax.f32 %v2550_v13, 0.0 }
 0x23f   :  { %20726 = vst [vmem:[#allocation14_spill] sm:$0xff] %v16221_v19  ;;  %v3197_v30 = vmax.f32 %v2692_v26, 0.0  ;;  %20728 = vst [vmem:[#allocation16_spill] sm:$0xff] %v16233_v8  ;;  %v3199_v15 = vmax.f32 %v2763_v29, 0.0  ;;  %v2694_v24 = vadd.f32 %v16102_v18, %v16179_v50  ;;  %v2765_v57 = vadd.f32 %v16118_v2, %v16179_v50 }
 0x240   :  { %v16208_v7 = vmul.f32 %v3196_v60, %v16188_v63  ;;  %v16211_v45 = vmul.f32 %v3195_v59, %v16185_v31  ;;  %v16217_v6 = vmul.f32 %v3194_v51, %v16195_v55  ;;  %v16228_v28 = vmul.f32 %v3193_v12, %v16205_v11 }
 0x241   :  { %v16237_v44 = vmul.f32 %v3197_v30, %v16221_v19  ;;  %v16247_v9 = vmul.f32 %v3199_v15, %v16233_v8  ;;  %v16260_v18 = vrot.slane %v51_v58, %v79_v1  ;;  %v3198_v14 = vmax.f32 %v2694_v24, 0.0 }
 0x242   :  { %20723 = vst [vmem:[#allocation12_spill] sm:$0xff] %v16208_v7  ;;  %20724 = vst [vmem:[#allocation19_spill] sm:$0xff] %v16211_v45  ;;  %v12620_v10 = vpack.i.bf16 %v16208_v7, %v16211_v45  ;;  %v12610_v3 = vpack.i.bf16 %v16211_v45, %v16217_v6  ;;  %v12630_v53 = vpack.i.bf16 %v16208_v7, %v16217_v6  ;;  %v3200_v20 = vmax.f32 %v2765_v57, 0.0 }
 0x243   :  { %20725 = vst [vmem:[#allocation13_spill] sm:$0xff] %v16217_v6  ;;  %20727 = vst [vmem:[#allocation15_spill] sm:$0xff] %v16228_v28  ;;  %v12615_v5 = vpack.i.bf16 %v16211_v45, %v16228_v28  ;;  %v16256_v0 = vpack.i.bf16 %v16237_v44, %v16208_v7  ;;  %v12625_v16 = vpack.i.bf16 %v16217_v6, %v16208_v7 }
 0x244   :  { %12621 = vrot.lane.b32.xlu0 %v12620_v10, %s13607_s16  ;;  %12611 = vrot.lane.b32.xlu1 %v12610_v3, %s13605_s29  ;;  %20729 = vst [vmem:[#allocation17_spill] sm:$0xff] %v16237_v44  ;;  %20730 = vst [vmem:[#allocation18_spill] sm:$0xff] %v16247_v9  ;;  %v16268_v2 = vrot.slane %v51_v58, %v87_v47  ;;  %v12650_v33 = vpack.i.bf16 %v16237_v44, %v16247_v9 }
 0x245   :  { %20731 = vst [vmem:[#allocation21_spill] sm:$0xff] %v16260_v18  ;;  %v16274_v21 = vmul.f32 %v3198_v14, %v16260_v18  ;;  %v12635_v52 = vpack.i.bf16 %v16211_v45, %v16237_v44  ;;  %v12680_v41 = vpack.i.bf16 %v16228_v28, %v16217_v6  ;;  %v12675_v61 = vpack.i.bf16 %v20375_v35, %v16228_v28 }
 0x246   :  { %20732 = vst [vmem:[#allocation20_spill] sm:$0xff] %v16268_v2  ;;  %v16279_v23 = vmul.f32 %v3200_v20, %v16268_v2  ;;  %v16321_v27 = vrot.slane %v16311_v42, %v16177_v54  ;;  %v16328_v60 = vrot.slane %v16311_v42, %v16168_v62  ;;  %v16344_v3 = vrot.slane %v16311_v42, %v16171_v37 }
 0x247   :  { %20733 = vst [vmem:[#allocation22_spill] sm:$0xff] %v16274_v21  ;;  %v12645_v17 = vpack.i.bf16 %v16274_v21, %v16211_v45 }
 0x248   :  { %12631 = vrot.lane.b32.xlu0 %v12630_v53, %s13607_s16  ;;  %12616 = vrot.lane.b32.xlu1 %v12615_v5, %s13605_s29  ;;  %20734 = vst [vmem:[#allocation23_spill] sm:$0xff] %v16279_v23  ;;  %v12655_v40 = vpack.i.bf16 %v16279_v23, %v16247_v9  ;;  %v12665_v25 = vpack.i.bf16 %v16279_v23, %v16274_v21  ;;  %20736 = vst [vmem:[#allocation25_spill] sm:$0xff] %v16321_v27 }
 0x249   :  { %20738 = vst [vmem:[#allocation27_spill] sm:$0xff] %v16328_v60  ;;  %20741 = vst [vmem:[#allocation30_spill] sm:$0xff] %v16344_v3 }
 0x24c   :  { %12641 = vrot.lane.b32.xlu0 %v16256_v0, %s13605_s29  ;;  %12626 = vrot.lane.b32.xlu1 %v12625_v16, %s13605_s29 }
 0x250   :  { %12651 = vrot.lane.b32.xlu0 %v12650_v33, %s13605_s29  ;;  %12636 = vrot.lane.b32.xlu1 %v12635_v52, %s13607_s16 }
 0x254   :  { %3782 = vrot.lane.b32.xlu0 %v16274_v21, %s13607_s16  ;;  %12646 = vrot.lane.b32.xlu1 %v12645_v17, %s13605_s29 }
 0x258   :  { %12656 = vrot.lane.b32.xlu0 %v12655_v40, %s13607_s16  ;;  %3780 = vrot.lane.b32.xlu1 %v16237_v44, %s13607_s16 }
 0x25c   :  { %12666 = vrot.lane.b32.xlu0 %v12665_v25, %s13607_s16  ;;  %3778 = vrot.lane.b32.xlu1 %v16208_v7, %s13607_s16 }
 0x260   :  { %3786 = vrot.lane.b32.xlu0 %v16279_v23, %s13607_s16  ;;  %12661 = vrot.lane.b32.xlu1 %v12655_v40, %s13605_s29 }
 0x264   :  { %12681 = vrot.lane.b32.xlu0 %v12680_v41, %s13607_s16  ;;  %12671 = vrot.lane.b32.xlu1 %v12665_v25, %s13605_s29 }
 0x268   :  { %12676 = vrot.lane.b32.xlu1 %v12675_v61, %s13607_s16 }
 0x271   :  { %v2833_v43 = vpop.f32.mrb[4].mxu0 }
 0x272   :  { %v2834_v22 = vadd.f32 %v2833_v43, %v16179_v50  ;;  %v2835_v58 = vpop.f32.mrb[5].mxu0 }
 0x273   :  { %v2836_v48 = vadd.f32 %v2835_v58, %v16179_v50 }
 0x274   :  { %v3201_v56 = vmax.f32 %v2834_v22, 0.0 }
 0x275   :  { %v3202_v4 = vmax.f32 %v2836_v48, 0.0  ;;  %v2904_v49 = vpop.f32.mrb[4].mxu1 }
 0x276   :  { %v16324_v13 = vmul.f32 %v3201_v56, %v16315_v38  ;;  %v2905_v26 = vadd.f32 %v2904_v49, %v16179_v50  ;;  %v2906_v59 = vpop.f32.mrb[5].mxu1 }
 0x277   :  { %v2907_v51 = vadd.f32 %v2906_v59, %v16179_v50  ;;  %v16333_v12 = vmul.f32 %v3202_v4, %v16321_v27 }
 0x278   :  { %20737 = vst [vmem:[#allocation26_spill] sm:$0xff] %v16324_v13  ;;  %v3203_v29 = vmax.f32 %v2905_v26, 0.0  ;;  %v12685_v30 = vpack.i.bf16 %v16247_v9, %v16324_v13 }
 0x279   :  { %20739 = vst [vmem:[#allocation28_spill] sm:$0xff] %v16333_v12  ;;  %v3204_v15 = vmax.f32 %v2907_v51, 0.0 }
 0x27a   :  { %v16338_v10 = vmul.f32 %v3203_v29, %v16328_v60  ;;  %12686 = vrot.lane.b32.xlu0 %v12685_v30, %s13607_s16  ;;  %12691 = vrot.lane.b32.xlu1 %v12685_v30, %s13605_s29 }
 0x27b   :  { %v16354_v5 = vmul.f32 %v3204_v15, %v16344_v3 }
 0x27c   :  { %20740 = vst [vmem:[#allocation29_spill] sm:$0xff] %v16338_v10  ;;  %v12700_v53 = vpack.i.bf16 %v16338_v10, %v16333_v12  ;;  %v12695_v24 = vpack.i.bf16 %v16338_v10, %v16324_v13 }
 0x27d   :  { %20742 = vst [vmem:[#allocation31_spill] sm:$0xff] %v16354_v5  ;;  %v12710_v57 = vpack.i.bf16 %v16333_v12, %v16354_v5  ;;  %v12705_v14 = vpack.i.bf16 %v16354_v5, %v16338_v10  ;;  %v12715_v16 = vpack.i.bf16 %v16354_v5, %v16333_v12 }
 0x27e   :  { %12701 = vrot.lane.b32.xlu0 %v12700_v53, %s13605_s29  ;;  %3788 = vrot.lane.b32.xlu1 %v16324_v13, %s13607_s16  ;;  %v16406_v53 = vrot.slane %v16311_v42, %v75_v32 }
 0x280   :  { %20743 = vst [vmem:[#allocation32_spill] sm:$0xff] %v16406_v53 }
 0x282   :  { %12696 = vrot.lane.b32.xlu1 %v12695_v24, %s13605_s29  ;;  %3790 = vrot.lane.b32.xlu0 %v16333_v12, %s13607_s16 }
 0x286   :  { %12711 = vrot.lane.b32.xlu0 %v12710_v57, %s13605_s29  ;;  %12706 = vrot.lane.b32.xlu1 %v12705_v14, %s13607_s16 }
 0x28a   :  { %3794 = vrot.lane.b32.xlu0 %v16354_v5, %s13607_s16  ;;  %12716 = vrot.lane.b32.xlu1 %v12715_v16, %s13607_s16 }
 0x2b6   :  { %v16370_v20 = vpop.permute.xlu0 %12621  ;;  %v16372_v33 = vpop.permute.xlu1 %12611 }
 0x2b7   :  { %v20371_v52 = vunpack.i.h.bf16 %v16372_v33  ;;  %v12613_v17 = vunpack.i.l.bf16 %v16372_v33  ;;  %v20373_v22 = vunpack.i.h.bf16 %v16370_v20  ;;  %v12623_v58 = vunpack.i.l.bf16 %v16370_v20 }
 0x2b9   :  { %v3330_v25 = vsel %vm310_vm2, %v12613_v17, %v20371_v52 }
 0x2ba   :  { %v16376_v40 = vpop.permute.xlu0 %12631  ;;  %v16382_v41 = vpop.permute.xlu1 %12616  ;;  %v11038_v61 = vpack.c.bf16 %v16211_v45, %v3330_v25  ;;  %v3429_v25 = vsel %vm411_vm3, %v12623_v58, %v20373_v22 }
 0x2bb   :  { %v20374_v43 = vunpack.i.l.bf16 %v16382_v41  ;;  %v20380_v4 = vunpack.i.l.bf16 %v16376_v40  ;;  %v12619_v59 = vunpack.i.h.bf16 %v16382_v41 }
 0x2bc   :  { %11039 = vmatprep.subr.bf16.mxu1 %v11038_v61  ;;  %v12634_v61 = vunpack.i.h.bf16 %v16376_v40 }
 0x2bd   :  { %v3331_v48 = vsel %vm310_vm2, %v20374_v43, %v12613_v17 }
 0x2be   :  { %v16392_v56 = vpop.permute.xlu0 %12641  ;;  %v16395_v49 = vpop.permute.xlu1 %12626  ;;  %v11040_v26 = vpack.c.bf16 %v16217_v6, %v3331_v48  ;;  %v3430_v48 = vsel %vm411_vm3, %v20380_v4, %v12623_v58  ;;  %v16441_v58 = vrot.slane %v16311_v42, %v83_v39 }
 0x2bf   :  { %v20372_v51 = vunpack.i.h.bf16 %v16395_v49  ;;  %v20378_v29 = vunpack.i.l.bf16 %v16395_v49  ;;  %v20377_v30 = vunpack.i.h.bf16 %v16392_v56  ;;  %v12643_v15 = vunpack.i.l.bf16 %v16392_v56 }
 0x2c0   :  { %11041 = vmatpush1.bf16.msra.mxu1 %v11040_v26  ;;  %20745 = vst [vmem:[#allocation34_spill] sm:$0xff] %v16441_v58 }
 0x2c1   :  { %v2975_v24 = vpop.f32.mrb[6].mxu0  ;;  %v3531_v57 = vsel %vm310_vm2, %v20372_v51, %v12619_v59  ;;  %v3530_v32 = vsel %vm310_vm2, %v12619_v59, %v20378_v29  ;;  %v16436_v59 = vrot.slane %v16311_v42, %v79_v1 }
 0x2c2   :  { %v2976_v14 = vadd.f32 %v2975_v24, %v16179_v50  ;;  %v2977_v16 = vpop.f32.mrb[7].mxu0  ;;  %v16413_v17 = vpop.permute.xlu0 %12651  ;;  %v11042_v52 = vpack.c.bf16 %v3530_v32, %v3429_v25  ;;  %v11044_v35 = vpack.c.bf16 %v3531_v57, %v3430_v48 }
 0x2c3   :  { %v2978_v26 = vadd.f32 %v2977_v16, %v16179_v50  ;;  %v16429_v24 = vpop.permute.xlu1 %12636  ;;  %20744 = vst [vmem:[#allocation33_spill] sm:$0xff] %v16436_v59 }
 0x2c4   :  { %v3205_v51 = vmax.f32 %v2976_v14, 0.0  ;;  %v20379_v22 = vunpack.i.h.bf16 %v16429_v24  ;;  %v20381_v43 = vunpack.i.l.bf16 %v16429_v24  ;;  %11043 = vmatprep.subr.bf16.mxu1 %v11042_v52  ;;  %v3730_v14 = vsel %vm310_vm2, %v12643_v15, %v20377_v30 }
 0x2c5   :  { %v3046_v16 = vpop.f32.mrb[6].mxu1  ;;  %11045 = vmatpush1.bf16.msra.mxu1 %v11044_v35  ;;  %v3206_v32 = vmax.f32 %v2978_v26, 0.0  ;;  %v11050_v26 = vpack.c.bf16 %v16237_v44, %v3730_v14  ;;  %v16488_v14 = vrot.slane %v16311_v42, %v87_v47  ;;  %v20750_v47 = vunpack.i.l.bf16 %v16413_v17 }
 0x2c6   :  { %v16448_v25 = vmul.f32 %v3205_v51, %v16406_v53  ;;  %v3630_v1 = vsel %vm411_vm3, %v20379_v22, %v12634_v61  ;;  %v3047_v52 = vadd.f32 %v3046_v16, %v16179_v50  ;;  %v3048_v57 = vpop.f32.mrb[7].mxu1  ;;  %v3629_v39 = vsel %vm411_vm3, %v12634_v61, %v20381_v43  ;;  %v16460_v30 = vpop.permute.xlu0 %3782 }
 0x2c7   :  { %v3049_v48 = vadd.f32 %v3048_v57, %v16179_v50  ;;  %v16462_v51 = vpop.permute.xlu1 %12646  ;;  %v11046_v29 = vpack.c.bf16 %v3629_v39, %v16208_v7  ;;  %v11048_v22 = vpack.c.bf16 %v3630_v1, %v16211_v45  ;;  %20749 = vst [vmem:[#allocation38_spill] sm:$0xff] %v16488_v14 }
 0x2c8   :  { %20746 = vst [vmem:[#allocation35_spill] sm:$0xff] %v16448_v25  ;;  %v3207_v4 = vmax.f32 %v3047_v52, 0.0  ;;  %v20383_v35 = vunpack.i.l.bf16 %v16462_v51  ;;  %v12720_v16 = vpack.i.bf16 %v16338_v10, %v16448_v25  ;;  %v12725_v61 = vpack.i.bf16 %v16448_v25, %v16354_v5 }
 0x2c9   :  { %11047 = vmatprep.subr.bf16.mxu1 %v11046_v29  ;;  %v12649_v39 = vunpack.i.h.bf16 %v16462_v51  ;;  %v16483_v29 = vmul.f32 %v3206_v32, %v16436_v59 }
 0x2ca   :  { %v16474_v43 = vmul.f32 %v3207_v4, %v16441_v58  ;;  %v3731_v1 = vsel %vm310_vm2, %v20383_v35, %v12643_v15  ;;  %11049 = vmatpush1.bf16.msra.mxu1 %v11048_v22  ;;  %12721 = vrot.lane.b32.xlu0 %v12720_v16, %s13607_s16  ;;  %v3208_v4 = vmax.f32 %v3049_v48, 0.0  ;;  %v20382_v15 = vunpack.i.h.bf16 %v16413_v17  ;;  %v16498_v36 = vpop.permute.xlu0 %12656 }
 0x2cb   :  { %20748 = vst [vmem:[#allocation37_spill] sm:$0xff] %v16483_v29  ;;  %12726 = vrot.lane.b32.xlu1 %v12725_v61, %s13605_s29  ;;  %v3781_v52 = vpop.permute.xlu1 %3780  ;;  %11051 = vmatprep.subr.bf16.mxu1 %v11050_v26  ;;  %v11052_v57 = vpack.c.bf16 %v16208_v7, %v3731_v1  ;;  %v3326_v42 = vsel %vm310_vm2, %v12649_v39, %v20750_v47  ;;  %v12658_v1 = vunpack.i.l.bf16 %v16498_v36 }
 0x2cc   :  { %20747 = vst [vmem:[#allocation36_spill] sm:$0xff] %v16474_v43  ;;  %v12730_v22 = vpack.i.bf16 %v16448_v25, %v16474_v43  ;;  %v3829_v32 = vsel %vm411_vm3, %v3781_v52, %v16460_v30  ;;  %v16507_v48 = vmul.f32 %v3208_v4, %v16488_v14  ;;  %v12735_v61 = vpack.i.bf16 %v16483_v29, %v16338_v10 }
 0x2cd   :  { %v3327_v26 = vsel %vm310_vm2, %v20382_v15, %v12649_v39 }
 0x2ce   :  { %11053 = vmatpush1.bf16.msra.mxu1 %v11052_v57  ;;  %3796 = vrot.lane.b32.xlu0 %v16448_v25, %s13607_s16  ;;  %20751 = vst [vmem:[#allocation39_spill] sm:$0xff] %v16507_v48  ;;  %v20388_v57 = vunpack.i.h.bf16 %v16498_v36  ;;  %v16530_v47 = vpop.permute.xlu0 %12666  ;;  %v12750_v38 = vpack.i.bf16 %v16507_v48, %v16483_v29 }
 0x2cf   :  { %12731 = vrot.lane.b32.xlu1 %v12730_v22, %s13605_s29  ;;  %v16510_v16 = vpop.permute.xlu1 %3778  ;;  %4130 = vmatprep.subr.mxu1 %v3829_v32  ;;  %v11070_v22 = vpack.c.bf16 %v16247_v9, %v3326_v42  ;;  %v16527_v32 = vld [vmem:[%s20261_s3] sm:$0xff]  ;;  %v12745_v42 = vpack.i.bf16 %v16507_v48, %v16474_v43  ;;  %v20753_v53 = vunpack.i.l.bf16 %v16530_v47 }
 0x2d0   :  { %v3830_v4 = vsel %vm411_vm3, %v16510_v16, %v3781_v52  ;;  %v11072_v52 = vpack.c.bf16 %v16274_v21, %v3327_v26 }
 0x2d2   :  { %4131 = vmatpush1.msra.mxu1 %v3830_v4  ;;  %12736 = vrot.lane.b32.xlu0 %v12735_v61, %s13605_s29  ;;  %v3425_v61 = vsel %vm411_vm3, %v12658_v1, %v20388_v57  ;;  %v3426_v57 = vsel %vm411_vm3, %v20753_v53, %v12658_v1  ;;  %v16572_v53 = vpop.permute.xlu0 %3786 }
 0x2d3   :  { %3798 = vrot.lane.b32.xlu1 %v16483_v29, %s13607_s16  ;;  %v16534_v39 = vpop.permute.xlu1 %12661  ;;  %11071 = vmatprep.subr.bf16.mxu1 %v11070_v22  ;;  %v20752_v22 = vmov 0.0  }
 0x2d4   :  { %v20393_v35 = vunpack.i.h.bf16 %v16534_v39  ;;  %v12663_v4 = vunpack.i.l.bf16 %v16534_v39  ;;  %10488 = vmatmul.mubr.msk.f32.vlgmr.msra.gmra.mrb[10].mxu1 %vm2479_vm0, %v16527_v32  ;;  %v12755_v27 = vpack.i.bf16 %v20752_v22, %v16483_v29 }
 0x2d5   :  { %11073 = vmatpush1.bf16.msra.mxu1 %v11072_v52  ;;  %4320 = vmatprep.mubr.f32.mxu1 %v20752_v22 }
 0x2d6   :  { %12746 = vrot.lane.b32.xlu0 %v12745_v42, %s13605_s29  ;;  %v3526_v26 = vsel %vm310_vm2, %v12663_v4, %v20393_v35  ;;  %v16574_v1 = vpop.permute.xlu0 %12681  ;;  %v12669_v35 = vunpack.i.h.bf16 %v16530_v47 }
 0x2d7   :  { %12741 = vrot.lane.b32.xlu1 %v12745_v42, %s13607_s16  ;;  %v16555_v15 = vpop.permute.xlu1 %12671  ;;  %v11074_v59 = vpack.c.bf16 %v3526_v26, %v3425_v61 }
 0x2d8   :  { %v20396_v52 = vunpack.i.l.bf16 %v16555_v15 }
 0x2d9   :  { %11075 = vmatprep.subr.bf16.mxu1 %v11074_v59 }
 0x2da   :  { %v3527_v42 = vsel %vm310_vm2, %v20396_v52, %v12663_v4  ;;  %12756 = vrot.lane.b32.xlu0 %v12755_v27, %s13605_s29  ;;  %v12674_v4 = vunpack.i.h.bf16 %v16555_v15 }
 0x2db   :  { %12751 = vrot.lane.b32.xlu1 %v12750_v38, %s13607_s16  ;;  %v11076_v61 = vpack.c.bf16 %v3527_v42, %v3426_v57  ;;  %v16576_v26 = vpop.permute.xlu1 %12676 }
 0x2dd   :  { %11077 = vmatpush1.bf16.msra.mxu1 %v11076_v61 }
 0x2ec   :  { %v16579_v59 = vpop.permute.xlu0 %12686  ;;  %v16581_v18 = vpop.permute.xlu1 %12691 }
 0x2ed   :  { %v20407_v27 = vunpack.i.h.bf16 %v16579_v59  ;;  %v20408_v38 = vunpack.i.l.bf16 %v16579_v59  ;;  %v20411_v57 = vunpack.i.l.bf16 %v16581_v18  ;;  %v20755_v58 = vunpack.i.h.bf16 %v16581_v18 }
 0x2ef   :  { %v3626_v61 = vsel %vm411_vm3, %v20407_v27, %v12669_v35  ;;  %v3625_v52 = vsel %vm411_vm3, %v12669_v35, %v20408_v38  ;;  %v3726_v19 = vsel %vm310_vm2, %v12674_v4, %v20411_v57  ;;  %v3727_v27 = vsel %vm310_vm2, %v20755_v58, %v12674_v4 }
 0x2f0   :  { %v16600_v55 = vpop.permute.xlu0 %12701  ;;  %v3789_v11 = vpop.permute.xlu1 %3788  ;;  %v11078_v42 = vpack.c.bf16 %v3625_v52, %v16279_v23  ;;  %v11080_v14 = vpack.c.bf16 %v3626_v61, %v16247_v9  ;;  %v11082_v35 = vpack.c.bf16 %v16324_v13, %v3726_v19  ;;  %v11084_v61 = vpack.c.bf16 %v16279_v23, %v3727_v27 }
 0x2f1   :  { %20754 = vst [vmem:[#allocation40_spill] sm:$0xff] %v16600_v55  ;;  %v20418_v38 = vunpack.i.h.bf16 %v16600_v55  ;;  %v12703_v3 = vunpack.i.l.bf16 %v16600_v55 }
 0x2f2   :  { %11079 = vmatprep.subr.bf16.mxu1 %v11078_v42 }
 0x2f3   :  { %11081 = vmatpush1.bf16.msra.mxu1 %v11080_v14  ;;  %v3322_v14 = vsel %vm310_vm2, %v12703_v3, %v20418_v38  ;;  %v3826_v38 = vsel %vm411_vm3, %v16572_v53, %v3789_v11 }
 0x2f4   :  { %v16611_v57 = vpop.permute.xlu1 %12696  ;;  %11083 = vmatprep.subr.bf16.mxu1 %v11082_v35  ;;  %v16613_v60 = vpop.permute.xlu0 %3790  ;;  %v11102_v31 = vpack.c.bf16 %v16338_v10, %v3322_v14 }
 0x2f5   :  { %20756 = vst [vmem:[#allocation41_spill] sm:$0xff] %v16613_v60  ;;  %v20421_v52 = vunpack.i.l.bf16 %v16611_v57  ;;  %v3825_v58 = vsel %vm411_vm3, %v3789_v11, %v16613_v60  ;;  %v12699_v19 = vunpack.i.h.bf16 %v16611_v57 }
 0x2f7   :  { %11085 = vmatpush1.bf16.msra.mxu1 %v11084_v61  ;;  %v3323_v4 = vsel %vm310_vm2, %v20421_v52, %v12703_v3 }
 0x2f8   :  { %4272 = vmatprep.subr.mxu1 %v3825_v58  ;;  %v16629_v42 = vpop.permute.xlu0 %12711  ;;  %v16631_v27 = vpop.permute.xlu1 %12706  ;;  %v11104_v3 = vpack.c.bf16 %v16333_v12, %v3323_v4 }
 0x2f9   :  { %20757 = vst [vmem:[#allocation42_spill] sm:$0xff] %v16631_v27  ;;  %v20424_v35 = vunpack.i.h.bf16 %v16629_v42  ;;  %v20422_v8 = vunpack.i.l.bf16 %v16629_v42  ;;  %v20423_v61 = vunpack.i.h.bf16 %v16631_v27  ;;  %v12708_v63 = vunpack.i.l.bf16 %v16631_v27 }
 0x2fb   :  { %4273 = vmatpush1.msra.mxu1 %v3826_v38  ;;  %v3421_v58 = vsel %vm411_vm3, %v12708_v63, %v20423_v61  ;;  %v3522_v52 = vsel %vm310_vm2, %v12699_v19, %v20422_v8  ;;  %v3523_v38 = vsel %vm310_vm2, %v20424_v35, %v12699_v19 }
 0x2fc   :  { %11103 = vmatprep.subr.bf16.mxu1 %v11102_v31  ;;  %10490 = vmatmul.mubr.msk.f32.vlgmr.msra.gmra.mrb[12].mxu1 %vm2479_vm0, %v16527_v32  ;;  %v16652_v11 = vpop.permute.xlu1 %12716  ;;  %v11106_v14 = vpack.c.bf16 %v3522_v52, %v3421_v58  ;;  %v53_v31 = vld [vmem:[%s20267_s9 + $0x10] sm:$0xf] }
 0x2fd   :  { %11105 = vmatpush1.bf16.msra.mxu1 %v11104_v3  ;;  %v20430_v4 = vunpack.i.l.bf16 %v16652_v11  ;;  %4462 = vmatprep.mubr.f32.mxu1 %v20752_v22  ;;  %v16668_v8 = vrot.slane %v53_v31, %v16182_v46  ;;  %v16672_v2 = vrot.slane %v53_v31, %v16168_v62 }
 0x2fe   :  { %11107 = vmatprep.subr.bf16.mxu1 %v11106_v14 }
 0x2ff   :  { %v3422_v52 = vsel %vm411_vm3, %v20430_v4, %v12708_v63  ;;  %20758 = vst [vmem:[#allocation43_spill] sm:$0xff] %v16668_v8  ;;  %20759 = vst [vmem:[#allocation44_spill] sm:$0xff] %v16672_v2 }
 0x300   :  { %v11108_v3 = vpack.c.bf16 %v3523_v38, %v3422_v52  ;;  %v16683_v52 = vrot.slane %v53_v31, %v16171_v37 }
 0x301   :  { %v3117_v58 = vpop.f32.mrb[8].mxu0 }
 0x302   :  { %v3118_v19 = vadd.f32 %v3117_v58, %v16179_v50  ;;  %v3119_v61 = vpop.f32.mrb[9].mxu0  ;;  %11109 = vmatpush1.bf16.msra.mxu1 %v11108_v3  ;;  %20762 = vst [vmem:[#allocation47_spill] sm:$0xff] %v16683_v52 }
 0x303   :  { %v3188_v35 = vpop.f32.mrb[8].mxu1 }
 0x304   :  { %v3209_v14 = vmax.f32 %v3118_v19, 0.0  ;;  %v3189_v27 = vadd.f32 %v3188_v35, %v16179_v50  ;;  %v3190_v60 = vpop.f32.mrb[9].mxu1 }
 0x305   :  { %v3191_v55 = vadd.f32 %v3190_v60, %v16179_v50 }
 0x306   :  { %v16677_v63 = vmul.f32 %v3209_v14, %v16668_v8  ;;  %v3211_v38 = vmax.f32 %v3189_v27, 0.0  ;;  %v3120_v27 = vadd.f32 %v3119_v61, %v16179_v50  ;;  %v12780_v50 = vpack.i.bf16 %v20752_v22, %v16217_v6  ;;  %v16746_v14 = vpop.permute.xlu0 %3794 }
 0x307   :  { %v3212_v3 = vmax.f32 %v3191_v55, 0.0  ;;  %v16701_v55 = vrot.slane %v53_v31, %v16177_v54  ;;  %20766 = vst [vmem:[#allocation51_spill] sm:$0xff] %v16746_v14 }
 0x308   :  { %20760 = vst [vmem:[#allocation45_spill] sm:$0xff] %v16677_v63  ;;  %v16680_v46 = vmul.f32 %v3211_v38, %v16672_v2  ;;  %v12765_v62 = vpack.i.bf16 %v16474_v43, %v16677_v63  ;;  %v3210_v58 = vmax.f32 %v3120_v27, 0.0 }
 0x309   :  { %v16691_v60 = vmul.f32 %v3212_v3, %v16683_v52  ;;  %20764 = vst [vmem:[#allocation49_spill] sm:$0xff] %v16701_v55  ;;  %v12719_v3 = vunpack.i.h.bf16 %v16652_v11 }
 0x30a   :  { %20761 = vst [vmem:[#allocation46_spill] sm:$0xff] %v16680_v46  ;;  %12766 = vrot.lane.b32.xlu0 %v12765_v62, %s13607_s16  ;;  %v12760_v35 = vpack.i.bf16 %v16228_v28, %v16680_v46  ;;  %v16709_v61 = vmul.f32 %v3210_v58, %v16701_v55 }
 0x30b   :  { %20763 = vst [vmem:[#allocation48_spill] sm:$0xff] %v16691_v60  ;;  %v12775_v37 = vpack.i.bf16 %v16507_v48, %v16691_v60  ;;  %v12805_v19 = vpack.i.bf16 %v16680_v46, %v16691_v60 }
 0x30c   :  { %12761 = vrot.lane.b32.xlu1 %v12760_v35, %s13605_s29  ;;  %20765 = vst [vmem:[#allocation50_spill] sm:$0xff] %v16709_v61  ;;  %v12790_v54 = vpack.i.bf16 %v16677_v63, %v16709_v61  ;;  %v12795_v31 = vpack.i.bf16 %v16709_v61, %v16680_v46 }
 0x30e   :  { %3804 = vrot.lane.b32.xlu0 %v16677_v63, %s13607_s16 }
 0x310   :  { %12771 = vrot.lane.b32.xlu1 %v12765_v62, %s13605_s29 }
 0x312   :  { %12776 = vrot.lane.b32.xlu0 %v12775_v37, %s13605_s29 }
 0x314   :  { %3802 = vrot.lane.b32.xlu1 %v16507_v48, %s13607_s16 }
 0x316   :  { %12781 = vrot.lane.b32.xlu0 %v12780_v50, %s13605_s29 }
 0x318   :  { %3776 = vrot.lane.b32.xlu1 %v16211_v45, %s13607_s16 }
 0x31a   :  { %12786 = vrot.lane.b32.xlu0 %v16256_v0, %s13605_s29  ;;  %v12815_v0 = vpack.i.bf16 %v20752_v22, %v16274_v21 }
 0x31c   :  { %12791 = vrot.lane.b32.xlu1 %v12790_v54, %s13605_s29 }
 0x31e   :  { %12796 = vrot.lane.b32.xlu0 %v12795_v31, %s13607_s16 }
 0x320   :  { %3806 = vrot.lane.b32.xlu1 %v16709_v61, %s13607_s16 }
 0x322   :  { %12806 = vrot.lane.b32.xlu0 %v12805_v19, %s13607_s16 }
 0x324   :  { %12801 = vrot.lane.b32.xlu1 %v12795_v31, %s13605_s29 }
 0x326   :  { %3384 = vrot.lane.b32.xlu0 %v16237_v44, %s13607_s16 }
 0x328   :  { %3774 = vrot.lane.b32.xlu1 %v16217_v6, %s13607_s16 }
 0x32a   :  { %12816 = vrot.lane.b32.xlu0 %v12815_v0, %s13607_s16 }
 0x32c   :  { %12811 = vrot.lane.b32.xlu1 %v12805_v19, %s13605_s29 }
 0x32e   :  { %3810 = vrot.lane.b32.xlu0 %v16691_v60, %s13607_s16 }
 0x330   :  { %3682 = vrot.lane.b32.xlu1 %v16274_v21, %s13605_s29 }
 0x332   :  { %3784 = vrot.lane.b32.xlu0 %v16247_v9, %s13607_s16 }
 0x334   :  { %3290 = vrot.lane.b32.xlu1 %v16279_v23, %s13605_s29 }
 0x336   :  { %3490 = vrot.lane.b32.xlu0 %v16324_v13, %s13605_s29 }
 0x338   :  { %3392 = vrot.lane.b32.xlu1 %v16324_v13, %s13607_s16 }
 0x33a   :  { %3690 = vrot.lane.b32.xlu0 %v16333_v12, %s13605_s29 }
 0x33c   :  { %v16752_v38 = vpop.permute.xlu0 %12721  ;;  %3592 = vrot.lane.b32.xlu1 %v16333_v12, %s13607_s16 }
 0x33d   :  { %v20435_v62 = vunpack.i.h.bf16 %v16752_v38  ;;  %v20433_v35 = vunpack.i.l.bf16 %v16752_v38  ;;  %v16759_v27 = vpop.permute.xlu1 %12726 }
 0x33e   :  { %20767 = vst [vmem:[#allocation52_spill] sm:$0xff] %v16759_v27  ;;  %v20434_v37 = vunpack.i.h.bf16 %v16759_v27  ;;  %v12728_v58 = vunpack.i.l.bf16 %v16759_v27  ;;  %3792 = vrot.lane.b32.xlu0 %v16338_v10, %s13607_s16 }
 0x33f   :  { %v3622_v50 = vsel %vm411_vm3, %v20435_v62, %v12719_v3  ;;  %v3621_v54 = vsel %vm411_vm3, %v12719_v3, %v20433_v35 }
 0x340   :  { %v3797_v31 = vpop.permute.xlu0 %3796  ;;  %3298 = vrot.lane.b32.xlu1 %v16354_v5, %s13605_s29  ;;  %v11110_v19 = vpack.c.bf16 %v3621_v54, %v16354_v5  ;;  %v11112_v0 = vpack.c.bf16 %v3622_v50, %v16338_v10  ;;  %v3722_v4 = vsel %vm310_vm2, %v12728_v58, %v20434_v37 }
 0x341   :  { %v16781_v55 = vpop.permute.xlu1 %12731  ;;  %v11114_v3 = vpack.c.bf16 %v16448_v25, %v3722_v4 }
 0x342   :  { %20768 = vst [vmem:[#allocation53_spill] sm:$0xff] %v16781_v55  ;;  %3498 = vrot.lane.b32.xlu0 %v16448_v25, %s13605_s29  ;;  %11111 = vmatprep.subr.bf16.mxu1 %v11110_v19  ;;  %v20447_v19 = vunpack.i.l.bf16 %v16781_v55  ;;  %v20450_v62 = vunpack.i.h.bf16 %v16781_v55 }
 0x343   :  { %11113 = vmatpush1.bf16.msra.mxu1 %v11112_v0 }
 0x344   :  { %v16786_v35 = vpop.permute.xlu0 %12736  ;;  %3400 = vrot.lane.b32.xlu1 %v16448_v25, %s13607_s16  ;;  %11115 = vmatprep.subr.bf16.mxu1 %v11114_v3 }
 0x345   :  { %v20443_v50 = vunpack.i.l.bf16 %v16786_v35  ;;  %v16791_v54 = vpop.permute.xlu1 %3798  ;;  %v12739_v37 = vunpack.i.h.bf16 %v16786_v35 }
 0x346   :  { %20769 = vst [vmem:[#allocation54_spill] sm:$0xff] %v16791_v54  ;;  %3698 = vrot.lane.b32.xlu0 %v16483_v29, %s13605_s29 }
 0x347   :  { %v3723_v4 = vsel %vm310_vm2, %v20443_v50, %v12728_v58  ;;  %v3318_v50 = vsel %vm310_vm2, %v12739_v37, %v20447_v19  ;;  %v3319_v8 = vsel %vm310_vm2, %v20450_v62, %v12739_v37  ;;  %v3822_v62 = vsel %vm411_vm3, %v16746_v14, %v3797_v31 }
 0x348   :  { %v16801_v0 = vpop.permute.xlu0 %12746  ;;  %3600 = vrot.lane.b32.xlu1 %v16483_v29, %s13607_s16  ;;  %v11116_v3 = vpack.c.bf16 %v16354_v5, %v3723_v4  ;;  %v3821_v4 = vsel %vm411_vm3, %v3797_v31, %v16791_v54 }
 0x349   :  { %20770 = vst [vmem:[#allocation55_spill] sm:$0xff] %v16801_v0  ;;  %v12748_v52 = vunpack.i.l.bf16 %v16801_v0  ;;  %v16809_v2 = vpop.permute.xlu1 %12741  ;;  %v20774_v5 = vunpack.i.h.bf16 %v16801_v0 }
 0x34a   :  { %20771 = vst [vmem:[#allocation56_spill] sm:$0xff] %v16809_v2  ;;  %v12743_v58 = vunpack.i.l.bf16 %v16809_v2  ;;  %3800 = vrot.lane.b32.xlu0 %v16474_v43, %s13607_s16  ;;  %11117 = vmatpush1.bf16.msra.mxu1 %v11116_v3  ;;  %v20773_v3 = vunpack.i.h.bf16 %v16809_v2  ;;  %v11134_v2 = vpack.c.bf16 %v16474_v43, %v3318_v50  ;;  %v20776_v50 = vunpack.i.l.bf16 %v16382_v41  ;;  %v4034_v41 = vld [vmem:[%s20262_s4] sm:$0xff] }
 0x34b   :  { %4414 = vmatprep.subr.mxu1 %v3821_v4  ;;  %v3518_v19 = vsel %vm310_vm2, %v12748_v52, %v20774_v5  ;;  %v11136_v5 = vpack.c.bf16 %v16483_v29, %v3319_v8 }
 0x34c   :  { %v16826_v27 = vpop.permute.xlu0 %12756  ;;  %3306 = vrot.lane.b32.xlu1 %v16507_v48, %s13605_s29  ;;  %v3417_v54 = vsel %vm411_vm3, %v12743_v58, %v20773_v3 }
 0x34d   :  { %20772 = vst [vmem:[#allocation57_spill] sm:$0xff] %v16826_v27  ;;  %v12759_v25 = vunpack.i.h.bf16 %v16826_v27  ;;  %v20455_v37 = vunpack.i.l.bf16 %v16826_v27  ;;  %v16840_v4 = vpop.permute.xlu1 %12751  ;;  %v11138_v31 = vpack.c.bf16 %v3518_v19, %v3417_v54 }
 0x34e   :  { %20775 = vst [vmem:[#allocation58_spill] sm:$0xff] %v16840_v4  ;;  %3506 = vrot.lane.b32.xlu0 %v16677_v63, %s13605_s29  ;;  %4415 = vmatpush1.msra.mxu1 %v3822_v62  ;;  %v20777_v0 = vunpack.i.l.bf16 %v16840_v4  ;;  %v12678_v62 = vunpack.i.l.bf16 %v16576_v26  ;;  %v12754_v54 = vunpack.i.h.bf16 %v16840_v4  ;;  %v20783_v4 = vunpack.i.h.bf16 %v16574_v1 }
 0x34f   :  { %v3519_v3 = vsel %vm310_vm2, %v20455_v37, %v12748_v52  ;;  %10492 = vmatmul.mubr.msk.f32.vlgmr.msra.gmra.mrb[14].mxu1 %vm2479_vm0, %v16527_v32  ;;  %11135 = vmatprep.subr.bf16.mxu1 %v11134_v2  ;;  %v3332_v55 = vsel %vm310_vm2, %v12759_v25, %v20776_v50  ;;  %v20779_v37 = vunpack.i.l.bf16 %v16376_v40 }
 0x350   :  { %v3418_v8 = vsel %vm411_vm3, %v20777_v0, %v12743_v58  ;;  %3408 = vrot.lane.b32.xlu1 %v16677_v63, %s13607_s16  ;;  %11137 = vmatpush1.bf16.msra.mxu1 %v11136_v5  ;;  %v11022_v52 = vpack.c.bf16 %v16228_v28, %v3332_v55 }
 0x351   :  { %11139 = vmatprep.subr.bf16.mxu1 %v11138_v31  ;;  %4604 = vmatprep.mubr.f32.mxu1 %v20752_v22  ;;  %v11140_v2 = vpack.c.bf16 %v3519_v3, %v3418_v8 }
 0x352   :  { %3706 = vrot.lane.b32.xlu0 %v16709_v61, %s13605_s29  ;;  %11023 = vmatprep.subr.bf16.mxu0 %v11022_v52 }
 0x354   :  { %3608 = vrot.lane.b32.xlu1 %v16709_v61, %s13607_s16  ;;  %11141 = vmatpush1.bf16.msra.mxu1 %v11140_v2 }
 0x356   :  { %4037 = vperm.xlu0 %12609, %v4034_v41  }
 0x358   :  { %3808 = vrot.lane.b32.xlu1 %v16680_v46, %s13607_s16 }
 0x37c   :  { %v16877_v55 = vpop.permute.xlu0 %12766 }
 0x37d   :  { %20778 = vst [vmem:[#allocation59_spill] sm:$0xff] %v16877_v55  ;;  %v20456_v19 = vunpack.i.h.bf16 %v16877_v55  ;;  %v20459_v0 = vunpack.i.l.bf16 %v16877_v55 }
 0x37e   :  { %v12762_v58 = vpop.permute.xlu1 %12761 }
 0x37f   :  { %v3618_v5 = vsel %vm411_vm3, %v20456_v19, %v12754_v54  ;;  %v12764_v3 = vunpack.i.h.bf16 %v12762_v58  ;;  %v12763_v31 = vunpack.i.l.bf16 %v12762_v58  ;;  %v3617_v50 = vsel %vm411_vm3, %v12754_v54, %v20459_v0 }
 0x380   :  { %v16891_v8 = vpop.permute.xlu0 %3804  ;;  %v11142_v52 = vpack.c.bf16 %v3617_v50, %v16507_v48  ;;  %v11144_v2 = vpack.c.bf16 %v3618_v5, %v16474_v43  ;;  %v3431_v19 = vsel %vm411_vm3, %v12678_v62, %v20779_v37  ;;  %v20780_v58 = vunpack.i.h.bf16 %v16395_v49 }
 0x381   :  { %v3333_v41 = vsel %vm310_vm2, %v12763_v31, %v12759_v25  ;;  %v12683_v54 = vunpack.i.l.bf16 %v16574_v1  ;;  %v20465_v25 = vunpack.i.h.bf16 %v16576_v26 }
 0x382   :  { %v3532_v29 = vsel %vm310_vm2, %v12764_v3, %v20780_v58  ;;  %v16906_v0 = vpop.permute.xlu1 %12771  ;;  %11143 = vmatprep.subr.bf16.mxu1 %v11142_v52  ;;  %v11024_v5 = vpack.c.bf16 %v20752_v22, %v3333_v41 }
 0x383   :  { %20781 = vst [vmem:[#allocation60_spill] sm:$0xff] %v16906_v0  ;;  %v11026_v50 = vpack.c.bf16 %v3532_v29, %v3431_v19  ;;  %11145 = vmatpush1.bf16.msra.mxu1 %v11144_v2  ;;  %v20468_v37 = vunpack.i.h.bf16 %v16906_v0  ;;  %v20472_v58 = vunpack.i.l.bf16 %v16906_v0  ;;  %v20782_v29 = vunpack.i.h.bf16 %v16429_v24 }
 0x384   :  { %v16911_v43 = vpop.permute.xlu0 %12776  ;;  %11025 = vmatpush1.bf16.msra.mxu0 %v11024_v5  ;;  %v3432_v2 = vsel %vm411_vm3, %v20465_v25, %v12678_v62 }
 0x385   :  { %v12779_v55 = vunpack.i.h.bf16 %v16911_v43  ;;  %v20467_v27 = vunpack.i.l.bf16 %v16911_v43  ;;  %11027 = vmatprep.subr.bf16.mxu0 %v11026_v50  ;;  %v3631_v19 = vsel %vm411_vm3, %v12683_v54, %v20782_v29 }
 0x386   :  { %v16917_v52 = vpop.permute.xlu1 %3802  ;;  %v11030_v0 = vpack.c.bf16 %v3631_v19, %v16217_v6 }
 0x387   :  { %v3533_v41 = vsel %vm310_vm2, %v20467_v27, %v12764_v3  ;;  %v3719_v5 = vsel %vm310_vm2, %v20468_v37, %v12779_v55  ;;  %v3718_v50 = vsel %vm310_vm2, %v12779_v55, %v20472_v58  ;;  %v3632_v3 = vsel %vm411_vm3, %v20783_v4, %v12683_v54 }
 0x388   :  { %v16939_v29 = vpop.permute.xlu0 %12781  ;;  %v11028_v40 = vpack.c.bf16 %v3533_v41, %v3432_v2  ;;  %v11146_v62 = vpack.c.bf16 %v16677_v63, %v3718_v50  ;;  %v11148_v25 = vpack.c.bf16 %v16507_v48, %v3719_v5  ;;  %v20784_v55 = vunpack.i.l.bf16 %v16462_v51 }
 0x389   :  { %v20474_v27 = vunpack.i.h.bf16 %v16939_v29  ;;  %v12783_v37 = vunpack.i.l.bf16 %v16939_v29  ;;  %v11032_v4 = vpack.c.bf16 %v3632_v3, %v16228_v28  ;;  %v20788_v58 = vunpack.i.l.bf16 %v16911_v43 }
 0x38a   :  { %v3777_v14 = vpop.permute.xlu1 %3776  ;;  %11029 = vmatpush1.bf16.msra.mxu0 %v11028_v40  ;;  %11147 = vmatprep.subr.bf16.mxu1 %v11146_v62 }
 0x38b   :  { %11031 = vmatprep.subr.bf16.mxu0 %v11030_v0  ;;  %11149 = vmatpush1.bf16.msra.mxu1 %v11148_v25  ;;  %v3732_v2 = vsel %vm310_vm2, %v12783_v37, %v20784_v55  ;;  %v3733_v19 = vsel %vm310_vm2, %v20474_v27, %v12783_v37  ;;  %v3831_v3 = vsel %vm411_vm3, %v3777_v14, %v16510_v16  ;;  %v20786_v27 = vunpack.i.h.bf16 %v16413_v17 }
 0x38c   :  { %v16954_v41 = vpop.permute.xlu0 %12786  ;;  %v11034_v54 = vpack.c.bf16 %v16211_v45, %v3732_v2  ;;  %v11036_v5 = vpack.c.bf16 %v16217_v6, %v3733_v19 }
 0x38e   :  { %v16962_v40 = vpop.permute.xlu1 %12791  ;;  %11033 = vmatpush1.bf16.msra.mxu0 %v11032_v4  ;;  %v3818_v4 = vsel %vm411_vm3, %v16917_v52, %v16891_v8 }
 0x38f   :  { %v20473_v0 = vunpack.i.h.bf16 %v16962_v40  ;;  %v12793_v51 = vunpack.i.l.bf16 %v16962_v40  ;;  %11035 = vmatprep.subr.bf16.mxu0 %v11034_v54 }
 0x390   :  { %v16966_v25 = vpop.permute.xlu0 %12796 }
 0x391   :  { %v3314_v50 = vsel %vm310_vm2, %v12793_v51, %v12763_v31  ;;  %v3315_v37 = vsel %vm310_vm2, %v20473_v0, %v12793_v51  ;;  %v12788_v31 = vunpack.i.l.bf16 %v16954_v41  ;;  %v20475_v16 = vunpack.i.h.bf16 %v16966_v25 }
 0x392   :  { %v16975_v62 = vpop.permute.xlu1 %3806  ;;  %11037 = vmatpush1.bf16.msra.mxu0 %v11036_v5  ;;  %v11166_v54 = vpack.c.bf16 %v16680_v46, %v3314_v50  ;;  %v12798_v19 = vunpack.i.l.bf16 %v16966_v25  ;;  %v11168_v51 = vpack.c.bf16 %v16709_v61, %v3315_v37  ;;  %v12789_v50 = vunpack.i.h.bf16 %v16954_v41 }
 0x393   :  { %4059 = vmatprep.subr.mxu0 %v3831_v3  ;;  %v3817_v55 = vsel %vm411_vm3, %v16891_v8, %v16975_v62  ;;  %v20787_v41 = vunpack.i.h.bf16 %v16576_v26 }
 0x394   :  { %v16985_v2 = vpop.permute.xlu0 %12806  ;;  %4556 = vmatprep.subr.mxu1 %v3817_v55 }
 0x395   :  { %4557 = vmatpush1.msra.mxu1 %v3818_v4  ;;  %v12808_v5 = vunpack.i.l.bf16 %v16985_v2  ;;  %v20785_v4 = vunpack.i.h.bf16 %v16372_v33 }
 0x396   :  { %v16996_v3 = vpop.permute.xlu1 %12801  ;;  %10494 = vmatmul.mubr.msk.f32.vlgmr.msra.gmra.mrb[16].mxu1 %vm2479_vm0, %v16527_v32  ;;  %11167 = vmatprep.subr.bf16.mxu1 %v11166_v54  ;;  %v3328_v54 = vsel %vm310_vm2, %v12788_v31, %v20786_v27 }
 0x397   :  { %v20479_v55 = vunpack.i.h.bf16 %v16996_v3  ;;  %v12803_v8 = vunpack.i.l.bf16 %v16996_v3  ;;  %11169 = vmatpush1.bf16.msra.mxu1 %v11168_v51  ;;  %4746 = vmatprep.mubr.f32.mxu1 %v20752_v22  ;;  %v3329_v37 = vsel %vm310_vm2, %v20785_v4, %v12788_v31  ;;  %v3414_v51 = vsel %vm411_vm3, %v20475_v16, %v12798_v19 }
 0x398   :  { %v3385_v0 = vpop.permute.xlu0 %3384  ;;  %v3433_v4 = vsel %vm411_vm3, %v12798_v19, %v20787_v41  ;;  %v20789_v31 = vunpack.i.l.bf16 %v16530_v47  ;;  %v11054_v43 = vpack.c.bf16 %v16237_v44, %v3328_v54 }
 0x399   :  { %v3515_v33 = vsel %vm310_vm2, %v20479_v55, %v12803_v8  ;;  %v3514_v27 = vsel %vm310_vm2, %v12803_v8, %v20788_v58  ;;  %v20790_v55 = vunpack.i.h.bf16 %v16574_v1  ;;  %v20791_v58 = vunpack.i.h.bf16 %v16985_v2 }
 0x39a   :  { %v3427_v16 = vsel %vm411_vm3, %v3385_v0, %v20789_v31  ;;  %v3775_v45 = vpop.permute.xlu1 %3774  ;;  %v11170_v6 = vpack.c.bf16 %v3514_v27, %v3433_v4  ;;  %v11172_v28 = vpack.c.bf16 %v3515_v33, %v3414_v51  ;;  %v11056_v51 = vpack.c.bf16 %v16208_v7, %v3329_v37 }
 0x39b   :  { %v3633_v26 = vsel %vm411_vm3, %v12808_v5, %v20790_v55  ;;  %v3832_v19 = vsel %vm411_vm3, %v3775_v45, %v3777_v14  ;;  %v3614_v47 = vsel %vm411_vm3, %v20791_v58, %v12808_v5  ;;  %v20792_v1 = vunpack.i.l.bf16 %v16555_v15 }
 0x39c   :  { %v12817_v8 = vpop.permute.xlu0 %12816  ;;  %4060 = vmatpush1.msra.mxu0 %v3832_v19  ;;  %11171 = vmatprep.subr.bf16.mxu1 %v11170_v6  ;;  %v20793_v33 = vunpack.i.h.bf16 %v16370_v20  ;;  %v11174_v5 = vpack.c.bf16 %v3633_v26, %v16691_v60  ;;  %v20794_v15 = vunpack.i.l.bf16 %v16395_v49  ;;  %v20795_v4 = vunpack.i.h.bf16 %v16579_v59 }
 0x39d   :  { %v3528_v55 = vsel %vm310_vm2, %v12789_v50, %v20792_v1  ;;  %v12818_v54 = vunpack.i.l.bf16 %v12817_v8  ;;  %10487 = vmatmul.mubr.msk.f32.vlgmr.msra.gmra.mrb[10].mxu0 %vm2479_vm0, %v16527_v32  ;;  %11055 = vmatprep.subr.bf16.mxu0 %v11054_v43  ;;  %v11176_v31 = vpack.c.bf16 %v3614_v47, %v16680_v46  ;;  %v20797_v43 = vunpack.i.h.bf16 %v16939_v29 }
 0x39e   :  { %v3428_v14 = vsel %vm411_vm3, %v20793_v33, %v3385_v0  ;;  %v11058_v6 = vpack.c.bf16 %v3528_v55, %v3427_v16  ;;  %11173 = vmatpush1.bf16.msra.mxu1 %v11172_v28  ;;  %v17056_v37 = vpop.permute.xlu1 %12811  ;;  %11057 = vmatpush1.bf16.msra.mxu0 %v11056_v51  ;;  %v3529_v20 = vsel %vm310_vm2, %v20794_v15, %v12789_v50  ;;  %v20796_v50 = vunpack.i.l.bf16 %v16429_v24 }
 0x39f   :  { %v12814_v41 = vunpack.i.h.bf16 %v17056_v37  ;;  %v12813_v0 = vunpack.i.l.bf16 %v17056_v37  ;;  %11175 = vmatprep.subr.bf16.mxu1 %v11174_v5  ;;  %v3627_v16 = vsel %vm411_vm3, %v12818_v54, %v20795_v4  ;;  %v11060_v28 = vpack.c.bf16 %v3529_v20, %v3428_v14  ;;  %4249 = vmatprep.mubr.f32.mxu0 %v20752_v22  ;;  %v20847_v37 = vld [vmem:[#allocation9_spill] sm:$0xff] }
 0x3a0   :  { %11059 = vmatprep.subr.bf16.mxu0 %v11058_v6  ;;  %v17068_v27 = vpop.permute.xlu0 %3810  ;;  %v11062_v49 = vpack.c.bf16 %v3627_v16, %v16274_v21  ;;  %v3628_v26 = vsel %vm411_vm3, %v20796_v50, %v12818_v54  ;;  %v12819_v47 = vunpack.i.h.bf16 %v12817_v8  ;;  %v20798_v55 = vunpack.i.h.bf16 %v16581_v18 }
 0x3a1   :  { %v3715_v19 = vsel %vm310_vm2, %v12814_v41, %v12813_v0  ;;  %v3714_v58 = vsel %vm310_vm2, %v12813_v0, %v20797_v43  ;;  %v11064_v29 = vpack.c.bf16 %v3628_v26, %v16237_v44  ;;  %v20799_v8 = vunpack.i.h.bf16 %v16392_v56 }
 0x3a2   :  { %11177 = vmatpush1.bf16.msra.mxu1 %v11176_v31  ;;  %v3683_v51 = vpop.permute.xlu1 %3682  ;;  %11061 = vmatpush1.bf16.msra.mxu0 %v11060_v28  ;;  %v11178_v1 = vpack.c.bf16 %v20752_v22, %v3714_v58  ;;  %v11180_v24 = vpack.c.bf16 %v16691_v60, %v3715_v19  ;;  %v3833_v15 = vsel %vm411_vm3, %v12819_v47, %v3775_v45  ;;  %v20800_v28 = vunpack.i.l.bf16 %v16611_v57 }
 0x3a3   :  { %v3728_v33 = vsel %vm310_vm2, %v3683_v51, %v20798_v55  ;;  %11063 = vmatprep.subr.bf16.mxu0 %v11062_v49  ;;  %v3729_v5 = vsel %vm310_vm2, %v20799_v8, %v3683_v51  ;;  %v3814_v56 = vsel %vm411_vm3, %v17068_v27, %v12819_v47  ;;  %v20801_v50 = vunpack.i.l.bf16 %v16413_v17 }
 0x3a4   :  { %v3785_v14 = vpop.permute.xlu0 %3784  ;;  %11179 = vmatprep.subr.bf16.mxu1 %v11178_v1  ;;  %v11066_v54 = vpack.c.bf16 %v16247_v9, %v3728_v33  ;;  %v11068_v0 = vpack.c.bf16 %v16274_v21, %v3729_v5  ;;  %v20802_v57 = vunpack.i.l.bf16 %v16652_v11  ;;  %v20803_v47 = vunpack.i.h.bf16 %v16629_v42 }
 0x3a5   :  { %v3827_v49 = vsel %vm411_vm3, %v3785_v14, %v16572_v53  ;;  %v3828_v53 = vsel %vm411_vm3, %v16460_v30, %v3785_v14  ;;  %v20804_v1 = vunpack.i.h.bf16 %v16498_v36  ;;  %v20805_v55 = vunpack.i.h.bf16 %v16752_v38 }
 0x3a6   :  { %11181 = vmatpush1.bf16.msra.mxu1 %v11180_v24  ;;  %v3291_v6 = vpop.permute.xlu1 %3290  ;;  %11065 = vmatpush1.bf16.msra.mxu0 %v11064_v29  ;;  %v20806_v14 = vunpack.i.h.bf16 %v16534_v39 }
 0x3a7   :  { %4698 = vmatprep.subr.mxu1 %v3833_v15  ;;  %11067 = vmatprep.subr.bf16.mxu0 %v11066_v54  ;;  %v17099_v20 = vpop.f32.mrb[10].mxu1  ;;  %v3324_v31 = vsel %vm310_vm2, %v3291_v6, %v20800_v28  ;;  %v3325_v26 = vsel %vm310_vm2, %v20801_v50, %v3291_v6  ;;  %v20807_v54 = vunpack.i.l.bf16 %v16579_v59 }
 0x3a8   :  { %v3491_v4 = vpop.permute.xlu0 %3490  ;;  %v17102_v16 = vpop.f32.mrb[11].mxu1  ;;  %v11086_v17 = vpack.c.bf16 %v16324_v13, %v3324_v31  ;;  %v11088_v58 = vpack.c.bf16 %v16279_v23, %v3325_v26 }
 0x3a9   :  { %v3524_v51 = vsel %vm310_vm2, %v3491_v4, %v20803_v47  ;;  %v3525_v36 = vsel %vm310_vm2, %v20806_v14, %v3491_v4  ;;  %v20809_v4 = vunpack.i.l.bf16 %v16581_v18 }
 0x3aa   :  { %4699 = vmatpush1.msra.mxu1 %v3814_v56  ;;  %v3393_v45 = vpop.permute.xlu1 %3392  ;;  %11069 = vmatpush1.bf16.msra.mxu0 %v11068_v0  ;;  %v20808_v0 = vunpack.i.l.bf16 %v16786_v35 }
 0x3ab   :  { %10496 = vmatmul.mubr.msk.f32.vlgmr.msra.gmra.mrb[18].mxu1 %vm2479_vm0, %v16527_v32  ;;  %4201 = vmatprep.subr.mxu0 %v3827_v49  ;;  %v3423_v19 = vsel %vm411_vm3, %v3393_v45, %v20802_v57  ;;  %v3424_v24 = vsel %vm411_vm3, %v20804_v1, %v3393_v45  ;;  %v20810_v49 = vld [vmem:[#allocation53_spill] sm:$0xff]  ;;  %v20812_v57 = vld [vmem:[#allocation51_spill] sm:$0xff] }
 0x3ac   :  { %5738 = vmatprep.mubr.f32.mxu1 %v20752_v22  ;;  %v3691_v43 = vpop.permute.xlu0 %3690  ;;  %v11090_v30 = vpack.c.bf16 %v3524_v51, %v3423_v19  ;;  %v11092_v29 = vpack.c.bf16 %v3525_v36, %v3424_v24  ;;  %v20811_v50 = vunpack.i.h.bf16 %v20810_v49  ;;  %v20813_v19 = vld [vmem:[#allocation40_spill] sm:$0xff]  ;;  %v20817_v1 = vld [vmem:[#allocation41_spill] sm:$0xff] }
 0x3ad   :  { %v3724_v56 = vsel %vm310_vm2, %v3691_v43, %v20808_v0  ;;  %v3725_v59 = vsel %vm310_vm2, %v20809_v4, %v3691_v43  ;;  %v20814_v43 = vunpack.i.h.bf16 %v20813_v19  ;;  %v20820_v36 = vld [vmem:[#allocation57_spill] sm:$0xff]  ;;  %v20824_v0 = vld [vmem:[#allocation59_spill] sm:$0xff]  ;;  %v20826_v4 = vunpack.i.l.bf16 %v16629_v42  ;;  %v20829_v19 = vld [vmem:[#allocation60_spill] sm:$0xff] }
 0x3ae   :  { %v3593_v11 = vpop.permute.xlu1 %3592  ;;  %4202 = vmatpush1.msra.mxu0 %v3828_v53  ;;  %v11098_v28 = vpack.c.bf16 %v16338_v10, %v3724_v56  ;;  %v11100_v35 = vpack.c.bf16 %v16333_v12, %v3725_v59  ;;  %v20825_v56 = vunpack.i.h.bf16 %v20824_v0 }
 0x3af   :  { %10489 = vmatmul.mubr.msk.f32.vlgmr.msra.gmra.mrb[12].mxu0 %vm2479_vm0, %v16527_v32  ;;  %11087 = vmatprep.subr.bf16.mxu0 %v11086_v17  ;;  %v3623_v33 = vsel %vm411_vm3, %v3593_v11, %v20805_v55  ;;  %v3624_v8 = vsel %vm411_vm3, %v20807_v54, %v3593_v11  ;;  %v20815_v17 = vld [vmem:[#allocation58_spill] sm:$0xff] }
 0x3b0   :  { %11089 = vmatpush1.bf16.msra.mxu0 %v11088_v58  ;;  %4391 = vmatprep.mubr.f32.mxu0 %v20752_v22  ;;  %v3793_v5 = vpop.permute.xlu0 %3792  ;;  %v11094_v15 = vpack.c.bf16 %v3623_v33, %v16333_v12  ;;  %v11096_v39 = vpack.c.bf16 %v3624_v8, %v16324_v13  ;;  %v20816_v58 = vunpack.i.l.bf16 %v20815_v17  ;;  %v20819_v33 = vld [vmem:[#allocation31_spill] sm:$0xff]  ;;  %v20822_v8 = vld [vmem:[#allocation42_spill] sm:$0xff] }
 0x3b1   :  { %11091 = vmatprep.subr.bf16.mxu0 %v11090_v30  ;;  %v3823_v18 = vsel %vm411_vm3, %v3793_v5, %v20812_v57  ;;  %v3824_v24 = vsel %vm411_vm3, %v20817_v1, %v3793_v5  ;;  %v20818_v30 = vld [vmem:[#allocation35_spill] sm:$0xff]  ;;  %v20828_v57 = vld [vmem:[#allocation37_spill] sm:$0xff] }
 0x3b2   :  { %v3299_v6 = vpop.permute.xlu1 %3298 }
 0x3b3   :  { %v3320_v26 = vsel %vm310_vm2, %v3299_v6, %v20811_v50  ;;  %v3321_v53 = vsel %vm310_vm2, %v20814_v43, %v3299_v6  ;;  %v20823_v6 = vunpack.i.h.bf16 %v20822_v8  ;;  %v20830_v43 = vunpack.i.h.bf16 %v20829_v19 }
 0x3b4   :  { %11093 = vmatpush1.bf16.msra.mxu0 %v11092_v29  ;;  %v3499_v31 = vpop.permute.xlu0 %3498  ;;  %v11118_v55 = vpack.c.bf16 %v20818_v30, %v3320_v26  ;;  %v11120_v14 = vpack.c.bf16 %v20819_v33, %v3321_v53  ;;  %v20821_v29 = vunpack.i.l.bf16 %v20820_v36  ;;  %v20836_v8 = vunpack.i.h.bf16 %v16966_v25  ;;  %v20839_v25 = vld [vmem:[#allocation56_spill] sm:$0xff] }
 0x3b5   :  { %11095 = vmatprep.subr.bf16.mxu0 %v11094_v15  ;;  %v3521_v59 = vsel %vm310_vm2, %v20826_v4, %v3499_v31  ;;  %v20838_v4 = vunpack.i.h.bf16 %v16996_v3  ;;  %v20843_v3 = vunpack.i.h.bf16 %v16985_v2 }
 0x3b6   :  { %v3401_v45 = vpop.permute.xlu1 %3400  ;;  %v3520_v54 = vsel %vm310_vm2, %v3499_v31, %v20821_v29  ;;  %v20831_v31 = vld [vmem:[#allocation52_spill] sm:$0xff] }
 0x3b7   :  { %v3419_v47 = vsel %vm411_vm3, %v3401_v45, %v20816_v58  ;;  %v3420_v15 = vsel %vm411_vm3, %v20823_v6, %v3401_v45  ;;  %v20827_v45 = vunpack.i.l.bf16 %v16752_v38  ;;  %v20832_v17 = vunpack.i.h.bf16 %v20831_v31  ;;  %v20833_v58 = vld [vmem:[#allocation36_spill] sm:$0xff] }
 0x3b8   :  { %11097 = vmatpush1.bf16.msra.mxu0 %v11096_v39  ;;  %v3699_v51 = vpop.permute.xlu0 %3698  ;;  %v11122_v5 = vpack.c.bf16 %v3520_v54, %v3419_v47 }
 0x3b9   :  { %11099 = vmatprep.subr.bf16.mxu0 %v11098_v28  ;;  %v11124_v28 = vpack.c.bf16 %v3521_v59, %v3420_v15  ;;  %v3720_v53 = vsel %vm310_vm2, %v3699_v51, %v20830_v43  ;;  %v3721_v38 = vsel %vm310_vm2, %v20832_v17, %v3699_v51  ;;  %v20835_v51 = vunpack.i.l.bf16 %v20810_v49 }
 0x3ba   :  { %v3601_v11 = vpop.permute.xlu1 %3600  ;;  %v11130_v47 = vpack.c.bf16 %v20833_v58, %v3720_v53 }
 0x3bb   :  { %v3619_v39 = vsel %vm411_vm3, %v3601_v11, %v20825_v56  ;;  %v20837_v56 = vld [vmem:[#allocation54_spill] sm:$0xff] }
 0x3bc   :  { %11101 = vmatpush1.bf16.msra.mxu0 %v11100_v35  ;;  %v3620_v35 = vsel %vm411_vm3, %v20827_v45, %v3601_v11  ;;  %v3801_v50 = vpop.permute.xlu0 %3800 }
 0x3bd   :  { %4343 = vmatprep.subr.mxu0 %v3823_v18  ;;  %v11126_v18 = vpack.c.bf16 %v3619_v39, %v20828_v57  ;;  %v11128_v42 = vpack.c.bf16 %v3620_v35, %v20818_v30  ;;  %v3819_v36 = vsel %vm411_vm3, %v3801_v50, %v16917_v52  ;;  %v3820_v39 = vsel %vm411_vm3, %v20837_v56, %v3801_v50  ;;  %v20841_v50 = vld [vmem:[#allocation55_spill] sm:$0xff] }
 0x3be   :  { %v3307_v26 = vpop.permute.xlu1 %3306 }
 0x3bf   :  { %v3317_v29 = vsel %vm310_vm2, %v20835_v51, %v3307_v26 }
 0x3c0   :  { %4344 = vmatpush1.msra.mxu0 %v3824_v24  ;;  %v3507_v11 = vpop.permute.xlu0 %3506  ;;  %v11132_v24 = vpack.c.bf16 %v20828_v57, %v3721_v38  ;;  %v11152_v49 = vpack.c.bf16 %v16507_v48, %v3317_v29 }
 0x3c1   :  { %10491 = vmatmul.mubr.msk.f32.vlgmr.msra.gmra.mrb[14].mxu0 %vm2479_vm0, %v16527_v32  ;;  %11119 = vmatprep.subr.bf16.mxu0 %v11118_v55  ;;  %v20834_v55 = vunpack.i.h.bf16 %v16962_v40  ;;  %v3516_v59 = vsel %vm310_vm2, %v3507_v11, %v20838_v4 }
 0x3c2   :  { %11121 = vmatpush1.bf16.msra.mxu0 %v11120_v14  ;;  %4533 = vmatprep.mubr.f32.mxu0 %v20752_v22  ;;  %v3409_v1 = vpop.permute.xlu1 %3408 }
 0x3c3   :  { %11123 = vmatprep.subr.bf16.mxu0 %v11122_v5  ;;  %v3316_v14 = vsel %vm310_vm2, %v3307_v26, %v20834_v55  ;;  %v3415_v40 = vsel %vm411_vm3, %v3409_v1, %v20836_v8  ;;  %v20842_v26 = vunpack.i.h.bf16 %v20841_v50  ;;  %v20850_v50 = vld [vmem:[#allocation27_spill] sm:$0xff] }
 0x3c4   :  { %v3707_v15 = vpop.permute.xlu0 %3706  ;;  %v11150_v52 = vpack.c.bf16 %v16677_v63, %v3316_v14  ;;  %v11154_v35 = vpack.c.bf16 %v3516_v59, %v3415_v40  ;;  %v20849_v40 = vunpack.i.l.bf16 %v20829_v19  ;;  %v13589_v59 = vld [vmem:[%s20261_s3] sm:$0xff] }
 0x3c6   :  { %11125 = vmatpush1.bf16.msra.mxu0 %v11124_v28  ;;  %v3609_v5 = vpop.permute.xlu1 %3608  ;;  %v20840_v28 = vunpack.i.h.bf16 %v20839_v25 }
 0x3c7   :  { %11127 = vmatprep.subr.bf16.mxu0 %v11126_v18  ;;  %v3517_v18 = vsel %vm310_vm2, %v20842_v26, %v3507_v11  ;;  %v3615_v43 = vsel %vm411_vm3, %v3609_v5, %v20843_v3 }
 0x3c8   :  { %v3416_v45 = vsel %vm411_vm3, %v20840_v28, %v3409_v1  ;;  %v11158_v11 = vpack.c.bf16 %v3615_v43, %v16709_v61 }
 0x3c9   :  { %v11156_v53 = vpack.c.bf16 %v3517_v18, %v3416_v45  ;;  %v20851_v18 = vld [vmem:[#allocation30_spill] sm:$0xff] }
 0x3ca   :  { %11129 = vmatpush1.bf16.msra.mxu0 %v11128_v42  ;;  %v20844_v42 = vunpack.i.l.bf16 %v20824_v0  ;;  %v3716_v0 = vsel %vm310_vm2, %v3707_v15, %v12814_v41  ;;  %v20848_v41 = vld [vmem:[#allocation16_spill] sm:$0xff] }
 0x3cb   :  { %11131 = vmatprep.subr.bf16.mxu0 %v11130_v47 }
 0x3ce   :  { %11133 = vmatpush1.bf16.msra.mxu0 %v11132_v24 }
 0x3cf   :  { %4485 = vmatprep.subr.mxu0 %v3819_v36  ;;  %v4322_v54 = vpop.f32.mrb[12].mxu1 }
 0x3d0   :  { %v4324_v6 = vpop.f32.mrb[13].mxu1 }
 0x3d2   :  { %4486 = vmatpush1.msra.mxu0 %v3820_v39  ;;  %v3809_v39 = vpop.permute.xlu1 %3808 }
 0x3d3   :  { %10493 = vmatmul.mubr.msk.f32.vlgmr.msra.gmra.mrb[16].mxu0 %vm2479_vm0, %v16527_v32  ;;  %11151 = vmatprep.subr.bf16.mxu0 %v11150_v52  ;;  %v3616_v32 = vsel %vm411_vm3, %v20844_v42, %v3609_v5  ;;  %v11162_v5 = vpack.c.bf16 %v16680_v46, %v3716_v0 }
 0x3d4   :  { %11153 = vmatpush1.bf16.msra.mxu0 %v11152_v49  ;;  %4675 = vmatprep.mubr.f32.mxu0 %v20752_v22  ;;  %v11160_v36 = vpack.c.bf16 %v3616_v32, %v16677_v63  ;;  %v3816_v49 = vsel %vm411_vm3, %v16975_v62, %v3809_v39 }
 0x3d5   :  { %v17263_v31 = vpop.permute.xlu0 %4037  ;;  %11155 = vmatprep.subr.bf16.mxu0 %v11154_v35 }
 0x3d6   :  { %v4325_v17 = vadd.f32 %v4324_v6, %v17263_v31  ;;  %v4181_v2 = vadd.f32 %v17099_v20, %v17263_v31  ;;  %v4183_v38 = vadd.f32 %v17102_v16, %v17263_v31  ;;  %v4323_v47 = vadd.f32 %v4322_v54, %v17263_v31  ;;  %v20845_v20 = vld [vmem:[#allocation20_spill] sm:$0xff] }
 0x3d7   :  { %v20846_v16 = vld [vmem:[#allocation8_spill] sm:$0xff]  ;;  %v3717_v6 = vsel %vm310_vm2, %v20849_v40, %v3707_v15  ;;  %v3815_v15 = vsel %vm411_vm3, %v3809_v39, %v17068_v27 }
 0x3d8   :  { %v4760_v1 = vmax.f32 %v4325_v17, 0.0  ;;  %11157 = vmatpush1.bf16.msra.mxu0 %v11156_v53  ;;  %v4755_v24 = vmax.f32 %v4181_v2, 0.0  ;;  %v4756_v55 = vmax.f32 %v4183_v38, 0.0  ;;  %v4759_v14 = vmax.f32 %v4323_v47, 0.0  ;;  %v20852_v47 = vld [vmem:[#allocation34_spill] sm:$0xff] }
 0x3d9   :  { %11159 = vmatprep.subr.bf16.mxu0 %v11158_v11  ;;  %v11164_v52 = vpack.c.bf16 %v16709_v61, %v3717_v6  ;;  %v20853_v11 = vld [vmem:[#allocation38_spill] sm:$0xff] }
 0x3da   :  { %v17278_v51 = vmul.f32 %v4760_v1, %v20845_v20  ;;  %v17281_v29 = vmul.f32 %v4755_v24, %v20846_v16  ;;  %v17284_v54 = vmul.f32 %v4756_v55, %v20847_v37  ;;  %v17287_v8 = vmul.f32 %v4759_v14, %v20848_v41 }
 0x3dc   :  { %11161 = vmatpush1.bf16.msra.mxu0 %v11160_v36  ;;  %5336 = vrot.lane.b32.xlu0 %v17281_v29, %s13607_s16  ;;  %v12820_v56 = vpack.i.bf16 %v17284_v54, %v17281_v29  ;;  %v12835_v19 = vpack.i.bf16 %v17278_v51, %v17287_v8  ;;  %v12830_v4 = vpack.i.bf16 %v17284_v54, %v20752_v22 }
 0x3dd   :  { %11163 = vmatprep.subr.bf16.mxu0 %v11162_v5 }
 0x3de   :  { %12821 = vrot.lane.b32.xlu1 %v12820_v56, %s13607_s16 }
 0x3e0   :  { %11165 = vmatpush1.bf16.msra.mxu0 %v11164_v52  ;;  %12836 = vrot.lane.b32.xlu0 %v12835_v19, %s13607_s16  ;;  %v20855_v52 = vld [vmem:[#allocation10_spill] sm:$0xff] }
 0x3e1   :  { %4627 = vmatprep.subr.mxu0 %v3815_v15 }
 0x3e2   :  { %12826 = vrot.lane.b32.xlu1 %v12820_v56, %s13607_s16  ;;  %v20854_v56 = vld [vmem:[#allocation11_spill] sm:$0xff] }
 0x3e4   :  { %4628 = vmatpush1.msra.mxu0 %v3816_v49  ;;  %5346 = vrot.lane.b32.xlu0 %v17278_v51, %s13607_s16 }
 0x3e5   :  { %10495 = vmatmul.mubr.msk.f32.vlgmr.msra.gmra.mrb[18].mxu0 %vm2479_vm0, %v13589_v59 }
 0x3e6   :  { %12831 = vrot.lane.b32.xlu1 %v12830_v4, %s13605_s29  ;;  %5667 = vmatprep.mubr.f32.mxu0 %v20752_v22 }
 0x3ea   :  { %5338 = vrot.lane.b32.xlu1 %v17284_v54, %s13607_s16 }
 0x3ee   :  { %5344 = vrot.lane.b32.xlu1 %v17287_v8, %s13607_s16 }
 0x3f2   :  { %12841 = vrot.lane.b32.xlu1 %v12835_v19, %s13605_s29 }
 0x422   :  { %v4464_v62 = vpop.f32.mrb[14].mxu1 }
 0x423   :  { %v4465_v27 = vadd.f32 %v4464_v62, %v17263_v31  ;;  %v4466_v25 = vpop.f32.mrb[15].mxu1 }
 0x424   :  { %v4467_v28 = vadd.f32 %v4466_v25, %v17263_v31 }
 0x425   :  { %v4763_v45 = vmax.f32 %v4465_v27, 0.0 }
 0x426   :  { %v4764_v35 = vmax.f32 %v4467_v28, 0.0 }
 0x427   :  { %v17328_v26 = vmul.f32 %v4763_v45, %v20850_v50 }
 0x428   :  { %v17331_v3 = vmul.f32 %v4764_v35, %v20851_v18 }
 0x429   :  { %5352 = vrot.lane.b32.xlu1 %v17328_v26, %s13607_s16 }
 0x42a   :  { %v12845_v43 = vpack.i.bf16 %v17331_v3, %v17328_v26 }
 0x42c   :  { %12846 = vrot.lane.b32.xlu0 %v12845_v43, %s13607_s16 }
 0x42d   :  { %12851 = vrot.lane.b32.xlu1 %v12845_v43, %s13605_s29  ;;  %v20856_v43 = vld [vmem:[#allocation44_spill] sm:$0xff] }
 0x430   :  { %5354 = vrot.lane.b32.xlu0 %v17331_v3, %s13607_s16 }
 0x469   :  { %v4606_v53 = vpop.f32.mrb[16].mxu1 }
 0x46a   :  { %v4607_v42 = vadd.f32 %v4606_v53, %v17263_v31  ;;  %v4608_v32 = vpop.f32.mrb[17].mxu1 }
 0x46b   :  { %v4609_v17 = vadd.f32 %v4608_v32, %v17263_v31 }
 0x46c   :  { %v4767_v2 = vmax.f32 %v4607_v42, 0.0 }
 0x46d   :  { %v4768_v38 = vmax.f32 %v4609_v17, 0.0 }
 0x46e   :  { %v17344_v0 = vmul.f32 %v4767_v2, %v20852_v47  ;;  %v20857_v2 = vld [vmem:[#allocation47_spill] sm:$0xff] }
 0x46f   :  { %v17347_v1 = vmul.f32 %v4768_v38, %v20853_v11 }
 0x470   :  { %v4109_v24 = vpop.f32.mrb[10].mxu0  ;;  %5360 = vrot.lane.b32.xlu0 %v17344_v0, %s13607_s16 }
 0x471   :  { %v4110_v55 = vadd.f32 %v4109_v24, %v17263_v31  ;;  %v4111_v14 = vpop.f32.mrb[11].mxu0  ;;  %v12860_v36 = vpack.i.bf16 %v17347_v1, %v17344_v0 }
 0x472   :  { %v4112_v40 = vadd.f32 %v4111_v14, %v17263_v31  ;;  %v20859_v14 = vld [vmem:[#allocation14_spill] sm:$0xff] }
 0x473   :  { %v4753_v6 = vmax.f32 %v4110_v55, 0.0  ;;  %12861 = vrot.lane.b32.xlu1 %v12860_v36, %s13605_s29 }
 0x474   :  { %v4754_v5 = vmax.f32 %v4112_v40, 0.0  ;;  %12856 = vrot.lane.b32.xlu0 %v12860_v36, %s13607_s16 }
 0x475   :  { %v17358_v39 = vmul.f32 %v4753_v6, %v20854_v56 }
 0x476   :  { %v17361_v19 = vmul.f32 %v4754_v5, %v20855_v52 }
 0x477   :  { %5362 = vrot.lane.b32.xlu1 %v17347_v1, %s13607_s16  ;;  %v12865_v49 = vpack.i.bf16 %v17358_v39, %v20752_v22 }
 0x478   :  { %v12870_v15 = vpack.i.bf16 %v17281_v29, %v17361_v19  ;;  %v12875_v4 = vpack.i.bf16 %v17361_v19, %v17358_v39  ;;  %v12885_v17 = vpack.i.bf16 %v17361_v19, %v20752_v22 }
 0x47a   :  { %12871 = vrot.lane.b32.xlu0 %v12870_v15, %s13605_s29 }
 0x47b   :  { %12866 = vrot.lane.b32.xlu1 %v12865_v49, %s13605_s29 }
 0x47e   :  { %v4748_v59 = vpop.f32.mrb[18].mxu1  ;;  %12876 = vrot.lane.b32.xlu0 %v12875_v4, %s13607_s16 }
 0x47f   :  { %v4749_v62 = vadd.f32 %v4748_v59, %v17263_v31  ;;  %v4750_v27 = vpop.f32.mrb[19].mxu1  ;;  %12891 = vrot.lane.b32.xlu1 %v12870_v15, %s13605_s29  ;;  %v20860_v59 = vld [vmem:[#allocation21_spill] sm:$0xff] }
 0x480   :  { %v4751_v25 = vadd.f32 %v4750_v27, %v17263_v31 }
 0x481   :  { %v4771_v28 = vmax.f32 %v4749_v62, 0.0 }
 0x482   :  { %v4772_v45 = vmax.f32 %v4751_v25, 0.0  ;;  %v4251_v35 = vpop.f32.mrb[12].mxu0  ;;  %12881 = vrot.lane.b32.xlu0 %v12870_v15, %s13605_s29 }
 0x483   :  { %v17379_v53 = vmul.f32 %v4771_v28, %v20856_v43  ;;  %v4252_v42 = vadd.f32 %v4251_v35, %v17263_v31  ;;  %v4253_v32 = vpop.f32.mrb[13].mxu0 }
 0x484   :  { %v17385_v38 = vmul.f32 %v4772_v45, %v20857_v2  ;;  %v4254_v40 = vadd.f32 %v4253_v32, %v17263_v31 }
 0x485   :  { %v4757_v24 = vmax.f32 %v4252_v42, 0.0  ;;  %v12895_v55 = vpack.i.bf16 %v17358_v39, %v17379_v53 }
 0x486   :  { %20858 = vst [vmem:[#allocation53_spill] sm:$0xff] %v17385_v38  ;;  %12886 = vrot.lane.b32.xlu0 %v12885_v17, %s13607_s16  ;;  %v12900_v6 = vpack.i.bf16 %v17385_v38, %v17284_v54  ;;  %v4758_v15 = vmax.f32 %v4254_v40, 0.0  ;;  %v20861_v17 = vld [vmem:[#allocation24_spill] sm:$0xff] }
 0x487   :  { %12896 = vrot.lane.b32.xlu1 %v12895_v55, %s13605_s29  ;;  %v17392_v36 = vmul.f32 %v4757_v24, %v20859_v14 }
 0x488   :  { %v17409_v62 = vmul.f32 %v4758_v15, %v20860_v59 }
 0x489   :  { %v12905_v5 = vpack.i.bf16 %v17358_v39, %v17392_v36  ;;  %v12915_v49 = vpack.i.bf16 %v17392_v36, %v17287_v8  ;;  %v12910_v4 = vpack.i.bf16 %v17392_v36, %v17284_v54 }
 0x48a   :  { %5334 = vrot.lane.b32.xlu0 %v17361_v19, %s13607_s16  ;;  %v12925_v45 = vpack.i.bf16 %v17409_v62, %v17392_v36  ;;  %v12930_v32 = vpack.i.bf16 %v17287_v8, %v17409_v62  ;;  %v12935_v55 = vpack.i.bf16 %v17409_v62, %v17278_v51 }
 0x48b   :  { %12901 = vrot.lane.b32.xlu1 %v12900_v6, %s13605_s29 }
 0x48e   :  { %12906 = vrot.lane.b32.xlu0 %v12905_v5, %s13607_s16  ;;  %v20862_v5 = vld [vmem:[#allocation25_spill] sm:$0xff] }
 0x48f   :  { %12916 = vrot.lane.b32.xlu1 %v12915_v49, %s13605_s29 }
 0x492   :  { %12911 = vrot.lane.b32.xlu0 %v12910_v4, %s13605_s29 }
 0x493   :  { %5342 = vrot.lane.b32.xlu1 %v17409_v62, %s13607_s16 }
 0x494   :  { %v4393_v27 = vpop.f32.mrb[14].mxu0 }
 0x495   :  { %v4394_v25 = vadd.f32 %v4393_v27, %v17263_v31  ;;  %v4395_v28 = vpop.f32.mrb[15].mxu0 }
 0x496   :  { %5340 = vrot.lane.b32.xlu0 %v17392_v36, %s13607_s16  ;;  %v4396_v42 = vadd.f32 %v4395_v28, %v17263_v31 }
 0x497   :  { %12926 = vrot.lane.b32.xlu1 %v12925_v45, %s13607_s16  ;;  %v4761_v35 = vmax.f32 %v4394_v25, 0.0 }
 0x498   :  { %v4762_v40 = vmax.f32 %v4396_v42, 0.0 }
 0x499   :  { %v17426_v24 = vmul.f32 %v4761_v35, %v20861_v17 }
 0x49a   :  { %12921 = vrot.lane.b32.xlu0 %v12925_v45, %s13605_s29  ;;  %v17435_v15 = vmul.f32 %v4762_v40, %v20862_v5 }
 0x49b   :  { %12931 = vrot.lane.b32.xlu1 %v12930_v32, %s13605_s29  ;;  %v12945_v6 = vpack.i.bf16 %v17426_v24, %v17278_v51  ;;  %v12950_v49 = vpack.i.bf16 %v17278_v51, %v17426_v24  ;;  %v12955_v45 = vpack.i.bf16 %v17426_v24, %v17328_v26 }
 0x49c   :  { %v12960_v4 = vpack.i.bf16 %v17435_v15, %v17426_v24 }
 0x49e   :  { %12936 = vrot.lane.b32.xlu0 %v12935_v55, %s13605_s29  ;;  %v20863_v55 = vld [vmem:[#allocation32_spill] sm:$0xff] }
 0x49f   :  { %12941 = vrot.lane.b32.xlu1 %v12930_v32, %s13607_s16  ;;  %v12970_v32 = vpack.i.bf16 %v17328_v26, %v17435_v15 }
 0x4a2   :  { %12946 = vrot.lane.b32.xlu0 %v12945_v6, %s13607_s16  ;;  %v12975_v6 = vpack.i.bf16 %v17435_v15, %v17331_v3 }
 0x4a3   :  { %5348 = vrot.lane.b32.xlu1 %v17426_v24, %s13607_s16 }
 0x4a6   :  { %v4535_v27 = vpop.f32.mrb[16].mxu0  ;;  %12951 = vrot.lane.b32.xlu0 %v12950_v49, %s13605_s29 }
 0x4a7   :  { %12961 = vrot.lane.b32.xlu1 %v12960_v4, %s13605_s29  ;;  %v4537_v25 = vpop.f32.mrb[17].mxu0  ;;  %v4536_v28 = vadd.f32 %v4535_v27, %v17263_v31  ;;  %v20864_v27 = vld [vmem:[#allocation33_spill] sm:$0xff] }
 0x4a8   :  { %v4538_v42 = vadd.f32 %v4537_v25, %v17263_v31 }
 0x4a9   :  { %v4765_v35 = vmax.f32 %v4536_v28, 0.0 }
 0x4aa   :  { %12956 = vrot.lane.b32.xlu0 %v12955_v45, %s13605_s29  ;;  %v4766_v49 = vmax.f32 %v4538_v42, 0.0 }
 0x4ab   :  { %12966 = vrot.lane.b32.xlu1 %v12960_v4, %s13607_s16  ;;  %v17458_v40 = vmul.f32 %v4765_v35, %v20863_v55  ;;  %v17474_v35 = vpop.permute.xlu1 %12821 }
 0x4ac   :  { %v17467_v25 = vmul.f32 %v4766_v49, %v20864_v27 }
 0x4ad   :  { %v12985_v4 = vpack.i.bf16 %v17458_v40, %v17331_v3  ;;  %v12990_v45 = vpack.i.bf16 %v17331_v3, %v17458_v40  ;;  %v12995_v49 = vpack.i.bf16 %v17458_v40, %v17344_v0 }
 0x4ae   :  { %5350 = vrot.lane.b32.xlu0 %v17435_v15, %s13607_s16 }
 0x4af   :  { %12971 = vrot.lane.b32.xlu1 %v12970_v32, %s13605_s29  ;;  %v17485_v2 = vpop.permute.xlu1 %12826 }
 0x4b0   :  { %v12828_v44 = vunpack.i.l.bf16 %v17485_v2  ;;  %v12829_v52 = vunpack.i.h.bf16 %v17485_v2 }
 0x4b2   :  { %12976 = vrot.lane.b32.xlu0 %v12975_v6, %s13605_s29 }
 0x4b3   :  { %12981 = vrot.lane.b32.xlu1 %v12970_v32, %s13607_s16  ;;  %v13000_v32 = vpack.i.bf16 %v17467_v25, %v17458_v40 }
 0x4b6   :  { %12986 = vrot.lane.b32.xlu0 %v12985_v4, %s13607_s16 }
 0x4b7   :  { %5356 = vrot.lane.b32.xlu1 %v17458_v40, %s13607_s16 }
 0x4b8   :  { %v4677_v28 = vpop.f32.mrb[18].mxu0 }
 0x4b9   :  { %v4679_v42 = vpop.f32.mrb[19].mxu0  ;;  %v4678_v6 = vadd.f32 %v4677_v28, %v17263_v31  ;;  %v20865_v28 = vld [vmem:[#allocation43_spill] sm:$0xff] }
 0x4ba   :  { %12991 = vrot.lane.b32.xlu0 %v12990_v45, %s13605_s29  ;;  %v4680_v4 = vadd.f32 %v4679_v42, %v17263_v31  ;;  %v13010_v45 = vpack.i.bf16 %v17344_v0, %v17467_v25  ;;  %v13015_v31 = vpack.i.bf16 %v17467_v25, %v17347_v1  ;;  %v17498_v42 = vpop.permute.xlu1 %12831 }
 0x4bb   :  { %13001 = vrot.lane.b32.xlu1 %v13000_v32, %s13605_s29  ;;  %v4769_v61 = vmax.f32 %v4678_v6, 0.0  ;;  %v17505_v6 = vpop.permute.xlu0 %5336 }
 0x4bc   :  { %v4770_v60 = vmax.f32 %v4680_v4, 0.0 }
 0x4bd   :  { %v17494_v43 = vmul.f32 %v4769_v61, %v20865_v28 }
 0x4be   :  { %12996 = vrot.lane.b32.xlu0 %v12995_v49, %s13605_s29  ;;  %v20866_v49 = vld [vmem:[#allocation49_spill] sm:$0xff]  ;;  %v17512_v28 = vpop.permute.xlu1 %5338 }
 0x4bf   :  { %13006 = vrot.lane.b32.xlu1 %v13000_v32, %s13607_s16  ;;  %v17501_v32 = vmul.f32 %v4770_v60, %v20866_v49  ;;  %v13025_v4 = vpack.i.bf16 %v17494_v43, %v17347_v1  ;;  %v13030_v60 = vpack.i.bf16 %v17347_v1, %v17494_v43 }
 0x4c1   :  { %20867 = vst [vmem:[#allocation51_spill] sm:$0xff] %v17501_v32  ;;  %v13035_v61 = vpack.i.bf16 %v17501_v32, %v17494_v43  ;;  %v13045_v49 = vpack.i.bf16 %v17501_v32, %v17379_v53  ;;  %v13060_v63 = vpack.i.bf16 %v17379_v53, %v17501_v32 }
 0x4c2   :  { %5358 = vrot.lane.b32.xlu0 %v17467_v25, %s13607_s16 }
 0x4c3   :  { %13011 = vrot.lane.b32.xlu1 %v13010_v45, %s13605_s29 }
 0x4c6   :  { %13016 = vrot.lane.b32.xlu0 %v13015_v31, %s13605_s29  ;;  %v17517_v31 = vpop.permute.xlu0 %12836 }
 0x4c7   :  { %13021 = vrot.lane.b32.xlu1 %v13010_v45, %s13607_s16  ;;  %v17522_v45 = vpop.permute.xlu1 %5344 }
 0x4ca   :  { %13026 = vrot.lane.b32.xlu0 %v13025_v4, %s13607_s16  ;;  %v17529_v4 = vpop.permute.xlu0 %5346 }
 0x4cb   :  { %13036 = vrot.lane.b32.xlu1 %v13035_v61, %s13605_s29  ;;  %v17532_v46 = vpop.permute.xlu1 %12841 }
 0x4ce   :  { %13031 = vrot.lane.b32.xlu0 %v13030_v60, %s13605_s29  ;;  %v17536_v60 = vpop.permute.xlu0 %12846 }
 0x4cf   :  { %5366 = vrot.lane.b32.xlu1 %v17501_v32, %s13607_s16  ;;  %v17541_v11 = vpop.permute.xlu1 %5352 }
 0x4d2   :  { %5364 = vrot.lane.b32.xlu0 %v17494_v43, %s13607_s16  ;;  %v17546_v27 = vpop.permute.xlu0 %5354 }
 0x4d3   :  { %13046 = vrot.lane.b32.xlu1 %v13045_v49, %s13607_s16  ;;  %v13055_v49 = vpack.i.bf16 %v17385_v38, %v17379_v53  ;;  %v17551_v48 = vpop.permute.xlu1 %12851 }
 0x4d6   :  { %13041 = vrot.lane.b32.xlu0 %v13035_v61, %s13607_s16 }
 0x4d7   :  { %5070 = vrot.lane.b32.xlu1 %v17379_v53, %s13605_s29 }
 0x4da   :  { %13051 = vrot.lane.b32.xlu0 %v13035_v61, %s13605_s29 }
 0x4db   :  { %13061 = vrot.lane.b32.xlu1 %v13060_v63, %s13605_s29 }
 0x4de   :  { %13056 = vrot.lane.b32.xlu0 %v13055_v49, %s13607_s16  ;;  %v5594_v49 = vld [vmem:[%s20264_s6] sm:$0xff] }
 0x4df   :  { %5368 = vrot.lane.b32.xlu1 %v17379_v53, %s13607_s16 }
 0x4e2   :  { %5270 = vrot.lane.b32.xlu0 %v17385_v38, %s13605_s29  ;;  %v17555_v61 = vpop.permute.xlu0 %5360 }
 0x4e3   :  { %5372 = vrot.lane.b32.xlu1 %v20752_v22, %s13607_s16 }
 0x4e5   :  { %v17559_v63 = vpop.permute.xlu1 %12861 }
 0x4e6   :  { %5370 = vrot.lane.b32.xlu0 %v17385_v38, %s13607_s16  ;;  %v17566_v47 = vpop.permute.xlu0 %12856 }
 0x4e9   :  { %v17568_v57 = vpop.permute.xlu1 %5362 }
 0x4ea   :  { %5597 = vperm.xlu0 %12609, %v5594_v49  }
 0x4ec   :  { %v17570_v55 = vpop.permute.xlu0 %12871 }
 0x4ed   :  { %v20490_v58 = vunpack.i.h.bf16 %v17570_v55  ;;  %v12873_v30 = vunpack.i.l.bf16 %v17570_v55  ;;  %v12867_v18 = vpop.permute.xlu1 %12866 }
 0x4ee   :  { %v12869_v50 = vunpack.i.h.bf16 %v12867_v18  ;;  %v12868_v5 = vunpack.i.l.bf16 %v12867_v18 }
 0x4ef   :  { %v4890_v33 = vsel %vm310_vm2, %v12873_v30, %v20490_v58 }
 0x4f0   :  { %v4891_v17 = vsel %vm310_vm2, %v12869_v50, %v12873_v30  ;;  %v12877_v10 = vpop.permute.xlu0 %12876  ;;  %v11198_v49 = vpack.c.bf16 %v17281_v29, %v4890_v33  ;;  %v4892_v12 = vsel %vm310_vm2, %v12868_v5, %v12869_v50  ;;  %v12823_v50 = vunpack.i.l.bf16 %v17474_v35 }
 0x4f1   :  { %v11182_v13 = vpack.c.bf16 %v17358_v39, %v4892_v12  ;;  %v11200_v20 = vpack.c.bf16 %v17361_v19, %v4891_v17  ;;  %v17585_v59 = vpop.permute.xlu1 %12891  ;;  %v12879_v58 = vunpack.i.h.bf16 %v12877_v10  ;;  %v12878_v41 = vunpack.i.l.bf16 %v12877_v10 }
 0x4f2   :  { %11199 = vmatprep.subr.bf16.mxu1 %v11198_v49  ;;  %v20869_v49 = vunpack.i.h.bf16 %v17474_v35  ;;  %v12894_v7 = vunpack.i.h.bf16 %v17585_v59  ;;  %v12893_v38 = vunpack.i.l.bf16 %v17585_v59 }
 0x4f3   :  { %11183 = vmatprep.subr.bf16.mxu0 %v11182_v13  ;;  %11201 = vmatpush1.bf16.msra.mxu1 %v11200_v20  ;;  %v4991_v21 = vsel %vm411_vm3, %v12878_v41, %v12879_v58 }
 0x4f4   :  { %v12882_v18 = vpop.permute.xlu0 %12881  ;;  %v4989_v56 = vsel %vm411_vm3, %v12823_v50, %v20869_v49 }
 0x4f5   :  { %v12883_v14 = vunpack.i.l.bf16 %v12882_v18  ;;  %v12884_v13 = vunpack.i.h.bf16 %v12882_v18 }
 0x4f7   :  { %v5091_v32 = vsel %vm310_vm2, %v12883_v14, %v12884_v13 }
 0x4f8   :  { %v17587_v23 = vpop.permute.xlu0 %12886 }
 0x4f9   :  { %20868 = vst [vmem:[#allocation40_spill] sm:$0xff] %v17587_v23  ;;  %v17590_v33 = vpop.permute.xlu1 %12896  ;;  %v12889_v20 = vunpack.i.h.bf16 %v17587_v23  ;;  %v20870_v2 = vunpack.i.l.bf16 %v17587_v23  ;;  %v5190_v23 = vsel %vm411_vm3, %v12828_v44, %v12829_v52 }
 0x4fa   :  { %v12899_v12 = vunpack.i.h.bf16 %v17590_v33  ;;  %v20495_v17 = vunpack.i.l.bf16 %v17590_v33 }
 0x4fc   :  { %v4893_v10 = vsel %vm310_vm2, %v20495_v17, %v12868_v5  ;;  %v17601_v30 = vpop.permute.xlu0 %5334  ;;  %v5092_v9 = vsel %vm310_vm2, %v12899_v12, %v12883_v14 }
 0x4fd   :  { %v17608_v18 = vpop.permute.xlu1 %12901  ;;  %v11184_v37 = vpack.c.bf16 %v20752_v22, %v4893_v10  ;;  %v11186_v16 = vpack.c.bf16 %v5092_v9, %v4991_v21  ;;  %v5191_v9 = vsel %vm411_vm3, %v12889_v20, %v12828_v44  ;;  %v4990_v21 = vsel %vm411_vm3, %v12879_v58, %v12823_v50 }
 0x4fe   :  { %v20502_v5 = vunpack.i.h.bf16 %v17608_v18  ;;  %v12903_v17 = vunpack.i.l.bf16 %v17608_v18  ;;  %v4992_v10 = vsel %vm411_vm3, %v20870_v2, %v12878_v41  ;;  %v20503_v44 = vunpack.i.l.bf16 %v17498_v42 }
 0x4ff   :  { %11185 = vmatpush1.bf16.msra.mxu0 %v11184_v37 }
 0x500   :  { %v5093_v59 = vsel %vm310_vm2, %v20502_v5, %v12899_v12  ;;  %11187 = vmatprep.subr.bf16.mxu0 %v11186_v16  ;;  %v17634_v49 = vpop.permute.xlu0 %12906  ;;  %v5090_v37 = vsel %vm310_vm2, %v12884_v13, %v12903_v17  ;;  %v11190_v16 = vpack.c.bf16 %v5191_v9, %v17361_v19  ;;  %v11204_v12 = vpack.c.bf16 %v5091_v32, %v4990_v21 }
 0x501   :  { %v17640_v14 = vpop.permute.xlu1 %12916  ;;  %v20504_v58 = vunpack.i.h.bf16 %v17634_v49  ;;  %v12908_v50 = vunpack.i.l.bf16 %v17634_v49  ;;  %v11188_v41 = vpack.c.bf16 %v5093_v59, %v4992_v10  ;;  %v11202_v2 = vpack.c.bf16 %v5090_v37, %v4989_v56 }
 0x502   :  { %v5292_v56 = vsel %vm310_vm2, %v12893_v38, %v12894_v7 }
 0x503   :  { %v5192_v5 = vsel %vm411_vm3, %v20504_v58, %v12889_v20  ;;  %11189 = vmatpush1.bf16.msra.mxu0 %v11188_v41  ;;  %11203 = vmatprep.subr.bf16.mxu1 %v11202_v2  ;;  %v5189_v13 = vsel %vm411_vm3, %v12829_v52, %v12908_v50  ;;  %v5293_v52 = vsel %vm310_vm2, %v20503_v44, %v12893_v38  ;;  %v12843_v58 = vunpack.i.l.bf16 %v17532_v46 }
 0x504   :  { %11191 = vmatprep.subr.bf16.mxu0 %v11190_v16  ;;  %11205 = vmatpush1.bf16.msra.mxu1 %v11204_v12  ;;  %v17658_v32 = vpop.permute.xlu0 %12911  ;;  %v11192_v9 = vpack.c.bf16 %v5192_v5, %v17358_v39  ;;  %v11206_v20 = vpack.c.bf16 %v5189_v13, %v17284_v54  ;;  %v11194_v37 = vpack.c.bf16 %v17281_v29, %v5292_v56  ;;  %v12834_v39 = vunpack.i.h.bf16 %v17498_v42 }
 0x505   :  { %v17662_v21 = vpop.permute.xlu1 %5342  ;;  %v12914_v10 = vunpack.i.h.bf16 %v17658_v32  ;;  %v12913_v59 = vunpack.i.l.bf16 %v17658_v32  ;;  %v11208_v41 = vpack.c.bf16 %v5190_v23, %v17281_v29  ;;  %v20871_v23 = vunpack.i.h.bf16 %v17570_v55 }
 0x506   :  { %11207 = vmatprep.subr.bf16.mxu1 %v11206_v20  ;;  %v20505_v56 = vunpack.i.h.bf16 %v17517_v31  ;;  %v12838_v20 = vunpack.i.l.bf16 %v17517_v31 }
 0x507   :  { %v5291_v5 = vsel %vm310_vm2, %v12894_v7, %v12913_v59  ;;  %11193 = vmatpush1.bf16.msra.mxu0 %v11192_v9  ;;  %v5290_v2 = vsel %vm310_vm2, %v12913_v59, %v12914_v10  ;;  %v4889_v29 = vsel %vm310_vm2, %v20871_v23, %v12834_v39  ;;  %v11196_v7 = vpack.c.bf16 %v17361_v19, %v5293_v52  ;;  %v17700_v23 = vld [vmem:[%s20263_s5] sm:$0xff] }
 0x508   :  { %11195 = vmatprep.subr.bf16.mxu0 %v11194_v37  ;;  %11209 = vmatpush1.bf16.msra.mxu1 %v11208_v41  ;;  %v5341_v16 = vpop.permute.xlu0 %5340  ;;  %v11210_v38 = vpack.c.bf16 %v17392_v36, %v5290_v2  ;;  %v11212_v12 = vpack.c.bf16 %v17284_v54, %v5291_v5  ;;  %v5391_v9 = vsel %vm411_vm3, %v17505_v6, %v17512_v28  ;;  %v12918_v52 = vunpack.i.l.bf16 %v17640_v14 }
 0x509   :  { %v12927_v13 = vpop.permute.xlu1 %12926  ;;  %v5389_v37 = vsel %vm411_vm3, %v5341_v16, %v17662_v21  ;;  %v11216_v19 = vpack.c.bf16 %v17284_v54, %v4889_v29  ;;  %v5392_v54 = vsel %vm411_vm3, %v17601_v30, %v17505_v6 }
 0x50a   :  { %11211 = vmatprep.subr.bf16.mxu1 %v11210_v38  ;;  %v12928_v59 = vunpack.i.l.bf16 %v12927_v13  ;;  %v12929_v41 = vunpack.i.h.bf16 %v12927_v13  ;;  %v5390_v13 = vsel %vm411_vm3, %v17512_v28, %v5341_v16 }
 0x50b   :  { %11197 = vmatpush1.bf16.msra.mxu0 %v11196_v7 }
 0x50c   :  { %5619 = vmatprep.subr.mxu0 %v5391_v9  ;;  %11213 = vmatpush1.bf16.msra.mxu1 %v11212_v12  ;;  %v12922_v55 = vpop.permute.xlu0 %12921  ;;  %v12919_v12 = vunpack.i.h.bf16 %v17640_v14 }
 0x50d   :  { %v12932_v5 = vpop.permute.xlu1 %12931  ;;  %v12924_v2 = vunpack.i.h.bf16 %v12922_v55  ;;  %v12923_v38 = vunpack.i.l.bf16 %v12922_v55  ;;  %5690 = vmatprep.subr.mxu1 %v5389_v37 }
 0x50e   :  { %v12934_v7 = vunpack.i.h.bf16 %v12932_v5  ;;  %v12933_v9 = vunpack.i.l.bf16 %v12932_v5  ;;  %v20872_v5 = vunpack.i.h.bf16 %v17474_v35 }
 0x50f   :  { %v4887_v29 = vsel %vm310_vm2, %v12923_v38, %v12924_v2  ;;  %5620 = vmatpush1.msra.mxu0 %v5392_v54  ;;  %v4888_v55 = vsel %vm310_vm2, %v12834_v39, %v12923_v38  ;;  %v4886_v37 = vsel %vm310_vm2, %v12924_v2, %v12918_v52  ;;  %v4987_v2 = vsel %vm411_vm3, %v12928_v59, %v12929_v41 }
 0x510   :  { %v4988_v6 = vsel %vm411_vm3, %v20872_v5, %v12928_v59  ;;  %10497 = vmatmul.mubr.msk.f32.vlgmr.msra.gmra.mrb[20].mxu0 %vm2479_vm0, %v17700_v23  ;;  %5691 = vmatpush1.msra.mxu1 %v5390_v13  ;;  %v17724_v54 = vpop.permute.xlu0 %12936  ;;  %v11214_v28 = vpack.c.bf16 %v17392_v36, %v4888_v55  ;;  %v11230_v39 = vpack.c.bf16 %v17287_v8, %v4886_v37 }
 0x511   :  { %v12942_v16 = vpop.permute.xlu1 %12941  ;;  %v20506_v38 = vunpack.i.l.bf16 %v17724_v54  ;;  %10498 = vmatmul.mubr.msk.f32.vlgmr.msra.gmra.mrb[20].mxu1 %vm2479_vm0, %v17700_v23  ;;  %v11232_v35 = vpack.c.bf16 %v17409_v62, %v4887_v29  ;;  %v5088_v13 = vsel %vm310_vm2, %v12919_v12, %v12933_v9  ;;  %5809 = vmatprep.mubr.f32.mxu0 %v20752_v22  ;;  %v5087_v55 = vsel %vm310_vm2, %v12933_v9, %v12934_v7 }
 0x512   :  { %v12944_v37 = vunpack.i.h.bf16 %v12942_v16  ;;  %v12943_v5 = vunpack.i.l.bf16 %v12942_v16  ;;  %11215 = vmatprep.subr.bf16.mxu0 %v11214_v28  ;;  %11231 = vmatprep.subr.bf16.mxu1 %v11230_v39  ;;  %v11218_v44 = vpack.c.bf16 %v5088_v13, %v4987_v2  ;;  %v12939_v29 = vunpack.i.h.bf16 %v17724_v54 }
 0x513   :  { %11217 = vmatpush1.bf16.msra.mxu0 %v11216_v19  ;;  %11233 = vmatpush1.bf16.msra.mxu1 %v11232_v35  ;;  %v4985_v59 = vsel %vm411_vm3, %v12838_v20, %v20505_v56  ;;  %v5086_v9 = vsel %vm310_vm2, %v12934_v7, %v20506_v38  ;;  %v5089_v28 = vsel %vm310_vm2, %v12903_v17, %v12919_v12  ;;  %v12844_v17 = vunpack.i.h.bf16 %v17532_v46 }
 0x514   :  { %v4986_v39 = vsel %vm411_vm3, %v12929_v41, %v12838_v20  ;;  %v17755_v19 = vpop.permute.xlu0 %12946  ;;  %11219 = vmatprep.subr.bf16.mxu0 %v11218_v44  ;;  %v11234_v16 = vpack.c.bf16 %v5086_v9, %v4985_v59  ;;  %v5187_v35 = vsel %vm411_vm3, %v12943_v5, %v12944_v37  ;;  %v11220_v56 = vpack.c.bf16 %v5089_v28, %v4988_v6 }
 0x515   :  { %v5349_v2 = vpop.permute.xlu1 %5348  ;;  %v12949_v13 = vunpack.i.h.bf16 %v17755_v19  ;;  %v12948_v7 = vunpack.i.l.bf16 %v17755_v19  ;;  %v11236_v38 = vpack.c.bf16 %v5087_v55, %v4986_v39  ;;  %5880 = vmatprep.mubr.f32.mxu1 %v20752_v22  ;;  %v5188_v44 = vsel %vm411_vm3, %v12908_v50, %v12943_v5 }
 0x516   :  { %11235 = vmatprep.subr.bf16.mxu1 %v11234_v16  ;;  %v11222_v20 = vpack.c.bf16 %v5187_v35, %v17409_v62  ;;  %v5288_v46 = vsel %vm310_vm2, %v12939_v29, %v12843_v58  ;;  %v5289_v59 = vsel %vm310_vm2, %v12914_v10, %v12939_v29 }
 0x517   :  { %v5186_v41 = vsel %vm411_vm3, %v12944_v37, %v12948_v7  ;;  %11221 = vmatpush1.bf16.msra.mxu0 %v11220_v56  ;;  %11237 = vmatpush1.bf16.msra.mxu1 %v11236_v38  ;;  %v5185_v12 = vsel %vm411_vm3, %v12948_v7, %v12949_v13  ;;  %v11224_v56 = vpack.c.bf16 %v5188_v44, %v17392_v36 }
 0x518   :  { %v17776_v6 = vpop.permute.xlu0 %12951  ;;  %11223 = vmatprep.subr.bf16.mxu0 %v11222_v20  ;;  %v11238_v50 = vpack.c.bf16 %v5185_v12, %v17278_v51  ;;  %v11240_v55 = vpack.c.bf16 %v5186_v41, %v17287_v8  ;;  %v5287_v38 = vsel %vm310_vm2, %v12843_v58, %v12844_v17  ;;  %v11226_v9 = vpack.c.bf16 %v17287_v8, %v5288_v46 }
 0x519   :  { %v12962_v5 = vpop.permute.xlu1 %12961  ;;  %v12953_v37 = vunpack.i.l.bf16 %v17776_v6  ;;  %v12954_v16 = vunpack.i.h.bf16 %v17776_v6  ;;  %v11228_v8 = vpack.c.bf16 %v17409_v62, %v5289_v59  ;;  %v11244_v35 = vpack.c.bf16 %v17278_v51, %v5287_v38 }
 0x51a   :  { %11239 = vmatprep.subr.bf16.mxu1 %v11238_v50  ;;  %v12964_v28 = vunpack.i.h.bf16 %v12962_v5  ;;  %v12963_v39 = vunpack.i.l.bf16 %v12962_v5  ;;  %v5387_v7 = vsel %vm411_vm3, %v17522_v45, %v17529_v4  ;;  %v12849_v50 = vunpack.i.h.bf16 %v17536_v60 }
 0x51b   :  { %11225 = vmatpush1.bf16.msra.mxu0 %v11224_v56  ;;  %11241 = vmatpush1.bf16.msra.mxu1 %v11240_v55  ;;  %v5286_v36 = vsel %vm310_vm2, %v12844_v17, %v12953_v37  ;;  %v4885_v44 = vsel %vm310_vm2, %v12918_v52, %v12954_v16  ;;  %v5388_v5 = vsel %vm411_vm3, %v17662_v21, %v17522_v45  ;;  %v20873_v45 = vunpack.i.l.bf16 %v17724_v54 }
 0x51c   :  { %v17794_v58 = vpop.permute.xlu0 %12956  ;;  %11227 = vmatprep.subr.bf16.mxu0 %v11226_v9  ;;  %v11242_v32 = vpack.c.bf16 %v17426_v24, %v5286_v36  ;;  %v4883_v17 = vsel %vm310_vm2, %v12963_v39, %v12964_v28  ;;  %v4884_v62 = vsel %vm310_vm2, %v12954_v16, %v12963_v39  ;;  %v5386_v59 = vsel %vm411_vm3, %v17529_v4, %v5349_v2 }
 0x51d   :  { %v12967_v10 = vpop.permute.xlu1 %12966  ;;  %v12958_v29 = vunpack.i.l.bf16 %v17794_v58  ;;  %v12959_v12 = vunpack.i.h.bf16 %v17794_v58  ;;  %v11248_v9 = vpack.c.bf16 %v17278_v51, %v4885_v44  ;;  %v11246_v39 = vpack.c.bf16 %v17426_v24, %v4884_v62 }
 0x51e   :  { %11243 = vmatprep.subr.bf16.mxu1 %v11242_v32  ;;  %v12969_v20 = vunpack.i.h.bf16 %v12967_v10  ;;  %v12968_v41 = vunpack.i.l.bf16 %v12967_v10  ;;  %v11264_v36 = vpack.c.bf16 %v17435_v15, %v4883_v17 }
 0x51f   :  { %11229 = vmatpush1.bf16.msra.mxu0 %v11228_v8  ;;  %11245 = vmatpush1.bf16.msra.mxu1 %v11244_v35  ;;  %v4882_v14 = vsel %vm310_vm2, %v12964_v28, %v12958_v29  ;;  %v12848_v28 = vunpack.i.l.bf16 %v17536_v60  ;;  %v5085_v21 = vsel %vm310_vm2, %v20873_v45, %v12959_v12 }
 0x520   :  { %v17813_v46 = vpop.permute.xlu0 %5350  ;;  %5761 = vmatprep.subr.mxu0 %v5387_v7  ;;  %v11262_v16 = vpack.c.bf16 %v17328_v26, %v4882_v14  ;;  %v4983_v51 = vsel %vm411_vm3, %v12968_v41, %v12969_v20 }
 0x521   :  { %v12972_v52 = vpop.permute.xlu1 %12971  ;;  %v5385_v55 = vsel %vm411_vm3, %v5349_v2, %v17813_v46  ;;  %v20874_v2 = vunpack.i.h.bf16 %v17517_v31  ;;  %v12853_v31 = vunpack.i.l.bf16 %v17551_v48  ;;  %v5384_v58 = vsel %vm411_vm3, %v17813_v46, %v17541_v11 }
 0x522   :  { %v12974_v56 = vunpack.i.h.bf16 %v12972_v52  ;;  %v12973_v38 = vunpack.i.l.bf16 %v12972_v52  ;;  %5832 = vmatprep.subr.mxu1 %v5385_v55 }
 0x523   :  { %5762 = vmatpush1.msra.mxu0 %v5388_v5  ;;  %5833 = vmatpush1.msra.mxu1 %v5386_v59  ;;  %v4984_v54 = vsel %vm411_vm3, %v20874_v2, %v12968_v41  ;;  %v4982_v41 = vsel %vm411_vm3, %v12969_v20, %v12848_v28 }
 0x524   :  { %v17839_v32 = vpop.permute.xlu0 %12976  ;;  %10499 = vmatmul.mubr.msk.f32.vlgmr.msra.gmra.mrb[22].mxu0 %vm2479_vm0, %v17700_v23  ;;  %10500 = vmatmul.mubr.msk.f32.vlgmr.msra.gmra.mrb[22].mxu1 %vm2479_vm0, %v17700_v23  ;;  %v5084_v4 = vsel %vm310_vm2, %v12959_v12, %v12973_v38  ;;  %v5083_v10 = vsel %vm310_vm2, %v12973_v38, %v12974_v56  ;;  %v4981_v12 = vsel %vm411_vm3, %v12848_v28, %v12849_v50 }
 0x525   :  { %v12982_v8 = vpop.permute.xlu1 %12981  ;;  %v12978_v35 = vunpack.i.l.bf16 %v17839_v32  ;;  %11247 = vmatprep.subr.bf16.mxu0 %v11246_v39  ;;  %11263 = vmatprep.subr.bf16.mxu1 %v11262_v16  ;;  %v11250_v7 = vpack.c.bf16 %v5084_v4, %v4983_v51  ;;  %v12979_v62 = vunpack.i.h.bf16 %v17839_v32  ;;  %v11252_v55 = vpack.c.bf16 %v5085_v21, %v4984_v54 }
 0x526   :  { %v12984_v17 = vunpack.i.h.bf16 %v12982_v8  ;;  %v12983_v44 = vunpack.i.l.bf16 %v12982_v8  ;;  %11249 = vmatpush1.bf16.msra.mxu0 %v11248_v9  ;;  %11265 = vmatpush1.bf16.msra.mxu1 %v11264_v36  ;;  %v11268_v38 = vpack.c.bf16 %v5083_v10, %v4982_v41  ;;  %v12854_v16 = vunpack.i.h.bf16 %v17551_v48 }
 0x527   :  { %11251 = vmatprep.subr.bf16.mxu0 %v11250_v7  ;;  %v5082_v14 = vsel %vm310_vm2, %v12974_v56, %v12978_v35  ;;  %5951 = vmatprep.mubr.f32.mxu0 %v20752_v22  ;;  %v5284_v36 = vsel %vm310_vm2, %v12979_v62, %v12853_v31  ;;  %v5285_v4 = vsel %vm310_vm2, %v12953_v37, %v12979_v62 }
 0x528   :  { %v17869_v52 = vpop.permute.xlu0 %12986  ;;  %v5183_v5 = vsel %vm411_vm3, %v12983_v44, %v12984_v17  ;;  %v11266_v20 = vpack.c.bf16 %v5082_v14, %v4981_v12  ;;  %6022 = vmatprep.mubr.f32.mxu1 %v20752_v22  ;;  %v5184_v59 = vsel %vm411_vm3, %v12949_v13, %v12983_v44  ;;  %v11258_v10 = vpack.c.bf16 %v17328_v26, %v5284_v36 }
 0x529   :  { %v5357_v9 = vpop.permute.xlu1 %5356  ;;  %v12989_v56 = vunpack.i.h.bf16 %v17869_v52  ;;  %v12988_v28 = vunpack.i.l.bf16 %v17869_v52  ;;  %v11254_v39 = vpack.c.bf16 %v5183_v5, %v17435_v15  ;;  %v11256_v21 = vpack.c.bf16 %v5184_v59, %v17426_v24 }
 0x52a   :  { %11253 = vmatpush1.bf16.msra.mxu0 %v11252_v55  ;;  %11267 = vmatprep.subr.bf16.mxu1 %v11266_v20  ;;  %v5283_v8 = vsel %vm310_vm2, %v12853_v31, %v12854_v16  ;;  %v5383_v12 = vsel %vm411_vm3, %v17541_v11, %v17546_v27  ;;  %v12858_v11 = vunpack.i.l.bf16 %v17566_v47 }
 0x52b   :  { %v5182_v19 = vsel %vm411_vm3, %v12984_v17, %v12988_v28  ;;  %11255 = vmatprep.subr.bf16.mxu0 %v11254_v39  ;;  %11269 = vmatpush1.bf16.msra.mxu1 %v11268_v38  ;;  %v5181_v13 = vsel %vm411_vm3, %v12988_v28, %v12989_v56  ;;  %v11276_v41 = vpack.c.bf16 %v17331_v3, %v5283_v8  ;;  %v12859_v38 = vunpack.i.h.bf16 %v17566_v47 }
 0x52c   :  { %v17890_v45 = vpop.permute.xlu0 %12991  ;;  %v11270_v48 = vpack.c.bf16 %v5181_v13, %v17331_v3  ;;  %v11272_v51 = vpack.c.bf16 %v5182_v19, %v17328_v26  ;;  %v11260_v26 = vpack.c.bf16 %v17435_v15, %v5285_v4  ;;  %v5382_v19 = vsel %vm411_vm3, %v17546_v27, %v5357_v9 }
 0x52d   :  { %v13002_v2 = vpop.permute.xlu1 %13001  ;;  %v12993_v54 = vunpack.i.l.bf16 %v17890_v45  ;;  %v12994_v24 = vunpack.i.h.bf16 %v17890_v45 }
 0x52e   :  { %v13003_v7 = vunpack.i.l.bf16 %v13002_v2  ;;  %11257 = vmatpush1.bf16.msra.mxu0 %v11256_v21  ;;  %11271 = vmatprep.subr.bf16.mxu1 %v11270_v48  ;;  %v13004_v17 = vunpack.i.h.bf16 %v13002_v2 }
 0x52f   :  { %11259 = vmatprep.subr.bf16.mxu0 %v11258_v10  ;;  %11273 = vmatpush1.bf16.msra.mxu1 %v11272_v51  ;;  %v5282_v6 = vsel %vm310_vm2, %v12854_v16, %v12993_v54  ;;  %v4881_v55 = vsel %vm310_vm2, %v12958_v29, %v12994_v24 }
 0x530   :  { %v17908_v37 = vpop.permute.xlu0 %12996  ;;  %v11274_v44 = vpack.c.bf16 %v17458_v40, %v5282_v6  ;;  %v4880_v14 = vsel %vm310_vm2, %v12994_v24, %v13003_v7  ;;  %v4879_v15 = vsel %vm310_vm2, %v13003_v7, %v13004_v17  ;;  %v11280_v48 = vpack.c.bf16 %v17331_v3, %v4881_v55 }
 0x531   :  { %v13007_v62 = vpop.permute.xlu1 %13006  ;;  %v12998_v31 = vunpack.i.l.bf16 %v17908_v37  ;;  %v12999_v20 = vunpack.i.h.bf16 %v17908_v37  ;;  %v11278_v36 = vpack.c.bf16 %v17458_v40, %v4880_v14  ;;  %v11296_v51 = vpack.c.bf16 %v17467_v25, %v4879_v15 }
 0x532   :  { %11261 = vmatpush1.bf16.msra.mxu0 %v11260_v26  ;;  %11275 = vmatprep.subr.bf16.mxu1 %v11274_v44  ;;  %v13008_v5 = vunpack.i.l.bf16 %v13007_v62  ;;  %v13009_v59 = vunpack.i.h.bf16 %v13007_v62  ;;  %v4977_v26 = vsel %vm411_vm3, %v12858_v11, %v12859_v38 }
 0x533   :  { %5903 = vmatprep.subr.mxu0 %v5383_v12  ;;  %11277 = vmatpush1.bf16.msra.mxu1 %v11276_v41  ;;  %v4878_v39 = vsel %vm310_vm2, %v13004_v17, %v12998_v31  ;;  %v5081_v27 = vsel %vm310_vm2, %v12978_v35, %v12999_v20  ;;  %v12863_v35 = vunpack.i.l.bf16 %v17559_v63 }
 0x534   :  { %v17928_v28 = vpop.permute.xlu0 %5358  ;;  %v4980_v46 = vsel %vm411_vm3, %v12849_v50, %v13008_v5  ;;  %v11294_v3 = vpack.c.bf16 %v17344_v0, %v4878_v39  ;;  %v4979_v50 = vsel %vm411_vm3, %v13008_v5, %v13009_v59  ;;  %v4978_v7 = vsel %vm411_vm3, %v13009_v59, %v12858_v11 }
 0x535   :  { %v13012_v16 = vpop.permute.xlu1 %13011  ;;  %v5381_v29 = vsel %vm411_vm3, %v5357_v9, %v17928_v28  ;;  %v11284_v6 = vpack.c.bf16 %v5081_v27, %v4980_v46  ;;  %v5379_v27 = vsel %vm411_vm3, %v17555_v61, %v17568_v57 }
 0x536   :  { %v13014_v13 = vunpack.i.h.bf16 %v13012_v16  ;;  %v13013_v21 = vunpack.i.l.bf16 %v13012_v16  ;;  %5904 = vmatpush1.msra.mxu0 %v5384_v58  ;;  %5974 = vmatprep.subr.mxu1 %v5381_v29 }
 0x537   :  { %10501 = vmatmul.mubr.msk.f32.vlgmr.msra.gmra.mrb[24].mxu0 %vm2479_vm0, %v17700_v23  ;;  %11279 = vmatprep.subr.bf16.mxu0 %v11278_v36 }
 0x538   :  { %v5079_v9 = vsel %vm310_vm2, %v13013_v21, %v13014_v13  ;;  %5975 = vmatpush1.msra.mxu1 %v5382_v19  ;;  %11281 = vmatpush1.bf16.msra.mxu0 %v11280_v48  ;;  %v17961_v60 = vpop.permute.xlu0 %13016  ;;  %v5080_v32 = vsel %vm310_vm2, %v12999_v20, %v13013_v21 }
 0x539   :  { %v13022_v4 = vpop.permute.xlu1 %13021  ;;  %v13019_v2 = vunpack.i.h.bf16 %v17961_v60  ;;  %v13018_v10 = vunpack.i.l.bf16 %v17961_v60  ;;  %10502 = vmatmul.mubr.msk.f32.vlgmr.msra.gmra.mrb[24].mxu1 %vm2479_vm0, %v17700_v23  ;;  %11295 = vmatprep.subr.bf16.mxu1 %v11294_v3  ;;  %v11282_v8 = vpack.c.bf16 %v5080_v32, %v4979_v50  ;;  %v11300_v62 = vpack.c.bf16 %v5079_v9, %v4978_v7 }
 0x53a   :  { %v13024_v24 = vunpack.i.h.bf16 %v13022_v4  ;;  %v13023_v17 = vunpack.i.l.bf16 %v13022_v4  ;;  %11297 = vmatpush1.bf16.msra.mxu1 %v11296_v51  ;;  %6093 = vmatprep.mubr.f32.mxu0 %v20752_v22 }
 0x53b   :  { %11283 = vmatprep.subr.bf16.mxu0 %v11282_v8  ;;  %v5078_v44 = vsel %vm310_vm2, %v13014_v13, %v13018_v10  ;;  %6164 = vmatprep.mubr.f32.mxu1 %v20752_v22  ;;  %v5280_v55 = vsel %vm310_vm2, %v13019_v2, %v12863_v35  ;;  %v5281_v16 = vsel %vm310_vm2, %v12993_v54, %v13019_v2 }
 0x53c   :  { %v5180_v41 = vsel %vm411_vm3, %v12989_v56, %v13023_v17  ;;  %11285 = vmatpush1.bf16.msra.mxu0 %v11284_v6  ;;  %v17988_v12 = vpop.permute.xlu0 %13026  ;;  %v5179_v14 = vsel %vm411_vm3, %v13023_v17, %v13024_v24  ;;  %v11298_v15 = vpack.c.bf16 %v5078_v44, %v4977_v26  ;;  %v12864_v56 = vunpack.i.h.bf16 %v17559_v63 }
 0x53d   :  { %v13037_v5 = vpop.permute.xlu1 %13036  ;;  %v13029_v20 = vunpack.i.h.bf16 %v17988_v12  ;;  %v13028_v59 = vunpack.i.l.bf16 %v17988_v12  ;;  %v11286_v52 = vpack.c.bf16 %v5179_v14, %v17467_v25  ;;  %v11288_v39 = vpack.c.bf16 %v5180_v41, %v17458_v40  ;;  %v20878_v14 = vld [vmem:[#allocation40_spill] sm:$0xff] }
 0x53e   :  { %11299 = vmatprep.subr.bf16.mxu1 %v11298_v15  ;;  %v11290_v29 = vpack.c.bf16 %v17344_v0, %v5280_v55  ;;  %v5279_v21 = vsel %vm310_vm2, %v12863_v35, %v12864_v56  ;;  %v13039_v48 = vunpack.i.h.bf16 %v13037_v5  ;;  %v13038_v51 = vunpack.i.l.bf16 %v13037_v5 }
 0x53f   :  { %v5178_v58 = vsel %vm411_vm3, %v13024_v24, %v13028_v59  ;;  %11287 = vmatprep.subr.bf16.mxu0 %v11286_v52  ;;  %11301 = vmatpush1.bf16.msra.mxu1 %v11300_v62  ;;  %v5177_v40 = vsel %vm411_vm3, %v13028_v59, %v13029_v20  ;;  %v11292_v11 = vpack.c.bf16 %v17467_v25, %v5281_v16  ;;  %v20875_v35 = vunpack.i.l.bf16 %v17590_v33 }
 0x540   :  { %11289 = vmatpush1.bf16.msra.mxu0 %v11288_v39  ;;  %v18010_v63 = vpop.permute.xlu0 %13031  ;;  %v11302_v45 = vpack.c.bf16 %v5177_v40, %v17347_v1  ;;  %v11304_v54 = vpack.c.bf16 %v5178_v58, %v17344_v0  ;;  %v11308_v32 = vpack.c.bf16 %v17347_v1, %v5279_v21  ;;  %v5380_v8 = vsel %vm411_vm3, %v17928_v28, %v17555_v61 }
 0x541   :  { %v18014_v36 = vpop.permute.xlu1 %5366  ;;  %v13034_v19 = vunpack.i.h.bf16 %v18010_v63  ;;  %v13033_v13 = vunpack.i.l.bf16 %v18010_v63  ;;  %11291 = vmatprep.subr.bf16.mxu0 %v11290_v29  ;;  %v4874_v4 = vsel %vm310_vm2, %v13039_v48, %v20875_v35  ;;  %v4875_v7 = vsel %vm310_vm2, %v13038_v51, %v13039_v48 }
 0x542   :  { %11303 = vmatprep.subr.bf16.mxu1 %v11302_v45  ;;  %v11326_v61 = vpack.c.bf16 %v17379_v53, %v4874_v4  ;;  %v20876_v28 = vunpack.i.h.bf16 %v17608_v18  ;;  %v20879_v15 = vunpack.i.l.bf16 %v20878_v14 }
 0x543   :  { %11305 = vmatpush1.bf16.msra.mxu1 %v11304_v54  ;;  %v5278_v0 = vsel %vm310_vm2, %v12864_v56, %v13033_v13  ;;  %v4876_v9 = vsel %vm310_vm2, %v13034_v19, %v13038_v51  ;;  %v4877_v25 = vsel %vm310_vm2, %v12998_v31, %v13034_v19 }
 0x544   :  { %11293 = vmatpush1.bf16.msra.mxu0 %v11292_v11  ;;  %v5365_v46 = vpop.permute.xlu0 %5364  ;;  %v11306_v3 = vpack.c.bf16 %v17494_v43, %v5278_v0  ;;  %v11310_v31 = vpack.c.bf16 %v17494_v43, %v4876_v9  ;;  %v11312_v24 = vpack.c.bf16 %v17347_v1, %v4877_v25  ;;  %v20877_v1 = vld [vmem:[#allocation51_spill] sm:$0xff]  ;;  %v20881_v25 = vld [vmem:[#allocation53_spill] sm:$0xff] }
 0x545   :  { %v13047_v50 = vpop.permute.xlu1 %13046  ;;  %6045 = vmatprep.subr.mxu0 %v5379_v27  ;;  %v5377_v37 = vsel %vm411_vm3, %v5365_v46, %v18014_v36  ;;  %v5378_v62 = vsel %vm411_vm3, %v17568_v57, %v5365_v46  ;;  %v11328_v41 = vpack.c.bf16 %v20877_v1, %v4875_v7  ;;  %v20880_v27 = vunpack.i.h.bf16 %v17634_v49 }
 0x546   :  { %11307 = vmatprep.subr.bf16.mxu1 %v11306_v3  ;;  %v13048_v2 = vunpack.i.l.bf16 %v13047_v50  ;;  %v13049_v59 = vunpack.i.h.bf16 %v13047_v50  ;;  %v20882_v49 = vunpack.i.l.bf16 %v17498_v42 }
 0x547   :  { %11309 = vmatpush1.bf16.msra.mxu1 %v11308_v32 }
 0x548   :  { %6046 = vmatpush1.msra.mxu0 %v5380_v8  ;;  %v13042_v33 = vpop.permute.xlu0 %13041  ;;  %6116 = vmatprep.subr.mxu1 %v5377_v37  ;;  %v4993_v18 = vsel %vm411_vm3, %v13048_v2, %v20879_v15  ;;  %v5176_v0 = vsel %vm411_vm3, %v13029_v20, %v13049_v59  ;;  %v20885_v15 = vld [vmem:[#allocation19_spill] sm:$0xff] }
 0x549   :  { %v5071_v17 = vpop.permute.xlu1 %5070  ;;  %10503 = vmatmul.mubr.msk.f32.vlgmr.msra.gmra.mrb[26].mxu0 %vm2479_vm0, %v17700_v23  ;;  %11311 = vmatprep.subr.bf16.mxu0 %v11310_v31  ;;  %v13044_v26 = vunpack.i.h.bf16 %v13042_v33  ;;  %v13043_v44 = vunpack.i.l.bf16 %v13042_v33 }
 0x54a   :  { %v5074_v6 = vsel %vm310_vm2, %v5071_v17, %v20876_v28  ;;  %11313 = vmatpush1.bf16.msra.mxu0 %v11312_v24  ;;  %6235 = vmatprep.mubr.f32.mxu0 %v20752_v22 }
 0x54b   :  { %6117 = vmatpush1.msra.mxu1 %v5378_v62  ;;  %v11330_v5 = vpack.c.bf16 %v5074_v6, %v4993_v18  ;;  %v4974_v56 = vsel %vm411_vm3, %v13044_v26, %v13048_v2  ;;  %v4976_v16 = vsel %vm411_vm3, %v12859_v38, %v13043_v44  ;;  %v4975_v29 = vsel %vm411_vm3, %v13043_v44, %v13044_v26  ;;  %v20883_v62 = vld [vmem:[#allocation15_spill] sm:$0xff] }
 0x54c   :  { %v13052_v55 = vpop.permute.xlu0 %13051  ;;  %10504 = vmatmul.mubr.msk.f32.vlgmr.msra.gmra.mrb[26].mxu1 %vm2479_vm0, %v17700_v23  ;;  %11327 = vmatprep.subr.bf16.mxu1 %v11326_v61  ;;  %v11320_v2 = vpack.c.bf16 %v5176_v0, %v17494_v43 }
 0x54d   :  { %v13062_v52 = vpop.permute.xlu1 %13061  ;;  %v13054_v39 = vunpack.i.h.bf16 %v13052_v55  ;;  %v13053_v57 = vunpack.i.l.bf16 %v13052_v55  ;;  %11329 = vmatpush1.bf16.msra.mxu1 %v11328_v41  ;;  %6306 = vmatprep.mubr.f32.mxu1 %v20752_v22  ;;  %v20884_v41 = vld [vmem:[#allocation13_spill] sm:$0xff] }
 0x54e   :  { %v13064_v58 = vunpack.i.h.bf16 %v13062_v52  ;;  %11331 = vmatprep.subr.bf16.mxu1 %v11330_v5  ;;  %v13063_v40 = vunpack.i.l.bf16 %v13062_v52  ;;  %v20886_v5 = vld [vmem:[#allocation12_spill] sm:$0xff] }
 0x54f   :  { %v5075_v45 = vsel %vm310_vm2, %v13054_v39, %v5071_v17  ;;  %v5077_v54 = vsel %vm310_vm2, %v13018_v10, %v13053_v57  ;;  %v5076_v47 = vsel %vm310_vm2, %v13053_v57, %v13054_v39  ;;  %v20887_v57 = vld [vmem:[#allocation11_spill] sm:$0xff] }
 0x550   :  { %v13057_v19 = vpop.permute.xlu0 %13056  ;;  %v11314_v21 = vpack.c.bf16 %v5076_v47, %v4975_v29  ;;  %v11332_v38 = vpack.c.bf16 %v5075_v45, %v4974_v56  ;;  %v11316_v48 = vpack.c.bf16 %v5077_v54, %v4976_v16  ;;  %v5276_v12 = vsel %vm310_vm2, %v13063_v40, %v13064_v58  ;;  %v20893_v54 = vld [vmem:[#allocation9_spill] sm:$0xff] }
 0x551   :  { %v13059_v51 = vunpack.i.h.bf16 %v13057_v19  ;;  %v13058_v11 = vunpack.i.l.bf16 %v13057_v19  ;;  %v5369_v46 = vpop.permute.xlu1 %5368  ;;  %v5277_v35 = vsel %vm310_vm2, %v13033_v13, %v13063_v40  ;;  %v11322_v37 = vpack.c.bf16 %v17379_v53, %v5276_v12  ;;  %v20891_v40 = vld [vmem:[#allocation8_spill] sm:$0xff] }
 0x552   :  { %11315 = vmatprep.subr.bf16.mxu0 %v11314_v21  ;;  %11333 = vmatpush1.bf16.msra.mxu1 %v11332_v38  ;;  %v11324_v7 = vpack.c.bf16 %v20877_v1, %v5277_v35  ;;  %v5376_v33 = vsel %vm411_vm3, %v18014_v36, %v5369_v46 }
 0x553   :  { %v5174_v60 = vsel %vm411_vm3, %v13058_v11, %v13059_v51  ;;  %11317 = vmatpush1.bf16.msra.mxu0 %v11316_v48  ;;  %v5175_v10 = vsel %vm411_vm3, %v13049_v59, %v13058_v11  ;;  %v5193_v3 = vsel %vm411_vm3, %v13059_v51, %v20880_v27 }
 0x554   :  { %v5271_v9 = vpop.permute.xlu0 %5270  ;;  %v11318_v20 = vpack.c.bf16 %v5175_v10, %v20877_v1  ;;  %v11334_v50 = vpack.c.bf16 %v5193_v3, %v20881_v25  ;;  %v11336_v32 = vpack.c.bf16 %v5174_v60, %v17379_v53 }
 0x555   :  { %v5274_v4 = vsel %vm310_vm2, %v5271_v9, %v20882_v49  ;;  %v5275_v8 = vsel %vm310_vm2, %v13064_v58, %v5271_v9  ;;  %v5373_v63 = vpop.permute.xlu1 %5372  ;;  %v20889_v58 = vld [vmem:[#allocation10_spill] sm:$0xff] }
 0x556   :  { %11319 = vmatprep.subr.bf16.mxu0 %v11318_v20  ;;  %11335 = vmatprep.subr.bf16.mxu1 %v11334_v50  ;;  %v11338_v31 = vpack.c.bf16 %v20752_v22, %v5274_v4  ;;  %v11340_v42 = vpack.c.bf16 %v20881_v25, %v5275_v8  ;;  %v5393_v53 = vsel %vm411_vm3, %v5373_v63, %v17601_v30  ;;  %v20895_v20 = vld [vmem:[#allocation17_spill] sm:$0xff]  ;;  %v20896_v50 = vld [vmem:[#allocation18_spill] sm:$0xff] }
 0x557   :  { %11321 = vmatpush1.bf16.msra.mxu0 %v11320_v2  ;;  %11337 = vmatpush1.bf16.msra.mxu1 %v11336_v32  ;;  %v20897_v2 = vld [vmem:[#allocation22_spill] sm:$0xff] }
 0x558   :  { %v5371_v13 = vpop.permute.xlu0 %5370  ;;  %11323 = vmatprep.subr.bf16.mxu0 %v11322_v37  ;;  %11339 = vmatprep.subr.bf16.mxu1 %v11338_v31  ;;  %v20898_v37 = vld [vmem:[#allocation14_spill] sm:$0xff] }
 0x559   :  { %v5375_v43 = vsel %vm411_vm3, %v5369_v46, %v5371_v13  ;;  %v5374_v24 = vsel %vm411_vm3, %v5371_v13, %v5373_v63  ;;  %v20900_v63 = vld [vmem:[#allocation23_spill] sm:$0xff] }
 0x55b   :  { %11325 = vmatpush1.bf16.msra.mxu0 %v11324_v7  ;;  %11341 = vmatpush1.bf16.msra.mxu1 %v11340_v42  ;;  %v20901_v42 = vld [vmem:[#allocation16_spill] sm:$0xff] }
 0x55c   :  { %6187 = vmatprep.subr.mxu0 %v5375_v43  ;;  %6258 = vmatprep.subr.mxu1 %v5393_v53 }
 0x55f   :  { %6188 = vmatpush1.msra.mxu0 %v5376_v33  ;;  %6259 = vmatpush1.msra.mxu1 %v5374_v24  ;;  %v20903_v24 = vld [vmem:[#allocation21_spill] sm:$0xff] }
 0x560   :  { %10505 = vmatmul.mubr.msk.f32.vlgmr.msra.gmra.mrb[28].mxu0 %vm2479_vm0, %v17700_v23  ;;  %10506 = vmatmul.mubr.msk.f32.vlgmr.msra.gmra.mrb[28].mxu1 %vm2479_vm0, %v17700_v23 }
 0x561   :  { %7340 = vmatprep.mubr.f32.mxu1 %v20752_v22  ;;  %7269 = vmatprep.mubr.f32.mxu0 %v20752_v22 }
 0x569   :  { %v18135_v30 = vpop.permute.xlu0 %5597 }
 0x5e3   :  { %v5669_v17 = vpop.f32.mrb[20].mxu0 }
 0x5e4   :  { %v5670_v36 = vadd.f32 %v5669_v17, %v18135_v30  ;;  %v5671_v61 = vpop.f32.mrb[21].mxu0  ;;  %v5740_v28 = vpop.f32.mrb[20].mxu1 }
 0x5e5   :  { %v5672_v6 = vadd.f32 %v5671_v61, %v18135_v30  ;;  %v5741_v26 = vadd.f32 %v5740_v28, %v18135_v30  ;;  %v5742_v44 = vpop.f32.mrb[21].mxu1  ;;  %v20905_v28 = vld [vmem:[#allocation20_spill] sm:$0xff] }
 0x5e6   :  { %v6333_v1 = vadd.f32 %v5670_v36, %v20883_v62  ;;  %v5743_v23 = vadd.f32 %v5742_v44, %v18135_v30 }
 0x5e7   :  { %v6334_v14 = vadd.f32 %v5672_v6, %v20884_v41  ;;  %v6335_v18 = vadd.f32 %v5741_v26, %v20885_v15  ;;  %v20907_v15 = vld [vmem:[#allocation26_spill] sm:$0xff] }
 0x5e8   :  { %v6353_v55 = vmax.f32 %v6333_v1, 0.0  ;;  %v6336_v59 = vadd.f32 %v5743_v23, %v20886_v5 }
 0x5e9   :  { %v6354_v52 = vmax.f32 %v6334_v14, 0.0  ;;  %v6355_v39 = vmax.f32 %v6335_v18, 0.0 }
 0x5ea   :  { %v18146_v56 = vmul.f32 %v6353_v55, %v20887_v57  ;;  %v6356_v16 = vmax.f32 %v6336_v59, 0.0 }
 0x5eb   :  { %v18149_v29 = vmul.f32 %v6354_v52, %v20889_v58  ;;  %v18152_v45 = vmul.f32 %v6355_v39, %v20891_v40  ;;  %v20908_v39 = vld [vmem:[#allocation28_spill] sm:$0xff] }
 0x5ec   :  { %20888 = vst [vmem:[#allocation58_spill] sm:$0xff] %v18146_v56  ;;  %v18155_v47 = vmul.f32 %v6356_v16, %v20893_v54  ;;  %v13070_v48 = vpack.i.bf16 %v20752_v22, %v18146_v56 }
 0x5ed   :  { %20890 = vst [vmem:[#allocation41_spill] sm:$0xff] %v18149_v29  ;;  %20892 = vst [vmem:[#allocation57_spill] sm:$0xff] %v18152_v45  ;;  %v13075_v19 = vpack.i.bf16 %v18152_v45, %v18149_v29  ;;  %v13065_v21 = vpack.i.bf16 %v18152_v45, %v18146_v56  ;;  %v13095_v9 = vpack.i.bf16 %v18146_v56, %v18149_v29 }
 0x5ee   :  { %20894 = vst [vmem:[#allocation42_spill] sm:$0xff] %v18155_v47  ;;  %v13080_v38 = vpack.i.bf16 %v18155_v47, %v18152_v45  ;;  %v13090_v51 = vpack.i.bf16 %v18155_v47, %v18149_v29  ;;  %v13085_v11 = vpack.i.bf16 %v18149_v29, %v18155_v47 }
 0x5ef   :  { %13076 = vrot.lane.b32.xlu1 %v13075_v19, %s13605_s29  ;;  %13066 = vrot.lane.b32.xlu0 %v13065_v21, %s13605_s29  ;;  %v20909_v19 = vld [vmem:[#allocation29_spill] sm:$0xff] }
 0x5f3   :  { %13081 = vrot.lane.b32.xlu1 %v13080_v38, %s13607_s16  ;;  %13071 = vrot.lane.b32.xlu0 %v13070_v48, %s13607_s16  ;;  %v20910_v48 = vld [vmem:[#allocation24_spill] sm:$0xff] }
 0x5f7   :  { %13091 = vrot.lane.b32.xlu1 %v13090_v51, %s13607_s16  ;;  %13086 = vrot.lane.b32.xlu0 %v13085_v11, %s13605_s29  ;;  %v5811_v0 = vpop.f32.mrb[22].mxu0  ;;  %v5882_v46 = vpop.f32.mrb[22].mxu1 }
 0x5f8   :  { %v5812_v60 = vadd.f32 %v5811_v0, %v18135_v30  ;;  %v5883_v10 = vadd.f32 %v5882_v46, %v18135_v30  ;;  %v5813_v27 = vpop.f32.mrb[23].mxu0  ;;  %v5884_v3 = vpop.f32.mrb[23].mxu1  ;;  %v20912_v46 = vld [vmem:[#allocation31_spill] sm:$0xff] }
 0x5f9   :  { %v5814_v12 = vadd.f32 %v5813_v27, %v18135_v30  ;;  %v5885_v35 = vadd.f32 %v5884_v3, %v18135_v30  ;;  %v20913_v27 = vld [vmem:[#allocation25_spill] sm:$0xff] }
 0x5fa   :  { %v6337_v25 = vadd.f32 %v5812_v60, %v20895_v20  ;;  %v6339_v32 = vadd.f32 %v5883_v10, %v20896_v50 }
 0x5fb   :  { %13096 = vrot.lane.b32.xlu1 %v13095_v9, %s13607_s16  ;;  %6939 = vrot.lane.b32.xlu0 %v18155_v47, %s13607_s16  ;;  %v6338_v8 = vadd.f32 %v5814_v12, %v20897_v2  ;;  %v6340_v13 = vadd.f32 %v5885_v35, %v20900_v63  ;;  %v20915_v12 = vld [vmem:[#allocation27_spill] sm:$0xff] }
 0x5fc   :  { %v6357_v49 = vmax.f32 %v6337_v25, 0.0  ;;  %v6359_v4 = vmax.f32 %v6339_v32, 0.0  ;;  %v20917_v25 = vld [vmem:[#allocation30_spill] sm:$0xff] }
 0x5fd   :  { %v6358_v43 = vmax.f32 %v6338_v8, 0.0  ;;  %v6360_v36 = vmax.f32 %v6340_v13, 0.0  ;;  %v20919_v8 = vld [vmem:[#allocation35_spill] sm:$0xff] }
 0x5fe   :  { %v18188_v31 = vmul.f32 %v6357_v49, %v20898_v37  ;;  %v18192_v7 = vmul.f32 %v6359_v4, %v20901_v42 }
 0x5ff   :  { %v18204_v17 = vmul.f32 %v6358_v43, %v20903_v24  ;;  %v18212_v6 = vmul.f32 %v6360_v36, %v20905_v28 }
 0x600   :  { %20899 = vst [vmem:[#allocation59_spill] sm:$0xff] %v18188_v31  ;;  %20902 = vst [vmem:[#allocation60_spill] sm:$0xff] %v18192_v7  ;;  %v18196_v53 = vpack.i.bf16 %v18188_v31, %v18155_v47  ;;  %v13100_v33 = vpack.i.bf16 %v18152_v45, %v18188_v31  ;;  %v13110_v61 = vpack.i.bf16 %v18188_v31, %v18192_v7 }
 0x601   :  { %20904 = vst [vmem:[#allocation52_spill] sm:$0xff] %v18204_v17  ;;  %20906 = vst [vmem:[#allocation54_spill] sm:$0xff] %v18212_v6  ;;  %v13115_v26 = vpack.i.bf16 %v18204_v17, %v18152_v45  ;;  %v13125_v14 = vpack.i.bf16 %v18212_v6, %v18192_v7  ;;  %v13135_v52 = vpack.i.bf16 %v18212_v6, %v18204_v17 }
 0x602   :  { %13106 = vrot.lane.b32.xlu1 %v18196_v53, %s13605_s29  ;;  %13101 = vrot.lane.b32.xlu0 %v13100_v33, %s13607_s16 }
 0x606   :  { %6941 = vrot.lane.b32.xlu0 %v18188_v31, %s13607_s16  ;;  %13111 = vrot.lane.b32.xlu1 %v13110_v61, %s13605_s29 }
 0x60a   :  { %v5953_v44 = vpop.f32.mrb[24].mxu0  ;;  %13116 = vrot.lane.b32.xlu0 %v13115_v26, %s13605_s29  ;;  %6943 = vrot.lane.b32.xlu1 %v18204_v17, %s13607_s16  ;;  %v20920_v26 = vld [vmem:[#allocation36_spill] sm:$0xff] }
 0x60b   :  { %v5954_v62 = vadd.f32 %v5953_v44, %v18135_v30  ;;  %v5955_v1 = vpop.f32.mrb[25].mxu0 }
 0x60c   :  { %v5956_v23 = vadd.f32 %v5955_v1, %v18135_v30  ;;  %v6024_v41 = vpop.f32.mrb[24].mxu1 }
 0x60d   :  { %v6341_v18 = vadd.f32 %v5954_v62, %v20907_v15  ;;  %v6025_v55 = vadd.f32 %v6024_v41, %v18135_v30  ;;  %v6026_v5 = vpop.f32.mrb[25].mxu1 }
 0x60e   :  { %13126 = vrot.lane.b32.xlu0 %v13125_v14, %s13605_s29  ;;  %13121 = vrot.lane.b32.xlu1 %v13125_v14, %s13607_s16  ;;  %v6342_v16 = vadd.f32 %v5956_v23, %v20908_v39  ;;  %v6027_v38 = vadd.f32 %v6026_v5, %v18135_v30  ;;  %v20921_v23 = vld [vmem:[#allocation32_spill] sm:$0xff]  ;;  %v20926_v39 = vld [vmem:[#allocation39_spill] sm:$0xff] }
 0x60f   :  { %v6361_v59 = vmax.f32 %v6341_v18, 0.0  ;;  %v6343_v21 = vadd.f32 %v6025_v55, %v20909_v19  ;;  %v20923_v55 = vld [vmem:[#allocation37_spill] sm:$0xff] }
 0x610   :  { %v6362_v11 = vmax.f32 %v6342_v16, 0.0  ;;  %v6344_v60 = vadd.f32 %v6027_v38, %v20912_v46  ;;  %v20927_v46 = vld [vmem:[#allocation33_spill] sm:$0xff] }
 0x611   :  { %v18233_v51 = vmul.f32 %v6361_v59, %v20910_v48  ;;  %v6363_v0 = vmax.f32 %v6343_v21, 0.0  ;;  %v20924_v59 = vld [vmem:[#allocation34_spill] sm:$0xff] }
 0x612   :  { %13136 = vrot.lane.b32.xlu0 %v13135_v52, %s13605_s29  ;;  %13131 = vrot.lane.b32.xlu1 %v13135_v52, %s13607_s16  ;;  %v18244_v3 = vmul.f32 %v6362_v11, %v20913_v27  ;;  %v6364_v20 = vmax.f32 %v6344_v60, 0.0 }
 0x613   :  { %20911 = vst [vmem:[#allocation56_spill] sm:$0xff] %v18233_v51  ;;  %v13145_v10 = vpack.i.bf16 %v18192_v7, %v18233_v51  ;;  %v18247_v9 = vmul.f32 %v6363_v0, %v20915_v12 }
 0x614   :  { %20914 = vst [vmem:[#allocation55_spill] sm:$0xff] %v18244_v3  ;;  %v18253_v50 = vmul.f32 %v6364_v20, %v20917_v25 }
 0x615   :  { %20916 = vst [vmem:[#allocation51_spill] sm:$0xff] %v18247_v9  ;;  %v13150_v35 = vpack.i.bf16 %v18247_v9, %v18233_v51  ;;  %v13155_v49 = vpack.i.bf16 %v18247_v9, %v18244_v3 }
 0x616   :  { %13146 = vrot.lane.b32.xlu0 %v13145_v10, %s13605_s29  ;;  %6947 = vrot.lane.b32.xlu1 %v18212_v6, %s13607_s16  ;;  %20918 = vst [vmem:[#allocation40_spill] sm:$0xff] %v18253_v50  ;;  %v13160_v36 = vpack.i.bf16 %v18253_v50, %v18247_v9  ;;  %v13170_v62 = vpack.i.bf16 %v18253_v50, %v18244_v3 }
 0x617   :  { %v13165_v1 = vpack.i.bf16 %v18244_v3, %v18253_v50 }
 0x61a   :  { %6949 = vrot.lane.b32.xlu0 %v18233_v51, %s13607_s16  ;;  %13141 = vrot.lane.b32.xlu1 %v13145_v10, %s13607_s16  ;;  %v20929_v10 = vld [vmem:[#allocation38_spill] sm:$0xff] }
 0x61c   :  { %v6095_v32 = vpop.f32.mrb[26].mxu0 }
 0x61d   :  { %v6096_v4 = vadd.f32 %v6095_v32, %v18135_v30  ;;  %v6097_v2 = vpop.f32.mrb[27].mxu0 }
 0x61e   :  { %13151 = vrot.lane.b32.xlu0 %v13150_v35, %s13605_s29  ;;  %13156 = vrot.lane.b32.xlu1 %v13155_v49, %s13605_s29  ;;  %v6098_v14 = vadd.f32 %v6097_v2, %v18135_v30 }
 0x61f   :  { %v6345_v63 = vadd.f32 %v6096_v4, %v20919_v8  ;;  %v6166_v13 = vpop.f32.mrb[26].mxu1 }
 0x620   :  { %v6167_v43 = vadd.f32 %v6166_v13, %v18135_v30  ;;  %v6168_v33 = vpop.f32.mrb[27].mxu1  ;;  %v6346_v5 = vadd.f32 %v6098_v14, %v20923_v55  ;;  %v20933_v14 = vld [vmem:[#allocation44_spill] sm:$0xff]  ;;  %v20935_v55 = vld [vmem:[#allocation43_spill] sm:$0xff] }
 0x621   :  { %v6365_v61 = vmax.f32 %v6345_v63, 0.0  ;;  %v6169_v18 = vadd.f32 %v6168_v33, %v18135_v30 }
 0x622   :  { %v6347_v44 = vadd.f32 %v6167_v43, %v20920_v26  ;;  %13161 = vrot.lane.b32.xlu0 %v13160_v36, %s13607_s16  ;;  %6951 = vrot.lane.b32.xlu1 %v18244_v3, %s13607_s16  ;;  %v6366_v21 = vmax.f32 %v6346_v5, 0.0  ;;  %v20931_v43 = vld [vmem:[#allocation45_spill] sm:$0xff]  ;;  %v20932_v36 = vld [vmem:[#allocation46_spill] sm:$0xff] }
 0x623   :  { %v18275_v41 = vmul.f32 %v6365_v61, %v20921_v23  ;;  %v6348_v16 = vadd.f32 %v6169_v18, %v20926_v39 }
 0x624   :  { %v6367_v15 = vmax.f32 %v6347_v44, 0.0  ;;  %v18298_v60 = vmul.f32 %v6366_v21, %v20927_v46 }
 0x625   :  { %20922 = vst [vmem:[#allocation53_spill] sm:$0xff] %v18275_v41  ;;  %v13180_v19 = vpack.i.bf16 %v18275_v41, %v18253_v50  ;;  %v6368_v38 = vmax.f32 %v6348_v16, 0.0  ;;  %v13175_v0 = vpack.i.bf16 %v18247_v9, %v18275_v41  ;;  %v20937_v16 = vld [vmem:[#allocation48_spill] sm:$0xff] }
 0x626   :  { %13171 = vrot.lane.b32.xlu0 %v13170_v62, %s13607_s16  ;;  %13166 = vrot.lane.b32.xlu1 %v13165_v1, %s13605_s29  ;;  %v18283_v52 = vmul.f32 %v6367_v15, %v20924_v59  ;;  %20928 = vst [vmem:[#allocation13_spill] sm:$0xff] %v18298_v60  ;;  %v13190_v13 = vpack.i.bf16 %v18298_v60, %v18247_v9 }
 0x627   :  { %v18301_v20 = vmul.f32 %v6368_v38, %v20929_v10  ;;  %v13210_v18 = vpack.i.bf16 %v20752_v22, %v18298_v60  ;;  %v20938_v38 = vld [vmem:[#allocation50_spill] sm:$0xff] }
 0x628   :  { %20925 = vst [vmem:[#allocation15_spill] sm:$0xff] %v18283_v52  ;;  %v13185_v11 = vpack.i.bf16 %v18275_v41, %v18283_v52 }
 0x629   :  { %20930 = vst [vmem:[#allocation19_spill] sm:$0xff] %v18301_v20  ;;  %v13195_v63 = vpack.i.bf16 %v18301_v20, %v18283_v52  ;;  %v13205_v26 = vpack.i.bf16 %v18301_v20, %v18298_v60 }
 0x62a   :  { %13181 = vrot.lane.b32.xlu0 %v13180_v19, %s13605_s29  ;;  %6955 = vrot.lane.b32.xlu1 %v18253_v50, %s13607_s16 }
 0x62e   :  { %13186 = vrot.lane.b32.xlu0 %v13185_v11, %s13605_s29  ;;  %13176 = vrot.lane.b32.xlu1 %v13175_v0, %s13607_s16 }
 0x632   :  { %6959 = vrot.lane.b32.xlu0 %v18298_v60, %s13607_s16  ;;  %6957 = vrot.lane.b32.xlu1 %v18275_v41, %s13607_s16 }
 0x633   :  { %v6237_v32 = vpop.f32.mrb[28].mxu0  ;;  %v6308_v35 = vpop.f32.mrb[28].mxu1 }
 0x634   :  { %v6238_v49 = vadd.f32 %v6237_v32, %v18135_v30  ;;  %v6309_v4 = vadd.f32 %v6308_v35, %v18135_v30  ;;  %v6239_v2 = vpop.f32.mrb[29].mxu0  ;;  %v6310_v8 = vpop.f32.mrb[29].mxu1  ;;  %v20939_v35 = vld [vmem:[#allocation47_spill] sm:$0xff] }
 0x635   :  { %v6311_v1 = vadd.f32 %v6310_v8, %v18135_v30  ;;  %v6240_v39 = vadd.f32 %v6239_v2, %v18135_v30 }
 0x636   :  { %v6349_v33 = vadd.f32 %v6238_v49, %v20931_v43  ;;  %v6351_v61 = vadd.f32 %v6309_v4, %v20932_v36  ;;  %13196 = vrot.lane.b32.xlu0 %v13195_v63, %s13607_s16  ;;  %13191 = vrot.lane.b32.xlu1 %v13190_v13, %s13605_s29  ;;  %v20941_v4 = vld [vmem:[#allocation49_spill] sm:$0xff]  ;;  %v13235_v13 = vpack.i.bf16 %v20752_v22, %v18149_v29 }
 0x637   :  { %v6352_v19 = vadd.f32 %v6311_v1, %v20937_v16  ;;  %v6350_v11 = vadd.f32 %v6240_v39, %v20938_v38 }
 0x638   :  { %v6369_v44 = vmax.f32 %v6349_v33, 0.0  ;;  %v6371_v62 = vmax.f32 %v6351_v61, 0.0 }
 0x639   :  { %v6372_v0 = vmax.f32 %v6352_v19, 0.0  ;;  %v6370_v30 = vmax.f32 %v6350_v11, 0.0 }
 0x63a   :  { %v18321_v15 = vmul.f32 %v6371_v62, %v20933_v14  ;;  %13206 = vrot.lane.b32.xlu0 %v13205_v26, %s13607_s16  ;;  %13201 = vrot.lane.b32.xlu1 %v13195_v63, %s13605_s29  ;;  %v18328_v5 = vmul.f32 %v6369_v44, %v20935_v55 }
 0x63b   :  { %v18342_v49 = vmul.f32 %v6372_v0, %v20939_v35  ;;  %v18349_v2 = vmul.f32 %v6370_v30, %v20941_v4 }
 0x63c   :  { %20934 = vst [vmem:[#allocation12_spill] sm:$0xff] %v18321_v15  ;;  %20936 = vst [vmem:[#allocation17_spill] sm:$0xff] %v18328_v5  ;;  %v13215_v21 = vpack.i.bf16 %v18146_v56, %v18321_v15  ;;  %v13225_v32 = vpack.i.bf16 %v18283_v52, %v18328_v5 }
 0x63d   :  { %20940 = vst [vmem:[#allocation18_spill] sm:$0xff] %v18342_v49  ;;  %20942 = vst [vmem:[#allocation22_spill] sm:$0xff] %v18349_v2  ;;  %v13230_v8 = vpack.i.bf16 %v18301_v20, %v18342_v49  ;;  %v13245_v63 = vpack.i.bf16 %v18328_v5, %v18349_v2  ;;  %v13255_v43 = vpack.i.bf16 %v18349_v2, %v18321_v15 }
 0x63e   :  { %13216 = vrot.lane.b32.xlu0 %v13215_v21, %s13605_s29  ;;  %13211 = vrot.lane.b32.xlu1 %v13210_v18, %s13605_s29  ;;  %v13260_v33 = vpack.i.bf16 %v18321_v15, %v18342_v49 }
 0x642   :  { %13226 = vrot.lane.b32.xlu0 %v13225_v32, %s13605_s29  ;;  %13221 = vrot.lane.b32.xlu1 %v13225_v32, %s13607_s16 }
 0x646   :  { %6963 = vrot.lane.b32.xlu0 %v18301_v20, %s13607_s16  ;;  %6965 = vrot.lane.b32.xlu1 %v18328_v5, %s13607_s16 }
 0x64a   :  { %6937 = vrot.lane.b32.xlu0 %v18152_v45, %s13607_s16  ;;  %13231 = vrot.lane.b32.xlu1 %v13230_v8, %s13605_s29 }
 0x64e   :  { %13246 = vrot.lane.b32.xlu0 %v13245_v63, %s13605_s29  ;;  %13236 = vrot.lane.b32.xlu1 %v13235_v13, %s13605_s29 }
 0x652   :  { %6967 = vrot.lane.b32.xlu0 %v18349_v2, %s13607_s16  ;;  %13241 = vrot.lane.b32.xlu1 %v18196_v53, %s13605_s29  ;;  %v13270_v53 = vpack.i.bf16 %v20752_v22, %v18204_v17 }
 0x656   :  { %13256 = vrot.lane.b32.xlu0 %v13255_v43, %s13605_s29  ;;  %13251 = vrot.lane.b32.xlu1 %v13255_v43, %s13607_s16 }
 0x65a   :  { %6935 = vrot.lane.b32.xlu0 %v18149_v29, %s13607_s16  ;;  %13261 = vrot.lane.b32.xlu1 %v13260_v33, %s13607_s16 }
 0x65e   :  { %13266 = vrot.lane.b32.xlu0 %v13260_v33, %s13605_s29  ;;  %6545 = vrot.lane.b32.xlu1 %v18188_v31, %s13607_s16 }
 0x661   :  { %v18380_v36 = vpop.permute.xlu1 %13076  ;;  %v18382_v61 = vpop.permute.xlu0 %13066 }
 0x662   :  { %v20509_v26 = vunpack.i.h.bf16 %v18380_v36  ;;  %v13078_v44 = vunpack.i.l.bf16 %v18380_v36  ;;  %v20512_v62 = vunpack.i.l.bf16 %v18382_v61  ;;  %6843 = vrot.lane.b32.xlu0 %v18204_v17, %s13605_s29  ;;  %13271 = vrot.lane.b32.xlu1 %v13270_v53, %s13607_s16  ;;  %v13069_v30 = vunpack.i.h.bf16 %v18382_v61 }
 0x664   :  { %v6492_v1 = vsel %vm310_vm2, %v20512_v62, %v13078_v44  ;;  %v6491_v18 = vsel %vm310_vm2, %v13078_v44, %v20509_v26 }
 0x665   :  { %v18398_v39 = vpop.permute.xlu1 %13081  ;;  %v18400_v16 = vpop.permute.xlu0 %13071  ;;  %v11358_v19 = vpack.c.bf16 %v18152_v45, %v6491_v18  ;;  %v11360_v21 = vpack.c.bf16 %v18149_v29, %v6492_v1 }
 0x666   :  { %6451 = vrot.lane.b32.xlu0 %v18212_v6, %s13605_s29  ;;  %6971 = vrot.lane.b32.xlu1 %v18342_v49, %s13607_s16  ;;  %v20507_v38 = vunpack.i.h.bf16 %v18398_v39  ;;  %v13083_v11 = vunpack.i.l.bf16 %v18398_v39 }
 0x667   :  { %11359 = vmatprep.subr.bf16.mxu1 %v11358_v19 }
 0x668   :  { %11361 = vmatpush1.bf16.msra.mxu1 %v11360_v21  ;;  %v6590_v53 = vsel %vm411_vm3, %v13083_v11, %v20507_v38 }
 0x669   :  { %v18410_v0 = vpop.permute.xlu1 %13091  ;;  %v18412_v32 = vpop.permute.xlu0 %13086 }
 0x66a   :  { %v20511_v8 = vunpack.i.l.bf16 %v18410_v0  ;;  %v20510_v63 = vunpack.i.h.bf16 %v18412_v32  ;;  %v20508_v13 = vunpack.i.l.bf16 %v18412_v32  ;;  %6553 = vrot.lane.b32.xlu0 %v18233_v51, %s13607_s16  ;;  %6945 = vrot.lane.b32.xlu1 %v18192_v7, %s13607_s16 }
 0x66c   :  { %v6591_v43 = vsel %vm411_vm3, %v20511_v8, %v13083_v11  ;;  %v6692_v33 = vsel %vm310_vm2, %v20510_v63, %v13069_v30  ;;  %v6691_v44 = vsel %vm310_vm2, %v13069_v30, %v20508_v13  ;;  %v13094_v11 = vunpack.i.h.bf16 %v18410_v0 }
 0x66d   :  { %v11362_v1 = vpack.c.bf16 %v6691_v44, %v6590_v53  ;;  %v11364_v18 = vpack.c.bf16 %v6692_v33, %v6591_v43  ;;  %v18442_v19 = vpop.permute.xlu1 %13096  ;;  %v18444_v21 = vpop.permute.xlu0 %6939 }
 0x66e   :  { %6753 = vrot.lane.b32.xlu0 %v18244_v3, %s13607_s16  ;;  %6651 = vrot.lane.b32.xlu1 %v18233_v51, %s13605_s29 }
 0x66f   :  { %11363 = vmatprep.subr.bf16.mxu1 %v11362_v1 }
 0x670   :  { %11365 = vmatpush1.bf16.msra.mxu1 %v11364_v18 }
 0x672   :  { %6459 = vrot.lane.b32.xlu0 %v18253_v50, %s13605_s29  ;;  %6851 = vrot.lane.b32.xlu1 %v18244_v3, %s13605_s29 }
 0x674   :  { %v18451_v30 = vpop.permute.xlu1 %13106  ;;  %v18453_v43 = vpop.permute.xlu0 %13101 }
 0x675   :  { %v20514_v33 = vunpack.i.h.bf16 %v18451_v30  ;;  %v13108_v53 = vunpack.i.l.bf16 %v18451_v30  ;;  %v20513_v44 = vunpack.i.h.bf16 %v18453_v43  ;;  %v20515_v1 = vunpack.i.l.bf16 %v18453_v43 }
 0x676   :  { %6561 = vrot.lane.b32.xlu0 %v18275_v41, %s13607_s16  ;;  %6953 = vrot.lane.b32.xlu1 %v18247_v9, %s13607_s16 }
 0x677   :  { %v6791_v18 = vsel %vm411_vm3, %v20513_v44, %v13094_v11  ;;  %v6790_v38 = vsel %vm411_vm3, %v13094_v11, %v20515_v1  ;;  %v6891_v13 = vsel %vm310_vm2, %v13108_v53, %v20514_v33 }
 0x678   :  { %v6942_v26 = vpop.permute.xlu0 %6941  ;;  %v18475_v63 = vpop.permute.xlu1 %13111  ;;  %v11366_v8 = vpack.c.bf16 %v6790_v38, %v18155_v47  ;;  %v11368_v62 = vpack.c.bf16 %v6791_v18, %v18152_v45  ;;  %v11370_v44 = vpack.c.bf16 %v18188_v31, %v6891_v13 }
 0x679   :  { %v6991_v27 = vsel %vm411_vm3, %v18444_v21, %v6942_v26 }
 0x67a   :  { %11367 = vmatprep.subr.bf16.mxu1 %v11366_v8  ;;  %6761 = vrot.lane.b32.xlu0 %v18298_v60, %s13607_s16 }
 0x67b   :  { %6659 = vrot.lane.b32.xlu1 %v18275_v41, %s13605_s29  ;;  %11369 = vmatpush1.bf16.msra.mxu1 %v11368_v62  ;;  %v20517_v62 = vunpack.i.l.bf16 %v18475_v63 }
 0x67c   :  { %v18484_v11 = vpop.permute.xlu0 %13116  ;;  %11371 = vmatprep.subr.bf16.mxu1 %v11370_v44  ;;  %v18486_v33 = vpop.permute.xlu1 %6943 }
 0x67d   :  { %v20516_v1 = vunpack.i.l.bf16 %v18484_v11  ;;  %v13119_v38 = vunpack.i.h.bf16 %v18484_v11 }
 0x67e   :  { %6467 = vrot.lane.b32.xlu0 %v18301_v20, %s13605_s29 }
 0x67f   :  { %v6892_v8 = vsel %vm310_vm2, %v20516_v1, %v13108_v53  ;;  %6859 = vrot.lane.b32.xlu1 %v18298_v60, %s13605_s29  ;;  %v20518_v53 = vunpack.i.h.bf16 %v18475_v63  ;;  %v6990_v1 = vsel %vm411_vm3, %v6942_v26, %v18486_v33 }
 0x680   :  { %v18499_v13 = vpop.permute.xlu0 %13126  ;;  %v18501_v44 = vpop.permute.xlu1 %13121  ;;  %v11372_v18 = vpack.c.bf16 %v18155_v47, %v6892_v8  ;;  %v6487_v8 = vsel %vm310_vm2, %v13119_v38, %v20517_v62 }
 0x681   :  { %v13128_v55 = vunpack.i.l.bf16 %v18499_v13  ;;  %v13123_v23 = vunpack.i.l.bf16 %v18501_v44  ;;  %v20943_v24 = vunpack.i.h.bf16 %v18501_v44  ;;  %v11390_v26 = vpack.c.bf16 %v18192_v7, %v6487_v8 }
 0x682   :  { %11373 = vmatpush1.bf16.msra.mxu1 %v11372_v18  ;;  %6569 = vrot.lane.b32.xlu0 %v18328_v5, %s13607_s16  ;;  %v6488_v18 = vsel %vm310_vm2, %v20518_v53, %v13119_v38  ;;  %v20944_v53 = vunpack.i.h.bf16 %v18499_v13 }
 0x683   :  { %6961 = vrot.lane.b32.xlu1 %v18283_v52, %s13607_s16  ;;  %7292 = vmatprep.subr.mxu1 %v6990_v1  ;;  %v18534_v1 = vld [vmem:[%s20261_s3 + $0x8] sm:$0xff]  ;;  %v6586_v38 = vsel %vm411_vm3, %v13123_v23, %v20943_v24  ;;  %v11392_v48 = vpack.c.bf16 %v18204_v17, %v6488_v18 }
 0x684   :  { %v18524_v4 = vpop.permute.xlu0 %13136  ;;  %v18526_v46 = vpop.permute.xlu1 %13131  ;;  %v6687_v37 = vsel %vm310_vm2, %v13128_v55, %v20944_v53 }
 0x685   :  { %v20519_v62 = vunpack.i.l.bf16 %v18524_v4  ;;  %v20945_v53 = vunpack.i.l.bf16 %v18526_v46  ;;  %v11394_v14 = vpack.c.bf16 %v6687_v37, %v6586_v38  ;;  %v10508_v37 = vld [vmem:[%s20262_s4 + $0x8] sm:$0xff]  ;;  %v13139_v38 = vunpack.i.h.bf16 %v18524_v4 }
 0x686   :  { %6769 = vrot.lane.b32.xlu0 %v18349_v2, %s13607_s16  ;;  %7293 = vmatpush1.msra.mxu1 %v6991_v27 }
 0x687   :  { %6667 = vrot.lane.b32.xlu1 %v18328_v5, %s13605_s29  ;;  %10510 = vmatmul.mubr.msk.f32.vlgmr.msra.gmra.mrb[30].mxu1 %vm2479_vm0, %v18534_v1  ;;  %v6688_v24 = vsel %vm310_vm2, %v20519_v62, %v13128_v55  ;;  %v6587_v27 = vsel %vm411_vm3, %v20945_v53, %v13123_v23 }
 0x688   :  { %11391 = vmatprep.subr.bf16.mxu1 %v11390_v26  ;;  %v18562_v8 = vpop.permute.xlu0 %13146  ;;  %v18564_v35 = vpop.permute.xlu1 %6947  ;;  %7482 = vmatprep.mubr.f32.mxu1 %v20752_v22  ;;  %v11396_v18 = vpack.c.bf16 %v6688_v24, %v6587_v27 }
 0x689   :  { %11393 = vmatpush1.bf16.msra.mxu1 %v11392_v48  ;;  %v20522_v55 = vunpack.i.l.bf16 %v18562_v8  ;;  %v13134_v48 = vunpack.i.h.bf16 %v18526_v46 }
 0x68a   :  { %11395 = vmatprep.subr.bf16.mxu1 %v11394_v14  ;;  %6969 = vrot.lane.b32.xlu0 %v18321_v15, %s13607_s16 }
 0x68b   :  { %6867 = vrot.lane.b32.xlu1 %v18349_v2, %s13605_s29  ;;  %v6887_v58 = vsel %vm310_vm2, %v13139_v38, %v20522_v55 }
 0x68c   :  { %v6950_v23 = vpop.permute.xlu0 %6949  ;;  %v18572_v26 = vpop.permute.xlu1 %13141 }
 0x68d   :  { %v20520_v14 = vunpack.i.h.bf16 %v18572_v26  ;;  %v20521_v53 = vunpack.i.l.bf16 %v18572_v26  ;;  %11397 = vmatpush1.bf16.msra.mxu1 %v11396_v18 }
 0x68f   :  { %v6787_v24 = vsel %vm411_vm3, %v20520_v14, %v13134_v48  ;;  %v6786_v27 = vsel %vm411_vm3, %v13134_v48, %v20521_v53  ;;  %7199 = vperm.xlu1 %13275, %v10508_v37   ;;  %v20947_v14 = vunpack.i.h.bf16 %v18562_v8  ;;  %v11402_v48 = vpack.c.bf16 %v18233_v51, %v6887_v58 }
 0x690   :  { %v18594_v57 = vpop.permute.xlu0 %13151  ;;  %v18596_v18 = vpop.permute.xlu1 %13156  ;;  %v11398_v62 = vpack.c.bf16 %v6786_v27, %v18212_v6  ;;  %v11400_v10 = vpack.c.bf16 %v6787_v24, %v18192_v7 }
 0x691   :  { %20946 = vst [vmem:[#allocation23_spill] sm:$0xff] %v18596_v18  ;;  %v6888_v59 = vsel %vm310_vm2, %v20947_v14, %v13139_v38  ;;  %v20523_v53 = vunpack.i.h.bf16 %v18596_v18  ;;  %v13158_v37 = vunpack.i.l.bf16 %v18596_v18  ;;  %v20524_v55 = vunpack.i.l.bf16 %v18594_v57 }
 0x692   :  { %11399 = vmatprep.subr.bf16.mxu1 %v11398_v62  ;;  %v11404_v24 = vpack.c.bf16 %v18212_v6, %v6888_v59 }
 0x693   :  { %11401 = vmatpush1.bf16.msra.mxu1 %v11400_v10  ;;  %v6483_v10 = vsel %vm310_vm2, %v13158_v37, %v20523_v53  ;;  %v6484_v38 = vsel %vm310_vm2, %v20524_v55, %v13158_v37  ;;  %v6987_v53 = vsel %vm411_vm3, %v18564_v35, %v6950_v23 }
 0x694   :  { %v18608_v25 = vpop.permute.xlu0 %13161  ;;  %v18610_v27 = vpop.permute.xlu1 %6951  ;;  %11403 = vmatprep.subr.bf16.mxu1 %v11402_v48  ;;  %v13154_v48 = vunpack.i.h.bf16 %v18594_v57  ;;  %v11422_v42 = vpack.c.bf16 %v18247_v9, %v6483_v10  ;;  %v11424_v37 = vpack.c.bf16 %v18244_v3, %v6484_v38 }
 0x695   :  { %20948 = vst [vmem:[#allocation26_spill] sm:$0xff] %v18608_v25  ;;  %20949 = vst [vmem:[#allocation28_spill] sm:$0xff] %v18610_v27  ;;  %v13163_v62 = vunpack.i.l.bf16 %v18608_v25  ;;  %v6986_v58 = vsel %vm411_vm3, %v6950_v23, %v18610_v27  ;;  %v20950_v55 = vunpack.i.h.bf16 %v18608_v25 }
 0x697   :  { %11405 = vmatpush1.bf16.msra.mxu1 %v11404_v24 }
 0x698   :  { %v18626_v59 = vpop.permute.xlu0 %13171  ;;  %v18628_v14 = vpop.permute.xlu1 %13166  ;;  %7434 = vmatprep.subr.mxu1 %v6986_v58  ;;  %v6582_v58 = vsel %vm411_vm3, %v13163_v62, %v20950_v55 }
 0x699   :  { %v20526_v24 = vunpack.i.l.bf16 %v18626_v59  ;;  %v20525_v28 = vunpack.i.l.bf16 %v18628_v14  ;;  %v20951_v10 = vunpack.i.h.bf16 %v18628_v14 }
 0x69b   :  { %7435 = vmatpush1.msra.mxu1 %v6987_v53  ;;  %v6683_v12 = vsel %vm310_vm2, %v13154_v48, %v20525_v28  ;;  %v6583_v23 = vsel %vm411_vm3, %v20526_v24, %v13163_v62  ;;  %v6684_v53 = vsel %vm310_vm2, %v20951_v10, %v13154_v48  ;;  %v13174_v10 = vunpack.i.h.bf16 %v18626_v59 }
 0x69c   :  { %v18655_v38 = vpop.permute.xlu0 %13181  ;;  %v18657_v54 = vpop.permute.xlu1 %6955  ;;  %10512 = vmatmul.mubr.msk.f32.vlgmr.msra.gmra.mrb[32].mxu1 %vm2479_vm0, %v18534_v1  ;;  %11423 = vmatprep.subr.bf16.mxu1 %v11422_v42  ;;  %v11426_v55 = vpack.c.bf16 %v6683_v12, %v6582_v58  ;;  %v11428_v24 = vpack.c.bf16 %v6684_v53, %v6583_v23 }
 0x69d   :  { %20952 = vst [vmem:[#allocation29_spill] sm:$0xff] %v18655_v38  ;;  %20953 = vst [vmem:[#allocation31_spill] sm:$0xff] %v18657_v54  ;;  %11425 = vmatpush1.bf16.msra.mxu1 %v11424_v37  ;;  %7624 = vmatprep.mubr.f32.mxu1 %v20752_v22  ;;  %v20531_v62 = vunpack.i.h.bf16 %v18655_v38  ;;  %v13183_v28 = vunpack.i.l.bf16 %v18655_v38 }
 0x69e   :  { %11427 = vmatprep.subr.bf16.mxu1 %v11426_v55 }
 0x69f   :  { %v6883_v58 = vsel %vm310_vm2, %v13183_v28, %v20531_v62 }
 0x6a0   :  { %v18664_v40 = vpop.permute.xlu0 %13186  ;;  %v18666_v48 = vpop.permute.xlu1 %13176 }
 0x6a1   :  { %20954 = vst [vmem:[#allocation35_spill] sm:$0xff] %v18664_v40  ;;  %v20528_v25 = vunpack.i.h.bf16 %v18666_v48  ;;  %v20532_v42 = vunpack.i.l.bf16 %v18666_v48  ;;  %11429 = vmatpush1.bf16.msra.mxu1 %v11428_v24  ;;  %v20543_v38 = vunpack.i.h.bf16 %v18664_v40 }
 0x6a3   :  { %v6783_v12 = vsel %vm411_vm3, %v20528_v25, %v13174_v10  ;;  %v6782_v37 = vsel %vm411_vm3, %v13174_v10, %v20532_v42  ;;  %v11434_v25 = vpack.c.bf16 %v18275_v41, %v6883_v58 }
 0x6a4   :  { %v18683_v23 = vpop.permute.xlu0 %6959  ;;  %v6958_v53 = vpop.permute.xlu1 %6957  ;;  %v11430_v24 = vpack.c.bf16 %v6782_v37, %v18253_v50  ;;  %v11432_v55 = vpack.c.bf16 %v6783_v12, %v18247_v9  ;;  %v20959_v9 = vunpack.i.l.bf16 %v18664_v40  ;;  %v13073_v40 = vunpack.i.l.bf16 %v18400_v16 }
 0x6a5   :  { %20955 = vst [vmem:[#allocation36_spill] sm:$0xff] %v18683_v23 }
 0x6a6   :  { %11431 = vmatprep.subr.bf16.mxu1 %v11430_v24 }
 0x6a7   :  { %11433 = vmatpush1.bf16.msra.mxu1 %v11432_v55 }
 0x6a8   :  { %v18688_v27 = vpop.permute.xlu0 %13196  ;;  %v18690_v18 = vpop.permute.xlu1 %13191  ;;  %11435 = vmatprep.subr.bf16.mxu1 %v11434_v25 }
 0x6a9   :  { %20956 = vst [vmem:[#allocation37_spill] sm:$0xff] %v18688_v27  ;;  %20957 = vst [vmem:[#allocation39_spill] sm:$0xff] %v18690_v18  ;;  %v13194_v10 = vunpack.i.h.bf16 %v18690_v18  ;;  %v20538_v62 = vunpack.i.l.bf16 %v18690_v18  ;;  %v13198_v58 = vunpack.i.l.bf16 %v18688_v27 }
 0x6ab   :  { %v6884_v12 = vsel %vm310_vm2, %v20538_v62, %v13183_v28  ;;  %v6479_v28 = vsel %vm310_vm2, %v13194_v10, %v20959_v9  ;;  %v6982_v62 = vsel %vm411_vm3, %v6958_v53, %v18683_v23 }
 0x6ac   :  { %v18701_v24 = vpop.permute.xlu0 %13206  ;;  %v18703_v55 = vpop.permute.xlu1 %13201  ;;  %v11436_v25 = vpack.c.bf16 %v18253_v50, %v6884_v12  ;;  %v6480_v12 = vsel %vm310_vm2, %v20543_v38, %v13194_v10  ;;  %v11454_v23 = vpack.c.bf16 %v18283_v52, %v6479_v28  ;;  %v20961_v10 = vunpack.i.h.bf16 %v18688_v27 }
 0x6ad   :  { %20958 = vst [vmem:[#allocation45_spill] sm:$0xff] %v18703_v55  ;;  %v20544_v41 = vunpack.i.h.bf16 %v18703_v55  ;;  %v13203_v42 = vunpack.i.l.bf16 %v18703_v55  ;;  %v20962_v27 = vunpack.i.l.bf16 %v18382_v61 }
 0x6ae   :  { %11437 = vmatpush1.bf16.msra.mxu1 %v11436_v25  ;;  %v6983_v25 = vsel %vm411_vm3, %v18657_v54, %v6958_v53  ;;  %v11456_v53 = vpack.c.bf16 %v18298_v60, %v6480_v12 }
 0x6af   :  { %7576 = vmatprep.subr.mxu1 %v6982_v62  ;;  %v6679_v37 = vsel %vm310_vm2, %v13203_v42, %v20544_v41  ;;  %v6578_v62 = vsel %vm411_vm3, %v13198_v58, %v20961_v10 }
 0x6b0   :  { %v18725_v18 = vpop.permute.xlu0 %13216  ;;  %v18727_v9 = vpop.permute.xlu1 %13211  ;;  %v11458_v54 = vpack.c.bf16 %v6679_v37, %v6578_v62 }
 0x6b1   :  { %20960 = vst [vmem:[#allocation46_spill] sm:$0xff] %v18727_v9  ;;  %v13219_v38 = vunpack.i.h.bf16 %v18725_v18  ;;  %v20550_v41 = vunpack.i.l.bf16 %v18725_v18  ;;  %v13214_v50 = vunpack.i.h.bf16 %v18727_v9  ;;  %v20551_v55 = vunpack.i.l.bf16 %v18727_v9 }
 0x6b2   :  { %7577 = vmatpush1.msra.mxu1 %v6983_v25 }
 0x6b3   :  { %v6494_v28 = vsel %vm310_vm2, %v20550_v41, %v13214_v50  ;;  %v6680_v10 = vsel %vm310_vm2, %v20551_v55, %v13203_v42  ;;  %10514 = vmatmul.mubr.msk.f32.vlgmr.msra.gmra.mrb[34].mxu1 %vm2479_vm0, %v18534_v1  ;;  %11455 = vmatprep.subr.bf16.mxu1 %v11454_v23  ;;  %v6493_v12 = vsel %vm310_vm2, %v13214_v50, %v20962_v27  ;;  %v20965_v42 = vunpack.i.l.bf16 %v18410_v0 }
 0x6b4   :  { %v18757_v37 = vpop.permute.xlu0 %13226  ;;  %v18759_v25 = vpop.permute.xlu1 %13221  ;;  %11457 = vmatpush1.bf16.msra.mxu1 %v11456_v53  ;;  %v11342_v62 = vpack.c.bf16 %v18146_v56, %v6493_v12  ;;  %v11344_v41 = vpack.c.bf16 %v20752_v22, %v6494_v28  ;;  %v20966_v23 = vunpack.i.h.bf16 %v18412_v32  ;;  %v13209_v50 = vunpack.i.h.bf16 %v18701_v24  ;;  %7766 = vmatprep.mubr.f32.mxu1 %v20752_v22 }
 0x6b5   :  { %20963 = vst [vmem:[#allocation48_spill] sm:$0xff] %v18757_v37  ;;  %20964 = vst [vmem:[#allocation50_spill] sm:$0xff] %v18759_v25  ;;  %v6592_v55 = vsel %vm411_vm3, %v13073_v40, %v20965_v42  ;;  %v20967_v27 = vunpack.i.l.bf16 %v18701_v24  ;;  %v20555_v12 = vunpack.i.h.bf16 %v18759_v25  ;;  %v20554_v28 = vunpack.i.l.bf16 %v18759_v25  ;;  %11459 = vmatprep.subr.bf16.mxu1 %v11458_v54 }
 0x6b6   :  { %v6693_v61 = vsel %vm310_vm2, %v13219_v38, %v20966_v23  ;;  %11343 = vmatprep.subr.bf16.mxu0 %v11342_v62 }
 0x6b7   :  { %v6579_v53 = vsel %vm411_vm3, %v20967_v27, %v13198_v58  ;;  %v11346_v0 = vpack.c.bf16 %v6693_v61, %v6592_v55  ;;  %v6779_v23 = vsel %vm411_vm3, %v20555_v12, %v13209_v50  ;;  %11345 = vmatpush1.bf16.msra.mxu0 %v11344_v41  ;;  %v6778_v58 = vsel %vm411_vm3, %v13209_v50, %v20554_v28 }
 0x6b8   :  { %v11460_v42 = vpack.c.bf16 %v6680_v10, %v6579_v53  ;;  %v18787_v27 = vpop.permute.xlu0 %6963  ;;  %v6966_v60 = vpop.permute.xlu1 %6965  ;;  %v11462_v54 = vpack.c.bf16 %v6778_v58, %v18301_v20  ;;  %v20558_v55 = vunpack.i.h.bf16 %v18400_v16  ;;  %v13098_v10 = vunpack.i.l.bf16 %v18442_v19 }
 0x6b9   :  { %11347 = vmatprep.subr.bf16.mxu0 %v11346_v0  ;;  %v11464_v62 = vpack.c.bf16 %v6779_v23, %v18283_v52  ;;  %v20559_v41 = vunpack.i.h.bf16 %v18442_v19  ;;  %v20968_v50 = vunpack.i.h.bf16 %v18453_v43  ;;  %v20566_v58 = vunpack.i.l.bf16 %v18757_v37 }
 0x6ba   :  { %11461 = vmatpush1.bf16.msra.mxu1 %v11460_v42  ;;  %v20562_v42 = vunpack.i.h.bf16 %v18757_v37  ;;  %v6593_v28 = vsel %vm411_vm3, %v20558_v55, %v13073_v40 }
 0x6bb   :  { %11463 = vmatprep.subr.bf16.mxu1 %v11462_v54  ;;  %v6792_v0 = vsel %vm411_vm3, %v13098_v10, %v20968_v50 }
 0x6bc   :  { %v18794_v61 = vpop.permute.xlu0 %6937  ;;  %v18796_v53 = vpop.permute.xlu1 %13231 }
 0x6bd   :  { %v13234_v54 = vunpack.i.h.bf16 %v18796_v53  ;;  %v13233_v23 = vunpack.i.l.bf16 %v18796_v53 }
 0x6be   :  { %11465 = vmatpush1.bf16.msra.mxu1 %v11464_v62  ;;  %v6793_v62 = vsel %vm411_vm3, %v20559_v41, %v13098_v10  ;;  %v11350_v41 = vpack.c.bf16 %v6792_v0, %v18149_v29 }
 0x6bf   :  { %v6880_v50 = vsel %vm310_vm2, %v20562_v42, %v13234_v54  ;;  %v6694_v12 = vsel %vm310_vm2, %v13233_v23, %v13219_v38  ;;  %v6879_v53 = vsel %vm310_vm2, %v13234_v54, %v20566_v58 }
 0x6c0   :  { %v18824_v52 = vpop.permute.xlu0 %13246  ;;  %v18826_v40 = vpop.permute.xlu1 %13236  ;;  %v11348_v55 = vpack.c.bf16 %v6694_v12, %v6593_v28  ;;  %v11466_v10 = vpack.c.bf16 %v18328_v5, %v6879_v53  ;;  %v11468_v25 = vpack.c.bf16 %v18301_v20, %v6880_v50  ;;  %v20969_v12 = vunpack.i.l.bf16 %v18484_v11 }
 0x6c1   :  { %v20567_v42 = vunpack.i.h.bf16 %v18824_v52  ;;  %v13248_v38 = vunpack.i.l.bf16 %v18824_v52  ;;  %v20569_v37 = vunpack.i.h.bf16 %v18826_v40  ;;  %v13238_v9 = vunpack.i.l.bf16 %v18826_v40 }
 0x6c2   :  { %11349 = vmatpush1.bf16.msra.mxu0 %v11348_v55  ;;  %11467 = vmatprep.subr.bf16.mxu1 %v11466_v10  ;;  %v11352_v53 = vpack.c.bf16 %v6793_v62, %v18146_v56  ;;  %v6979_v62 = vsel %vm411_vm3, %v18787_v27, %v6966_v60 }
 0x6c3   :  { %11351 = vmatprep.subr.bf16.mxu0 %v11350_v41  ;;  %11469 = vmatpush1.bf16.msra.mxu1 %v11468_v25  ;;  %v6893_v28 = vsel %vm310_vm2, %v13238_v9, %v20969_v12  ;;  %v6476_v0 = vsel %vm310_vm2, %v20567_v42, %v13248_v38  ;;  %v20970_v41 = vunpack.i.l.bf16 %v18725_v18  ;;  %v6894_v25 = vsel %vm310_vm2, %v20569_v37, %v13238_v9 }
 0x6c4   :  { %v18843_v54 = vpop.permute.xlu0 %6967  ;;  %v13242_v50 = vpop.permute.xlu1 %13241  ;;  %v11354_v55 = vpack.c.bf16 %v18152_v45, %v6893_v28 }
 0x6c5   :  { %v6475_v11 = vsel %vm310_vm2, %v13248_v38, %v20970_v41  ;;  %v6978_v10 = vsel %vm411_vm3, %v6966_v60, %v18843_v54  ;;  %v13243_v12 = vunpack.i.l.bf16 %v13242_v50  ;;  %v11488_v38 = vpack.c.bf16 %v18349_v2, %v6476_v0 }
 0x6c6   :  { %11353 = vmatpush1.bf16.msra.mxu0 %v11352_v53  ;;  %7718 = vmatprep.subr.mxu1 %v6978_v10  ;;  %v11486_v18 = vpack.c.bf16 %v18321_v15, %v6475_v11  ;;  %v11356_v53 = vpack.c.bf16 %v18149_v29, %v6894_v25  ;;  %v13244_v0 = vunpack.i.h.bf16 %v13242_v50  ;;  %v20971_v10 = vunpack.i.h.bf16 %v18380_v36 }
 0x6c7   :  { %11355 = vmatprep.subr.bf16.mxu0 %v11354_v55  ;;  %7719 = vmatpush1.msra.mxu1 %v6979_v62  ;;  %v6992_v25 = vsel %vm411_vm3, %v18794_v61, %v18444_v21 }
 0x6c8   :  { %v18863_v28 = vpop.permute.xlu0 %13256  ;;  %v18865_v9 = vpop.permute.xlu1 %13251  ;;  %10516 = vmatmul.mubr.msk.f32.vlgmr.msra.gmra.mrb[36].mxu1 %vm2479_vm0, %v18534_v1  ;;  %11487 = vmatprep.subr.bf16.mxu1 %v11486_v18  ;;  %v6490_v62 = vsel %vm310_vm2, %v20971_v10, %v13243_v12  ;;  %v20972_v18 = vunpack.i.h.bf16 %v18475_v63 }
 0x6c9   :  { %v20568_v41 = vunpack.i.h.bf16 %v18863_v28  ;;  %v13258_v60 = vunpack.i.l.bf16 %v18863_v28  ;;  %v13254_v11 = vunpack.i.h.bf16 %v18865_v9  ;;  %v13253_v55 = vunpack.i.l.bf16 %v18865_v9  ;;  %11489 = vmatpush1.bf16.msra.mxu1 %v11488_v38  ;;  %7908 = vmatprep.mubr.f32.mxu1 %v20752_v22  ;;  %v21025_v9 = vld [vmem:[#allocation37_spill] sm:$0xff] }
 0x6ca   :  { %11357 = vmatpush1.bf16.msra.mxu0 %v11356_v53  ;;  %v6489_v58 = vsel %vm310_vm2, %v13243_v12, %v20972_v18  ;;  %v20973_v38 = vunpack.i.h.bf16 %v18400_v16 }
 0x6cb   :  { %v6676_v50 = vsel %vm310_vm2, %v20568_v41, %v13258_v60  ;;  %v6575_v36 = vsel %vm411_vm3, %v13254_v11, %v13253_v55  ;;  %7221 = vmatprep.subr.mxu0 %v6992_v25  ;;  %v6675_v53 = vsel %vm310_vm2, %v13258_v60, %v13233_v23  ;;  %v11374_v16 = vpack.c.bf16 %v18188_v31, %v6489_v58 }
 0x6cc   :  { %v6594_v21 = vsel %vm411_vm3, %v13253_v55, %v20973_v38  ;;  %v6936_v12 = vpop.permute.xlu0 %6935  ;;  %v18901_v10 = vpop.permute.xlu1 %13261  ;;  %v11492_v42 = vpack.c.bf16 %v6676_v50, %v6575_v36  ;;  %v11376_v55 = vpack.c.bf16 %v18155_v47, %v6490_v62  ;;  %v20974_v60 = vunpack.i.l.bf16 %v18524_v4 }
 0x6cd   :  { %v11490_v18 = vpack.c.bf16 %v6675_v53, %v6594_v21  ;;  %v13264_v41 = vunpack.i.h.bf16 %v18901_v10  ;;  %v13263_v37 = vunpack.i.l.bf16 %v18901_v10  ;;  %v6993_v25 = vsel %vm411_vm3, %v6936_v12, %v18794_v61 }
 0x6ce   :  { %7222 = vmatpush1.msra.mxu0 %v6993_v25  ;;  %v6689_v61 = vsel %vm310_vm2, %v13244_v0, %v20974_v60  ;;  %v20975_v58 = vunpack.i.h.bf16 %v18442_v19  ;;  %v20976_v38 = vunpack.i.l.bf16 %v18412_v32  ;;  %v20978_v25 = vunpack.i.h.bf16 %v18398_v39 }
 0x6cf   :  { %11491 = vmatprep.subr.bf16.mxu1 %v11490_v18  ;;  %v6775_v23 = vsel %vm411_vm3, %v13264_v41, %v13263_v37  ;;  %10509 = vmatmul.mubr.msk.f32.vlgmr.msra.gmra.mrb[30].mxu0 %vm2479_vm0, %v18534_v1 }
 0x6d0   :  { %11375 = vmatprep.subr.bf16.mxu0 %v11374_v16  ;;  %v6794_v50 = vsel %vm411_vm3, %v13263_v37, %v20975_v58  ;;  %11493 = vmatpush1.bf16.msra.mxu1 %v11492_v42  ;;  %v18924_v62 = vpop.permute.xlu0 %13266  ;;  %v6546_v36 = vpop.permute.xlu1 %6545  ;;  %v6690_v21 = vsel %vm310_vm2, %v20976_v38, %v13244_v0  ;;  %v11496_v53 = vpack.c.bf16 %v6775_v23, %v18321_v15  ;;  %v20977_v37 = vunpack.i.l.bf16 %v18526_v46 }
 0x6d1   :  { %11377 = vmatpush1.bf16.msra.mxu0 %v11376_v55  ;;  %v11494_v4 = vpack.c.bf16 %v6794_v50, %v18342_v49  ;;  %v13269_v18 = vunpack.i.h.bf16 %v18924_v62  ;;  %v13268_v19 = vunpack.i.l.bf16 %v18924_v62  ;;  %v6589_v32 = vsel %vm411_vm3, %v20978_v25, %v6546_v36  ;;  %7411 = vmatprep.mubr.f32.mxu0 %v20752_v22 }
 0x6d2   :  { %v6588_v42 = vsel %vm411_vm3, %v6546_v36, %v20977_v37  ;;  %v11380_v16 = vpack.c.bf16 %v6690_v21, %v6589_v32  ;;  %v20979_v46 = vunpack.i.h.bf16 %v18826_v40  ;;  %v20980_v38 = vunpack.i.h.bf16 %v18562_v8 }
 0x6d3   :  { %v11378_v0 = vpack.c.bf16 %v6689_v61, %v6588_v42  ;;  %11495 = vmatprep.subr.bf16.mxu1 %v11494_v4  ;;  %v6876_v55 = vsel %vm310_vm2, %v13269_v18, %v13268_v19  ;;  %v20981_v21 = vunpack.i.l.bf16 %v18453_v43 }
 0x6d4   :  { %v6875_v23 = vsel %vm310_vm2, %v13268_v19, %v20979_v46  ;;  %v11500_v39 = vpack.c.bf16 %v18342_v49, %v6876_v55  ;;  %11497 = vmatpush1.bf16.msra.mxu1 %v11496_v53  ;;  %v6844_v60 = vpop.permute.xlu0 %6843  ;;  %v13272_v58 = vpop.permute.xlu1 %13271  ;;  %v20982_v19 = vunpack.i.h.bf16 %v18572_v26 }
 0x6d5   :  { %11379 = vmatprep.subr.bf16.mxu0 %v11378_v0  ;;  %v11498_v61 = vpack.c.bf16 %v20752_v22, %v6875_v23  ;;  %v13274_v50 = vunpack.i.h.bf16 %v13272_v58  ;;  %v13273_v36 = vunpack.i.l.bf16 %v13272_v58  ;;  %v6889_v40 = vsel %vm310_vm2, %v6844_v60, %v20980_v38 }
 0x6d6   :  { %11381 = vmatpush1.bf16.msra.mxu0 %v11380_v16  ;;  %v11386_v55 = vpack.c.bf16 %v18192_v7, %v6889_v40  ;;  %v20986_v40 = vunpack.i.h.bf16 %v18628_v14 }
 0x6d7   :  { %11499 = vmatprep.subr.bf16.mxu1 %v11498_v61  ;;  %v6789_v4 = vsel %vm411_vm3, %v20981_v21, %v13273_v36  ;;  %v6994_v53 = vsel %vm411_vm3, %v13274_v50, %v6936_v12  ;;  %v6788_v37 = vsel %vm411_vm3, %v13273_v36, %v20982_v19  ;;  %v20983_v12 = vunpack.i.h.bf16 %v18451_v30 }
 0x6d8   :  { %v11384_v42 = vpack.c.bf16 %v6789_v4, %v18188_v31  ;;  %11501 = vmatpush1.bf16.msra.mxu1 %v11500_v39  ;;  %v6452_v25 = vpop.permute.xlu0 %6451  ;;  %v18968_v32 = vpop.permute.xlu1 %6971  ;;  %v11382_v0 = vpack.c.bf16 %v6788_v37, %v18204_v17  ;;  %v20984_v30 = vunpack.i.l.bf16 %v18594_v57  ;;  %v20985_v61 = vunpack.i.l.bf16 %v18475_v63 }
 0x6d9   :  { %v6975_v43 = vsel %vm411_vm3, %v18968_v32, %v13274_v50  ;;  %7860 = vmatprep.subr.mxu1 %v6994_v53  ;;  %v6890_v16 = vsel %vm310_vm2, %v20983_v12, %v6844_v60  ;;  %v20987_v63 = vunpack.i.l.bf16 %v18626_v59  ;;  %v20988_v19 = vunpack.i.h.bf16 %v18499_v13 }
 0x6da   :  { %11383 = vmatprep.subr.bf16.mxu0 %v11382_v0  ;;  %v11388_v39 = vpack.c.bf16 %v18204_v17, %v6890_v16  ;;  %v6485_v60 = vsel %vm310_vm2, %v6452_v25, %v20984_v30  ;;  %v6486_v50 = vsel %vm310_vm2, %v20985_v61, %v6452_v25  ;;  %v20991_v16 = vunpack.i.l.bf16 %v18572_v26  ;;  %v20992_v30 = vld [vmem:[#allocation39_spill] sm:$0xff] }
 0x6db   :  { %11385 = vmatpush1.bf16.msra.mxu0 %v11384_v42  ;;  %v11406_v21 = vpack.c.bf16 %v18233_v51, %v6485_v60  ;;  %v20993_v60 = vunpack.i.l.bf16 %v20992_v30  ;;  %v20994_v61 = vunpack.i.l.bf16 %v18562_v8 }
 0x6dc   :  { %7861 = vmatpush1.msra.mxu1 %v6975_v43  ;;  %v6554_v46 = vpop.permute.xlu0 %6553  ;;  %v6946_v23 = vpop.permute.xlu1 %6945  ;;  %11387 = vmatprep.subr.bf16.mxu0 %v11386_v55  ;;  %v20990_v43 = vunpack.i.h.bf16 %v18501_v44 }
 0x6dd   :  { %10518 = vmatmul.mubr.msk.f32.vlgmr.msra.gmra.mrb[38].mxu1 %vm2479_vm0, %v18534_v1  ;;  %v6988_v58 = vsel %vm411_vm3, %v6946_v23, %v18564_v35  ;;  %v6989_v4 = vsel %vm411_vm3, %v18486_v33, %v6946_v23  ;;  %v11408_v35 = vpack.c.bf16 %v18212_v6, %v6486_v50  ;;  %v6584_v53 = vsel %vm411_vm3, %v6554_v46, %v20987_v63  ;;  %v20995_v50 = vld [vmem:[#allocation51_spill] sm:$0xff] }
 0x6de   :  { %8902 = vmatprep.mubr.f32.mxu1 %v20752_v22  ;;  %v20989_v33 = vunpack.i.h.bf16 %v18666_v48  ;;  %v6585_v13 = vsel %vm411_vm3, %v20990_v43, %v6554_v46  ;;  %v21004_v43 = vld [vmem:[#allocation53_spill] sm:$0xff] }
 0x6df   :  { %11389 = vmatpush1.bf16.msra.mxu0 %v11388_v39 }
 0x6e0   :  { %v6754_v36 = vpop.permute.xlu0 %6753  ;;  %v6652_v38 = vpop.permute.xlu1 %6651  ;;  %7363 = vmatprep.subr.mxu0 %v6988_v58 }
 0x6e1   :  { %v6685_v57 = vsel %vm310_vm2, %v6652_v38, %v20986_v40  ;;  %v6686_v37 = vsel %vm310_vm2, %v20988_v19, %v6652_v38  ;;  %v6784_v59 = vsel %vm411_vm3, %v6754_v36, %v20989_v33  ;;  %v6785_v55 = vsel %vm411_vm3, %v20991_v16, %v6754_v36 }
 0x6e2   :  { %v11410_v42 = vpack.c.bf16 %v6685_v57, %v6584_v53  ;;  %v11412_v12 = vpack.c.bf16 %v6686_v37, %v6585_v13  ;;  %v11414_v23 = vpack.c.bf16 %v6784_v59, %v18244_v3  ;;  %v11416_v46 = vpack.c.bf16 %v6785_v55, %v18233_v51  ;;  %v20999_v53 = vld [vmem:[#allocation35_spill] sm:$0xff] }
 0x6e3   :  { %7364 = vmatpush1.msra.mxu0 %v6989_v4  ;;  %v20996_v40 = vunpack.i.l.bf16 %v18701_v24  ;;  %v21000_v19 = vunpack.i.h.bf16 %v20999_v53 }
 0x6e4   :  { %v6852_v25 = vpop.permute.xlu1 %6851  ;;  %10511 = vmatmul.mubr.msk.f32.vlgmr.msra.gmra.mrb[32].mxu0 %vm2479_vm0, %v18534_v1  ;;  %11407 = vmatprep.subr.bf16.mxu0 %v11406_v21  ;;  %v6460_v0 = vpop.permute.xlu0 %6459  ;;  %v20997_v21 = vld [vmem:[#allocation46_spill] sm:$0xff] }
 0x6e5   :  { %11409 = vmatpush1.bf16.msra.mxu0 %v11408_v35  ;;  %7553 = vmatprep.mubr.f32.mxu0 %v20752_v22  ;;  %v6885_v44 = vsel %vm310_vm2, %v6852_v25, %v20993_v60  ;;  %v6886_v26 = vsel %vm310_vm2, %v20994_v61, %v6852_v25  ;;  %v20998_v4 = vunpack.i.l.bf16 %v20997_v21  ;;  %v6481_v37 = vsel %vm310_vm2, %v6460_v0, %v21000_v19  ;;  %v21002_v25 = vld [vmem:[#allocation23_spill] sm:$0xff]  ;;  %v21013_v21 = vld [vmem:[#allocation13_spill] sm:$0xff] }
 0x6e6   :  { %11411 = vmatprep.subr.bf16.mxu0 %v11410_v42  ;;  %v11418_v36 = vpack.c.bf16 %v20995_v50, %v6885_v44  ;;  %v11420_v8 = vpack.c.bf16 %v18244_v3, %v6886_v26  ;;  %v21001_v42 = vld [vmem:[#allocation31_spill] sm:$0xff]  ;;  %v21003_v33 = vunpack.i.h.bf16 %v21002_v25  ;;  %v11438_v13 = vpack.c.bf16 %v21004_v43, %v6481_v37 }
 0x6e7   :  { %v21007_v60 = vunpack.i.l.bf16 %v18628_v14  ;;  %v21018_v25 = vld [vmem:[#allocation15_spill] sm:$0xff] }
 0x6e8   :  { %v6954_v39 = vpop.permute.xlu1 %6953  ;;  %v6562_v58 = vpop.permute.xlu0 %6561  ;;  %v6482_v59 = vsel %vm310_vm2, %v21003_v33, %v6460_v0  ;;  %v21008_v0 = vld [vmem:[#allocation50_spill] sm:$0xff] }
 0x6e9   :  { %11413 = vmatpush1.bf16.msra.mxu0 %v11412_v12  ;;  %v6580_v57 = vsel %vm411_vm3, %v6562_v58, %v20996_v40  ;;  %v6984_v24 = vsel %vm411_vm3, %v6954_v39, %v21001_v42  ;;  %v21005_v12 = vld [vmem:[#allocation28_spill] sm:$0xff]  ;;  %v21009_v61 = vunpack.i.h.bf16 %v21008_v0  ;;  %v21012_v40 = vunpack.i.l.bf16 %v18666_v48 }
 0x6ea   :  { %11415 = vmatprep.subr.bf16.mxu0 %v11414_v23  ;;  %v6985_v16 = vsel %vm411_vm3, %v21005_v12, %v6954_v39  ;;  %v21006_v23 = vld [vmem:[#allocation40_spill] sm:$0xff]  ;;  %v21010_v39 = vld [vmem:[#allocation26_spill] sm:$0xff] }
 0x6eb   :  { %v11440_v30 = vpack.c.bf16 %v21006_v23, %v6482_v59 }
 0x6ec   :  { %v6762_v55 = vpop.permute.xlu0 %6761 }
 0x6ed   :  { %v6660_v38 = vpop.permute.xlu1 %6659  ;;  %11417 = vmatpush1.bf16.msra.mxu0 %v11416_v46  ;;  %v6780_v26 = vsel %vm411_vm3, %v6762_v55, %v21009_v61 }
 0x6ee   :  { %v6681_v35 = vsel %vm310_vm2, %v6660_v38, %v20998_v4  ;;  %11419 = vmatprep.subr.bf16.mxu0 %v11418_v36  ;;  %v6682_v44 = vsel %vm310_vm2, %v21007_v60, %v6660_v38  ;;  %v21011_v36 = vunpack.i.h.bf16 %v21010_v39  ;;  %v11446_v4 = vpack.c.bf16 %v6780_v26, %v21013_v21  ;;  %v21022_v26 = vld [vmem:[#allocation36_spill] sm:$0xff] }
 0x6ef   :  { %v11442_v63 = vpack.c.bf16 %v6681_v35, %v6580_v57  ;;  %v6781_v57 = vsel %vm411_vm3, %v21012_v40, %v6762_v55  ;;  %v21020_v60 = vunpack.i.l.bf16 %v20999_v53 }
 0x6f0   :  { %v6581_v14 = vsel %vm411_vm3, %v21011_v36, %v6562_v58  ;;  %v6468_v35 = vpop.permute.xlu0 %6467  ;;  %v11448_v58 = vpack.c.bf16 %v6781_v57, %v21004_v43 }
 0x6f1   :  { %11421 = vmatpush1.bf16.msra.mxu0 %v11420_v8  ;;  %v6860_v46 = vpop.permute.xlu1 %6859  ;;  %v11444_v38 = vpack.c.bf16 %v6682_v44, %v6581_v14  ;;  %v21014_v8 = vld [vmem:[#allocation48_spill] sm:$0xff]  ;;  %v6478_v44 = vsel %vm310_vm2, %v21020_v60, %v6468_v35  ;;  %v21023_v14 = vld [vmem:[#allocation45_spill] sm:$0xff] }
 0x6f2   :  { %7505 = vmatprep.subr.mxu0 %v6984_v24  ;;  %v21015_v19 = vunpack.i.h.bf16 %v21014_v8 }
 0x6f4   :  { %v6881_v37 = vsel %vm310_vm2, %v6860_v46, %v21015_v19  ;;  %v6570_v59 = vpop.permute.xlu0 %6569 }
 0x6f5   :  { %7506 = vmatpush1.msra.mxu0 %v6985_v16  ;;  %v6962_v42 = vpop.permute.xlu1 %6961  ;;  %v11450_v33 = vpack.c.bf16 %v21018_v25, %v6881_v37  ;;  %v21019_v16 = vunpack.i.h.bf16 %v18824_v52  ;;  %v6576_v53 = vsel %vm411_vm3, %v6570_v59, %v13254_v11  ;;  %v21026_v11 = vunpack.i.h.bf16 %v21025_v9 }
 0x6f6   :  { %10513 = vmatmul.mubr.msk.f32.vlgmr.msra.gmra.mrb[34].mxu0 %vm2479_vm0, %v18534_v1  ;;  %11439 = vmatprep.subr.bf16.mxu0 %v11438_v13  ;;  %v6981_v39 = vsel %vm411_vm3, %v21022_v26, %v6962_v42  ;;  %v21027_v37 = vunpack.i.l.bf16 %v21008_v0 }
 0x6f7   :  { %11441 = vmatpush1.bf16.msra.mxu0 %v11440_v30  ;;  %7695 = vmatprep.mubr.f32.mxu0 %v20752_v22  ;;  %v6477_v55 = vsel %vm310_vm2, %v6468_v35, %v21019_v16  ;;  %v6980_v30 = vsel %vm411_vm3, %v6962_v42, %v18787_v27  ;;  %v11472_v27 = vpack.c.bf16 %v18301_v20, %v6478_v44 }
 0x6f8   :  { %11443 = vmatprep.subr.bf16.mxu0 %v11442_v63  ;;  %v21016_v63 = vld [vmem:[#allocation29_spill] sm:$0xff]  ;;  %v11470_v52 = vpack.c.bf16 %v18328_v5, %v6477_v55  ;;  %v6770_v36 = vpop.permute.xlu0 %6769 }
 0x6f9   :  { %v21017_v24 = vunpack.i.h.bf16 %v21016_v63  ;;  %v6668_v12 = vpop.permute.xlu1 %6667  ;;  %v6776_v57 = vsel %vm411_vm3, %v6770_v36, %v13264_v41  ;;  %v6777_v42 = vsel %vm411_vm3, %v21027_v37, %v6770_v36  ;;  %v21028_v63 = vunpack.i.l.bf16 %v21014_v8  ;;  %v21033_v37 = vld [vmem:[#allocation27_spill] sm:$0xff] }
 0x6fa   :  { %v11478_v10 = vpack.c.bf16 %v6776_v57, %v18349_v2 }
 0x6fb   :  { %11445 = vmatpush1.bf16.msra.mxu0 %v11444_v38  ;;  %v6882_v48 = vsel %vm310_vm2, %v21017_v24, %v6860_v46  ;;  %v21021_v46 = vunpack.i.h.bf16 %v18863_v28  ;;  %v21024_v28 = vunpack.i.h.bf16 %v21023_v14 }
 0x6fc   :  { %11447 = vmatprep.subr.bf16.mxu0 %v11446_v4  ;;  %v11452_v13 = vpack.c.bf16 %v21013_v21, %v6882_v48  ;;  %v6577_v4 = vsel %vm411_vm3, %v21026_v11, %v6570_v59  ;;  %v6970_v48 = vpop.permute.xlu0 %6969 }
 0x6fd   :  { %v6677_v61 = vsel %vm310_vm2, %v6668_v12, %v21021_v46  ;;  %v6678_v38 = vsel %vm310_vm2, %v21024_v28, %v6668_v12  ;;  %v6868_v35 = vpop.permute.xlu1 %6867  ;;  %v6976_v62 = vsel %vm411_vm3, %v6970_v48, %v18968_v32  ;;  %v21032_v28 = vld [vmem:[#allocation20_spill] sm:$0xff] }
 0x6fe   :  { %v11474_v40 = vpack.c.bf16 %v6677_v61, %v6576_v53  ;;  %v11476_v19 = vpack.c.bf16 %v6678_v38, %v6577_v4  ;;  %v6877_v41 = vsel %vm310_vm2, %v6868_v35, %v13269_v18  ;;  %v6878_v24 = vsel %vm310_vm2, %v21028_v63, %v6868_v35  ;;  %v21031_v53 = vld [vmem:[#allocation16_spill] sm:$0xff] }
 0x6ff   :  { %11449 = vmatpush1.bf16.msra.mxu0 %v11448_v58  ;;  %v11480_v58 = vpack.c.bf16 %v6777_v42, %v18328_v5  ;;  %v11482_v0 = vpack.c.bf16 %v18321_v15, %v6877_v41  ;;  %v6977_v18 = vsel %vm411_vm3, %v18843_v54, %v6970_v48  ;;  %v21030_v54 = vld [vmem:[#allocation9_spill] sm:$0xff] }
 0x700   :  { %11451 = vmatprep.subr.bf16.mxu0 %v11450_v33  ;;  %v11484_v33 = vpack.c.bf16 %v18349_v2, %v6878_v24 }
 0x703   :  { %11453 = vmatpush1.bf16.msra.mxu0 %v11452_v13 }
 0x704   :  { %7647 = vmatprep.subr.mxu0 %v6980_v30  ;;  %v21029_v30 = vld [vmem:[#allocation8_spill] sm:$0xff] }
 0x707   :  { %7648 = vmatpush1.msra.mxu0 %v6981_v39 }
 0x708   :  { %10515 = vmatmul.mubr.msk.f32.vlgmr.msra.gmra.mrb[36].mxu0 %vm2479_vm0, %v18534_v1  ;;  %11471 = vmatprep.subr.bf16.mxu0 %v11470_v52 }
 0x709   :  { %11473 = vmatpush1.bf16.msra.mxu0 %v11472_v27  ;;  %7837 = vmatprep.mubr.f32.mxu0 %v20752_v22 }
 0x70a   :  { %11475 = vmatprep.subr.bf16.mxu0 %v11474_v40 }
 0x70d   :  { %11477 = vmatpush1.bf16.msra.mxu0 %v11476_v19 }
 0x70e   :  { %11479 = vmatprep.subr.bf16.mxu0 %v11478_v10  ;;  %v19157_v8 = vpop.permute.xlu1 %7199  ;;  %v21034_v10 = vld [vmem:[#allocation30_spill] sm:$0xff] }
 0x711   :  { %11481 = vmatpush1.bf16.msra.mxu0 %v11480_v58 }
 0x712   :  { %11483 = vmatprep.subr.bf16.mxu0 %v11482_v0 }
 0x715   :  { %11485 = vmatpush1.bf16.msra.mxu0 %v11484_v33 }
 0x716   :  { %7789 = vmatprep.subr.mxu0 %v6976_v62 }
 0x719   :  { %7790 = vmatpush1.msra.mxu0 %v6977_v18  ;;  %v21035_v18 = vld [vmem:[#allocation34_spill] sm:$0xff] }
 0x71a   :  { %10517 = vmatmul.mubr.msk.f32.vlgmr.msra.gmra.mrb[38].mxu0 %vm2479_vm0, %v18534_v1 }
 0x71b   :  { %8831 = vmatprep.mubr.f32.mxu0 %v20752_v22 }
 0x75a   :  { %v7342_v59 = vpop.f32.mrb[30].mxu1 }
 0x75b   :  { %v7344_v13 = vpop.f32.mrb[31].mxu1  ;;  %v7343_v12 = vadd.f32 %v7342_v59, %v19157_v8 }
 0x75c   :  { %v7345_v16 = vadd.f32 %v7344_v13, %v19157_v8  ;;  %v21036_v13 = vld [vmem:[#allocation38_spill] sm:$0xff] }
 0x75d   :  { %v7917_v32 = vmax.f32 %v7343_v12, 0.0 }
 0x75e   :  { %v7918_v55 = vmax.f32 %v7345_v16, 0.0 }
 0x75f   :  { %v19162_v60 = vmul.f32 %v7917_v32, %v21029_v30 }
 0x760   :  { %v19165_v44 = vmul.f32 %v7918_v55, %v21030_v54 }
 0x761   :  { %8499 = vrot.lane.b32.xlu1 %v19162_v60, %s13607_s16 }
 0x762   :  { %v13276_v1 = vpack.i.bf16 %v19165_v44, %v19162_v60  ;;  %v13286_v46 = vpack.i.bf16 %v19165_v44, %v20752_v22 }
 0x764   :  { %13277 = vrot.lane.b32.xlu0 %v13276_v1, %s13607_s16 }
 0x768   :  { %13282 = vrot.lane.b32.xlu0 %v13276_v1, %s13607_s16 }
 0x76c   :  { %13287 = vrot.lane.b32.xlu0 %v13286_v46, %s13605_s29 }
 0x76f   :  { %v7484_v61 = vpop.f32.mrb[32].mxu1 }
 0x770   :  { %v7485_v52 = vadd.f32 %v7484_v61, %v19157_v8  ;;  %8501 = vrot.lane.b32.xlu0 %v19165_v44, %s13607_s16  ;;  %v7486_v26 = vpop.f32.mrb[33].mxu1 }
 0x771   :  { %v7487_v39 = vadd.f32 %v7486_v26, %v19157_v8  ;;  %v21037_v26 = vld [vmem:[#allocation11_spill] sm:$0xff] }
 0x772   :  { %v7921_v36 = vmax.f32 %v7485_v52, 0.0 }
 0x773   :  { %v7922_v27 = vmax.f32 %v7487_v39, 0.0 }
 0x774   :  { %v19181_v14 = vmul.f32 %v7921_v36, %v21031_v53  ;;  %v21038_v36 = vld [vmem:[#allocation10_spill] sm:$0xff] }
 0x775   :  { %v19184_v38 = vmul.f32 %v7922_v27, %v21032_v28 }
 0x776   :  { %8507 = vrot.lane.b32.xlu0 %v19181_v14, %s13607_s16 }
 0x777   :  { %v13296_v40 = vpack.i.bf16 %v19184_v38, %v19181_v14 }
 0x779   :  { %13292 = vrot.lane.b32.xlu1 %v13296_v40, %s13607_s16 }
 0x77a   :  { %13297 = vrot.lane.b32.xlu0 %v13296_v40, %s13605_s29 }
 0x77d   :  { %8509 = vrot.lane.b32.xlu1 %v19184_v38, %s13607_s16 }
 0x786   :  { %v7626_v57 = vpop.f32.mrb[34].mxu1 }
 0x787   :  { %v7627_v9 = vadd.f32 %v7626_v57, %v19157_v8  ;;  %v7628_v11 = vpop.f32.mrb[35].mxu1 }
 0x788   :  { %v7629_v4 = vadd.f32 %v7628_v11, %v19157_v8 }
 0x789   :  { %v7925_v35 = vmax.f32 %v7627_v9, 0.0 }
 0x78a   :  { %v7926_v19 = vmax.f32 %v7629_v4, 0.0 }
 0x78b   :  { %v19197_v42 = vmul.f32 %v7925_v35, %v21033_v37 }
 0x78c   :  { %v19200_v41 = vmul.f32 %v7926_v19, %v21034_v10 }
 0x78d   :  { %8515 = vrot.lane.b32.xlu0 %v19197_v42, %s13607_s16 }
 0x78e   :  { %v13301_v58 = vpack.i.bf16 %v19200_v41, %v19197_v42 }
 0x790   :  { %13302 = vrot.lane.b32.xlu1 %v13301_v58, %s13607_s16 }
 0x791   :  { %13307 = vrot.lane.b32.xlu0 %v13301_v58, %s13605_s29 }
 0x794   :  { %8517 = vrot.lane.b32.xlu1 %v19200_v41, %s13607_s16 }
 0x79b   :  { %v7768_v63 = vpop.f32.mrb[36].mxu1 }
 0x79c   :  { %v7769_v24 = vadd.f32 %v7768_v63, %v19157_v8  ;;  %v7770_v0 = vpop.f32.mrb[37].mxu1 }
 0x79d   :  { %v7771_v48 = vadd.f32 %v7770_v0, %v19157_v8 }
 0x79e   :  { %v7929_v33 = vmax.f32 %v7769_v24, 0.0  ;;  %v21039_v24 = vld [vmem:[#allocation44_spill] sm:$0xff] }
 0x79f   :  { %v7930_v62 = vmax.f32 %v7771_v48, 0.0 }
 0x7a0   :  { %v19213_v59 = vmul.f32 %v7929_v33, %v21035_v18  ;;  %v21040_v33 = vld [vmem:[#allocation47_spill] sm:$0xff] }
 0x7a1   :  { %v19216_v12 = vmul.f32 %v7930_v62, %v21036_v13 }
 0x7a2   :  { %v7271_v16 = vpop.f32.mrb[30].mxu0  ;;  %8523 = vrot.lane.b32.xlu1 %v19213_v59, %s13607_s16 }
 0x7a3   :  { %v7272_v32 = vadd.f32 %v7271_v16, %v19157_v8  ;;  %v7273_v55 = vpop.f32.mrb[31].mxu0  ;;  %v13316_v1 = vpack.i.bf16 %v19216_v12, %v19213_v59 }
 0x7a4   :  { %v7274_v46 = vadd.f32 %v7273_v55, %v19157_v8 }
 0x7a5   :  { %v7915_v61 = vmax.f32 %v7272_v32, 0.0  ;;  %13317 = vrot.lane.b32.xlu0 %v13316_v1, %s13605_s29 }
 0x7a6   :  { %v7916_v52 = vmax.f32 %v7274_v46, 0.0  ;;  %13312 = vrot.lane.b32.xlu1 %v13316_v1, %s13607_s16 }
 0x7a7   :  { %v19227_v39 = vmul.f32 %v7915_v61, %v21037_v26 }
 0x7a8   :  { %v19230_v27 = vmul.f32 %v7916_v52, %v21038_v36 }
 0x7a9   :  { %8525 = vrot.lane.b32.xlu0 %v19216_v12, %s13607_s16  ;;  %v13321_v57 = vpack.i.bf16 %v19227_v39, %v20752_v22 }
 0x7aa   :  { %v13326_v40 = vpack.i.bf16 %v19162_v60, %v19230_v27  ;;  %v13331_v9 = vpack.i.bf16 %v19230_v27, %v19227_v39  ;;  %v13341_v48 = vpack.i.bf16 %v19230_v27, %v20752_v22 }
 0x7ac   :  { %13327 = vrot.lane.b32.xlu1 %v13326_v40, %s13605_s29 }
 0x7ad   :  { %13322 = vrot.lane.b32.xlu0 %v13321_v57, %s13605_s29 }
 0x7b0   :  { %v7910_v11 = vpop.f32.mrb[38].mxu1  ;;  %13332 = vrot.lane.b32.xlu1 %v13331_v9, %s13607_s16 }
 0x7b1   :  { %v7911_v4 = vadd.f32 %v7910_v11, %v19157_v8  ;;  %v7912_v35 = vpop.f32.mrb[39].mxu1  ;;  %13347 = vrot.lane.b32.xlu0 %v13326_v40, %s13605_s29 }
 0x7b2   :  { %v7913_v19 = vadd.f32 %v7912_v35, %v19157_v8 }
 0x7b3   :  { %v7933_v58 = vmax.f32 %v7911_v4, 0.0 }
 0x7b4   :  { %v7934_v63 = vmax.f32 %v7913_v19, 0.0  ;;  %13337 = vrot.lane.b32.xlu1 %v13326_v40, %s13605_s29  ;;  %v21042_v40 = vld [vmem:[#allocation14_spill] sm:$0xff]  ;;  %v21043_v19 = vld [vmem:[#allocation21_spill] sm:$0xff] }
 0x7b5   :  { %v19248_v0 = vmul.f32 %v7933_v58, %v21039_v24 }
 0x7b6   :  { %v19253_v62 = vmul.f32 %v7934_v63, %v21040_v33 }
 0x7b7   :  { %v7413_v16 = vpop.f32.mrb[32].mxu0  ;;  %v13351_v32 = vpack.i.bf16 %v19227_v39, %v19248_v0 }
 0x7b8   :  { %21041 = vst [vmem:[#allocation39_spill] sm:$0xff] %v19253_v62  ;;  %v7414_v55 = vadd.f32 %v7413_v16, %v19157_v8  ;;  %v7415_v1 = vpop.f32.mrb[33].mxu0  ;;  %13342 = vrot.lane.b32.xlu1 %v13341_v48, %s13607_s16  ;;  %v13356_v52 = vpack.i.bf16 %v19253_v62, %v19165_v44 }
 0x7b9   :  { %13352 = vrot.lane.b32.xlu0 %v13351_v32, %s13605_s29  ;;  %v7416_v61 = vadd.f32 %v7415_v1, %v19157_v8 }
 0x7ba   :  { %v7919_v46 = vmax.f32 %v7414_v55, 0.0 }
 0x7bb   :  { %v7920_v4 = vmax.f32 %v7416_v61, 0.0  ;;  %v21044_v61 = vld [vmem:[#allocation24_spill] sm:$0xff] }
 0x7bc   :  { %v19264_v57 = vmul.f32 %v7919_v46, %v21042_v40  ;;  %8497 = vrot.lane.b32.xlu1 %v19230_v27, %s13607_s16 }
 0x7bd   :  { %13357 = vrot.lane.b32.xlu0 %v13356_v52, %s13605_s29  ;;  %v19278_v58 = vmul.f32 %v7920_v4, %v21043_v19 }
 0x7be   :  { %v13361_v9 = vpack.i.bf16 %v19227_v39, %v19264_v57  ;;  %v13371_v11 = vpack.i.bf16 %v19264_v57, %v19181_v14  ;;  %v13366_v35 = vpack.i.bf16 %v19264_v57, %v19165_v44 }
 0x7bf   :  { %v13381_v63 = vpack.i.bf16 %v19278_v58, %v19264_v57  ;;  %v13386_v1 = vpack.i.bf16 %v19181_v14, %v19278_v58 }
 0x7c0   :  { %13362 = vrot.lane.b32.xlu1 %v13361_v9, %s13607_s16  ;;  %v13391_v9 = vpack.i.bf16 %v19278_v58, %v19184_v38 }
 0x7c1   :  { %13372 = vrot.lane.b32.xlu0 %v13371_v11, %s13605_s29 }
 0x7c4   :  { %13367 = vrot.lane.b32.xlu1 %v13366_v35, %s13605_s29  ;;  %v21045_v35 = vld [vmem:[#allocation25_spill] sm:$0xff] }
 0x7c5   :  { %8505 = vrot.lane.b32.xlu0 %v19278_v58, %s13607_s16 }
 0x7c8   :  { %8503 = vrot.lane.b32.xlu1 %v19264_v57, %s13607_s16 }
 0x7c9   :  { %13382 = vrot.lane.b32.xlu0 %v13381_v63, %s13607_s16  ;;  %v7555_v48 = vpop.f32.mrb[34].mxu0 }
 0x7ca   :  { %v7556_v16 = vadd.f32 %v7555_v48, %v19157_v8  ;;  %v7557_v32 = vpop.f32.mrb[35].mxu0 }
 0x7cb   :  { %v7558_v55 = vadd.f32 %v7557_v32, %v19157_v8 }
 0x7cc   :  { %v7923_v46 = vmax.f32 %v7556_v16, 0.0  ;;  %13377 = vrot.lane.b32.xlu1 %v13381_v63, %s13605_s29 }
 0x7cd   :  { %13387 = vrot.lane.b32.xlu0 %v13386_v1, %s13605_s29  ;;  %v7924_v11 = vmax.f32 %v7558_v55, 0.0 }
 0x7ce   :  { %v19295_v52 = vmul.f32 %v7923_v46, %v21044_v61 }
 0x7cf   :  { %v19304_v48 = vmul.f32 %v7924_v11, %v21045_v35 }
 0x7d0   :  { %13392 = vrot.lane.b32.xlu1 %v13391_v9, %s13605_s29  ;;  %v13401_v4 = vpack.i.bf16 %v19295_v52, %v19184_v38  ;;  %v13406_v63 = vpack.i.bf16 %v19184_v38, %v19295_v52  ;;  %v13411_v32 = vpack.i.bf16 %v19295_v52, %v19197_v42 }
 0x7d1   :  { %13397 = vrot.lane.b32.xlu0 %v13386_v1, %s13607_s16  ;;  %v13416_v16 = vpack.i.bf16 %v19304_v48, %v19295_v52 }
 0x7d4   :  { %13402 = vrot.lane.b32.xlu1 %v13401_v4, %s13607_s16  ;;  %v13426_v4 = vpack.i.bf16 %v19197_v42, %v19304_v48 }
 0x7d5   :  { %8511 = vrot.lane.b32.xlu0 %v19295_v52, %s13607_s16 }
 0x7d8   :  { %13407 = vrot.lane.b32.xlu1 %v13406_v63, %s13605_s29  ;;  %v21046_v63 = vld [vmem:[#allocation32_spill] sm:$0xff] }
 0x7d9   :  { %13417 = vrot.lane.b32.xlu0 %v13416_v16, %s13605_s29 }
 0x7db   :  { %v7697_v55 = vpop.f32.mrb[36].mxu0 }
 0x7dc   :  { %v7698_v1 = vadd.f32 %v7697_v55, %v19157_v8  ;;  %v7699_v46 = vpop.f32.mrb[37].mxu0  ;;  %13412 = vrot.lane.b32.xlu1 %v13411_v32, %s13605_s29  ;;  %v13431_v55 = vpack.i.bf16 %v19304_v48, %v19200_v41 }
 0x7dd   :  { %13422 = vrot.lane.b32.xlu0 %v13416_v16, %s13607_s16  ;;  %v7700_v11 = vadd.f32 %v7699_v46, %v19157_v8 }
 0x7de   :  { %v7927_v9 = vmax.f32 %v7698_v1, 0.0  ;;  %v21047_v1 = vld [vmem:[#allocation33_spill] sm:$0xff] }
 0x7df   :  { %v7928_v32 = vmax.f32 %v7700_v11, 0.0 }
 0x7e0   :  { %8513 = vrot.lane.b32.xlu1 %v19304_v48, %s13607_s16  ;;  %v19327_v24 = vmul.f32 %v7927_v9, %v21046_v63 }
 0x7e1   :  { %13427 = vrot.lane.b32.xlu0 %v13426_v4, %s13605_s29  ;;  %v19336_v46 = vmul.f32 %v7928_v32, %v21047_v1 }
 0x7e2   :  { %v13441_v16 = vpack.i.bf16 %v19327_v24, %v19200_v41  ;;  %v13446_v9 = vpack.i.bf16 %v19200_v41, %v19327_v24 }
 0x7e3   :  { %v13456_v11 = vpack.i.bf16 %v19336_v46, %v19327_v24  ;;  %v13466_v5 = vpack.i.bf16 %v19213_v59, %v19336_v46 }
 0x7e4   :  { %13432 = vrot.lane.b32.xlu1 %v13431_v55, %s13605_s29 }
 0x7e5   :  { %13437 = vrot.lane.b32.xlu0 %v13426_v4, %s13607_s16  ;;  %v19346_v4 = vpop.permute.xlu0 %13277 }
 0x7e8   :  { %13442 = vrot.lane.b32.xlu1 %v13441_v16, %s13607_s16  ;;  %v13451_v16 = vpack.i.bf16 %v19327_v24, %v19213_v59 }
 0x7e9   :  { %8519 = vrot.lane.b32.xlu0 %v19327_v24, %s13607_s16  ;;  %v19355_v15 = vpop.permute.xlu0 %13282 }
 0x7ea   :  { %v13284_v26 = vunpack.i.l.bf16 %v19355_v15  ;;  %v13285_v47 = vunpack.i.h.bf16 %v19355_v15 }
 0x7ec   :  { %13447 = vrot.lane.b32.xlu1 %v13446_v9, %s13605_s29 }
 0x7ed   :  { %13457 = vrot.lane.b32.xlu0 %v13456_v11, %s13605_s29  ;;  %v7839_v55 = vpop.f32.mrb[38].mxu0 }
 0x7ee   :  { %v7840_v32 = vadd.f32 %v7839_v55, %v19157_v8  ;;  %v7841_v33 = vpop.f32.mrb[39].mxu0  ;;  %v21048_v55 = vld [vmem:[#allocation43_spill] sm:$0xff] }
 0x7ef   :  { %v7842_v49 = vadd.f32 %v7841_v33, %v19157_v8  ;;  %v13471_v8 = vpack.i.bf16 %v19336_v46, %v19216_v12  ;;  %v21049_v33 = vld [vmem:[#allocation49_spill] sm:$0xff] }
 0x7f0   :  { %13452 = vrot.lane.b32.xlu1 %v13451_v16, %s13605_s29  ;;  %v7931_v2 = vmax.f32 %v7840_v32, 0.0 }
 0x7f1   :  { %13462 = vrot.lane.b32.xlu0 %v13456_v11, %s13607_s16  ;;  %v7932_v9 = vmax.f32 %v7842_v49, 0.0  ;;  %v19371_v49 = vpop.permute.xlu0 %13287 }
 0x7f2   :  { %v19363_v18 = vmul.f32 %v7931_v2, %v21048_v55  ;;  %v19378_v2 = vpop.permute.xlu1 %8499 }
 0x7f3   :  { %v19368_v11 = vmul.f32 %v7932_v9, %v21049_v33 }
 0x7f4   :  { %8521 = vrot.lane.b32.xlu1 %v19336_v46, %s13607_s16  ;;  %v13481_v32 = vpack.i.bf16 %v19363_v18, %v19216_v12  ;;  %v13486_v9 = vpack.i.bf16 %v19216_v12, %v19363_v18 }
 0x7f5   :  { %13467 = vrot.lane.b32.xlu0 %v13466_v5, %s13605_s29  ;;  %21050 = vst [vmem:[#allocation46_spill] sm:$0xff] %v19368_v11  ;;  %v13491_v16 = vpack.i.bf16 %v19368_v11, %v19363_v18  ;;  %v13501_v33 = vpack.i.bf16 %v19368_v11, %v19248_v0  ;;  %v13516_v63 = vpack.i.bf16 %v19248_v0, %v19368_v11 }
 0x7f6   :  { %v19386_v55 = vpop.permute.xlu1 %13292 }
 0x7f8   :  { %13472 = vrot.lane.b32.xlu1 %v13471_v8, %s13605_s29  ;;  %v19384_v8 = vpop.permute.xlu0 %8501 }
 0x7f9   :  { %13477 = vrot.lane.b32.xlu0 %v13466_v5, %s13607_s16 }
 0x7fc   :  { %13482 = vrot.lane.b32.xlu1 %v13481_v32, %s13607_s16  ;;  %v19391_v5 = vpop.permute.xlu0 %8507  ;;  %v19398_v32 = vpop.permute.xlu1 %8509 }
 0x7fd   :  { %13492 = vrot.lane.b32.xlu0 %v13491_v16, %s13605_s29 }
 0x800   :  { %13487 = vrot.lane.b32.xlu1 %v13486_v9, %s13605_s29  ;;  %v19401_v13 = vpop.permute.xlu0 %13297 }
 0x801   :  { %8529 = vrot.lane.b32.xlu0 %v19368_v11, %s13607_s16 }
 0x802   :  { %v19405_v9 = vpop.permute.xlu1 %13302 }
 0x804   :  { %8527 = vrot.lane.b32.xlu1 %v19363_v18, %s13607_s16  ;;  %v19410_v1 = vpop.permute.xlu0 %8515 }
 0x805   :  { %13502 = vrot.lane.b32.xlu0 %v13501_v33, %s13607_s16  ;;  %v13511_v33 = vpack.i.bf16 %v19253_v62, %v19248_v0 }
 0x806   :  { %v19415_v20 = vpop.permute.xlu1 %8517 }
 0x808   :  { %13497 = vrot.lane.b32.xlu1 %v13491_v16, %s13607_s16  ;;  %v19420_v25 = vpop.permute.xlu0 %13307 }
 0x809   :  { %8233 = vrot.lane.b32.xlu0 %v19248_v0, %s13605_s29 }
 0x80c   :  { %13507 = vrot.lane.b32.xlu1 %v13491_v16, %s13605_s29 }
 0x80d   :  { %13517 = vrot.lane.b32.xlu0 %v13516_v63, %s13605_s29  ;;  %v9598_v63 = vld [vmem:[%s20266_s8] sm:$0x7] }
 0x810   :  { %13512 = vrot.lane.b32.xlu1 %v13511_v33, %s13607_s16  ;;  %v10520_v33 = vld [vmem:[%s20264_s6 + $0x8] sm:$0xff] }
 0x811   :  { %8531 = vrot.lane.b32.xlu0 %v19248_v0, %s13607_s16 }
 0x814   :  { %v19422_v21 = vpop.permute.xlu1 %8523  ;;  %8433 = vrot.lane.b32.xlu1 %v19253_v62, %s13605_s29 }
 0x815   :  { %8535 = vrot.lane.b32.xlu0 %v20752_v22, %s13607_s16 }
 0x817   :  { %v19431_v16 = vpop.permute.xlu0 %13317 }
 0x818   :  { %8533 = vrot.lane.b32.xlu1 %v19253_v62, %s13607_s16  ;;  %v19438_v43 = vpop.permute.xlu1 %13312  ;;  %s10318_s16 = sld [smem:[#allocation5]] }
 0x819   :  { %9601 = vperm.xlu0 %12609, %v9598_v63  }
 0x81b   :  { %v19440_v37 = vpop.permute.xlu0 %8525 }
 0x81c   :  { %8761 = vperm.xlu1 %13275, %v10520_v33  }
 0x81e   :  { %v19442_v10 = vpop.permute.xlu1 %13327 }
 0x81f   :  { %v20580_v61 = vunpack.i.h.bf16 %v19442_v10  ;;  %v13329_v35 = vunpack.i.l.bf16 %v19442_v10  ;;  %v13323_v23 = vpop.permute.xlu0 %13322 }
 0x820   :  { %v13325_v50 = vunpack.i.h.bf16 %v13323_v23  ;;  %v13324_v3 = vunpack.i.l.bf16 %v13323_v23 }
 0x821   :  { %v8053_v63 = vsel %vm310_vm2, %v13329_v35, %v20580_v61 }
 0x822   :  { %v8054_v51 = vsel %vm310_vm2, %v13325_v50, %v13329_v35  ;;  %v13333_v53 = vpop.permute.xlu1 %13332  ;;  %v11518_v33 = vpack.c.bf16 %v19162_v60, %v8053_v63  ;;  %v8055_v28 = vsel %vm310_vm2, %v13324_v3, %v13325_v50  ;;  %v13279_v50 = vunpack.i.l.bf16 %v19346_v4 }
 0x823   :  { %v11520_v40 = vpack.c.bf16 %v19230_v27, %v8054_v51  ;;  %v11502_v19 = vpack.c.bf16 %v19227_v39, %v8055_v28  ;;  %v19457_v6 = vpop.permute.xlu0 %13347  ;;  %v13335_v61 = vunpack.i.h.bf16 %v13333_v53  ;;  %v13334_v17 = vunpack.i.l.bf16 %v13333_v53 }
 0x824   :  { %11519 = vmatprep.subr.bf16.mxu1 %v11518_v33  ;;  %v13350_v56 = vunpack.i.h.bf16 %v19457_v6  ;;  %v13349_v62 = vunpack.i.l.bf16 %v19457_v6 }
 0x825   :  { %11503 = vmatprep.subr.bf16.mxu0 %v11502_v19  ;;  %11521 = vmatpush1.bf16.msra.mxu1 %v11520_v40  ;;  %v8154_v30 = vsel %vm411_vm3, %v13334_v17, %v13335_v61 }
 0x826   :  { %v13338_v23 = vpop.permute.xlu1 %13337 }
 0x827   :  { %v13339_v31 = vunpack.i.l.bf16 %v13338_v23  ;;  %v13340_v19 = vunpack.i.h.bf16 %v13338_v23 }
 0x82a   :  { %v19459_v7 = vpop.permute.xlu1 %13342 }
 0x82b   :  { %21051 = vst [vmem:[#allocation35_spill] sm:$0xff] %v19459_v7  ;;  %v19462_v63 = vpop.permute.xlu0 %13352  ;;  %v13345_v40 = vunpack.i.h.bf16 %v19459_v7 }
 0x82c   :  { %v13355_v51 = vunpack.i.h.bf16 %v19462_v63  ;;  %v20586_v28 = vunpack.i.l.bf16 %v19462_v63 }
 0x82d   :  { %v8354_v15 = vsel %vm411_vm3, %v13345_v40, %v13284_v26 }
 0x82e   :  { %v8056_v53 = vsel %vm310_vm2, %v20586_v28, %v13324_v3  ;;  %v19473_v35 = vpop.permute.xlu1 %8497  ;;  %v8255_v54 = vsel %vm310_vm2, %v13355_v51, %v13339_v31  ;;  %v21052_v28 = vunpack.i.h.bf16 %v19346_v4 }
 0x82f   :  { %v11504_v23 = vpack.c.bf16 %v20752_v22, %v8056_v53  ;;  %v19481_v36 = vpop.permute.xlu0 %13357  ;;  %v11506_v33 = vpack.c.bf16 %v8255_v54, %v8154_v30  ;;  %v8254_v53 = vsel %vm310_vm2, %v13339_v31, %v13340_v19  ;;  %v8153_v30 = vsel %vm411_vm3, %v13335_v61, %v13279_v50 }
 0x830   :  { %v20594_v45 = vunpack.i.h.bf16 %v19481_v36  ;;  %v8152_v29 = vsel %vm411_vm3, %v13279_v50, %v21052_v28  ;;  %v21053_v54 = vunpack.i.l.bf16 %v19459_v7  ;;  %v21054_v31 = vunpack.i.l.bf16 %v19481_v36 }
 0x831   :  { %11505 = vmatpush1.bf16.msra.mxu0 %v11504_v23 }
 0x832   :  { %v8155_v3 = vsel %vm411_vm3, %v21053_v54, %v13334_v17  ;;  %v8256_v6 = vsel %vm310_vm2, %v20594_v45, %v13355_v51  ;;  %11507 = vmatprep.subr.bf16.mxu0 %v11506_v33  ;;  %v19506_v28 = vpop.permute.xlu1 %13362  ;;  %v8253_v23 = vsel %vm310_vm2, %v13340_v19, %v21054_v31  ;;  %v8353_v54 = vsel %vm411_vm3, %v13284_v26, %v13285_v47 }
 0x833   :  { %v11508_v11 = vpack.c.bf16 %v8256_v6, %v8155_v3  ;;  %v20596_v61 = vunpack.i.h.bf16 %v19506_v28  ;;  %v13364_v50 = vunpack.i.l.bf16 %v19506_v28  ;;  %v19514_v7 = vpop.permute.xlu0 %13372  ;;  %v11522_v17 = vpack.c.bf16 %v8253_v23, %v8152_v29 }
 0x834   :  { %v11524_v51 = vpack.c.bf16 %v8254_v53, %v8153_v30  ;;  %v11510_v33 = vpack.c.bf16 %v8354_v15, %v19230_v27  ;;  %v8455_v29 = vsel %vm310_vm2, %v13349_v62, %v13350_v56  ;;  %v20595_v26 = vunpack.i.l.bf16 %v19371_v49 }
 0x835   :  { %v8355_v45 = vsel %vm411_vm3, %v20596_v61, %v13345_v40  ;;  %11509 = vmatpush1.bf16.msra.mxu0 %v11508_v11  ;;  %11523 = vmatprep.subr.bf16.mxu1 %v11522_v17  ;;  %v8352_v19 = vsel %vm411_vm3, %v13285_v47, %v13364_v50  ;;  %v11528_v47 = vpack.c.bf16 %v8353_v54, %v19162_v60 }
 0x836   :  { %v11512_v3 = vpack.c.bf16 %v8355_v45, %v19227_v39  ;;  %11511 = vmatprep.subr.bf16.mxu0 %v11510_v33  ;;  %11525 = vmatpush1.bf16.msra.mxu1 %v11524_v51  ;;  %v19531_v53 = vpop.permute.xlu1 %13367  ;;  %v11526_v40 = vpack.c.bf16 %v8352_v19, %v19165_v44  ;;  %v8456_v6 = vsel %vm310_vm2, %v20595_v26, %v13349_v62  ;;  %v20597_v33 = vunpack.i.h.bf16 %v19386_v55 }
 0x837   :  { %v13370_v11 = vunpack.i.h.bf16 %v19531_v53  ;;  %v13369_v15 = vunpack.i.l.bf16 %v19531_v53  ;;  %v19536_v30 = vpop.permute.xlu0 %8505  ;;  %v11514_v45 = vpack.c.bf16 %v19162_v60, %v8455_v29  ;;  %v11516_v62 = vpack.c.bf16 %v19230_v27, %v8456_v6 }
 0x838   :  { %11527 = vmatprep.subr.bf16.mxu1 %v11526_v40  ;;  %v13290_v60 = vunpack.i.h.bf16 %v19371_v49  ;;  %v13294_v19 = vunpack.i.l.bf16 %v19386_v55  ;;  %v21055_v29 = vunpack.i.h.bf16 %v19442_v10  ;;  %v19571_v10 = vld [vmem:[%s20263_s5 + $0x8] sm:$0xff] }
 0x839   :  { %v8454_v39 = vsel %vm310_vm2, %v13350_v56, %v13369_v15  ;;  %11513 = vmatpush1.bf16.msra.mxu0 %v11512_v3  ;;  %v8453_v31 = vsel %vm310_vm2, %v13369_v15, %v13370_v11  ;;  %v8554_v56 = vsel %vm411_vm3, %v19378_v2, %v19384_v8  ;;  %v20599_v15 = vunpack.i.l.bf16 %v19514_v7 }
 0x83a   :  { %v11532_v23 = vpack.c.bf16 %v19165_v44, %v8454_v39  ;;  %11515 = vmatprep.subr.bf16.mxu0 %v11514_v45  ;;  %11529 = vmatpush1.bf16.msra.mxu1 %v11528_v47  ;;  %v8504_v17 = vpop.permute.xlu1 %8503  ;;  %v11530_v54 = vpack.c.bf16 %v19264_v57, %v8453_v31  ;;  %v8052_v3 = vsel %vm310_vm2, %v21055_v29, %v13290_v60 }
 0x83b   :  { %v13383_v51 = vpop.permute.xlu0 %13382  ;;  %v8552_v40 = vsel %vm411_vm3, %v8504_v17, %v19536_v30  ;;  %v8555_v31 = vsel %vm411_vm3, %v19473_v35, %v19378_v2  ;;  %v13375_v2 = vunpack.i.h.bf16 %v19514_v7 }
 0x83c   :  { %11531 = vmatprep.subr.bf16.mxu1 %v11530_v54  ;;  %v13384_v47 = vunpack.i.l.bf16 %v13383_v51  ;;  %v13385_v54 = vunpack.i.h.bf16 %v13383_v51  ;;  %v8148_v51 = vsel %vm411_vm3, %v13294_v19, %v20597_v33 }
 0x83d   :  { %11517 = vmatpush1.bf16.msra.mxu0 %v11516_v62 }
 0x83e   :  { %8783 = vmatprep.subr.mxu0 %v8554_v56  ;;  %11533 = vmatpush1.bf16.msra.mxu1 %v11532_v23  ;;  %v13378_v27 = vpop.permute.xlu1 %13377  ;;  %v8553_v23 = vsel %vm411_vm3, %v19384_v8, %v8504_v17 }
 0x83f   :  { %v13380_v6 = vunpack.i.h.bf16 %v13378_v27  ;;  %v13379_v45 = vunpack.i.l.bf16 %v13378_v27  ;;  %v13388_v39 = vpop.permute.xlu0 %13387  ;;  %8854 = vmatprep.subr.mxu1 %v8552_v40 }
 0x840   :  { %v13389_v62 = vunpack.i.l.bf16 %v13388_v39  ;;  %v13390_v29 = vunpack.i.h.bf16 %v13388_v39 }
 0x841   :  { %v8050_v56 = vsel %vm310_vm2, %v13379_v45, %v13380_v6  ;;  %8784 = vmatpush1.msra.mxu0 %v8555_v31  ;;  %v8051_v27 = vsel %vm310_vm2, %v13290_v60, %v13379_v45  ;;  %v8049_v40 = vsel %vm310_vm2, %v13380_v6, %v20599_v15  ;;  %v11536_v60 = vpack.c.bf16 %v19165_v44, %v8052_v3 }
 0x842   :  { %v11552_v26 = vpack.c.bf16 %v19278_v58, %v8050_v56  ;;  %10521 = vmatmul.mubr.msk.f32.vlgmr.msra.gmra.mrb[40].mxu0 %vm2479_vm0, %v19571_v10  ;;  %8855 = vmatpush1.msra.mxu1 %v8553_v23  ;;  %v19592_v8 = vpop.permute.xlu1 %13392  ;;  %v11534_v17 = vpack.c.bf16 %v19264_v57, %v8051_v27  ;;  %v21056_v6 = vunpack.i.h.bf16 %v19346_v4  ;;  %v11550_v23 = vpack.c.bf16 %v19181_v14, %v8049_v40 }
 0x843   :  { %v20598_v39 = vunpack.i.l.bf16 %v19592_v8  ;;  %v13398_v31 = vpop.permute.xlu0 %13397  ;;  %10522 = vmatmul.mubr.msk.f32.vlgmr.msra.gmra.mrb[40].mxu1 %vm2479_vm0, %v19571_v10  ;;  %8973 = vmatprep.mubr.f32.mxu0 %v20752_v22  ;;  %v8150_v44 = vsel %vm411_vm3, %v13384_v47, %v13385_v54  ;;  %v8251_v4 = vsel %vm310_vm2, %v13375_v2, %v13389_v62  ;;  %v8250_v3 = vsel %vm310_vm2, %v13389_v62, %v13390_v29 }
 0x844   :  { %v8151_v45 = vsel %vm411_vm3, %v21056_v6, %v13384_v47  ;;  %v13400_v56 = vunpack.i.h.bf16 %v13398_v31  ;;  %v13399_v27 = vunpack.i.l.bf16 %v13398_v31  ;;  %11535 = vmatprep.subr.bf16.mxu0 %v11534_v17  ;;  %9044 = vmatprep.mubr.f32.mxu1 %v20752_v22  ;;  %v13395_v6 = vunpack.i.h.bf16 %v19592_v8 }
 0x845   :  { %11551 = vmatprep.subr.bf16.mxu1 %v11550_v23  ;;  %11537 = vmatpush1.bf16.msra.mxu0 %v11536_v60  ;;  %v11538_v40 = vpack.c.bf16 %v8251_v4, %v8150_v44  ;;  %v8249_v17 = vsel %vm310_vm2, %v13390_v29, %v20598_v39  ;;  %v13299_v47 = vunpack.i.l.bf16 %v19401_v13  ;;  %v21057_v31 = vunpack.i.l.bf16 %v19481_v36 }
 0x846   :  { %11553 = vmatpush1.bf16.msra.mxu1 %v11552_v26  ;;  %v19626_v33 = vpop.permute.xlu1 %13402  ;;  %v11554_v62 = vpack.c.bf16 %v8249_v17, %v8148_v51  ;;  %v8350_v60 = vsel %vm411_vm3, %v13399_v27, %v13400_v56  ;;  %v8149_v23 = vsel %vm411_vm3, %v13385_v54, %v13294_v19  ;;  %v8351_v26 = vsel %vm411_vm3, %v13364_v50, %v13399_v27 }
 0x847   :  { %v8252_v61 = vsel %vm310_vm2, %v21057_v31, %v13375_v2  ;;  %11539 = vmatprep.subr.bf16.mxu0 %v11538_v40  ;;  %v8512_v29 = vpop.permute.xlu0 %8511  ;;  %v13405_v4 = vunpack.i.h.bf16 %v19626_v33  ;;  %v13404_v39 = vunpack.i.l.bf16 %v19626_v33  ;;  %v11556_v15 = vpack.c.bf16 %v8250_v3, %v8149_v23 }
 0x848   :  { %v11540_v44 = vpack.c.bf16 %v8252_v61, %v8151_v45  ;;  %11555 = vmatprep.subr.bf16.mxu1 %v11554_v62  ;;  %v11542_v2 = vpack.c.bf16 %v8350_v60, %v19278_v58  ;;  %v13300_v51 = vunpack.i.h.bf16 %v19401_v13  ;;  %v8451_v54 = vsel %vm310_vm2, %v13395_v6, %v13299_v47 }
 0x849   :  { %v8349_v61 = vsel %vm411_vm3, %v13400_v56, %v13404_v39  ;;  %v8348_v19 = vsel %vm411_vm3, %v13404_v39, %v13405_v4  ;;  %v11544_v27 = vpack.c.bf16 %v8351_v26, %v19264_v57  ;;  %v8452_v39 = vsel %vm310_vm2, %v13370_v11, %v13395_v6 }
 0x84a   :  { %11541 = vmatpush1.bf16.msra.mxu0 %v11540_v44  ;;  %v11560_v45 = vpack.c.bf16 %v8349_v61, %v19181_v14  ;;  %11557 = vmatpush1.bf16.msra.mxu1 %v11556_v15  ;;  %v19649_v50 = vpop.permute.xlu1 %13407  ;;  %v11558_v13 = vpack.c.bf16 %v8348_v19, %v19184_v38  ;;  %v11546_v40 = vpack.c.bf16 %v19181_v14, %v8451_v54  ;;  %v21058_v23 = vunpack.i.l.bf16 %v19514_v7 }
 0x84b   :  { %11543 = vmatprep.subr.bf16.mxu0 %v11542_v2  ;;  %v13418_v56 = vpop.permute.xlu0 %13417  ;;  %v13409_v3 = vunpack.i.l.bf16 %v19649_v50  ;;  %v8450_v15 = vsel %vm310_vm2, %v13299_v47, %v13300_v51  ;;  %v13410_v17 = vunpack.i.h.bf16 %v19649_v50  ;;  %v11548_v14 = vpack.c.bf16 %v19278_v58, %v8452_v39 }
 0x84c   :  { %11559 = vmatprep.subr.bf16.mxu1 %v11558_v13  ;;  %v13420_v31 = vunpack.i.h.bf16 %v13418_v56  ;;  %v13419_v62 = vunpack.i.l.bf16 %v13418_v56  ;;  %v11564_v60 = vpack.c.bf16 %v19184_v38, %v8450_v15  ;;  %v8550_v2 = vsel %vm411_vm3, %v19391_v5, %v19398_v32 }
 0x84d   :  { %v8449_v57 = vsel %vm310_vm2, %v13300_v51, %v13409_v3  ;;  %v8048_v44 = vsel %vm310_vm2, %v21058_v23, %v13410_v17  ;;  %v13305_v54 = vunpack.i.h.bf16 %v19405_v9  ;;  %v8551_v39 = vsel %vm411_vm3, %v19536_v30, %v19391_v5 }
 0x84e   :  { %11545 = vmatpush1.bf16.msra.mxu0 %v11544_v27  ;;  %11561 = vmatpush1.bf16.msra.mxu1 %v11560_v45  ;;  %v19666_v53 = vpop.permute.xlu1 %13412  ;;  %v11562_v11 = vpack.c.bf16 %v19295_v52, %v8449_v57  ;;  %v8046_v58 = vsel %vm310_vm2, %v13419_v62, %v13420_v31  ;;  %v8047_v7 = vsel %vm310_vm2, %v13410_v17, %v13419_v62  ;;  %v13304_v45 = vunpack.i.l.bf16 %v19405_v9 }
 0x84f   :  { %11547 = vmatprep.subr.bf16.mxu0 %v11546_v40  ;;  %v13423_v6 = vpop.permute.xlu0 %13422  ;;  %v13414_v47 = vunpack.i.l.bf16 %v19666_v53  ;;  %v13415_v26 = vunpack.i.h.bf16 %v19666_v53  ;;  %v8549_v40 = vsel %vm411_vm3, %v19398_v32, %v8512_v29  ;;  %v11584_v57 = vpack.c.bf16 %v19304_v48, %v8046_v58 }
 0x850   :  { %11563 = vmatprep.subr.bf16.mxu1 %v11562_v11  ;;  %v13425_v51 = vunpack.i.h.bf16 %v13423_v6  ;;  %v13424_v61 = vunpack.i.l.bf16 %v13423_v6  ;;  %v11568_v62 = vpack.c.bf16 %v19184_v38, %v8048_v44  ;;  %v21059_v11 = vunpack.i.l.bf16 %v19592_v8 }
 0x851   :  { %v8045_v56 = vsel %vm310_vm2, %v13420_v31, %v13414_v47  ;;  %v21060_v8 = vunpack.i.h.bf16 %v19386_v55  ;;  %v13309_v55 = vunpack.i.l.bf16 %v19420_v25 }
 0x852   :  { %11549 = vmatpush1.bf16.msra.mxu0 %v11548_v14  ;;  %11565 = vmatpush1.bf16.msra.mxu1 %v11564_v60  ;;  %v19683_v19 = vpop.permute.xlu1 %8513  ;;  %v8248_v31 = vsel %vm310_vm2, %v21059_v11, %v13415_v26  ;;  %v11566_v14 = vpack.c.bf16 %v19295_v52, %v8047_v7  ;;  %v11582_v32 = vpack.c.bf16 %v19197_v42, %v8045_v56  ;;  %v13310_v11 = vunpack.i.h.bf16 %v19420_v25 }
 0x853   :  { %8925 = vmatprep.subr.mxu0 %v8550_v2  ;;  %v13428_v13 = vpop.permute.xlu0 %13427  ;;  %v8548_v27 = vsel %vm411_vm3, %v8512_v29, %v19683_v19  ;;  %v8146_v30 = vsel %vm411_vm3, %v13424_v61, %v13425_v51  ;;  %v8147_v29 = vsel %vm411_vm3, %v21060_v8, %v13424_v61  ;;  %v8145_v61 = vsel %vm411_vm3, %v13425_v51, %v13304_v45 }
 0x854   :  { %v13430_v15 = vunpack.i.h.bf16 %v13428_v13  ;;  %v13429_v17 = vunpack.i.l.bf16 %v13428_v13  ;;  %8996 = vmatprep.subr.mxu1 %v8548_v27  ;;  %v8144_v7 = vsel %vm411_vm3, %v13304_v45, %v13305_v54  ;;  %v11572_v27 = vpack.c.bf16 %v8248_v31, %v8147_v29 }
 0x855   :  { %v8547_v53 = vsel %vm411_vm3, %v19683_v19, %v19410_v1 }
 0x856   :  { %8926 = vmatpush1.msra.mxu0 %v8551_v39  ;;  %8997 = vmatpush1.msra.mxu1 %v8549_v40  ;;  %v19712_v5 = vpop.permute.xlu1 %13432  ;;  %v8247_v38 = vsel %vm310_vm2, %v13415_v26, %v13429_v17  ;;  %v8246_v6 = vsel %vm310_vm2, %v13429_v17, %v13430_v15 }
 0x857   :  { %10523 = vmatmul.mubr.msk.f32.vlgmr.msra.gmra.mrb[42].mxu0 %vm2479_vm0, %v19571_v10  ;;  %v13438_v60 = vpop.permute.xlu0 %13437  ;;  %v13434_v23 = vunpack.i.l.bf16 %v19712_v5  ;;  %10524 = vmatmul.mubr.msk.f32.vlgmr.msra.gmra.mrb[42].mxu1 %vm2479_vm0, %v19571_v10  ;;  %v11570_v44 = vpack.c.bf16 %v8247_v38, %v8146_v30  ;;  %v13435_v26 = vunpack.i.h.bf16 %v19712_v5  ;;  %v11588_v56 = vpack.c.bf16 %v8246_v6, %v8145_v61 }
 0x858   :  { %11567 = vmatprep.subr.bf16.mxu0 %v11566_v14  ;;  %v13440_v2 = vunpack.i.h.bf16 %v13438_v60  ;;  %v13439_v58 = vunpack.i.l.bf16 %v13438_v60  ;;  %11583 = vmatprep.subr.bf16.mxu1 %v11582_v32  ;;  %v8446_v60 = vsel %vm310_vm2, %v13309_v55, %v13310_v11 }
 0x859   :  { %11569 = vmatpush1.bf16.msra.mxu0 %v11568_v62  ;;  %11585 = vmatpush1.bf16.msra.mxu1 %v11584_v57  ;;  %v8245_v13 = vsel %vm310_vm2, %v13430_v15, %v13434_v23  ;;  %v8447_v31 = vsel %vm310_vm2, %v13435_v26, %v13309_v55  ;;  %v8448_v38 = vsel %vm310_vm2, %v13409_v3, %v13435_v26 }
 0x85a   :  { %11571 = vmatprep.subr.bf16.mxu0 %v11570_v44  ;;  %v19740_v39 = vpop.permute.xlu1 %13442  ;;  %v8346_v40 = vsel %vm411_vm3, %v13439_v58, %v13440_v2  ;;  %v11586_v51 = vpack.c.bf16 %v8245_v13, %v8144_v7  ;;  %9115 = vmatprep.mubr.f32.mxu0 %v20752_v22  ;;  %v8347_v45 = vsel %vm411_vm3, %v13405_v4, %v13439_v58 }
 0x85b   :  { %v8520_v17 = vpop.permute.xlu0 %8519  ;;  %v13445_v57 = vunpack.i.h.bf16 %v19740_v39  ;;  %v13444_v15 = vunpack.i.l.bf16 %v19740_v39  ;;  %v11574_v62 = vpack.c.bf16 %v8346_v40, %v19304_v48  ;;  %9186 = vmatprep.mubr.f32.mxu1 %v20752_v22  ;;  %v11576_v14 = vpack.c.bf16 %v8347_v45, %v19295_v52 }
 0x85c   :  { %11587 = vmatprep.subr.bf16.mxu1 %v11586_v51  ;;  %v11578_v6 = vpack.c.bf16 %v19197_v42, %v8447_v31  ;;  %v11580_v3 = vpack.c.bf16 %v19304_v48, %v8448_v38  ;;  %v11596_v26 = vpack.c.bf16 %v19200_v41, %v8446_v60  ;;  %v8546_v7 = vsel %vm411_vm3, %v19410_v1, %v19415_v20 }
 0x85d   :  { %11573 = vmatpush1.bf16.msra.mxu0 %v11572_v27  ;;  %v8345_v33 = vsel %vm411_vm3, %v13440_v2, %v13444_v15  ;;  %11589 = vmatpush1.bf16.msra.mxu1 %v11588_v56  ;;  %v8344_v4 = vsel %vm411_vm3, %v13444_v15, %v13445_v57  ;;  %v13315_v51 = vunpack.i.h.bf16 %v19438_v43  ;;  %v13314_v1 = vunpack.i.l.bf16 %v19438_v43 }
 0x85e   :  { %11575 = vmatprep.subr.bf16.mxu0 %v11574_v62  ;;  %v11592_v32 = vpack.c.bf16 %v8345_v33, %v19197_v42  ;;  %v19764_v25 = vpop.permute.xlu1 %13447  ;;  %v11590_v30 = vpack.c.bf16 %v8344_v4, %v19200_v41 }
 0x85f   :  { %v13458_v8 = vpop.permute.xlu0 %13457  ;;  %v13449_v29 = vunpack.i.l.bf16 %v19764_v25  ;;  %v13450_v44 = vunpack.i.h.bf16 %v19764_v25 }
 0x860   :  { %v13459_v52 = vunpack.i.l.bf16 %v13458_v8  ;;  %11591 = vmatprep.subr.bf16.mxu1 %v11590_v30  ;;  %v13460_v2 = vunpack.i.h.bf16 %v13458_v8 }
 0x861   :  { %11577 = vmatpush1.bf16.msra.mxu0 %v11576_v14  ;;  %11593 = vmatpush1.bf16.msra.mxu1 %v11592_v32  ;;  %v8445_v50 = vsel %vm310_vm2, %v13310_v11, %v13449_v29  ;;  %v8044_v27 = vsel %vm310_vm2, %v13414_v47, %v13450_v44  ;;  %v8545_v47 = vsel %vm411_vm3, %v19415_v20, %v8520_v17 }
 0x862   :  { %11579 = vmatprep.subr.bf16.mxu0 %v11578_v6  ;;  %v19781_v58 = vpop.permute.xlu1 %13452  ;;  %v11594_v42 = vpack.c.bf16 %v19327_v24, %v8445_v50  ;;  %v8043_v13 = vsel %vm310_vm2, %v13450_v44, %v13459_v52  ;;  %v8042_v48 = vsel %vm310_vm2, %v13459_v52, %v13460_v2  ;;  %v11600_v14 = vpack.c.bf16 %v19200_v41, %v8044_v27 }
 0x863   :  { %v13463_v55 = vpop.permute.xlu0 %13462  ;;  %v13454_v61 = vunpack.i.l.bf16 %v19781_v58  ;;  %v13455_v40 = vunpack.i.h.bf16 %v19781_v58  ;;  %v11598_v33 = vpack.c.bf16 %v19327_v24, %v8043_v13  ;;  %v11616_v4 = vpack.c.bf16 %v19336_v46, %v8042_v48 }
 0x864   :  { %11595 = vmatprep.subr.bf16.mxu1 %v11594_v42  ;;  %v13464_v56 = vunpack.i.l.bf16 %v13463_v55  ;;  %v13465_v45 = vunpack.i.h.bf16 %v13463_v55  ;;  %v8140_v42 = vsel %vm411_vm3, %v13314_v1, %v13315_v51 }
 0x865   :  { %11581 = vmatpush1.bf16.msra.mxu0 %v11580_v3  ;;  %11597 = vmatpush1.bf16.msra.mxu1 %v11596_v26  ;;  %v8041_v62 = vsel %vm310_vm2, %v13460_v2, %v13454_v61  ;;  %v8244_v19 = vsel %vm310_vm2, %v13434_v23, %v13455_v40  ;;  %v13319_v23 = vunpack.i.l.bf16 %v19431_v16 }
 0x866   :  { %9067 = vmatprep.subr.mxu0 %v8546_v7  ;;  %v19800_v15 = vpop.permute.xlu1 %8521  ;;  %v8143_v20 = vsel %vm411_vm3, %v13305_v54, %v13464_v56  ;;  %v11614_v41 = vpack.c.bf16 %v19213_v59, %v8041_v62  ;;  %v8142_v54 = vsel %vm411_vm3, %v13464_v56, %v13465_v45  ;;  %v8141_v52 = vsel %vm411_vm3, %v13465_v45, %v13314_v1 }
 0x867   :  { %v13468_v11 = vpop.permute.xlu0 %13467  ;;  %v8544_v31 = vsel %vm411_vm3, %v8520_v17, %v19800_v15  ;;  %v11604_v44 = vpack.c.bf16 %v8244_v19, %v8143_v20  ;;  %v8542_v19 = vsel %vm411_vm3, %v19422_v21, %v19440_v37 }
 0x868   :  { %v13470_v32 = vunpack.i.h.bf16 %v13468_v11  ;;  %v13469_v30 = vunpack.i.l.bf16 %v13468_v11  ;;  %9138 = vmatprep.subr.mxu1 %v8544_v31 }
 0x869   :  { %9068 = vmatpush1.msra.mxu0 %v8547_v53  ;;  %9139 = vmatpush1.msra.mxu1 %v8545_v47 }
 0x86a   :  { %10525 = vmatmul.mubr.msk.f32.vlgmr.msra.gmra.mrb[44].mxu0 %vm2479_vm0, %v19571_v10  ;;  %11599 = vmatprep.subr.bf16.mxu0 %v11598_v33  ;;  %v8242_v17 = vsel %vm310_vm2, %v13469_v30, %v13470_v32  ;;  %v19833_v9 = vpop.permute.xlu1 %13472  ;;  %v8243_v5 = vsel %vm310_vm2, %v13455_v40, %v13469_v30 }
 0x86b   :  { %11601 = vmatpush1.bf16.msra.mxu0 %v11600_v14  ;;  %v13478_v38 = vpop.permute.xlu0 %13477  ;;  %v13475_v8 = vunpack.i.h.bf16 %v19833_v9  ;;  %v13474_v6 = vunpack.i.l.bf16 %v19833_v9  ;;  %10526 = vmatmul.mubr.msk.f32.vlgmr.msra.gmra.mrb[44].mxu1 %vm2479_vm0, %v19571_v10  ;;  %v11602_v60 = vpack.c.bf16 %v8243_v5, %v8142_v54  ;;  %v11620_v3 = vpack.c.bf16 %v8242_v17, %v8141_v52 }
 0x86c   :  { %11615 = vmatprep.subr.bf16.mxu1 %v11614_v41  ;;  %v13480_v2 = vunpack.i.h.bf16 %v13478_v38  ;;  %v13479_v50 = vunpack.i.l.bf16 %v13478_v38  ;;  %9257 = vmatprep.mubr.f32.mxu0 %v20752_v22 }
 0x86d   :  { %11617 = vmatpush1.bf16.msra.mxu1 %v11616_v4  ;;  %11603 = vmatprep.subr.bf16.mxu0 %v11602_v60  ;;  %v8241_v26 = vsel %vm310_vm2, %v13470_v32, %v13474_v6  ;;  %v8443_v27 = vsel %vm310_vm2, %v13475_v8, %v13319_v23  ;;  %v8444_v53 = vsel %vm310_vm2, %v13449_v29, %v13475_v8 }
 0x86e   :  { %9328 = vmatprep.mubr.f32.mxu1 %v20752_v22  ;;  %v8343_v55 = vsel %vm411_vm3, %v13445_v57, %v13479_v50  ;;  %v19860_v7 = vpop.permute.xlu1 %13482  ;;  %v8342_v13 = vsel %vm411_vm3, %v13479_v50, %v13480_v2  ;;  %v11618_v48 = vpack.c.bf16 %v8241_v26, %v8140_v42  ;;  %v13320_v57 = vunpack.i.h.bf16 %v19431_v16  ;;  %v21063_v26 = vld [vmem:[#allocation46_spill] sm:$0xff] }
 0x86f   :  { %11605 = vmatpush1.bf16.msra.mxu0 %v11604_v44  ;;  %v11608_v56 = vpack.c.bf16 %v8343_v55, %v19327_v24  ;;  %v13493_v40 = vpop.permute.xlu0 %13492  ;;  %v13485_v45 = vunpack.i.h.bf16 %v19860_v7  ;;  %v13484_v39 = vunpack.i.l.bf16 %v19860_v7  ;;  %v11606_v62 = vpack.c.bf16 %v8342_v13, %v19336_v46  ;;  %v21064_v13 = vld [vmem:[#allocation35_spill] sm:$0xff] }
 0x870   :  { %11619 = vmatprep.subr.bf16.mxu1 %v11618_v48  ;;  %v11610_v24 = vpack.c.bf16 %v19213_v59, %v8443_v27  ;;  %v8442_v14 = vsel %vm310_vm2, %v13319_v23, %v13320_v57  ;;  %v11612_v32 = vpack.c.bf16 %v19336_v46, %v8444_v53  ;;  %v13495_v30 = vunpack.i.h.bf16 %v13493_v40 }
 0x871   :  { %v8341_v47 = vsel %vm411_vm3, %v13480_v2, %v13484_v39  ;;  %11607 = vmatprep.subr.bf16.mxu0 %v11606_v62  ;;  %11621 = vmatpush1.bf16.msra.mxu1 %v11620_v3  ;;  %v8340_v11 = vsel %vm411_vm3, %v13484_v39, %v13485_v45  ;;  %v13494_v1 = vunpack.i.l.bf16 %v13493_v40  ;;  %v11628_v17 = vpack.c.bf16 %v19216_v12, %v8442_v14 }
 0x872   :  { %v11624_v16 = vpack.c.bf16 %v8341_v47, %v19213_v59  ;;  %v19883_v25 = vpop.permute.xlu1 %13487  ;;  %v11622_v29 = vpack.c.bf16 %v8340_v11, %v19216_v12  ;;  %v21061_v23 = vunpack.i.l.bf16 %v19462_v63  ;;  %v8543_v8 = vsel %vm411_vm3, %v19800_v15, %v19422_v21 }
 0x873   :  { %11609 = vmatpush1.bf16.msra.mxu0 %v11608_v56  ;;  %v19886_v31 = vpop.permute.xlu0 %8529  ;;  %v13490_v33 = vunpack.i.h.bf16 %v19883_v25  ;;  %v13489_v4 = vunpack.i.l.bf16 %v19883_v25  ;;  %v8038_v52 = vsel %vm310_vm2, %v13494_v1, %v13495_v30  ;;  %v21062_v50 = vunpack.i.h.bf16 %v19481_v36 }
 0x874   :  { %11611 = vmatprep.subr.bf16.mxu0 %v11610_v24  ;;  %11623 = vmatprep.subr.bf16.mxu1 %v11622_v29  ;;  %v8037_v38 = vsel %vm310_vm2, %v13495_v30, %v21061_v23  ;;  %v11648_v55 = vpack.c.bf16 %v21063_v26, %v8038_v52  ;;  %v21065_v48 = vunpack.i.l.bf16 %v21064_v13  ;;  %v21071_v13 = vld [vmem:[#allocation57_spill] sm:$0xff] }
 0x875   :  { %11625 = vmatpush1.bf16.msra.mxu1 %v11624_v16  ;;  %v8441_v59 = vsel %vm310_vm2, %v13320_v57, %v13489_v4  ;;  %v8039_v46 = vsel %vm310_vm2, %v13490_v33, %v13494_v1  ;;  %v8040_v54 = vsel %vm310_vm2, %v13454_v61, %v13490_v33  ;;  %v11646_v21 = vpack.c.bf16 %v19248_v0, %v8037_v38 }
 0x876   :  { %v8528_v20 = vpop.permute.xlu1 %8527  ;;  %v11626_v41 = vpack.c.bf16 %v19363_v18, %v8441_v59  ;;  %v11630_v61 = vpack.c.bf16 %v19363_v18, %v8039_v46  ;;  %v11632_v63 = vpack.c.bf16 %v19216_v12, %v8040_v54  ;;  %v21067_v54 = vld [vmem:[#allocation39_spill] sm:$0xff]  ;;  %v21068_v38 = vunpack.i.l.bf16 %v19371_v49 }
 0x877   :  { %11613 = vmatpush1.bf16.msra.mxu0 %v11612_v32  ;;  %v13503_v5 = vpop.permute.xlu0 %13502  ;;  %v8540_v58 = vsel %vm411_vm3, %v8528_v20, %v19886_v31  ;;  %v8541_v15 = vsel %vm411_vm3, %v19440_v37, %v8528_v20 }
 0x878   :  { %9209 = vmatprep.subr.mxu0 %v8542_v19  ;;  %11627 = vmatprep.subr.bf16.mxu1 %v11626_v41  ;;  %v13504_v60 = vunpack.i.l.bf16 %v13503_v5  ;;  %v13505_v36 = vunpack.i.h.bf16 %v13503_v5  ;;  %v21066_v19 = vunpack.i.h.bf16 %v19506_v28 }
 0x879   :  { %11629 = vmatpush1.bf16.msra.mxu1 %v11628_v17 }
 0x87a   :  { %v13498_v44 = vpop.permute.xlu1 %13497  ;;  %9280 = vmatprep.subr.mxu1 %v8540_v58  ;;  %v8156_v27 = vsel %vm411_vm3, %v13504_v60, %v21065_v48  ;;  %v8339_v59 = vsel %vm411_vm3, %v13485_v45, %v13505_v36 }
 0x87b   :  { %9210 = vmatpush1.msra.mxu0 %v8543_v8  ;;  %v8234_v2 = vpop.permute.xlu0 %8233  ;;  %v13500_v12 = vunpack.i.h.bf16 %v13498_v44  ;;  %v13499_v42 = vunpack.i.l.bf16 %v13498_v44  ;;  %v11640_v23 = vpack.c.bf16 %v8339_v59, %v19363_v18 }
 0x87c   :  { %10527 = vmatmul.mubr.msk.f32.vlgmr.msra.gmra.mrb[46].mxu0 %vm2479_vm0, %v19571_v10  ;;  %11631 = vmatprep.subr.bf16.mxu0 %v11630_v61  ;;  %v8237_v3 = vsel %vm310_vm2, %v8234_v2, %v21062_v50 }
 0x87d   :  { %11633 = vmatpush1.bf16.msra.mxu0 %v11632_v63  ;;  %9399 = vmatprep.mubr.f32.mxu0 %v20752_v22  ;;  %v11650_v56 = vpack.c.bf16 %v8237_v3, %v8156_v27  ;;  %v8137_v57 = vsel %vm411_vm3, %v13500_v12, %v13504_v60  ;;  %v8139_v53 = vsel %vm411_vm3, %v13315_v51, %v13499_v42 }
 0x87e   :  { %9281 = vmatpush1.msra.mxu1 %v8541_v15  ;;  %v13508_v37 = vpop.permute.xlu1 %13507  ;;  %v8138_v24 = vsel %vm411_vm3, %v13499_v42, %v13500_v12  ;;  %v21069_v12 = vld [vmem:[#allocation58_spill] sm:$0xff] }
 0x87f   :  { %10528 = vmatmul.mubr.msk.f32.vlgmr.msra.gmra.mrb[46].mxu1 %vm2479_vm0, %v19571_v10  ;;  %11647 = vmatprep.subr.bf16.mxu1 %v11646_v21  ;;  %v13518_v40 = vpop.permute.xlu0 %13517  ;;  %v13510_v39 = vunpack.i.h.bf16 %v13508_v37  ;;  %v13509_v62 = vunpack.i.l.bf16 %v13508_v37 }
 0x880   :  { %11649 = vmatpush1.bf16.msra.mxu1 %v11648_v55  ;;  %9470 = vmatprep.mubr.f32.mxu1 %v20752_v22  ;;  %v13520_v47 = vunpack.i.h.bf16 %v13518_v40  ;;  %v13519_v11 = vunpack.i.l.bf16 %v13518_v40 }
 0x881   :  { %11651 = vmatprep.subr.bf16.mxu1 %v11650_v56  ;;  %v8238_v16 = vsel %vm310_vm2, %v13510_v39, %v8234_v2  ;;  %v8240_v29 = vsel %vm310_vm2, %v13474_v6, %v13509_v62  ;;  %v8239_v43 = vsel %vm310_vm2, %v13509_v62, %v13510_v39  ;;  %v21072_v56 = vld [vmem:[#allocation42_spill] sm:$0xff] }
 0x882   :  { %v11636_v33 = vpack.c.bf16 %v8240_v29, %v8139_v53  ;;  %v11652_v14 = vpack.c.bf16 %v8238_v16, %v8137_v57  ;;  %v13513_v51 = vpop.permute.xlu1 %13512  ;;  %v11634_v32 = vpack.c.bf16 %v8239_v43, %v8138_v24  ;;  %v8439_v7 = vsel %vm310_vm2, %v13519_v11, %v13520_v47  ;;  %v21073_v62 = vld [vmem:[#allocation10_spill] sm:$0xff]  ;;  %v21074_v53 = vld [vmem:[#allocation11_spill] sm:$0xff]  ;;  %v21075_v24 = vld [vmem:[#allocation9_spill] sm:$0xff] }
 0x883   :  { %v13515_v30 = vunpack.i.h.bf16 %v13513_v51  ;;  %v13514_v1 = vunpack.i.l.bf16 %v13513_v51  ;;  %v8532_v20 = vpop.permute.xlu0 %8531  ;;  %v8440_v28 = vsel %vm310_vm2, %v13489_v4, %v13519_v11  ;;  %v11642_v61 = vpack.c.bf16 %v19248_v0, %v8439_v7  ;;  %v20023_v16 = vld [vmem:[%s20265_s7] sm:$0x7]  ;;  %s10541_s7 = sld [smem:[#allocation5 + $0x1]] }
 0x884   :  { %11635 = vmatprep.subr.bf16.mxu0 %v11634_v32  ;;  %11653 = vmatpush1.bf16.msra.mxu1 %v11652_v14  ;;  %v11644_v49 = vpack.c.bf16 %v21063_v26, %v8440_v28  ;;  %v21076_v29 = vld [vmem:[#allocation8_spill] sm:$0xff] }
 0x885   :  { %v8337_v9 = vsel %vm411_vm3, %v13514_v1, %v13515_v30  ;;  %11637 = vmatpush1.bf16.msra.mxu0 %v11636_v33  ;;  %v8338_v6 = vsel %vm411_vm3, %v13505_v36, %v13514_v1  ;;  %v8356_v41 = vsel %vm411_vm3, %v13515_v30, %v21066_v19  ;;  %v21078_v19 = vld [vmem:[#allocation60_spill] sm:$0xff] }
 0x886   :  { %v11656_v45 = vpack.c.bf16 %v8337_v9, %v19248_v0  ;;  %v8434_v46 = vpop.permute.xlu1 %8433  ;;  %v11638_v17 = vpack.c.bf16 %v8338_v6, %v21063_v26  ;;  %v11654_v5 = vpack.c.bf16 %v8356_v41, %v21067_v54  ;;  %v8539_v0 = vsel %vm411_vm3, %v19886_v31, %v8532_v20  ;;  %v21070_v26 = vld [vmem:[#allocation41_spill] sm:$0xff]  ;;  %v21079_v7 = vld [vmem:[#allocation52_spill] sm:$0xff] }
 0x887   :  { %v8437_v8 = vsel %vm310_vm2, %v8434_v46, %v21068_v38  ;;  %v8438_v60 = vsel %vm310_vm2, %v13520_v47, %v8434_v46  ;;  %v8536_v18 = vpop.permute.xlu0 %8535  ;;  %v21081_v38 = vld [vmem:[#allocation21_spill] sm:$0xff] }
 0x888   :  { %v11658_v58 = vpack.c.bf16 %v20752_v22, %v8437_v8  ;;  %11639 = vmatprep.subr.bf16.mxu0 %v11638_v17  ;;  %11655 = vmatprep.subr.bf16.mxu1 %v11654_v5  ;;  %v11660_v4 = vpack.c.bf16 %v21067_v54, %v8438_v60  ;;  %v8556_v63 = vsel %vm411_vm3, %v8536_v18, %v19473_v35  ;;  %v21080_v17 = vld [vmem:[#allocation54_spill] sm:$0xff] }
 0x889   :  { %11641 = vmatpush1.bf16.msra.mxu0 %v11640_v23  ;;  %11657 = vmatpush1.bf16.msra.mxu1 %v11656_v45  ;;  %v21082_v60 = vld [vmem:[#allocation14_spill] sm:$0xff] }
 0x88a   :  { %v8534_v25 = vpop.permute.xlu1 %8533  ;;  %11643 = vmatprep.subr.bf16.mxu0 %v11642_v61  ;;  %11659 = vmatprep.subr.bf16.mxu1 %v11658_v58  ;;  %v21083_v61 = vld [vmem:[#allocation20_spill] sm:$0xff] }
 0x88b   :  { %v8538_v52 = vsel %vm411_vm3, %v8532_v20, %v8534_v25  ;;  %v8537_v44 = vsel %vm411_vm3, %v8534_v25, %v8536_v18  ;;  %v21077_v20 = vld [vmem:[#allocation59_spill] sm:$0xff]  ;;  %v21084_v25 = vld [vmem:[#allocation16_spill] sm:$0xff] }
 0x88d   :  { %11645 = vmatpush1.bf16.msra.mxu0 %v11644_v49  ;;  %11661 = vmatpush1.bf16.msra.mxu1 %v11660_v4 }
 0x88e   :  { %9351 = vmatprep.subr.mxu0 %v8538_v52  ;;  %9422 = vmatprep.subr.mxu1 %v8556_v63 }
 0x891   :  { %9352 = vmatpush1.msra.mxu0 %v8539_v0  ;;  %9423 = vmatpush1.msra.mxu1 %v8537_v44 }
 0x892   :  { %10529 = vmatmul.mubr.msk.f32.vlgmr.msra.gmra.mrb[48].mxu0 %vm2479_vm0, %v19571_v10  ;;  %10530 = vmatmul.mubr.msk.f32.vlgmr.msra.gmra.mrb[48].mxu1 %vm2479_vm0, %v19571_v10 }
 0x893   :  { %9672 = vmatprep.mubr.f32.mxu0 %v20752_v22  ;;  %9743 = vmatprep.mubr.f32.mxu1 %v20752_v22 }
 0x89b   :  { %v20007_v35 = vpop.permute.xlu1 %8761 }
 0x915   :  { %v8833_v2 = vpop.f32.mrb[40].mxu0 }
 0x916   :  { %v8834_v31 = vadd.f32 %v8833_v2, %v20007_v35  ;;  %v8835_v21 = vpop.f32.mrb[41].mxu0  ;;  %v8904_v34 = vpop.f32.mrb[40].mxu1  ;;  %v21085_v2 = vld [vmem:[#allocation56_spill] sm:$0xff] }
 0x917   :  { %v8836_v15 = vadd.f32 %v8835_v21, %v20007_v35  ;;  %v8905_v50 = vadd.f32 %v8904_v34, %v20007_v35  ;;  %v8906_v3 = vpop.f32.mrb[41].mxu1 }
 0x918   :  { %v9497_v42 = vadd.f32 %v8834_v31, %v21069_v12  ;;  %v8907_v10 = vadd.f32 %v8906_v3, %v20007_v35 }
 0x919   :  { %v9498_v55 = vadd.f32 %v8836_v15, %v21070_v26  ;;  %v9499_v48 = vadd.f32 %v8905_v50, %v21071_v13  ;;  %v21086_v15 = vld [vmem:[#allocation55_spill] sm:$0xff] }
 0x91a   :  { %v9517_v27 = vmax.f32 %v9497_v42, 0.0  ;;  %v9500_v37 = vadd.f32 %v8907_v10, %v21072_v56  ;;  %v21087_v42 = vld [vmem:[#allocation51_spill] sm:$0xff]  ;;  %v21089_v56 = vld [vmem:[#allocation25_spill] sm:$0xff] }
 0x91b   :  { %v9518_v36 = vmax.f32 %v9498_v55, 0.0  ;;  %v9519_v40 = vmax.f32 %v9499_v48, 0.0  ;;  %v21088_v55 = vld [vmem:[#allocation40_spill] sm:$0xff] }
 0x91c   :  { %v9520_v39 = vmax.f32 %v9500_v37, 0.0  ;;  %v9537_v47 = vmul.f32 %v9517_v27, %v21074_v53 }
 0x91d   :  { %v9538_v57 = vmul.f32 %v9518_v36, %v21073_v62  ;;  %v9539_v43 = vmul.f32 %v9519_v40, %v21076_v29  ;;  %v21090_v36 = vld [vmem:[#allocation24_spill] sm:$0xff] }
 0x91e   :  { %v9540_v11 = vmul.f32 %v9520_v39, %v21075_v24  ;;  %v21091_v39 = vld [vmem:[#allocation30_spill] sm:$0xff] }
 0x91f   :  { %9608 = vmatprep.subr.mxu0 %v9538_v57  ;;  %v21092_v57 = vld [vmem:[#allocation27_spill] sm:$0xff] }
 0x920   :  { %9609 = vmatpush1.msra.mxu0 %v9537_v47  ;;  %9679 = vmatprep.subr.mxu1 %v9540_v11 }
 0x921   :  { %10531 = vmatmul.mubr.msk.f32.vlgmr.msra.gmra.mrb[50].mxu0 %vm9604_vm5, %v20023_v16  ;;  %9680 = vmatpush1.msra.mxu1 %v9539_v43  ;;  %v21093_v43 = vld [vmem:[#allocation53_spill] sm:$0xff] }
 0x922   :  { %10532 = vmatmul.mubr.msk.f32.vlgmr.msra.gmra.mrb[50].mxu1 %vm9604_vm5, %v20023_v16  ;;  %9814 = vmatprep.mubr.f32.mxu0 %v20752_v22 }
 0x923   :  { %9885 = vmatprep.mubr.f32.mxu1 %v20752_v22 }
 0x92a   :  { %v8975_v33 = vpop.f32.mrb[42].mxu0  ;;  %v9046_v51 = vpop.f32.mrb[42].mxu1 }
 0x92b   :  { %v8976_v14 = vadd.f32 %v8975_v33, %v20007_v35  ;;  %v8977_v32 = vpop.f32.mrb[43].mxu0  ;;  %v9047_v30 = vadd.f32 %v9046_v51, %v20007_v35  ;;  %v9048_v59 = vpop.f32.mrb[43].mxu1  ;;  %v21094_v51 = vld [vmem:[#allocation13_spill] sm:$0xff] }
 0x92c   :  { %v8978_v1 = vadd.f32 %v8977_v32, %v20007_v35  ;;  %v9049_v6 = vadd.f32 %v9048_v59, %v20007_v35 }
 0x92d   :  { %v9501_v9 = vadd.f32 %v8976_v14, %v21077_v20  ;;  %v9503_v41 = vadd.f32 %v9047_v30, %v21078_v19 }
 0x92e   :  { %v9502_v45 = vadd.f32 %v8978_v1, %v21079_v7  ;;  %v9504_v54 = vadd.f32 %v9049_v6, %v21080_v17  ;;  %v21095_v6 = vld [vmem:[#allocation15_spill] sm:$0xff] }
 0x92f   :  { %v9521_v46 = vmax.f32 %v9501_v9, 0.0  ;;  %v9523_v5 = vmax.f32 %v9503_v41, 0.0  ;;  %v21096_v41 = vld [vmem:[#allocation19_spill] sm:$0xff] }
 0x930   :  { %v9522_v23 = vmax.f32 %v9502_v45, 0.0  ;;  %v9524_v28 = vmax.f32 %v9504_v54, 0.0  ;;  %v21098_v54 = vld [vmem:[#allocation32_spill] sm:$0xff] }
 0x931   :  { %v9541_v58 = vmul.f32 %v9521_v46, %v21082_v60  ;;  %v9543_v49 = vmul.f32 %v9523_v5, %v21084_v25  ;;  %v21097_v46 = vld [vmem:[#allocation33_spill] sm:$0xff] }
 0x932   :  { %v9542_v8 = vmul.f32 %v9522_v23, %v21081_v38  ;;  %v9544_v18 = vmul.f32 %v9524_v28, %v21083_v61  ;;  %v21099_v28 = vld [vmem:[#allocation38_spill] sm:$0xff] }
 0x934   :  { %9750 = vmatprep.subr.mxu0 %v9542_v8  ;;  %9821 = vmatprep.subr.mxu1 %v9544_v18  ;;  %v21100_v8 = vld [vmem:[#allocation34_spill] sm:$0xff] }
 0x935   :  { %9751 = vmatpush1.msra.mxu0 %v9541_v58  ;;  %9822 = vmatpush1.msra.mxu1 %v9543_v49 }
 0x936   :  { %10533 = vmatmul.mubr.msk.f32.vlgmr.msra.gmra.mrb[52].mxu0 %vm9604_vm5, %v20023_v16  ;;  %10534 = vmatmul.mubr.msk.f32.vlgmr.msra.gmra.mrb[52].mxu1 %vm9604_vm5, %v20023_v16 }
 0x937   :  { %9956 = vmatprep.mubr.f32.mxu0 %v20752_v22  ;;  %10027 = vmatprep.mubr.f32.mxu1 %v20752_v22 }
 0x93d   :  { %v9117_v4 = vpop.f32.mrb[44].mxu0 }
 0x93e   :  { %v9118_v52 = vadd.f32 %v9117_v4, %v20007_v35  ;;  %v9119_v63 = vpop.f32.mrb[45].mxu0  ;;  %v9188_v44 = vpop.f32.mrb[44].mxu1 }
 0x93f   :  { %v9120_v0 = vadd.f32 %v9119_v63, %v20007_v35  ;;  %v9189_v21 = vadd.f32 %v9188_v44, %v20007_v35  ;;  %v9190_v34 = vpop.f32.mrb[45].mxu1 }
 0x940   :  { %v9505_v31 = vadd.f32 %v9118_v52, %v21085_v2  ;;  %v9191_v3 = vadd.f32 %v9190_v34, %v20007_v35  ;;  %v21102_v2 = vld [vmem:[#allocation12_spill] sm:$0xff] }
 0x941   :  { %v9506_v50 = vadd.f32 %v9120_v0, %v21086_v15  ;;  %v9507_v10 = vadd.f32 %v9189_v21, %v21087_v42  ;;  %v21101_v0 = vld [vmem:[#allocation17_spill] sm:$0xff]  ;;  %v21103_v21 = vld [vmem:[#allocation22_spill] sm:$0xff] }
 0x942   :  { %v9525_v12 = vmax.f32 %v9505_v31, 0.0  ;;  %v9508_v13 = vadd.f32 %v9191_v3, %v21088_v55  ;;  %v21104_v15 = vld [vmem:[#allocation18_spill] sm:$0xff]  ;;  %v21106_v55 = vld [vmem:[#allocation47_spill] sm:$0xff] }
 0x943   :  { %v9526_v26 = vmax.f32 %v9506_v50, 0.0  ;;  %v9527_v48 = vmax.f32 %v9507_v10, 0.0  ;;  %v21105_v10 = vld [vmem:[#allocation49_spill] sm:$0xff] }
 0x944   :  { %v9528_v27 = vmax.f32 %v9508_v13, 0.0  ;;  %v9545_v40 = vmul.f32 %v9525_v12, %v21090_v36  ;;  %v20105_v36 = vstv %s10541_s7 }
 0x945   :  { %v9546_v37 = vmul.f32 %v9526_v26, %v21089_v56  ;;  %v9547_v53 = vmul.f32 %v9527_v48, %v21092_v57  ;;  %v21107_v48 = vld [vmem:[#allocation43_spill] sm:$0xff]  ;;  %v21108_v56 = vld [vmem:[#allocation44_spill] sm:$0xff] }
 0x946   :  { %v9548_v62 = vmul.f32 %v9528_v27, %v21091_v39  ;;  %v10343_v39 = vld [vmem:[%s20258_s0 + $0x20] sm:$0x7] }
 0x947   :  { %9892 = vmatprep.subr.mxu0 %v9546_v37  ;;  %v10341_v37 = vld [vmem:[%s20258_s0 + $0x10] sm:$0x7] }
 0x948   :  { %9893 = vmatpush1.msra.mxu0 %v9545_v40  ;;  %9963 = vmatprep.subr.mxu1 %v9548_v62  ;;  %v10342_v40 = vld [vmem:[%s20258_s0 + $0x18] sm:$0x7]  ;;  %v20113_v62 = vpop.permute.xlu0 %9601 }
 0x949   :  { %10535 = vmatmul.mubr.msk.f32.vlgmr.msra.gmra.mrb[54].mxu0 %vm9604_vm5, %v20023_v16  ;;  %9964 = vmatpush1.msra.mxu1 %v9547_v53  ;;  %v10344_v53 = vld [vmem:[%s20258_s0 + $0x28] sm:$0x7] }
 0x94a   :  { %10098 = vmatprep.mubr.f32.mxu0 %v20752_v22  ;;  %10536 = vmatmul.mubr.msk.f32.vlgmr.msra.gmra.mrb[54].mxu1 %vm9604_vm5, %v20023_v16 }
 0x94b   :  { %10169 = vmatprep.mubr.f32.mxu1 %v20752_v22 }
 0x94f   :  { %v9259_v47 = vpop.f32.mrb[46].mxu0 }
 0x950   :  { %v9260_v24 = vadd.f32 %v9259_v47, %v20007_v35  ;;  %v9261_v11 = vpop.f32.mrb[47].mxu0 }
 0x951   :  { %v9262_v29 = vadd.f32 %v9261_v11, %v20007_v35 }
 0x952   :  { %v9509_v33 = vadd.f32 %v9260_v24, %v21093_v43  ;;  %v9330_v14 = vpop.f32.mrb[46].mxu1  ;;  %v10362_v24 = vmul.f32 %v20105_v36, %v10341_v37 }
 0x953   :  { %v9510_v32 = vadd.f32 %v9262_v29, %v21094_v51  ;;  %v9331_v30 = vadd.f32 %v9330_v14, %v20007_v35  ;;  %v9332_v1 = vpop.f32.mrb[47].mxu1  ;;  %v10364_v51 = vmul.f32 %v20105_v36, %v10343_v39 }
 0x954   :  { %v9529_v59 = vmax.f32 %v9509_v33, 0.0  ;;  %v9333_v20 = vadd.f32 %v9332_v1, %v20007_v35  ;;  %v10363_v33 = vmul.f32 %v20105_v36, %v10342_v40 }
 0x955   :  { %v9530_v9 = vmax.f32 %v9510_v32, 0.0  ;;  %v9511_v19 = vadd.f32 %v9331_v30, %v21095_v6 }
 0x956   :  { %v9512_v7 = vadd.f32 %v9333_v20, %v21096_v41  ;;  %v9549_v5 = vmul.f32 %v9529_v59, %v21098_v54  ;;  %v10365_v59 = vmul.f32 %v20105_v36, %v10344_v53  ;;  %v10345_v54 = vld [vmem:[%s20258_s0 + $0x30] sm:$0x7] }
 0x957   :  { %v9531_v45 = vmax.f32 %v9511_v19, 0.0  ;;  %v9550_v17 = vmul.f32 %v9530_v9, %v21097_v46 }
 0x958   :  { %v9532_v23 = vmax.f32 %v9512_v7, 0.0 }
 0x959   :  { %10034 = vmatprep.subr.mxu0 %v9550_v17  ;;  %v9551_v60 = vmul.f32 %v9531_v45, %v21100_v8 }
 0x95a   :  { %10035 = vmatpush1.msra.mxu0 %v9549_v5  ;;  %v9552_v38 = vmul.f32 %v9532_v23, %v21099_v28  ;;  %v10347_v28 = vld [vmem:[%s20258_s0 + $0x40] sm:$0x7] }
 0x95b   :  { %10537 = vmatmul.mubr.msk.f32.vlgmr.msra.gmra.mrb[56].mxu0 %vm9604_vm5, %v20023_v16 }
 0x95c   :  { %10105 = vmatprep.subr.mxu1 %v9552_v38  ;;  %10240 = vmatprep.mubr.f32.mxu0 %v20752_v22  ;;  %v10346_v38 = vld [vmem:[%s20258_s0 + $0x38] sm:$0x7] }
 0x95d   :  { %10106 = vmatpush1.msra.mxu1 %v9551_v60 }
 0x95e   :  { %10538 = vmatmul.mubr.msk.f32.vlgmr.msra.gmra.mrb[56].mxu1 %vm9604_vm5, %v20023_v16 }
 0x95f   :  { %10311 = vmatprep.mubr.f32.mxu1 %v20752_v22 }
 0x965   :  { %v9401_v58 = vpop.f32.mrb[48].mxu0  ;;  %v9472_v61 = vpop.f32.mrb[48].mxu1 }
 0x966   :  { %v9402_v18 = vadd.f32 %v9401_v58, %v20007_v35  ;;  %v9473_v25 = vadd.f32 %v9472_v61, %v20007_v35  ;;  %v9403_v49 = vpop.f32.mrb[49].mxu0  ;;  %v9474_v4 = vpop.f32.mrb[49].mxu1  ;;  %v10348_v58 = vld [vmem:[%s20258_s0 + $0x48] sm:$0x7] }
 0x967   :  { %v9404_v52 = vadd.f32 %v9403_v49, %v20007_v35  ;;  %v9475_v63 = vadd.f32 %v9474_v4, %v20007_v35 }
 0x968   :  { %v9513_v44 = vadd.f32 %v9402_v18, %v21101_v0  ;;  %v9515_v31 = vadd.f32 %v9473_v25, %v21102_v2  ;;  %v10366_v25 = vmul.f32 %v20105_v36, %v10345_v54 }
 0x969   :  { %v9514_v34 = vadd.f32 %v9404_v52, %v21103_v21  ;;  %v9516_v22 = vadd.f32 %v9475_v63, %v21104_v15  ;;  %v10368_v63 = vmul.f32 %v20105_v36, %v10347_v28 }
 0x96a   :  { %v9533_v50 = vmax.f32 %v9513_v44, 0.0  ;;  %v9535_v3 = vmax.f32 %v9515_v31, 0.0  ;;  %v10367_v44 = vmul.f32 %v20105_v36, %v10346_v38 }
 0x96b   :  { %v9534_v12 = vmax.f32 %v9514_v34, 0.0  ;;  %v9536_v42 = vmax.f32 %v9516_v22, 0.0  ;;  %v10369_v34 = vmul.f32 %v20105_v36, %v10348_v58  ;;  %v10355_v58 = vld [vmem:[%s20258_s0 + $0x80] sm:$0x7] }
 0x96c   :  { %v9553_v27 = vmul.f32 %v9533_v50, %v21107_v48  ;;  %v9555_v35 = vmul.f32 %v9535_v3, %v21108_v56  ;;  %v10350_v48 = vld [vmem:[%s20258_s0 + $0x58] sm:$0x7] }
 0x96d   :  { %v9554_v26 = vmul.f32 %v9534_v12, %v21105_v10  ;;  %v9556_v13 = vmul.f32 %v9536_v42, %v21106_v55  ;;  %v10349_v55 = vld [vmem:[%s20258_s0 + $0x50] sm:$0x7] }
 0x96f   :  { %10176 = vmatprep.subr.mxu0 %v9554_v26  ;;  %10247 = vmatprep.subr.mxu1 %v9556_v13 }
 0x970   :  { %10177 = vmatpush1.msra.mxu0 %v9553_v27  ;;  %10248 = vmatpush1.msra.mxu1 %v9555_v35  ;;  %v10351_v35 = vld [vmem:[%s20258_s0 + $0x60] sm:$0x7] }
 0x971   :  { %10539 = vmatmul.mubr.msk.f32.vlgmr.msra.gmra.mrb[58].mxu0 %vm9604_vm5, %v20023_v16  ;;  %10540 = vmatmul.mubr.msk.f32.vlgmr.msra.gmra.mrb[58].mxu1 %vm9604_vm5, %v20023_v16  ;;  %v20115_v16 = vstv %s10318_s16 }
 0x9f4   :  { %v9674_v57 = vpop.f32.mrb[50].mxu0 }
 0x9f5   :  { %v9675_v47 = vadd.f32 %v9674_v57, %v20113_v62  ;;  %v9676_v11 = vpop.f32.mrb[51].mxu0  ;;  %v9745_v29 = vpop.f32.mrb[50].mxu1  ;;  %v10370_v57 = vmul.f32 %v20105_v36, %v10349_v55 }
 0x9f6   :  { %v9677_v43 = vadd.f32 %v9676_v11, %v20113_v62  ;;  %v9746_v14 = vadd.f32 %v9745_v29, %v20113_v62  ;;  %v9747_v32 = vpop.f32.mrb[51].mxu1  ;;  %v10371_v29 = vmul.f32 %v20105_v36, %v10350_v48 }
 0x9f7   :  { %v10321_v30 = vmul.f32 %v20115_v16, %v9675_v47  ;;  %v9748_v1 = vadd.f32 %v9747_v32, %v20113_v62  ;;  %v10352_v47 = vld [vmem:[%s20258_s0 + $0x68] sm:$0x7] }
 0x9f8   :  { %v10322_v20 = vmul.f32 %v20115_v16, %v9677_v43  ;;  %v10323_v9 = vmul.f32 %v20115_v16, %v9746_v14 }
 0x9f9   :  { %v10382_v6 = vadd.f32 %v10362_v24, %v10321_v30  ;;  %v10324_v19 = vmul.f32 %v20115_v16, %v9748_v1 }
 0x9fa   :  { %v10383_v41 = vadd.f32 %v10363_v33, %v10322_v20  ;;  %v10384_v7 = vadd.f32 %v10364_v51, %v10323_v9  ;;  %v10372_v51 = vmul.f32 %v20105_v36, %v10351_v35 }
 0x9fb   :  { %13521 = vtanh.f32 %v10382_v6  ;;  %v10385_v45 = vadd.f32 %v10365_v59, %v10324_v19  ;;  %v10373_v59 = vmul.f32 %v20105_v36, %v10352_v47 }
 0x9fc   :  { %13523 = vtanh.f32 %v10383_v41 }
 0x9fd   :  { %13525 = vtanh.f32 %v10384_v7 }
 0x9fe   :  { %13527 = vtanh.f32 %v10385_v45  ;;  %v10353_v45 = vld [vmem:[%s20258_s0 + $0x70] sm:$0x7] }
 0xa05   :  { %v13522_v46 = vpop.eup %13521 }
 0xa06   :  { %v13524_v17 = vpop.eup %13523 }
 0xa07   :  { %v13526_v5 = vpop.eup %13525  ;;  %v10442_v23 = vcombine.low %v13522_v46, %v13524_v17  ;;  %v10354_v17 = vld [vmem:[%s20258_s0 + $0x78] sm:$0x7] }
 0xa08   :  { %v13528_v8 = vpop.eup %13527 }
 0xa09   :  { %v9816_v60 = vpop.f32.mrb[52].mxu0  ;;  %10462 = vst [vmem:[%s20269_s11] sm:$0x77] %v10442_v23  ;;  %v10443_v61 = vcombine.low %v13526_v5, %v13528_v8  ;;  %v9887_v49 = vpop.f32.mrb[52].mxu1  ;;  %v10374_v8 = vmul.f32 %v20105_v36, %v10353_v45 }
 0xa0a   :  { %v9817_v18 = vadd.f32 %v9816_v60, %v20113_v62  ;;  %v9818_v4 = vpop.f32.mrb[53].mxu0  ;;  %v9888_v52 = vadd.f32 %v9887_v49, %v20113_v62  ;;  %v9889_v2 = vpop.f32.mrb[53].mxu1  ;;  %v10356_v49 = vld [vmem:[%s20258_s0 + $0x88] sm:$0x7] }
 0xa0b   :  { %v9819_v0 = vadd.f32 %v9818_v4, %v20113_v62  ;;  %10463 = vst [vmem:[%s20269_s11 + $0x8] sm:$0x77] %v10443_v61  ;;  %v9890_v21 = vadd.f32 %v9889_v2, %v20113_v62  ;;  %v10376_v2 = vmul.f32 %v20105_v36, %v10355_v58 }
 0xa0c   :  { %v10325_v31 = vmul.f32 %v20115_v16, %v9817_v18  ;;  %v10327_v15 = vmul.f32 %v20115_v16, %v9888_v52 }
 0xa0d   :  { %v10326_v22 = vmul.f32 %v20115_v16, %v9819_v0  ;;  %v10328_v3 = vmul.f32 %v20115_v16, %v9890_v21 }
 0xa0e   :  { %v10386_v50 = vadd.f32 %v10366_v25, %v10325_v31  ;;  %v10388_v12 = vadd.f32 %v10368_v63, %v10327_v15  ;;  %v10375_v25 = vmul.f32 %v20105_v36, %v10354_v17  ;;  %v10377_v15 = vmul.f32 %v20105_v36, %v10356_v49 }
 0xa0f   :  { %v10387_v42 = vadd.f32 %v10367_v44, %v10326_v22  ;;  %v10389_v10 = vadd.f32 %v10369_v34, %v10328_v3 }
 0xa10   :  { %13529 = vtanh.f32 %v10386_v50 }
 0xa11   :  { %13531 = vtanh.f32 %v10388_v12 }
 0xa12   :  { %13533 = vtanh.f32 %v10387_v42 }
 0xa13   :  { %13535 = vtanh.f32 %v10389_v10 }
 0xa1a   :  { %v13530_v26 = vpop.eup %13529 }
 0xa1b   :  { %v13532_v13 = vpop.eup %13531 }
 0xa1c   :  { %v13534_v27 = vpop.eup %13533  ;;  %v9958_v56 = vpop.f32.mrb[54].mxu0 }
 0xa1d   :  { %v13536_v37 = vpop.eup %13535  ;;  %v10444_v40 = vcombine.low %v13530_v26, %v13534_v27  ;;  %v9959_v39 = vadd.f32 %v9958_v56, %v20113_v62  ;;  %v9960_v53 = vpop.f32.mrb[55].mxu0  ;;  %v10357_v27 = vld [vmem:[%s20258_s0 + $0x90] sm:$0x7]  ;;  %v10359_v56 = vld [vmem:[%s20258_s0 + $0xa0] sm:$0x7] }
 0xa1e   :  { %v10445_v24 = vcombine.low %v13532_v13, %v13536_v37  ;;  %v9961_v11 = vadd.f32 %v9960_v53, %v20113_v62  ;;  %v10029_v43 = vpop.f32.mrb[54].mxu1  ;;  %v10358_v37 = vld [vmem:[%s20258_s0 + $0x98] sm:$0x7]  ;;  %v10378_v47 = vmul.f32 %v20105_v36, %v10357_v27 }
 0xa1f   :  { %10464 = vst [vmem:[%s20269_s11 + $0x10] sm:$0x77] %v10444_v40  ;;  %v10329_v33 = vmul.f32 %v20115_v16, %v9959_v39  ;;  %v10030_v14 = vadd.f32 %v10029_v43, %v20113_v62  ;;  %v10031_v32 = vpop.f32.mrb[55].mxu1  ;;  %v10360_v40 = vld [vmem:[%s20258_s0 + $0xa8] sm:$0x7] }
 0xa20   :  { %10465 = vst [vmem:[%s20269_s11 + $0x18] sm:$0x77] %v10445_v24  ;;  %v10330_v30 = vmul.f32 %v20115_v16, %v9961_v11  ;;  %v10032_v1 = vadd.f32 %v10031_v32, %v20113_v62  ;;  %v10380_v11 = vmul.f32 %v20105_v36, %v10359_v56  ;;  %v10381_v32 = vmul.f32 %v20105_v36, %v10360_v40 }
 0xa21   :  { %v10390_v20 = vadd.f32 %v10370_v57, %v10329_v33  ;;  %v10331_v9 = vmul.f32 %v20115_v16, %v10030_v14  ;;  %v10379_v14 = vmul.f32 %v20105_v36, %v10358_v37 }
 0xa22   :  { %v10391_v6 = vadd.f32 %v10371_v29, %v10330_v30  ;;  %v10332_v19 = vmul.f32 %v20115_v16, %v10032_v1 }
 0xa23   :  { %13537 = vtanh.f32 %v10390_v20  ;;  %v10392_v41 = vadd.f32 %v10372_v51, %v10331_v9 }
 0xa24   :  { %13539 = vtanh.f32 %v10391_v6  ;;  %v10393_v7 = vadd.f32 %v10373_v59, %v10332_v19 }
 0xa25   :  { %13541 = vtanh.f32 %v10392_v41 }
 0xa26   :  { %13543 = vtanh.f32 %v10393_v7 }
 0xa2d   :  { %v13538_v46 = vpop.eup %13537 }
 0xa2e   :  { %v13540_v54 = vpop.eup %13539  ;;  %v10100_v5 = vpop.f32.mrb[56].mxu0 }
 0xa2f   :  { %v13542_v23 = vpop.eup %13541  ;;  %v10446_v28 = vcombine.low %v13538_v46, %v13540_v54  ;;  %v10101_v38 = vadd.f32 %v10100_v5, %v20113_v62  ;;  %v10102_v60 = vpop.f32.mrb[57].mxu0 }
 0xa30   :  { %v13544_v61 = vpop.eup %13543  ;;  %v10103_v18 = vadd.f32 %v10102_v60, %v20113_v62 }
 0xa31   :  { %10466 = vst [vmem:[%s20269_s11 + $0x20] sm:$0x77] %v10446_v28  ;;  %v10447_v4 = vcombine.low %v13542_v23, %v13544_v61  ;;  %v10333_v52 = vmul.f32 %v20115_v16, %v10101_v38  ;;  %v10171_v63 = vpop.f32.mrb[56].mxu1 }
 0xa32   :  { %v10334_v0 = vmul.f32 %v20115_v16, %v10103_v18  ;;  %v10172_v44 = vadd.f32 %v10171_v63, %v20113_v62  ;;  %v10173_v31 = vpop.f32.mrb[57].mxu1 }
 0xa33   :  { %10467 = vst [vmem:[%s20269_s11 + $0x28] sm:$0x77] %v10447_v4  ;;  %v10394_v21 = vadd.f32 %v10374_v8, %v10333_v52  ;;  %v10174_v34 = vadd.f32 %v10173_v31, %v20113_v62 }
 0xa34   :  { %v10395_v22 = vadd.f32 %v10375_v25, %v10334_v0  ;;  %v10335_v50 = vmul.f32 %v20115_v16, %v10172_v44 }
 0xa35   :  { %13545 = vtanh.f32 %v10394_v21  ;;  %v10336_v3 = vmul.f32 %v20115_v16, %v10174_v34 }
 0xa36   :  { %13547 = vtanh.f32 %v10395_v22  ;;  %v10396_v12 = vadd.f32 %v10376_v2, %v10335_v50 }
 0xa37   :  { %v10397_v42 = vadd.f32 %v10377_v15, %v10336_v3 }
 0xa38   :  { %13549 = vtanh.f32 %v10396_v12 }
 0xa39   :  { %13551 = vtanh.f32 %v10397_v42 }
 0xa3f   :  { %v13546_v10 = vpop.eup %13545 }
 0xa40   :  { %v13548_v26 = vpop.eup %13547 }
 0xa41   :  { %v10448_v55 = vcombine.low %v13546_v10, %v13548_v26 }
 0xa42   :  { %v13550_v13 = vpop.eup %13549 }
 0xa43   :  { %v13552_v48 = vpop.eup %13551  ;;  %10468 = vst [vmem:[%s20269_s11 + $0x30] sm:$0x77] %v10448_v55 }
 0xa44   :  { %v10449_v35 = vcombine.low %v13550_v13, %v13552_v48  ;;  %v10242_v39 = vpop.f32.mrb[58].mxu0  ;;  %v10313_v57 = vpop.f32.mrb[58].mxu1 }
 0xa45   :  { %v10243_v53 = vadd.f32 %v10242_v39, %v20113_v62  ;;  %v10314_v24 = vadd.f32 %v10313_v57, %v20113_v62  ;;  %v10244_v29 = vpop.f32.mrb[59].mxu0  ;;  %v10315_v43 = vpop.f32.mrb[59].mxu1 }
 0xa46   :  { %10469 = vst [vmem:[%s20269_s11 + $0x38] sm:$0x77] %v10449_v35  ;;  %v10245_v33 = vadd.f32 %v10244_v29, %v20113_v62  ;;  %v10316_v51 = vadd.f32 %v10315_v43, %v20113_v62 }
 0xa47   :  { %v10337_v30 = vmul.f32 %v20115_v16, %v10243_v53  ;;  %v10339_v1 = vmul.f32 %v20115_v16, %v10314_v24 }
 0xa48   :  { %v10338_v59 = vmul.f32 %v20115_v16, %v10245_v33  ;;  %v10340_v20 = vmul.f32 %v20115_v16, %v10316_v51 }
 0xa49   :  { %v10398_v9 = vadd.f32 %v10378_v47, %v10337_v30  ;;  %v10400_v6 = vadd.f32 %v10380_v11, %v10339_v1 }
 0xa4a   :  { %v10399_v19 = vadd.f32 %v10379_v14, %v10338_v59  ;;  %v10401_v41 = vadd.f32 %v10381_v32, %v10340_v20 }
 0xa4b   :  { %13553 = vtanh.f32 %v10398_v9 }
 0xa4c   :  { %13555 = vtanh.f32 %v10400_v6 }
 0xa4d   :  { %13557 = vtanh.f32 %v10399_v19 }
 0xa4e   :  { %13559 = vtanh.f32 %v10401_v41 }
 0xa55   :  { %v13554_v7 = vpop.eup %13553 }
 0xa56   :  { %v13556_v62 = vpop.eup %13555 }
 0xa57   :  { %v13558_v45 = vpop.eup %13557 }
 0xa58   :  { %v13560_v36 = vpop.eup %13559  ;;  %v10450_v46 = vcombine.low %v13554_v7, %v13558_v45 }
 0xa59   :  { %v10451_v17 = vcombine.low %v13556_v62, %v13560_v36 }
 0xa5a   :  { %10470 = vst [vmem:[%s20269_s11 + $0x40] sm:$0x77] %v10450_v46 }
 0xa5b   :  { %10471 = vst [vmem:[%s20269_s11 + $0x48] sm:$0x77] %v10451_v17 }
 0xa5c   :  { %10476 = vsyncpa [#allocation6], 1 }

</bundles_post_ra>
